<compile_context>
chip_gen: v5e
topology: v5e:2x2
jax: 0.10.0
libtpu: 0.0.40
codegen_flags: <defaults>
</compile_context>

<pallas_src>
import functools

import jax
import jax.numpy as jnp
from jax.experimental import pallas as pl
from jax.experimental.pallas import tpu as pltpu

GROUPS = 32                      # nn.GroupNorm(num_groups=32, ...)
VMEM_LIMIT = 64 * 1024 * 1024    # scoped VMEM budget for the fused conv kernels


def _silu(x):
    return x * jax.nn.sigmoid(x)


def _pick_hw_tile(hw, max_tile=512):
    # max_tile can be raised (e.g. 1024-2048 on v6e with 128 MiB VMEM); default kept
    # conservative so the per-step footprint also fits v7x's 64 MiB budget.
    for cand in (2048, 1024, 512, 256, 128, 64, 32, 16, 8):
        if cand <= max_tile and hw % cand == 0:
            return cand
    return hw   # TODO(synk): non-divisible H*W falls back to a single full-HW block.


def _gn_affine(stats, gamma, beta, n_spatial, eps):
    # Tiny (B, C)-sized finalize: group-reduce per-channel sums, compute mean / rstd in
    # f32, fold gamma/beta into per-channel scale & shift (plain JAX glue).
    B, _, C = stats.shape
    cg = C // GROUPS
    s1 = stats[:, 0, :].reshape(B, GROUPS, cg).sum(-1)       # (B, G)
    s2 = stats[:, 1, :].reshape(B, GROUPS, cg).sum(-1)
    n = float(n_spatial * cg)
    mean = s1 / n
    var = jnp.maximum(s2 / n - mean * mean, 0.0)             # biased var (GroupNorm)
    rstd = jax.lax.rsqrt(var + eps)
    mean_c = jnp.repeat(mean, cg, axis=1)                    # (B, C)
    rstd_c = jnp.repeat(rstd, cg, axis=1)
    scale = rstd_c * gamma[None, :]
    shift = beta[None, :] - mean_c * scale
    return (scale[:, None, :].astype(jnp.float32),           # (B, 1, C)
            shift[:, None, :].astype(jnp.float32))


# ----------------------------------------------------------------------------
# Kernel 1: fused GroupNorm1-apply + SiLU + Conv3d(3,1,1) + bias + temb add,
#           also emitting the norm2 partial statistics (per HW tile).
# ----------------------------------------------------------------------------
def gn_conv_temb_kernel(scale_ref, shift_ref, x_ref, w_ref, b_ref, tp_ref,
                        o_ref, st_ref, ypad):
    T, HWt, Cin = x_ref.shape[1], x_ref.shape[2], x_ref.shape[3]
    Cout = o_ref.shape[3]

    # GroupNorm apply + SiLU; bf16 block * f32 scale promotes per-vreg (no f32 copy).
    y = _silu(x_ref[0] * scale_ref[...] + shift_ref[...]).astype(jnp.bfloat16)

    # Temporal zero-pad via persistent VMEM scratch (no concat temp): boundary planes
    # zeroed, SiLU result written into planes 1..T, taps are contiguous slices.
    ypad[0] = jnp.zeros((HWt, Cin), jnp.bfloat16)
    ypad[T + 1] = jnp.zeros((HWt, Cin), jnp.bfloat16)
    ypad[pl.ds(1, T)] = y

    # Conv3d(3,1,1): out[t] = sum_k w[k] @ x[t-1+k]; accumulate chain of dots.
    acc = jnp.zeros((T * HWt, Cout), jnp.float32)
    for k in range(3):
        tap = ypad[pl.ds(k, T)].reshape(T * HWt, Cin)
        acc = acc + jnp.dot(tap, w_ref[k], preferred_element_type=jnp.float32)

    # bias + (hoisted) time-embedding projection broadcast over HW.
    h = acc.reshape(T, HWt, Cout) + b_ref[...] + tp_ref[0][:, None, :]

    # Fused norm2 statistics (f32, per-HW-tile partials; reduced in the glue).
    hf = h.reshape(T * HWt, Cout)
    s1 = jnp.sum(hf, axis=0, keepdims=True)
    s2 = jnp.sum(hf * hf, axis=0, keepdims=True)
    st_ref[0, 0] = jnp.concatenate([s1, s2], axis=0)

    o_ref[0] = h.astype(o_ref.dtype)


def gn_conv_temb(scale, shift, x, w3, b, tp, hw_tile):
    B, T, HW, Cin = x.shape
    Cout = w3.shape[2]
    n_hw = HW // hw_tile
    return pl.pallas_call(
        gn_conv_temb_kernel,
        out_shape=(jax.ShapeDtypeStruct((B, T, HW, Cout), jnp.bfloat16),
                   jax.ShapeDtypeStruct((B, n_hw, 2, Cout), jnp.float32)),
        grid=(B, n_hw),
        in_specs=[
            pl.BlockSpec((1, 1, Cin), lambda b, i: (b, 0, 0)),             # GN scale
            pl.BlockSpec((1, 1, Cin), lambda b, i: (b, 0, 0)),             # GN shift
            pl.BlockSpec((1, T, hw_tile, Cin), lambda b, i: (b, 0, i, 0)), # activation
            pl.BlockSpec((3, Cin, Cout), lambda b, i: (0, 0, 0)),          # conv taps
            pl.BlockSpec((1, Cout), lambda b, i: (0, 0)),                  # conv bias
            pl.BlockSpec((1, T, Cout), lambda b, i: (b, 0, 0)),            # temb proj (B,T,Cout)
        ],
        out_specs=(
            pl.BlockSpec((1, T, hw_tile, Cout), lambda b, i: (b, 0, i, 0)),
            pl.BlockSpec((1, 1, 2, Cout), lambda b, i: (b, i, 0, 0)),
        ),
        scratch_shapes=[pltpu.VMEM((T + 2, hw_tile, Cin), jnp.bfloat16)],
        compiler_params=pltpu.CompilerParams(
            dimension_semantics=("parallel", "parallel"),
            vmem_limit_bytes=VMEM_LIMIT),
    )(scale, shift, x, w3, b, tp)


# ----------------------------------------------------------------------------
# Kernel 2: fused GroupNorm2-apply + SiLU + Conv3d(3,1,1) + bias
#           + (1x1x1 shortcut conv | identity) + residual add.
# ----------------------------------------------------------------------------
def gn_conv_res_kernel(scale_ref, shift_ref, h_ref, w_ref, b_ref, x0_ref,
                       *rest, has_shortcut):
    if has_shortcut:
        ws_ref, bs_ref, o_ref, ypad = rest
    else:
        o_ref, ypad = rest

    T, HWt, Cmid = h_ref.shape[1], h_ref.shape[2], h_ref.shape[3]
    Cout = o_ref.shape[3]

    y = _silu(h_ref[0] * scale_ref[...] + shift_ref[...]).astype(jnp.bfloat16)
    ypad[0] = jnp.zeros((HWt, Cmid), jnp.bfloat16)
    ypad[T + 1] = jnp.zeros((HWt, Cmid), jnp.bfloat16)
    ypad[pl.ds(1, T)] = y

    acc = jnp.zeros((T * HWt, Cout), jnp.float32)
    for k in range(3):
        tap = ypad[pl.ds(k, T)].reshape(T * HWt, Cmid)
        acc = acc + jnp.dot(tap, w_ref[k], preferred_element_type=jnp.float32)
    out = acc.reshape(T, HWt, Cout) + b_ref[...]

    if has_shortcut:                                 # 1x1x1 conv on the original input
        x0 = x0_ref[0].reshape(T * HWt, x0_ref.shape[3])               # bf16 MXU input
        sc = jnp.dot(x0, ws_ref[...], preferred_element_type=jnp.float32)
        out = out + sc.reshape(T, HWt, Cout) + bs_ref[...]
    else:                                            # identity: bf16 + f32, per-vreg promote
        out = out + x0_ref[0]

    o_ref[0] = out.astype(o_ref.dtype)


def gn_conv_res(scale, shift, h, w3, b, x0, ws, bs, hw_tile):
    B, T, HW, Cmid = h.shape
    Cout = w3.shape[2]
    Cin = x0.shape[3]
    n_hw = HW // hw_tile
    has_shortcut = ws is not None
    kern = functools.partial(gn_conv_res_kernel, has_shortcut=has_shortcut)

    in_specs = [
        pl.BlockSpec((1, 1, Cmid), lambda b, i: (b, 0, 0)),
        pl.BlockSpec((1, 1, Cmid), lambda b, i: (b, 0, 0)),
        pl.BlockSpec((1, T, hw_tile, Cmid), lambda b, i: (b, 0, i, 0)),
        pl.BlockSpec((3, Cmid, Cout), lambda b, i: (0, 0, 0)),
        pl.BlockSpec((1, Cout), lambda b, i: (0, 0)),
        pl.BlockSpec((1, T, hw_tile, Cin), lambda b, i: (b, 0, i, 0)),
    ]
    args = [scale, shift, h, w3, b, x0]
    if has_shortcut:
        in_specs += [pl.BlockSpec((Cin, Cout), lambda b, i: (0, 0)),
                     pl.BlockSpec((1, Cout), lambda b, i: (0, 0))]
        args += [ws, bs]

    return pl.pallas_call(
        kern,
        out_shape=jax.ShapeDtypeStruct((B, T, HW, Cout), jnp.bfloat16),
        grid=(B, n_hw),
        in_specs=in_specs,
        out_specs=pl.BlockSpec((1, T, hw_tile, Cout), lambda b, i: (b, 0, i, 0)),
        scratch_shapes=[pltpu.VMEM((T + 2, hw_tile, Cmid), jnp.bfloat16)],
        compiler_params=pltpu.CompilerParams(
            dimension_semantics=("parallel", "parallel"),
            vmem_limit_bytes=VMEM_LIMIT),
    )(*args)


# ----------------------------------------------------------------------------
# Full block: layout transpose, bf16 cast, norm1 stats, temb projection and the
# tiny GN-finalize math live in JAX glue (all O(B*C) or fused with the transpose).
# ----------------------------------------------------------------------------
def temporal_resnet_block_pallas(x, temb, p, eps=1e-6, hw_tile=None):
    # x: (B, C, T, H, W) [PyTorch NCDHW], temb: (B, T, temb_channels)
    B, Cin, T, H, W = x.shape
    Cout = p["w1"].shape[0]
    HW = H * W
    HWt = hw_tile if hw_tile is not None else _pick_hw_tile(HW)
    assert HW % HWt == 0

    xf = x.astype(jnp.float32)

    # NCDHW -> (B, T, HW, C); bf16 for all DMA'd activation blocks.
    xl = jnp.transpose(xf, (0, 2, 3, 4, 1)).reshape(B, T, HW, Cin).astype(jnp.bfloat16)

    # norm1 statistics from the f32 input (no standalone stats kernel; better numerics
    # than reducing the bf16-cast copy; XLA fuses with the transpose read).
    s1 = jnp.sum(xf, axis=(2, 3, 4))
    s2 = jnp.sum(xf * xf, axis=(2, 3, 4))
    stats1 = jnp.stack([s1, s2], axis=1)                                  # (B, 2, Cin)
    scale1, shift1 = _gn_affine(stats1, p["gamma1"], p["beta1"], T * HW, eps)

    # time-embedding projection hoisted out of the HW-tile loop (depends only on b, t).
    tp = (_silu(temb.astype(jnp.float32)) @ p["wt"].T.astype(jnp.float32)
          + p["bt"][None, None, :].astype(jnp.float32))                   # (B, T, Cout)

    # norm1-apply + SiLU + conv1 + bias + temb add, plus fused norm2 partial stats.
    w1k = jnp.transpose(p["w1"], (2, 1, 0)).astype(jnp.bfloat16)          # (3, Cin, Cout)
    h, stats2_p = gn_conv_temb(scale1, shift1, xl, w1k,
                               p["b1"][None].astype(jnp.float32), tp, HWt)

    stats2 = stats2_p.sum(axis=1)                                         # (B, 2, Cout)
    scale2, shift2 = _gn_affine(stats2, p["gamma2"], p["beta2"], T * HW, eps)

    # norm2-apply + SiLU + (dropout p=0.0 identity) + conv2 + shortcut + residual.
    w2k = jnp.transpose(p["w2"], (2, 1, 0)).astype(jnp.bfloat16)          # (3, Cout, Cout)
    if p.get("ws") is not None:
        ws = p["ws"].T.astype(jnp.bfloat16)
        bs = p["bs"][None].astype(jnp.float32)
    else:
        ws, bs = None, None                        # identity shortcut: no eye matmul
    out = gn_conv_res(scale2, shift2, h, w2k,
                      p["b2"][None].astype(jnp.float32), xl, ws, bs, HWt)

    return jnp.transpose(out.reshape(B, T, H, W, Cout),
                         (0, 4, 1, 2, 3)).astype(x.dtype)                 # -> NCDHW


# ----------------------------------------------------------------------------
# Pure-JAX reference (mirrors the PyTorch forward) for correctness checking.
# ----------------------------------------------------------------------------
def temporal_resnet_block_ref(x, temb, p, eps=1e-6):
    def gn(h, gamma, beta):
        B, C, T, H, W = h.shape
        hg = h.reshape(B, GROUPS, C // GROUPS, T, H, W)
        mean = hg.mean(axis=(2, 3, 4, 5), keepdims=True)
        var = hg.var(axis=(2, 3, 4, 5), keepdims=True)
        hn = ((hg - mean) * jax.lax.rsqrt(var + eps)).reshape(B, C, T, H, W)
        return hn * gamma[None, :, None, None, None] + beta[None, :, None, None, None]

    def tconv(h, w, b):
        T = h.shape[2]
        hp = jnp.pad(h, ((0, 0), (0, 0), (1, 1), (0, 0), (0, 0)))
        out = sum(jnp.einsum("bcthw,oc->bothw", hp[:, :, k:k + T], w[:, :, k])
                  for k in range(3))
        return out + b[None, :, None, None, None]

    h = _silu(gn(x, p["gamma1"], p["beta1"]))
    h = tconv(h, p["w1"], p["b1"])
    tp = jnp.einsum("btc,oc->bto", _silu(temb), p["wt"]) + p["bt"]
    h = h + jnp.transpose(tp, (0, 2, 1))[:, :, :, None, None]
    h = _silu(gn(h, p["gamma2"], p["beta2"]))
    h = tconv(h, p["w2"], p["b2"])
    if p.get("ws") is not None:
        sc = jnp.einsum("bcthw,oc->bothw", x, p["ws"]) + p["bs"][None, :, None, None, None]
    else:
        sc = x
    return sc + h


if __name__ == "__main__":
    def make_params(key, Cin, Cout, Ct, use_shortcut):
        ks = jax.random.split(key, 12)
        p = {
            "gamma1": 1.0 + 0.1 * jax.random.normal(ks[0], (Cin,), jnp.float32),
            "beta1": 0.1 * jax.random.normal(ks[1], (Cin,), jnp.float32),
            "w1": 0.05 * jax.random.normal(ks[2], (Cout, Cin, 3), jnp.float32),
            "b1": 0.05 * jax.random.normal(ks[3], (Cout,), jnp.float32),
            "wt": 0.05 * jax.random.normal(ks[4], (Cout, Ct), jnp.float32),  # Linear (out, in)
            "bt": 0.05 * jax.random.normal(ks[5], (Cout,), jnp.float32),
            "gamma2": 1.0 + 0.1 * jax.random.normal(ks[6], (Cout,), jnp.float32),
            "beta2": 0.1 * jax.random.normal(ks[7], (Cout,), jnp.float32),
            "w2": 0.05 * jax.random.normal(ks[8], (Cout, Cout, 3), jnp.float32),
            "b2": 0.05 * jax.random.normal(ks[9], (Cout,), jnp.float32),
            "ws": None,
            "bs": None,
        }
        if use_shortcut:
            p["ws"] = 0.05 * jax.random.normal(ks[10], (Cout, Cin), jnp.float32)
            p["bs"] = 0.05 * jax.random.normal(ks[11], (Cout,), jnp.float32)
        return p

    eps = 1e-6
    key = jax.random.PRNGKey(0)
    k1, k2, k3, k4, k5, k6 = jax.random.split(key, 6)

    # Config A: in_channels != out_channels -> conv_shortcut path, HW tiled (2 tiles).
    B, Cin, Cout, Ct, T, H, W = 2, 64, 128, 32, 8, 16, 16
    pA = make_params(k1, Cin, Cout, Ct, True)
    xA = jax.random.normal(k2, (B, Cin, T, H, W), jnp.float32)
    tA = jax.random.normal(k3, (B, T, Ct), jnp.float32)
    outA = jax.block_until_ready(temporal_resnet_block_pallas(xA, tA, pA, eps, hw_tile=128))
    refA = jax.block_until_ready(temporal_resnet_block_ref(xA, tA, pA, eps))
    assert outA.shape == (B, Cout, T, H, W), outA.shape
    errA = float(jnp.max(jnp.abs(outA - refA))) / (float(jnp.max(jnp.abs(refA))) + 1e-3)
    assert errA < 3e-2, f"config A mismatch: rel err {errA}"

    # Config B: in_channels == out_channels -> identity shortcut (no eye matmul).
    B, Cin, Cout, Ct, T, H, W = 2, 64, 64, 32, 8, 8, 8
    pB = make_params(k4, Cin, Cout, Ct, False)
    xB = jax.random.normal(k5, (B, Cin, T, H, W), jnp.float32)
    tB = jax.random.normal(k6, (B, T, Ct), jnp.float32)
    outB = jax.block_until_ready(temporal_resnet_block_pallas(xB, tB, pB, eps))
    refB = jax.block_until_ready(temporal_resnet_block_ref(xB, tB, pB, eps))
    assert outB.shape == (B, Cout, T, H, W), outB.shape
    errB = float(jnp.max(jnp.abs(outB - refB))) / (float(jnp.max(jnp.abs(refB))) + 1e-3)
    assert errB < 3e-2, f"config B mismatch: rel err {errB}"

    print("KERNEL_OK")
</pallas_src>

<mosaic_0001>
module attributes {stable_mosaic.version = 11 : i64} {
  func.func @gn_conv_temb_kernel(%arg0: i32, %arg1: i32, %arg2: memref<1x1x64xf32, #tpu.memory_space<vmem>>, %arg3: memref<1x1x64xf32, #tpu.memory_space<vmem>>, %arg4: memref<1x8x128x64xbf16, #tpu.memory_space<vmem>>, %arg5: memref<3x64x128xbf16, #tpu.memory_space<vmem>>, %arg6: memref<1x128xf32, #tpu.memory_space<vmem>>, %arg7: memref<1x8x128xf32, #tpu.memory_space<vmem>>, %arg8: memref<1x8x128x128xbf16, #tpu.memory_space<vmem>>, %arg9: memref<1x1x2x128xf32, #tpu.memory_space<vmem>>, %arg10: memref<10x128x64xbf16, #tpu.memory_space<vmem>>) attributes {dimension_semantics = [#tpu.dimension_semantics<parallel>, #tpu.dimension_semantics<parallel>], iteration_bounds = array<i64: 2, 2>, scalar_prefetch = 0 : i64, scratch_operands = 1 : i64, tpu.core_type = #tpu.core_type<tc>, window_params = [{transform_indices = @transform_0, window_bounds = array<i64: 1, 1, 64>}, {transform_indices = @transform_1, window_bounds = array<i64: 1, 1, 64>}, {transform_indices = @transform_2, window_bounds = array<i64: 1, 8, 128, 64>}, {pipeline_mode = #tpu.pipeline_mode<synchronous>, transform_indices = @transform_3, window_bounds = array<i64: 3, 64, 128>}, {pipeline_mode = #tpu.pipeline_mode<synchronous>, transform_indices = @transform_4, window_bounds = array<i64: 1, 128>}, {transform_indices = @transform_5, window_bounds = array<i64: 1, 8, 128>}, {transform_indices = @transform_6, window_bounds = array<i64: 1, 8, 128, 128>}, {transform_indices = @transform_7, window_bounds = array<i64: 1, 1, 2, 128>}]} {
    %c0 = arith.constant 0 : index
    %c0_0 = arith.constant 0 : index
    %c0_1 = arith.constant 0 : index
    %c0_2 = arith.constant 0 : index
    %0 = vector.load %arg4[%c0, %c0_0, %c0_1, %c0_2] : memref<1x8x128x64xbf16, #tpu.memory_space<vmem>>, vector<1x8x128x64xbf16>
    %1 = vector.shape_cast %0 : vector<1x8x128x64xbf16> to vector<8x128x64xbf16>
    %c0_3 = arith.constant 0 : index
    %c0_4 = arith.constant 0 : index
    %c0_5 = arith.constant 0 : index
    %2 = vector.load %arg2[%c0_3, %c0_4, %c0_5] : memref<1x1x64xf32, #tpu.memory_space<vmem>>, vector<1x1x64xf32>
    %3 = arith.extf %1 : vector<8x128x64xbf16> to vector<8x128x64xf32>
    %4 = vector.broadcast %2 : vector<1x1x64xf32> to vector<8x128x64xf32>
    %5 = arith.mulf %3, %4 : vector<8x128x64xf32>
    %c0_6 = arith.constant 0 : index
    %c0_7 = arith.constant 0 : index
    %c0_8 = arith.constant 0 : index
    %6 = vector.load %arg3[%c0_6, %c0_7, %c0_8] : memref<1x1x64xf32, #tpu.memory_space<vmem>>, vector<1x1x64xf32>
    %7 = vector.broadcast %6 : vector<1x1x64xf32> to vector<8x128x64xf32>
    %8 = arith.addf %5, %7 : vector<8x128x64xf32>
    %9 = arith.negf %8 : vector<8x128x64xf32>
    %10 = math.exp %9 : vector<8x128x64xf32>
    %cst = arith.constant 1.000000e+00 : f32
    %11 = vector.broadcast %cst : f32 to vector<8x128x64xf32>
    %12 = arith.addf %11, %10 : vector<8x128x64xf32>
    %13 = arith.divf %11, %12 : vector<8x128x64xf32>
    %14 = arith.mulf %8, %13 : vector<8x128x64xf32>
    %15 = arith.truncf %14 : vector<8x128x64xf32> to vector<8x128x64xbf16>
    %cst_9 = arith.constant 0.000000e+00 : bf16
    %16 = vector.broadcast %cst_9 : bf16 to vector<128x64xbf16>
    %c0_10 = arith.constant 0 : index
    %c0_11 = arith.constant 0 : index
    %c0_12 = arith.constant 0 : index
    %17 = vector.load %arg10[%c0_10, %c0_11, %c0_12] : memref<10x128x64xbf16, #tpu.memory_space<vmem>>, vector<1x128x64xbf16>
    %18 = vector.shape_cast %17 : vector<1x128x64xbf16> to vector<128x64xbf16>
    %19 = vector.shape_cast %16 : vector<128x64xbf16> to vector<1x128x64xbf16>
    tpu.vector_store %arg10[%c0_10, %c0_11, %c0_12], %19 {strides = array<i32>} : memref<10x128x64xbf16, #tpu.memory_space<vmem>>, vector<1x128x64xbf16>,
    %cst_13 = arith.constant 0.000000e+00 : bf16
    %20 = vector.broadcast %cst_13 : bf16 to vector<128x64xbf16>
    %c9 = arith.constant 9 : index
    %c0_14 = arith.constant 0 : index
    %c0_15 = arith.constant 0 : index
    %21 = vector.load %arg10[%c9, %c0_14, %c0_15] : memref<10x128x64xbf16, #tpu.memory_space<vmem>>, vector<1x128x64xbf16>
    %22 = vector.shape_cast %21 : vector<1x128x64xbf16> to vector<128x64xbf16>
    %23 = vector.shape_cast %20 : vector<128x64xbf16> to vector<1x128x64xbf16>
    tpu.vector_store %arg10[%c9, %c0_14, %c0_15], %23 {strides = array<i32>} : memref<10x128x64xbf16, #tpu.memory_space<vmem>>, vector<1x128x64xbf16>,
    %c1 = arith.constant 1 : index
    %c0_16 = arith.constant 0 : index
    %c0_17 = arith.constant 0 : index
    %24 = vector.load %arg10[%c1, %c0_16, %c0_17] : memref<10x128x64xbf16, #tpu.memory_space<vmem>>, vector<8x128x64xbf16>
    tpu.vector_store %arg10[%c1, %c0_16, %c0_17], %15 {strides = array<i32>} : memref<10x128x64xbf16, #tpu.memory_space<vmem>>, vector<8x128x64xbf16>,
    %cst_18 = arith.constant 0.000000e+00 : f32
    %25 = vector.broadcast %cst_18 : f32 to vector<1024x128xf32>
    %c0_19 = arith.constant 0 : index
    %c0_20 = arith.constant 0 : index
    %c0_21 = arith.constant 0 : index
    %26 = vector.load %arg10[%c0_19, %c0_20, %c0_21] : memref<10x128x64xbf16, #tpu.memory_space<vmem>>, vector<8x128x64xbf16>
    %27 = vector.shape_cast %26 : vector<8x128x64xbf16> to vector<1024x64xbf16>
    %c0_22 = arith.constant 0 : index
    %c0_23 = arith.constant 0 : index
    %c0_24 = arith.constant 0 : index
    %28 = vector.load %arg5[%c0_22, %c0_23, %c0_24] : memref<3x64x128xbf16, #tpu.memory_space<vmem>>, vector<1x64x128xbf16>
    %29 = vector.shape_cast %28 : vector<1x64x128xbf16> to vector<64x128xbf16>
    %cst_25 = arith.constant dense<0.000000e+00> : vector<1024x128xf32>
    %30 = tpu.matmul %27, %29, %cst_25 {dimension_numbers = #tpu.dot_dimension_numbers<[1], [0], [0], [1], [0, 0, 1, 1], [], []>} : vector<1024x64xbf16>, vector<64x128xbf16>, vector<1024x128xf32> -> vector<1024x128xf32>
    %31 = arith.addf %25, %30 : vector<1024x128xf32>
    %c1_26 = arith.constant 1 : index
    %c0_27 = arith.constant 0 : index
    %c0_28 = arith.constant 0 : index
    %32 = vector.load %arg10[%c1_26, %c0_27, %c0_28] : memref<10x128x64xbf16, #tpu.memory_space<vmem>>, vector<8x128x64xbf16>
    %33 = vector.shape_cast %32 : vector<8x128x64xbf16> to vector<1024x64xbf16>
    %c1_29 = arith.constant 1 : index
    %c0_30 = arith.constant 0 : index
    %c0_31 = arith.constant 0 : index
    %34 = vector.load %arg5[%c1_29, %c0_30, %c0_31] : memref<3x64x128xbf16, #tpu.memory_space<vmem>>, vector<1x64x128xbf16>
    %35 = vector.shape_cast %34 : vector<1x64x128xbf16> to vector<64x128xbf16>
    %cst_32 = arith.constant dense<0.000000e+00> : vector<1024x128xf32>
    %36 = tpu.matmul %33, %35, %cst_32 {dimension_numbers = #tpu.dot_dimension_numbers<[1], [0], [0], [1], [0, 0, 1, 1], [], []>} : vector<1024x64xbf16>, vector<64x128xbf16>, vector<1024x128xf32> -> vector<1024x128xf32>
    %37 = arith.addf %31, %36 : vector<1024x128xf32>
    %c2 = arith.constant 2 : index
    %c0_33 = arith.constant 0 : index
    %c0_34 = arith.constant 0 : index
    %38 = vector.load %arg10[%c2, %c0_33, %c0_34] : memref<10x128x64xbf16, #tpu.memory_space<vmem>>, vector<8x128x64xbf16>
    %39 = vector.shape_cast %38 : vector<8x128x64xbf16> to vector<1024x64xbf16>
    %c2_35 = arith.constant 2 : index
    %c0_36 = arith.constant 0 : index
    %c0_37 = arith.constant 0 : index
    %40 = vector.load %arg5[%c2_35, %c0_36, %c0_37] : memref<3x64x128xbf16, #tpu.memory_space<vmem>>, vector<1x64x128xbf16>
    %41 = vector.shape_cast %40 : vector<1x64x128xbf16> to vector<64x128xbf16>
    %cst_38 = arith.constant dense<0.000000e+00> : vector<1024x128xf32>
    %42 = tpu.matmul %39, %41, %cst_38 {dimension_numbers = #tpu.dot_dimension_numbers<[1], [0], [0], [1], [0, 0, 1, 1], [], []>} : vector<1024x64xbf16>, vector<64x128xbf16>, vector<1024x128xf32> -> vector<1024x128xf32>
    %43 = arith.addf %37, %42 : vector<1024x128xf32>
    %44 = vector.shape_cast %43 : vector<1024x128xf32> to vector<8x128x128xf32>
    %c0_39 = arith.constant 0 : index
    %c0_40 = arith.constant 0 : index
    %45 = vector.load %arg6[%c0_39, %c0_40] : memref<1x128xf32, #tpu.memory_space<vmem>>, vector<1x128xf32>
    %46 = vector.shape_cast %45 : vector<1x128xf32> to vector<1x1x128xf32>
    %47 = vector.broadcast %46 : vector<1x1x128xf32> to vector<8x128x128xf32>
    %48 = arith.addf %44, %47 : vector<8x128x128xf32>
    %c0_41 = arith.constant 0 : index
    %c0_42 = arith.constant 0 : index
    %c0_43 = arith.constant 0 : index
    %49 = vector.load %arg7[%c0_41, %c0_42, %c0_43] : memref<1x8x128xf32, #tpu.memory_space<vmem>>, vector<1x8x128xf32>
    %50 = vector.shape_cast %49 : vector<1x8x128xf32> to vector<8x128xf32>
    %51 = vector.shape_cast %50 : vector<8x128xf32> to vector<8x1x128xf32>
    %52 = vector.broadcast %51 : vector<8x1x128xf32> to vector<8x128x128xf32>
    %53 = arith.addf %48, %52 : vector<8x128x128xf32>
    %54 = vector.shape_cast %53 : vector<8x128x128xf32> to vector<1024x128xf32>
    %cst_44 = arith.constant dense<0.000000e+00> : vector<128xf32>
    %55 = vector.multi_reduction <add>, %54, %cst_44 [0] : vector<1024x128xf32> to vector<128xf32>
    %56 = vector.shape_cast %55 : vector<128xf32> to vector<1x128xf32>
    %57 = arith.mulf %54, %54 : vector<1024x128xf32>
    %cst_45 = arith.constant dense<0.000000e+00> : vector<128xf32>
    %58 = vector.multi_reduction <add>, %57, %cst_45 [0] : vector<1024x128xf32> to vector<128xf32>
    %59 = vector.shape_cast %58 : vector<128xf32> to vector<1x128xf32>
    %60 = tpu.concatenate %56, %59 in 0 : vector<1x128xf32>, vector<1x128xf32> -> vector<2x128xf32>
    %c0_46 = arith.constant 0 : index
    %c0_47 = arith.constant 0 : index
    %c0_48 = arith.constant 0 : index
    %c0_49 = arith.constant 0 : index
    %61 = vector.load %arg9[%c0_46, %c0_47, %c0_48, %c0_49] : memref<1x1x2x128xf32, #tpu.memory_space<vmem>>, vector<1x1x2x128xf32>
    %62 = vector.shape_cast %61 : vector<1x1x2x128xf32> to vector<2x128xf32>
    %63 = vector.shape_cast %60 : vector<2x128xf32> to vector<1x1x2x128xf32>
    tpu.vector_store %arg9[%c0_46, %c0_47, %c0_48, %c0_49], %63 {strides = array<i32>} : memref<1x1x2x128xf32, #tpu.memory_space<vmem>>, vector<1x1x2x128xf32>,
    %64 = arith.truncf %53 : vector<8x128x128xf32> to vector<8x128x128xbf16>
    %c0_50 = arith.constant 0 : index
    %c0_51 = arith.constant 0 : index
    %c0_52 = arith.constant 0 : index
    %c0_53 = arith.constant 0 : index
    %65 = vector.load %arg8[%c0_50, %c0_51, %c0_52, %c0_53] : memref<1x8x128x128xbf16, #tpu.memory_space<vmem>>, vector<1x8x128x128xbf16>
    %66 = vector.shape_cast %65 : vector<1x8x128x128xbf16> to vector<8x128x128xbf16>
    %67 = vector.shape_cast %64 : vector<8x128x128xbf16> to vector<1x8x128x128xbf16>
    tpu.vector_store %arg8[%c0_50, %c0_51, %c0_52, %c0_53], %67 {strides = array<i32>} : memref<1x8x128x128xbf16, #tpu.memory_space<vmem>>, vector<1x8x128x128xbf16>,
    return
  }
  func.func @transform_0(%arg0: i32, %arg1: i32) -> (i32, i32, i32) {
    %c0_i32 = arith.constant 0 : i32
    %c0_i32_0 = arith.constant 0 : i32
    %c0_i32_1 = arith.constant 0 : i32
    return %arg0, %c0_i32, %c0_i32_0 : i32, i32, i32
  }
  func.func @transform_1(%arg0: i32, %arg1: i32) -> (i32, i32, i32) {
    %c0_i32 = arith.constant 0 : i32
    %c0_i32_0 = arith.constant 0 : i32
    %c0_i32_1 = arith.constant 0 : i32
    return %arg0, %c0_i32, %c0_i32_0 : i32, i32, i32
  }
  func.func @transform_2(%arg0: i32, %arg1: i32) -> (i32, i32, i32, i32) {
    %c0_i32 = arith.constant 0 : i32
    %c0_i32_0 = arith.constant 0 : i32
    %c0_i32_1 = arith.constant 0 : i32
    return %arg0, %c0_i32, %arg1, %c0_i32_0 : i32, i32, i32, i32
  }
  func.func @transform_3(%arg0: i32, %arg1: i32) -> (i32, i32, i32) {
    %c0_i32 = arith.constant 0 : i32
    %c0_i32_0 = arith.constant 0 : i32
    %c0_i32_1 = arith.constant 0 : i32
    %c0_i32_2 = arith.constant 0 : i32
    return %c0_i32, %c0_i32_0, %c0_i32_1 : i32, i32, i32
  }
  func.func @transform_4(%arg0: i32, %arg1: i32) -> (i32, i32) {
    %c0_i32 = arith.constant 0 : i32
    %c0_i32_0 = arith.constant 0 : i32
    %c0_i32_1 = arith.constant 0 : i32
    return %c0_i32, %c0_i32_0 : i32, i32
  }
  func.func @transform_5(%arg0: i32, %arg1: i32) -> (i32, i32, i32) {
    %c0_i32 = arith.constant 0 : i32
    %c0_i32_0 = arith.constant 0 : i32
    %c0_i32_1 = arith.constant 0 : i32
    return %arg0, %c0_i32, %c0_i32_0 : i32, i32, i32
  }
  func.func @transform_6(%arg0: i32, %arg1: i32) -> (i32, i32, i32, i32) {
    %c0_i32 = arith.constant 0 : i32
    %c0_i32_0 = arith.constant 0 : i32
    %c0_i32_1 = arith.constant 0 : i32
    return %arg0, %c0_i32, %arg1, %c0_i32_0 : i32, i32, i32, i32
  }
  func.func @transform_7(%arg0: i32, %arg1: i32) -> (i32, i32, i32, i32) {
    %c0_i32 = arith.constant 0 : i32
    %c0_i32_0 = arith.constant 0 : i32
    %c0_i32_1 = arith.constant 0 : i32
    return %arg0, %arg1, %c0_i32, %c0_i32_0 : i32, i32, i32, i32
  }
}

</mosaic_0001>

<bundles_post_ra>
// kernel: tpu_custom_call.1
= control target key start
LH: loop header
LB: loop body
LE: loop exit
PB: predicated region body
PF: predicated region fallthrough
CT: control target
= control target key end

     0   :  { %s17321_s0 = inlined_call_operand.vmem [shape: f32[2,1,64], index: 0, kind: input, shape index: {}]   ;;  %s17322_s1 = inlined_call_operand.vmem [shape: f32[2,1,64], index: 1, kind: input, shape index: {}]   ;;  %s17323_s2 = inlined_call_operand.vmem [shape: bf16[2,8,256,64], index: 2, kind: input, shape index: {}]   ;;  %s17324_s3 = inlined_call_operand.vmem [shape: bf16[3,64,128], index: 3, kind: input, shape index: {}]   ;;  %s17325_s4 = inlined_call_operand.vmem [shape: f32[1,128], index: 4, kind: input, shape index: {}]   ;;  %s17326_s5 = inlined_call_operand.vmem [shape: f32[2,8,128], index: 5, kind: input, shape index: {}]   ;;  %s17327_s6 = inlined_call_operand.hbm [shape: bf16[2,8,256,128], index: 6, kind: output, shape index: {0}]   ;;  %s17328_s7 = inlined_call_operand.hbm [shape: f32[2,2,2,128], index: 7, kind: output, shape index: {1}]  }
   0x1   :  { %17333 = sst [smem:[#allocation44_spill]] %s17321_s0 }
   0x2   :  { %17334 = sst [smem:[#allocation45_spill]] %s17322_s1 }
   0x3   :  { %17335 = sst [smem:[#allocation46_spill]] %s17323_s2 }
   0x4   :  { %17336 = sst [smem:[#allocation47_spill]] %s17324_s3 }
   0x5   :  { %17337 = sst [smem:[#allocation48_spill]] %s17325_s4 }
   0x6   :  { %17338 = sst [smem:[#allocation49_spill]] %s17326_s5 }
   0x7   :  { %13 = vsyncpa [#allocation5], 0 }
   0x8   :  { %15 = vsyncpa [#allocation5 + $0x1], 0 }
   0x9   :  { %16 = vsyncpa [#allocation7], 0 }
   0xa   :  { %18 = vsyncpa [#allocation7 + $0x1], 0  ;;  %s11433_s24 = smov 0   ;;  %s11435_s25 = smov 0  }
   0xb   :  { %s11437_s26 = smov 0   ;;  %s11439_s27 = smov 0  }
   0xc   :  { %s11441_s28 = smov 0   ;;  %s11443_s29 = smov 0  }
   0xd   :  { %s11445_s30 = smov 0   ;;  %s11447_s8 = smov 0  }
   0xe LB: > { %s8564_s9 = sadd.s32 4294967295, %s11383_s8   ;;  %s8565_s10 = sadd.s32 4294967294, %s11383_s8   ;;  %s11383_s8 = sphi %s11447_s8, %s24_s8   ;;  %s11379_s30 = sphi %s11445_s30, %s18228_s30   ;;  %s11375_s29 = sphi %s11443_s29, %s18227_s29   ;;  %s11371_s28 = sphi %s11441_s28, %s18226_s28   ;;  %s11367_s27 = sphi %s11439_s27, %s18225_s27   ;;  %s11363_s26 = sphi %s11437_s26, %s18224_s26   ;;  %s11359_s25 = sphi %s11435_s25, %s18223_s25   ;;  %s11355_s24 = sphi %s11433_s24, %s18222_s24  }
   0xf   : > { %s33_s11 = sadd.s32 1, %s11375_s29  ;;  %s36_s12 = sadd.s32 1, %s11379_s30 }
  0x10   : > { %p34_p0 = scmp.ge.s32.totalorder %s33_s11, 2  ;;  %p104_p1 = scmp.ne.s32.totalorder %s11363_s26, %s11359_s25 }
  0x11   : > { %p105_p2 = scmp.eq.s32.totalorder %s11383_s8, 0  ;;  %p204_p5 = scmp.eq.s32.totalorder %s8564_s9, 3 }
  0x12   : > { %s18230_s11 = smov (%p34_p0, %s33_s11), 0  ;;  %s18232_s12 = smov (!%p34_p0, %s36_s12), %s11379_s30 }
  0x13   : > { %s93_s13 = ssub.s32 %s11375_s29, %s18230_s11  ;;  %p11485_p3 = por %p105_p2, %p104_p1 }
  0x14   : > { %p38_p4 = scmp.ge.s32.totalorder %s18232_s12, 2  ;;  %p209_p6 = scmp.ne.s32.totalorder %s11359_s25, %s11355_s24 }
  0x15   : > { %p210_p7 = scmp.eq.s32.totalorder %s8565_s10, 3  ;;  %p11493_p8 = por %p204_p5, %p104_p1 }
  0x16   : > { %s18234_s12 = smov (%p38_p4, %s18232_s12), 0  ;;  %s97_s19 = sadd.s32 1, %s11363_s26 }
  0x17   : > { %17340 = sst [smem:[#allocation12_spill]] %s18234_s12  ;;  %p11497_p9 = por %p210_p7, %p209_p6 }
  0x18   : > { %s92_s17 = ssub.s32 %s11379_s30, %s18234_s12  ;;  %p8567_p11 = scmp.ge.s32.totalorder %s11383_s8, 4 }
  0x19   : > { %s94_s18 = sor.u32 %s93_s13, %s92_s17 }
  0x1a   : > { %p95_p10 = scmp.eq.s32.totalorder %s94_s18, 0  ;;  %260 = sbr.rel (%p8567_p11) target bundleno = 105 (0x69), region = 24 }
  0x1c   : > { %s11505_s20 = scalar_select %p95_p10, %s11363_s26, %s97_s19  }
  0x1f   : > { %275 = sbr.rel (!%p11485_p3) target bundleno = 105 (0x69), region = 36  ;;  %s277_s21 = sand.u32 (%p11485_p3), 1, %s11363_s26  }
  0x20   : > { %s8569_s22 = sshll.u32 (%p11485_p3), %s11375_s29, 4  ;;  %s8568_s23 = sshll.u32 (%p11485_p3), %s277_s21, 9 }
  0x21   : > { %s8570_s9 = sshll.u32 (%p11485_p3), %s11379_s30, 8  ;;  %s17343_s2 = sld [smem:[#allocation46_spill]] (%p11485_p3) }
  0x22   : > { %s282_s10 = sadd.s32 (%p11485_p3), %s8570_s9, %s8569_s22  ;;  %s11521_s14 = scalar_lea.vmem (%p11485_p3), [#allocation3], %s8568_s23 }
  0x23   : > { %s8571_s12 = sshll.u32 (%p11485_p3), %s282_s10, 2 }
  0x27   : > { %s11516_s18 = scalar_lea.vmem %s17343_s2, %s8571_s12 }
  0x28   : > { %v301_v0 = vld [vmem:[%s11516_s18] sm:$0xff]   ;;  %v305_v1 = vld [vmem:[%s11516_s18 + $0x8] sm:$0xff]   ;;  %v309_v2 = vld [vmem:[%s11516_s18 + $0x10] sm:$0xff]  }
  0x29   : > { %302 = vst [vmem:[%s11521_s14] sm:$0xff] %v301_v0   ;;  %v313_v3 = vld [vmem:[%s11516_s18 + $0x18] sm:$0xff]   ;;  %v317_v4 = vld [vmem:[%s11516_s18 + $0x20] sm:$0xff]   ;;  %v321_v5 = vld [vmem:[%s11516_s18 + $0x28] sm:$0xff]  }
  0x2a   : > { %306 = vst [vmem:[%s11521_s14 + $0x8] sm:$0xff] %v305_v1   ;;  %v325_v6 = vld [vmem:[%s11516_s18 + $0x30] sm:$0xff]   ;;  %v329_v7 = vld [vmem:[%s11516_s18 + $0x38] sm:$0xff]   ;;  %v333_v8 = vld [vmem:[%s11516_s18 + $0x80] sm:$0xff]  }
  0x2b   : > { %310 = vst [vmem:[%s11521_s14 + $0x10] sm:$0xff] %v309_v2   ;;  %v337_v9 = vld [vmem:[%s11516_s18 + $0x88] sm:$0xff]   ;;  %v341_v10 = vld [vmem:[%s11516_s18 + $0x90] sm:$0xff]   ;;  %v345_v11 = vld [vmem:[%s11516_s18 + $0x98] sm:$0xff]  }
  0x2c   : > { %314 = vst [vmem:[%s11521_s14 + $0x18] sm:$0xff] %v313_v3   ;;  %v349_v12 = vld [vmem:[%s11516_s18 + $0xa0] sm:$0xff]   ;;  %v353_v13 = vld [vmem:[%s11516_s18 + $0xa8] sm:$0xff]   ;;  %v357_v14 = vld [vmem:[%s11516_s18 + $0xb0] sm:$0xff]  }
  0x2d   : > { %318 = vst [vmem:[%s11521_s14 + $0x20] sm:$0xff] %v317_v4   ;;  %v361_v15 = vld [vmem:[%s11516_s18 + $0xb8] sm:$0xff]   ;;  %v365_v16 = vld [vmem:[%s11516_s18 + $0x100] sm:$0xff]   ;;  %v369_v17 = vld [vmem:[%s11516_s18 + $0x108] sm:$0xff]  }
  0x2e   : > { %322 = vst [vmem:[%s11521_s14 + $0x28] sm:$0xff] %v321_v5   ;;  %v373_v18 = vld [vmem:[%s11516_s18 + $0x110] sm:$0xff]   ;;  %v377_v19 = vld [vmem:[%s11516_s18 + $0x118] sm:$0xff]   ;;  %v381_v20 = vld [vmem:[%s11516_s18 + $0x120] sm:$0xff]  }
  0x2f   : > { %326 = vst [vmem:[%s11521_s14 + $0x30] sm:$0xff] %v325_v6   ;;  %v385_v21 = vld [vmem:[%s11516_s18 + $0x128] sm:$0xff]   ;;  %v389_v22 = vld [vmem:[%s11516_s18 + $0x130] sm:$0xff]   ;;  %v393_v23 = vld [vmem:[%s11516_s18 + $0x138] sm:$0xff]  }
  0x30   : > { %330 = vst [vmem:[%s11521_s14 + $0x38] sm:$0xff] %v329_v7   ;;  %v397_v24 = vld [vmem:[%s11516_s18 + $0x180] sm:$0xff]   ;;  %v401_v25 = vld [vmem:[%s11516_s18 + $0x188] sm:$0xff]   ;;  %v405_v26 = vld [vmem:[%s11516_s18 + $0x190] sm:$0xff]  }
  0x31   : > { %334 = vst [vmem:[%s11521_s14 + $0x40] sm:$0xff] %v333_v8   ;;  %v409_v27 = vld [vmem:[%s11516_s18 + $0x198] sm:$0xff]   ;;  %v413_v28 = vld [vmem:[%s11516_s18 + $0x1a0] sm:$0xff]   ;;  %v417_v29 = vld [vmem:[%s11516_s18 + $0x1a8] sm:$0xff]  }
  0x32   : > { %338 = vst [vmem:[%s11521_s14 + $0x48] sm:$0xff] %v337_v9   ;;  %v421_v30 = vld [vmem:[%s11516_s18 + $0x1b0] sm:$0xff]   ;;  %v425_v31 = vld [vmem:[%s11516_s18 + $0x1b8] sm:$0xff]   ;;  %v429_v32 = vld [vmem:[%s11516_s18 + $0x200] sm:$0xff]  }
  0x33   : > { %342 = vst [vmem:[%s11521_s14 + $0x50] sm:$0xff] %v341_v10   ;;  %v433_v33 = vld [vmem:[%s11516_s18 + $0x208] sm:$0xff]   ;;  %v437_v34 = vld [vmem:[%s11516_s18 + $0x210] sm:$0xff]   ;;  %v441_v35 = vld [vmem:[%s11516_s18 + $0x218] sm:$0xff]  }
  0x34   : > { %346 = vst [vmem:[%s11521_s14 + $0x58] sm:$0xff] %v345_v11   ;;  %v445_v36 = vld [vmem:[%s11516_s18 + $0x220] sm:$0xff]   ;;  %v449_v37 = vld [vmem:[%s11516_s18 + $0x228] sm:$0xff]   ;;  %v453_v38 = vld [vmem:[%s11516_s18 + $0x230] sm:$0xff]  }
  0x35   : > { %350 = vst [vmem:[%s11521_s14 + $0x60] sm:$0xff] %v349_v12   ;;  %v457_v39 = vld [vmem:[%s11516_s18 + $0x238] sm:$0xff]   ;;  %v461_v40 = vld [vmem:[%s11516_s18 + $0x280] sm:$0xff]   ;;  %v465_v41 = vld [vmem:[%s11516_s18 + $0x288] sm:$0xff]  }
  0x36   : > { %354 = vst [vmem:[%s11521_s14 + $0x68] sm:$0xff] %v353_v13   ;;  %v469_v42 = vld [vmem:[%s11516_s18 + $0x290] sm:$0xff]   ;;  %v473_v43 = vld [vmem:[%s11516_s18 + $0x298] sm:$0xff]   ;;  %v477_v44 = vld [vmem:[%s11516_s18 + $0x2a0] sm:$0xff]  }
  0x37   : > { %358 = vst [vmem:[%s11521_s14 + $0x70] sm:$0xff] %v357_v14   ;;  %v481_v45 = vld [vmem:[%s11516_s18 + $0x2a8] sm:$0xff]   ;;  %v485_v46 = vld [vmem:[%s11516_s18 + $0x2b0] sm:$0xff]   ;;  %v489_v47 = vld [vmem:[%s11516_s18 + $0x2b8] sm:$0xff]  }
  0x38   : > { %362 = vst [vmem:[%s11521_s14 + $0x78] sm:$0xff] %v361_v15   ;;  %v493_v48 = vld [vmem:[%s11516_s18 + $0x300] sm:$0xff]   ;;  %v497_v49 = vld [vmem:[%s11516_s18 + $0x308] sm:$0xff]   ;;  %v501_v50 = vld [vmem:[%s11516_s18 + $0x310] sm:$0xff]  }
  0x39   : > { %366 = vst [vmem:[%s11521_s14 + $0x80] sm:$0xff] %v365_v16   ;;  %v505_v51 = vld [vmem:[%s11516_s18 + $0x318] sm:$0xff]   ;;  %v509_v52 = vld [vmem:[%s11516_s18 + $0x320] sm:$0xff]   ;;  %v513_v53 = vld [vmem:[%s11516_s18 + $0x328] sm:$0xff]  }
  0x3a   : > { %370 = vst [vmem:[%s11521_s14 + $0x88] sm:$0xff] %v369_v17   ;;  %v517_v54 = vld [vmem:[%s11516_s18 + $0x330] sm:$0xff]   ;;  %v521_v55 = vld [vmem:[%s11516_s18 + $0x338] sm:$0xff]   ;;  %v525_v56 = vld [vmem:[%s11516_s18 + $0x380] sm:$0xff]  }
  0x3b   : > { %374 = vst [vmem:[%s11521_s14 + $0x90] sm:$0xff] %v373_v18   ;;  %v529_v57 = vld [vmem:[%s11516_s18 + $0x388] sm:$0xff]   ;;  %v533_v58 = vld [vmem:[%s11516_s18 + $0x390] sm:$0xff]   ;;  %v537_v59 = vld [vmem:[%s11516_s18 + $0x398] sm:$0xff]  }
  0x3c   : > { %378 = vst [vmem:[%s11521_s14 + $0x98] sm:$0xff] %v377_v19   ;;  %v541_v60 = vld [vmem:[%s11516_s18 + $0x3a0] sm:$0xff]   ;;  %v545_v61 = vld [vmem:[%s11516_s18 + $0x3a8] sm:$0xff]   ;;  %v549_v62 = vld [vmem:[%s11516_s18 + $0x3b0] sm:$0xff]  }
  0x3d   : > { %382 = vst [vmem:[%s11521_s14 + $0xa0] sm:$0xff] %v381_v20   ;;  %v553_v63 = vld [vmem:[%s11516_s18 + $0x3b8] sm:$0xff]  }
  0x3e   : > { %386 = vst [vmem:[%s11521_s14 + $0xa8] sm:$0xff] %v385_v21  }
  0x3f   : > { %390 = vst [vmem:[%s11521_s14 + $0xb0] sm:$0xff] %v389_v22  }
  0x40   : > { %394 = vst [vmem:[%s11521_s14 + $0xb8] sm:$0xff] %v393_v23  }
  0x41   : > { %398 = vst [vmem:[%s11521_s14 + $0xc0] sm:$0xff] %v397_v24  }
  0x42   : > { %402 = vst [vmem:[%s11521_s14 + $0xc8] sm:$0xff] %v401_v25  }
  0x43   : > { %406 = vst [vmem:[%s11521_s14 + $0xd0] sm:$0xff] %v405_v26  }
  0x44   : > { %410 = vst [vmem:[%s11521_s14 + $0xd8] sm:$0xff] %v409_v27  }
  0x45   : > { %414 = vst [vmem:[%s11521_s14 + $0xe0] sm:$0xff] %v413_v28  }
  0x46   : > { %418 = vst [vmem:[%s11521_s14 + $0xe8] sm:$0xff] %v417_v29  }
  0x47   : > { %422 = vst [vmem:[%s11521_s14 + $0xf0] sm:$0xff] %v421_v30  }
  0x48   : > { %426 = vst [vmem:[%s11521_s14 + $0xf8] sm:$0xff] %v425_v31  }
  0x49   : > { %430 = vst [vmem:[%s11521_s14 + $0x100] sm:$0xff] %v429_v32  }
  0x4a   : > { %434 = vst [vmem:[%s11521_s14 + $0x108] sm:$0xff] %v433_v33  }
  0x4b   : > { %438 = vst [vmem:[%s11521_s14 + $0x110] sm:$0xff] %v437_v34  }
  0x4c   : > { %442 = vst [vmem:[%s11521_s14 + $0x118] sm:$0xff] %v441_v35  }
  0x4d   : > { %446 = vst [vmem:[%s11521_s14 + $0x120] sm:$0xff] %v445_v36  }
  0x4e   : > { %450 = vst [vmem:[%s11521_s14 + $0x128] sm:$0xff] %v449_v37  }
  0x4f   : > { %454 = vst [vmem:[%s11521_s14 + $0x130] sm:$0xff] %v453_v38  }
  0x50   : > { %458 = vst [vmem:[%s11521_s14 + $0x138] sm:$0xff] %v457_v39  }
  0x51   : > { %462 = vst [vmem:[%s11521_s14 + $0x140] sm:$0xff] %v461_v40  }
  0x52   : > { %466 = vst [vmem:[%s11521_s14 + $0x148] sm:$0xff] %v465_v41  }
  0x53   : > { %470 = vst [vmem:[%s11521_s14 + $0x150] sm:$0xff] %v469_v42  }
  0x54   : > { %474 = vst [vmem:[%s11521_s14 + $0x158] sm:$0xff] %v473_v43  }
  0x55   : > { %478 = vst [vmem:[%s11521_s14 + $0x160] sm:$0xff] %v477_v44  }
  0x56   : > { %482 = vst [vmem:[%s11521_s14 + $0x168] sm:$0xff] %v481_v45  }
  0x57   : > { %486 = vst [vmem:[%s11521_s14 + $0x170] sm:$0xff] %v485_v46  }
  0x58   : > { %490 = vst [vmem:[%s11521_s14 + $0x178] sm:$0xff] %v489_v47  }
  0x59   : > { %494 = vst [vmem:[%s11521_s14 + $0x180] sm:$0xff] %v493_v48  }
  0x5a   : > { %498 = vst [vmem:[%s11521_s14 + $0x188] sm:$0xff] %v497_v49  }
  0x5b   : > { %502 = vst [vmem:[%s11521_s14 + $0x190] sm:$0xff] %v501_v50  }
  0x5c   : > { %506 = vst [vmem:[%s11521_s14 + $0x198] sm:$0xff] %v505_v51  }
  0x5d   : > { %510 = vst [vmem:[%s11521_s14 + $0x1a0] sm:$0xff] %v509_v52  }
  0x5e   : > { %514 = vst [vmem:[%s11521_s14 + $0x1a8] sm:$0xff] %v513_v53  }
  0x5f   : > { %518 = vst [vmem:[%s11521_s14 + $0x1b0] sm:$0xff] %v517_v54  }
  0x60   : > { %522 = vst [vmem:[%s11521_s14 + $0x1b8] sm:$0xff] %v521_v55  }
  0x61   : > { %526 = vst [vmem:[%s11521_s14 + $0x1c0] sm:$0xff] %v525_v56  }
  0x62   : > { %530 = vst [vmem:[%s11521_s14 + $0x1c8] sm:$0xff] %v529_v57  }
  0x63   : > { %534 = vst [vmem:[%s11521_s14 + $0x1d0] sm:$0xff] %v533_v58  }
  0x64   : > { %538 = vst [vmem:[%s11521_s14 + $0x1d8] sm:$0xff] %v537_v59  }
  0x65   : > { %542 = vst [vmem:[%s11521_s14 + $0x1e0] sm:$0xff] %v541_v60  }
  0x66   : > { %546 = vst [vmem:[%s11521_s14 + $0x1e8] sm:$0xff] %v545_v61  }
  0x67   : > { %550 = vst [vmem:[%s11521_s14 + $0x1f0] sm:$0xff] %v549_v62  }
  0x68   : > { %554 = vst [vmem:[%s11521_s14 + $0x1f8] sm:$0xff] %v553_v63  }
  0x69 PF: > { %p8572_p12 = scmp.ge.s32.totalorder %s11383_s8, 1  ;;  %p842_p13 = scmp.lt.s32.totalorder %s11383_s8, 5 }
  0x6b   : > { %p843_p0 = pnand %p8572_p12, %p842_p13 }
  0x6d   : > { %846 = sbr.rel (%p843_p0) target bundleno = 1445 (0x5a5), region = 81 }
  0x72   : > { %s17344_s3 = sld [smem:[#allocation47_spill]]  ;;  %vm17332_vm0 = vcmask 519168   ;;  %v11385_v3 = vmov 0   ;;  %s11666_s10 = sand.u32 1, %s11359_s25   ;;  %vm17331_vm1 = vcmask 523264  }
  0x73   : > { %4117 = vst.msk [vmem:[#allocation2] sm:$0xf] %vm17332_vm0, %v11385_v3  ;;  %s17330_s12 = sshll.u32 %s11666_s10, 9  ;;  %p895_p1 = scmp.lt.s32.totalorder %s11371_s28, 1 }
  0x74   : > { %4118 = vst.msk [vmem:[#allocation2 + $0x4] sm:$0xf] %vm17332_vm0, %v11385_v3  ;;  %s11703_s17 = scalar_lea.vmem [#allocation3], %s17330_s12  ;;  %s17345_s0 = sld [smem:[#allocation44_spill]] }
  0x75   : > { %4119 = vst.msk [vmem:[#allocation2 + $0x8] sm:$0xf] %vm17332_vm0, %v11385_v3  ;;  %v9943_v9 = vld [vmem:[%s11703_s17] sm:$0xff]   ;;  %s11712_s18 = scalar_select %p895_p1, %s11371_s28, 1  ;;  %v11715_v12 = vld [vmem:[%s11703_s17 + $0x8] sm:$0xff]  }
  0x76   : > { %4120 = vst.msk [vmem:[#allocation2 + $0xc] sm:$0xf] %vm17332_vm0, %v11385_v3  ;;  %v10565_v10 = vld [vmem:[%s11703_s17 + $0x180] sm:$0xff]   ;;  %s17346_s1 = sld [smem:[#allocation45_spill]]  ;;  %v9944_v14 = vunpack.c.l.bf16 %v9943_v9  ;;  %v9945_v15 = vunpack.c.h.bf16 %v9943_v9  ;;  %v10566_v18 = vld [vmem:[%s11703_s17 + $0x188] sm:$0xff]   ;;  %v9948_v23 = vunpack.c.l.bf16 %v11715_v12  ;;  %v9949_v27 = vunpack.c.h.bf16 %v11715_v12  ;;  %s17633_s13 = sshll.u32 %s11666_s10, 9 }
  0x77   : > { %4121 = vst.msk [vmem:[#allocation2 + $0x10] sm:$0xf] %vm17332_vm0, %v11385_v3  ;;  %v10525_v11 = vld [vmem:[%s11703_s17 + $0x40] sm:$0xff]   ;;  %v10136_v16 = vunpack.c.l.bf16 %v10565_v10  ;;  %v10137_v17 = vunpack.c.h.bf16 %v10565_v10  ;;  %v10140_v28 = vunpack.c.l.bf16 %v10566_v18  ;;  %v10141_v37 = vunpack.c.h.bf16 %v10566_v18  ;;  %v10526_v44 = vld [vmem:[%s11703_s17 + $0x48] sm:$0xff]   ;;  %s8576_s14 = sshll.u32 %s11712_s18, 3  ;;  %s17609_s5 = sld [smem:[#allocation49_spill]] }
  0x78   : > { %v11653_v0 = vld [vmem:[%s17344_s3 + $0x18] sm:$0xff]  ;;  %v11672_v4 = vld [vmem:[%s17344_s3 + $0x10] sm:$0xff]  ;;  %v11691_v7 = vld [vmem:[%s17344_s3 + $0x8] sm:$0xff]  ;;  %4122 = vst.msk [vmem:[#allocation2 + $0x14] sm:$0xf] %vm17332_vm0, %v11385_v3  ;;  %v9976_v21 = vunpack.c.l.bf16 %v10525_v11  ;;  %v9977_v22 = vunpack.c.h.bf16 %v10525_v11  ;;  %v9980_v55 = vunpack.c.l.bf16 %v10526_v44  ;;  %v9981_v59 = vunpack.c.h.bf16 %v10526_v44  ;;  %s17617_s4 = sld [smem:[#allocation48_spill]] }
  0x79   : > { %v9873_v1 = vld [vmem:[%s17344_s3 + $0x38] sm:$0xff]  ;;  %5958 = vmatpush.bf16.msra.mxu1 %v11653_v0  ;;  %v9872_v5 = vld [vmem:[%s17344_s3 + $0x30] sm:$0xff]  ;;  %v9871_v8 = vld [vmem:[%s17344_s3 + $0x28] sm:$0xff]  ;;  %4123 = vst.msk [vmem:[#allocation2 + $0x18] sm:$0xf] %vm17332_vm0, %v11385_v3 }
  0x7a   : > { %v11661_v2 = vld [vmem:[%s17344_s3 + $0x58] sm:$0xff]  ;;  %5093 = vmatpush.bf16.msra.mxu0 %v9873_v1  ;;  %10644 = vmatpush.bf16.msra.mxu3 %v9873_v1  ;;  %v11684_v6 = vld [vmem:[%s17344_s3 + $0x50] sm:$0xff]  ;;  %v11721_v13 = vld [vmem:[%s17344_s3 + $0x48] sm:$0xff]  ;;  %4124 = vst.msk [vmem:[#allocation2 + $0x1c] sm:$0xf] %vm17332_vm0, %v11385_v3  ;;  %s11731_s23 = scalar_lea.vmem %s17345_s0, %s11712_s18 }
  0x7b   : > { %6961 = vmatpush.bf16.msra.mxu2 %v11661_v2  ;;  %v11743_v19 = vld [vmem:[%s17344_s3] sm:$0xff]  ;;  %4125 = vst.msk [vmem:[#allocation2 + $0x20] sm:$0xf] %vm17332_vm0, %v11385_v3 }
  0x7c   : > { %s11737_s12 = scalar_lea.vmem %s17346_s1, %s11712_s18  ;;  %v9870_v20 = vld [vmem:[%s17344_s3 + $0x20] sm:$0xff]  ;;  %4126 = vst.msk [vmem:[#allocation2 + $0x24] sm:$0xf] %vm17332_vm0, %v11385_v3  ;;  %s8353_s18 = scalar_lea.sflag [#allocation5], %s11666_s10 }
  0x7d   : > { %5959 = vmatpush.bf16.msra.mxu1 %v11672_v4  ;;  %v11755_v24 = vld [vmem:[%s11731_s23] ss:$0 sm:$0xff]  ;;  %4127 = vst.msk [vmem:[#allocation2 + $0x28] sm:$0xf] %vm17332_vm0, %v11385_v3  ;;  %s13370_s21 = scalar_lea.vmem %s17609_s5, %s8576_s14  ;;  %s13495_s14 = scalar_lea.vmem [#allocation4], %s17633_s13 }
  0x7e   : > { %5094 = vmatpush.bf16.msra.mxu0 %v9872_v5  ;;  %10645 = vmatpush.bf16.msra.mxu3 %v9872_v5  ;;  %v11763_v25 = vld [vmem:[%s17344_s3 + $0x40] sm:$0xff]  ;;  %4128 = vst.msk [vmem:[#allocation2 + $0x2c] sm:$0xf] %vm17332_vm0, %v11385_v3  ;;  %v1168_v29 = vmul.f32 %v11755_v24, %v9944_v14  ;;  %v1169_v30 = vmul.f32 %v11755_v24, %v9945_v15 }
  0x7f   : > { %6962 = vmatpush.bf16.msra.mxu2 %v11684_v6  ;;  %v11766_v26 = vld [vmem:[%s11737_s12] ss:$0 sm:$0xff]  ;;  %v1264_v31 = vmul.f32 %v11755_v24, %v10136_v16  ;;  %v1265_v32 = vmul.f32 %v11755_v24, %v10137_v17  ;;  %4129 = vst.msk [vmem:[#allocation2 + $0x30] sm:$0xf] %vm17332_vm0, %v11385_v3  ;;  %v1184_v34 = vmul.f32 %v11755_v24, %v9976_v21 }
  0x80   : > { %v9738_v33 = vld [vmem:[#allocation2] sm:$0xff]  ;;  %v1185_v35 = vmul.f32 %v11755_v24, %v9977_v22  ;;  %v1170_v36 = vmul.f32 %v11755_v24, %v9948_v23  ;;  %4130 = vst.msk [vmem:[#allocation2 + $0x34] sm:$0xf] %vm17332_vm0, %v11385_v3  ;;  %v11784_v38 = vadd.f32 %v11766_v26, %v1168_v29  ;;  %v11787_v39 = vadd.f32 %v11766_v26, %v1169_v30 }
  0x81   : > { %5960 = vmatpush.bf16.msra.mxu1 %v11691_v7  ;;  %v11790_v40 = vadd.f32 %v11766_v26, %v1264_v31  ;;  %4131 = vst.msk [vmem:[#allocation2 + $0x38] sm:$0xf] %vm17332_vm0, %v11385_v3  ;;  %v11796_v41 = vadd.f32 %v11766_v26, %v1265_v32  ;;  %v11799_v42 = vadd.f32 %v11766_v26, %v1184_v34 }
  0x82   : > { %5095 = vmatpush.bf16.msra.mxu0 %v9871_v8  ;;  %10646 = vmatpush.bf16.msra.mxu3 %v9871_v8  ;;  %v11802_v43 = vadd.f32 %v11766_v26, %v1185_v35  ;;  %4132 = vst.msk [vmem:[#allocation2 + $0x3c] sm:$0xf] %vm17332_vm0, %v11385_v3  ;;  %v8577_v45 = vmul.f32 -1.442695, %v11784_v38  ;;  %v8578_v46 = vmul.f32 -1.442695, %v11787_v39  ;;  %v1171_v49 = vmul.f32 %v11755_v24, %v9949_v27 }
  0x83   : > { %6963 = vmatpush.bf16.msra.mxu2 %v11721_v13  ;;  %4134 = vst.msk [vmem:[#allocation2 + $0x240] sm:$0xf] %vm17332_vm0, %v11385_v3  ;;  %v8673_v47 = vmul.f32 -1.442695, %v11790_v40  ;;  %v8674_v48 = vmul.f32 -1.442695, %v11796_v41  ;;  %v11820_v51 = vadd.f32 %v11766_v26, %v1170_v36  ;;  %v1266_v52 = vmul.f32 %v11755_v24, %v10140_v28 }
  0x84   : > { %4135 = vst.msk [vmem:[#allocation2 + $0x244] sm:$0xf] %vm17332_vm0, %v11385_v3  ;;  %10749 = vpow2.f32 %v8577_v45  ;;  %v8593_v50 = vmul.f32 -1.442695, %v11799_v42  ;;  %v8594_v53 = vmul.f32 -1.442695, %v11802_v43  ;;  %v1267_v54 = vmul.f32 %v11755_v24, %v10141_v37 }
  0x85   : > { %5961 = vmatpush.bf16.msra.mxu1 %v11743_v19  ;;  %4136 = vst.msk [vmem:[#allocation2 + $0x248] sm:$0xf] %vm17332_vm0, %v11385_v3  ;;  %10751 = vpow2.f32 %v8578_v46  ;;  %v11833_v56 = vadd.f32 %v11766_v26, %v1171_v49  ;;  %v8579_v57 = vmul.f32 -1.442695, %v11820_v51  ;;  %v11839_v58 = vadd.f32 %v11766_v26, %v1266_v52  ;;  %v9739_v45 = vld [vmem:[#allocation2 + $0x8] sm:$0xff] }
  0x86   : > { %5096 = vmatpush.bf16.msra.mxu0 %v9870_v20  ;;  %10647 = vmatpush.bf16.msra.mxu3 %v9870_v20  ;;  %4137 = vst.msk [vmem:[#allocation2 + $0x24c] sm:$0xf] %vm17332_vm0, %v11385_v3  ;;  %10753 = vpow2.f32 %v8673_v47  ;;  %v11844_v60 = vadd.f32 %v11766_v26, %v1267_v54  ;;  %v1186_v62 = vmul.f32 %v11755_v24, %v9980_v55 }
  0x87   : > { %6964 = vmatpush.bf16.msra.mxu2 %v11763_v25  ;;  %4138 = vst.msk [vmem:[#allocation2 + $0x250] sm:$0xf] %vm17332_vm0, %v11385_v3  ;;  %10755 = vpow2.f32 %v8674_v48  ;;  %v8580_v1 = vmul.f32 -1.442695, %v11833_v56  ;;  %v8675_v8 = vmul.f32 -1.442695, %v11839_v58  ;;  %v1187_v9 = vmul.f32 %v11755_v24, %v9981_v59 }
  0x88   : > { %9321 = vmatmul.msk.bf16.vlgmr.msra.gmra.mxu1 %vm17331_vm1, %v9738_v33  ;;  %4139 = vst.msk [vmem:[#allocation2 + $0x254] sm:$0xf] %vm17332_vm0, %v11385_v3  ;;  %10757 = vpow2.f32 %v8593_v50  ;;  %v11866_v11 = vmul.f32 -1.442695, %v11844_v60  ;;  %v11874_v16 = vadd.f32 %v11766_v26, %v1186_v62 }
  0x89   : > { %4140 = vst.msk [vmem:[#allocation2 + $0x258] sm:$0xf] %vm17332_vm0, %v11385_v3  ;;  %10759 = vpow2.f32 %v8594_v53 }
  0x8a   : > { %10648 = vmatpush.bf16.msrb.mxu3 %v11653_v0  ;;  %v10750_v61 = vpop.eup %10749  ;;  %4141 = vst.msk [vmem:[#allocation2 + $0x25c] sm:$0xf] %vm17332_vm0, %v11385_v3  ;;  %10761 = vpow2.f32 %v8579_v57 }
  0x8b   : > { %v10752_v63 = vpop.eup %10751  ;;  %4142 = vst.msk [vmem:[#allocation2 + $0x260] sm:$0xf] %vm17332_vm0, %v11385_v3  ;;  %v11852_v0 = vadd.f32 1.0, %v10750_v61 }
  0x8c   : > { %4143 = vst.msk [vmem:[#allocation2 + $0x264] sm:$0xf] %vm17332_vm0, %v11385_v3  ;;  %v11857_v5 = vadd.f32 1.0, %v10752_v63 }
  0x8d   : > { %4144 = vst.msk [vmem:[#allocation2 + $0x268] sm:$0xf] %vm17332_vm0, %v11385_v3  ;;  %10763 = vrcp.f32 %v11852_v0  ;;  %v1951_v10 = vand.u32 2147483648, %v11852_v0  ;;  %v1949_v14 = vand.u32 2147483647, %v11852_v0  ;;  %vm1945_vm2 = vweird.f32 %v11852_v0 }
  0x8e   : > { %10649 = vmatpush.bf16.msrb.mxu3 %v11672_v4  ;;  %v10754_v4 = vpop.eup %10753  ;;  %4145 = vst.msk [vmem:[#allocation2 + $0x26c] sm:$0xf] %vm17332_vm0, %v11385_v3  ;;  %10765 = vrcp.f32 %v11857_v5  ;;  %v1964_v15 = vand.u32 2147483647, %v11857_v5  ;;  %v1966_v18 = vand.u32 2147483648, %v11857_v5  ;;  %vm1960_vm3 = vweird.f32 %v11857_v5 }
  0x8f   : > { %4146 = vst.msk [vmem:[#allocation2 + $0x270] sm:$0xf] %vm17332_vm0, %v11385_v3  ;;  %v11880_v20 = vadd.f32 1.0, %v10754_v4  ;;  %10767 = vpow2.f32 %v8580_v1  ;;  %v11894_v23 = vor.u32 1.1754944e-38, %v1951_v10  ;;  %vm11901_vm4 = vcmp.eq.f32.partialorder %v1949_v14, 8.507059e+37 }
  0x90   : > { %4147 = vst.msk [vmem:[#allocation2 + $0x274] sm:$0xf] %vm17332_vm0, %v11385_v3  ;;  %10769 = vpow2.f32 %v8675_v8  ;;  %vm11910_vm5 = vcmp.eq.f32.partialorder %v1964_v15, 8.507059e+37  ;;  %v1967_v35 = vor.u32 1.1754944e-38, %v1966_v18 }
  0x91   : > { %4148 = vst.msk [vmem:[#allocation2 + $0x278] sm:$0xf] %vm17332_vm0, %v11385_v3  ;;  %10771 = vrcp.f32 %v11880_v20  ;;  %v3391_v27 = vand.u32 2147483648, %v11880_v20  ;;  %v3389_v30 = vand.u32 2147483647, %v11880_v20  ;;  %vm3385_vm6 = vweird.f32 %v11880_v20 }
  0x92   : > { %10650 = vmatpush.bf16.msrb.mxu3 %v11691_v7  ;;  %v10756_v7 = vpop.eup %10755  ;;  %4149 = vst.msk [vmem:[#allocation2 + $0x27c] sm:$0xf] %vm17332_vm0, %v11385_v3 }
  0x93   : > { %v10758_v12 = vpop.eup %10757  ;;  %v11882_v21 = vadd.f32 1.0, %v10756_v7  ;;  %v11918_v44 = vor.u32 1.1754944e-38, %v3391_v27  ;;  %vm11927_vm10 = vcmp.eq.f32.partialorder %v3389_v30, 8.507059e+37 }
  0x94   : > { %v10760_v17 = vpop.eup %10759  ;;  %v11887_v22 = vadd.f32 1.0, %v10758_v12 }
  0x95   : > { %v10762_v28 = vpop.eup %10761  ;;  %10773 = vrcp.f32 %v11882_v21  ;;  %v3406_v31 = vand.u32 2147483648, %v11882_v21  ;;  %v11908_v32 = vadd.f32 1.0, %v10760_v17  ;;  %v3404_v3 = vand.u32 2147483647, %v11882_v21 }
  0x96   : > { %10651 = vmatpush.bf16.msrb.mxu3 %v11743_v19  ;;  %v11890_v19 = vadd.f32 %v11766_v26, %v1187_v9  ;;  %v10764_v33 = vpop.eup %10763  ;;  %10775 = vrcp.f32 %v11887_v22  ;;  %vm3400_vm7 = vweird.f32 %v11882_v21  ;;  %vm2185_vm8 = vweird.f32 %v11887_v22 }
  0x97   : > { %v10766_v36 = vpop.eup %10765  ;;  %v1941_v37 = vmul.f32 %v10764_v33, %v11852_v0  ;;  %v2189_v48 = vand.u32 2147483647, %v11887_v22  ;;  %v2191_v49 = vand.u32 2147483648, %v11887_v22  ;;  %vm1946_vm9 = vweird.f32 %v10764_v33 }
  0x98   : > { %v10768_v46 = vpop.eup %10767  ;;  %v1956_v47 = vmul.f32 %v10766_v36, %v11857_v5  ;;  %v3407_v54 = vor.u32 1.1754944e-38, %v3406_v31  ;;  %10777 = vrcp.f32 %v11908_v32  ;;  %9322 = vmatmul.msk.bf16.gmra.mxu1 %vm17331_vm1, %v9739_v45  ;;  %vm1961_vm11 = vweird.f32 %v10766_v36  ;;  %vm11948_vm15 = vmor %vm1945_vm2, %vm1946_vm9 }
  0x99   : > { %v11925_v50 = vpop.eup %10769  ;;  %v1942_v52 = vsub.f32 1.0, %v1941_v37  ;;  %vm11933_vm12 = vcmp.eq.f32.partialorder %v3404_v3, 8.507059e+37  ;;  %v2204_v61 = vand.u32 2147483647, %v11908_v32  ;;  %vm11940_vm14 = vcmp.eq.f32.partialorder %v2189_v48, 8.507059e+37  ;;  %vm11956_vm0 = vmor %vm1960_vm3, %vm1961_vm11 }
  0x9a   : > { %v10772_v55 = vpop.eup %10771  ;;  %v1957_v57 = vsub.f32 1.0, %v1956_v47  ;;  %v2192_v8 = vor.u32 1.1754944e-38, %v2191_v49  ;;  %v2206_v9 = vand.u32 2147483648, %v11908_v32  ;;  %v11961_v31 = vadd.f32 1.0, %v10762_v28 }
  0x9b   : > { %v10774_v62 = vpop.eup %10773  ;;  %v1943_v63 = vmul.f32 %v10764_v33, %v1942_v52  ;;  %v3381_v1 = vmul.f32 %v10772_v55, %v11880_v20  ;;  %vm3386_vm1 = vweird.f32 %v10772_v55  ;;  %v11963_v3 = vadd.f32 1.0, %v10768_v46 }
  0x9c   : > { %v10776_v7 = vpop.eup %10775  ;;  %v1958_v12 = vmul.f32 %v10766_v36, %v1957_v57  ;;  %v3396_v14 = vmul.f32 %v10774_v62, %v11882_v21  ;;  %vm3401_vm13 = vweird.f32 %v10774_v62  ;;  %10779 = vpow2.f32 %v11866_v11  ;;  %vm11976_vm3 = vmor %vm3385_vm6, %vm3386_vm1 }
  0x9d   : > { %v1944_v15 = vadd.f32 %v10764_v33, %v1943_v63  ;;  %v3382_v18 = vsub.f32 1.0, %v3381_v1  ;;  %v2181_v0 = vmul.f32 %v10776_v7, %v11887_v22  ;;  %vm2186_vm2 = vweird.f32 %v10776_v7 }
  0x9e   : > { %v1959_v27 = vadd.f32 %v10766_v36, %v1958_v12  ;;  %v3397_v30 = vsub.f32 1.0, %v3396_v14  ;;  %v10778_v37 = vpop.eup %10777  ;;  %vm11995_vm1 = vmor %vm2185_vm8, %vm2186_vm2  ;;  %10781 = vrcp.f32 %v11961_v31  ;;  %vm17368_vm6 = vweird.f32 %v11908_v32 }
  0x9f   : > { %v1948_v45 = vsel %vm11948_vm15, %v10764_v33, %v1944_v15  ;;  %v3383_v47 = vmul.f32 %v10772_v55, %v3382_v18  ;;  %v2182_v5 = vsub.f32 1.0, %v2181_v0  ;;  %v2196_v33 = vmul.f32 %v10778_v37, %v11908_v32 }
  0xa0   : > { %v1953_v48 = vsel %vm11901_vm4, %v11894_v23, %v1948_v45  ;;  %v1963_v49 = vsel %vm11956_vm0, %v10766_v36, %v1959_v27  ;;  %v3398_v46 = vmul.f32 %v10774_v62, %v3397_v30  ;;  %vm11987_vm0 = vmor %vm3400_vm7, %vm3401_vm13  ;;  %vm2201_vm4 = vweird.f32 %v10778_v37 }
  0xa1   : > { %v1968_v11 = vsel %vm11910_vm5, %v1967_v35, %v1963_v49  ;;  %v3860_v52 = vmul.f32 %v1953_v48, %v11784_v38  ;;  %v3384_v29 = vadd.f32 %v10772_v55, %v3383_v47  ;;  %v2183_v20 = vmul.f32 %v10776_v7, %v2182_v5  ;;  %vm12015_vm7 = vmor %vm17368_vm6, %vm2201_vm4 }
  0xa2   : > { %v3861_v36 = vmul.f32 %v1968_v11, %v11787_v39  ;;  %v3399_v57 = vadd.f32 %v10774_v62, %v3398_v46  ;;  %v2197_v38 = vsub.f32 1.0, %v2196_v33  ;;  %v10780_v12 = vpop.eup %10779  ;;  %vm17367_vm5 = vcmask 519168   ;;  %v10519_v46 = vld [vmem:[%s11703_s17 + $0x10] sm:$0xff]  }
  0xa3   : > { %v3988_v35 = vpack.c.bf16 %v3860_v52, %v3860_v52  ;;  %v3388_v21 = vsel %vm11976_vm3, %v10772_v55, %v3384_v29  ;;  %v2184_v63 = vadd.f32 %v10776_v7, %v2183_v20  ;;  %vm17371_vm8 = vmmov %vm17367_vm5  ;;  %vm2205_vm9 = vcmp.eq.f32.partialorder %v2204_v61, 8.507059e+37 }
  0xa4   : > { %v3989_v1 = vpack.c.bf16 %v3861_v36, %v3861_v36  ;;  %v3393_v39 = vsel %vm11927_vm10, %v11918_v44, %v3388_v21  ;;  %v3403_v22 = vsel %vm11987_vm0, %v10774_v62, %v3399_v57  ;;  %v2198_v10 = vmul.f32 %v10778_v37, %v2197_v38  ;;  %v10782_v0 = vpop.eup %10781  ;;  %vm17372_vm10 = vmmov %vm17367_vm5  ;;  %v12070_v21 = vld [vmem:[%s11703_s17 + $0x190] sm:$0xff]  }
  0xa5   : > { %4151 = vst.msk [vmem:[#allocation2 + $0x40] sm:$0xf] %vm17367_vm5, %v3988_v35  ;;  %v3408_v14 = vsel %vm11933_vm12, %v3407_v54, %v3403_v22  ;;  %v3956_v55 = vmul.f32 %v3393_v39, %v11790_v40  ;;  %v2188_v15 = vsel %vm11995_vm1, %v10776_v7, %v2184_v63  ;;  %v2207_v44 = vor.u32 1.1754944e-38, %v2206_v9  ;;  %vm17373_vm12 = vmmov %vm17367_vm5 }
  0xa6   : > { %4152 = vst.msk [vmem:[#allocation2 + $0x44] sm:$0xf] %vm17371_vm8, %v3989_v1  ;;  %v3957_v62 = vmul.f32 %v3408_v14, %v11796_v41  ;;  %v2193_v59 = vsel %vm11940_vm14, %v2192_v8, %v2188_v15  ;;  %v2199_v54 = vadd.f32 %v10778_v37, %v2198_v10  ;;  %10783 = vrcp.f32 %v11963_v3  ;;  %vm17374_vm13 = vmmov %vm17367_vm5 }
  0xa7   : > { %v4084_v40 = vpack.c.bf16 %v3956_v55, %v3956_v55  ;;  %v3876_v17 = vmul.f32 %v2193_v59, %v11799_v42  ;;  %v8595_v32 = vmul.f32 -1.442695, %v11874_v16  ;;  %v8596_v18 = vmul.f32 -1.442695, %v11890_v19  ;;  %vm17377_vm3 = vmmov %vm17367_vm5 }
  0xa8   : > { %v4085_v7 = vpack.c.bf16 %v3957_v62, %v3957_v62  ;;  %v2203_v9 = vsel %vm12015_vm7, %v10778_v37, %v2199_v54  ;;  %vm1975_vm11 = vweird.f32 %v11961_v31  ;;  %v1979_v61 = vand.u32 2147483647, %v11961_v31 }
  0xa9   : > { %4247 = vst.msk [vmem:[#allocation2 + $0x1c0] sm:$0xf] %vm17372_vm10, %v4084_v40  ;;  %v2208_v41 = vsel %vm2205_vm9, %v2207_v44, %v2203_v9  ;;  %v4004_v4 = vpack.c.bf16 %v3876_v17, %v3876_v17  ;;  %v1971_v8 = vmul.f32 %v10782_v0, %v11961_v31  ;;  %v1981_v27 = vand.u32 2147483648, %v11961_v31 }
  0xaa   : > { %4248 = vst.msk [vmem:[#allocation2 + $0x1c4] sm:$0xf] %vm17373_vm12, %v4085_v7  ;;  %v3877_v42 = vmul.f32 %v2208_v41, %v11802_v43  ;;  %v1994_v30 = vand.u32 2147483647, %v11963_v3  ;;  %v1996_v37 = vand.u32 2147483648, %v11963_v3  ;;  %v12040_v45 = vadd.f32 1.0, %v11925_v50 }
  0xab   : > { %4167 = vst.msk [vmem:[#allocation2 + $0x80] sm:$0xf] %vm17374_vm13, %v4004_v4  ;;  %v12042_v47 = vadd.f32 1.0, %v10780_v12  ;;  %10785 = vpow2.f32 %v8595_v32  ;;  %v1972_v48 = vsub.f32 1.0, %v1971_v8  ;;  %vm1976_vm14 = vweird.f32 %v10782_v0  ;;  %v9740_v4 = vld [vmem:[#allocation2 + $0x10] sm:$0xff] }
  0xac   : > { %v4005_v5 = vpack.c.bf16 %v3877_v42, %v3877_v42  ;;  %10787 = vpow2.f32 %v8596_v18  ;;  %v10784_v43 = vpop.eup %10783  ;;  %vm12044_vm15 = vcmp.eq.f32.partialorder %v1979_v61, 8.507059e+37  ;;  %vm1990_vm2 = vweird.f32 %v11963_v3  ;;  %vm12060_vm1 = vmor %vm1975_vm11, %vm1976_vm14 }
  0xad   : > { %v9806_v49 = vld [vmem:[#allocation2 + $0x40] sm:$0xff]  ;;  %10789 = vrcp.f32 %v12040_v45  ;;  %v3421_v50 = vand.u32 2147483648, %v12040_v45  ;;  %v1973_v33 = vmul.f32 %v10782_v0, %v1972_v48  ;;  %v1986_v11 = vmul.f32 %v10784_v43, %v11963_v3 }
  0xae   : > { %4168 = vst.msk [vmem:[#allocation2 + $0x84] sm:$0xf] %vm17377_vm3, %v4005_v5  ;;  %v3419_v52 = vand.u32 2147483647, %v12040_v45  ;;  %10791 = vrcp.f32 %v12042_v47  ;;  %vm17378_vm0 = vcmask 523264   ;;  %v1982_v23 = vor.u32 1.1754944e-38, %v1981_v27 }
  0xaf   : > { %8985 = vmatmul.msk.bf16.vlgmr.msra.gmra.mxu0 %vm17378_vm0, %v9806_v49  ;;  %vm12064_vm4 = vcmp.eq.f32.partialorder %v1994_v30, 8.507059e+37  ;;  %v1997_v36 = vor.u32 1.1754944e-38, %v1996_v37  ;;  %v3434_v57 = vand.u32 2147483647, %v12042_v47  ;;  %v1974_v34 = vadd.f32 %v10782_v0, %v1973_v33  ;;  %vm17385_vm9 = vmmov %vm17378_vm0 }
  0xb0   : > { %v1987_v38 = vsub.f32 1.0, %v1986_v11  ;;  %vm1991_vm5 = vweird.f32 %v10784_v43  ;;  %v9952_v35 = vunpack.c.l.bf16 %v10519_v46  ;;  %vm3415_vm6 = vweird.f32 %v12040_v45  ;;  %vm17390_vm14 = vmmov %vm17378_vm0 }
  0xb1   : > { %v10786_v63 = vpop.eup %10785  ;;  %v9854_v31 = vld [vmem:[#allocation2 + $0x1c0] sm:$0xff]  ;;  %v12073_v1 = vor.u32 1.1754944e-38, %v3421_v50  ;;  %vm3430_vm7 = vweird.f32 %v12042_v47  ;;  %v9953_v39 = vunpack.c.h.bf16 %v10519_v46  ;;  %v1978_v10 = vsel %vm12060_vm1, %v10782_v0, %v1974_v34  ;;  %vm12091_vm10 = vmor %vm1990_vm2, %vm1991_vm5 }
  0xb2   : > { %v10788_v22 = vpop.eup %10787  ;;  %v1988_v12 = vmul.f32 %v10784_v43, %v1987_v38  ;;  %vm12078_vm8 = vcmp.eq.f32.partialorder %v3419_v52, 8.507059e+37  ;;  %v3436_v55 = vand.u32 2147483648, %v12042_v47  ;;  %v12083_v15 = vadd.f32 1.0, %v10786_v63  ;;  %9033 = vmatmul.msk.bf16.vlgmr.msra.gmra.mxu3 %vm17385_vm9, %v9854_v31  ;;  %vm17392_vm2 = vmmov %vm17377_vm3 }
  0xb3   : > { %v10790_v53 = vpop.eup %10789  ;;  %v1983_v44 = vsel %vm12044_vm15, %v1982_v23, %v1978_v10  ;;  %vm12095_vm11 = vcmp.eq.f32.partialorder %v3434_v57, 8.507059e+37  ;;  %v12099_v54 = vadd.f32 1.0, %v10788_v22  ;;  %v10144_v40 = vunpack.c.l.bf16 %v12070_v21  ;;  %10652 = vmatpush.bf16.msra.mxu3 %v11661_v2  ;;  %vm17391_vm15 = vmmov %vm17378_vm0  ;;  %v10527_v10 = vld [vmem:[%s11703_s17 + $0x50] sm:$0xff]  }
  0xb4   : > { %v10145_v17 = vunpack.c.h.bf16 %v12070_v21  ;;  %v10792_v32 = vpop.eup %10791  ;;  %v1989_v7 = vadd.f32 %v10784_v43, %v1988_v12  ;;  %v3862_v9 = vmul.f32 %v1983_v44, %v11820_v51  ;;  %v3411_v3 = vmul.f32 %v10790_v53, %v12040_v45  ;;  %9323 = vmatmul.msk.bf16.gmra.mxu1 %vm17391_vm15, %v9740_v4  ;;  %vm17397_vm5 = vmmov %vm17392_vm2 }
  0xb5   : > { %v1172_v18 = vmul.f32 %v11755_v24, %v9952_v35  ;;  %v9874_v0 = vld [vmem:[#allocation2 + $0x80] sm:$0xff]  ;;  %vm3416_vm12 = vweird.f32 %v10790_v53  ;;  %v3426_v41 = vmul.f32 %v10792_v32, %v12042_v47  ;;  %10793 = vrcp.f32 %v12083_v15  ;;  %vm17400_vm9 = vmmov %vm17392_vm2 }
  0xb6   : > { %v1173_v61 = vmul.f32 %v11755_v24, %v9953_v39  ;;  %v1993_v42 = vsel %vm12091_vm10, %v10784_v43, %v1989_v7  ;;  %v3990_v8 = vpack.c.bf16 %v3862_v9, %v3862_v9  ;;  %v3412_v51 = vsub.f32 1.0, %v3411_v3  ;;  %9665 = vmatmul.msk.bf16.vlgmr.msra.gmra.mxu2 %vm17390_vm14, %v9874_v0  ;;  %vm12125_vm0 = vmor %vm3415_vm6, %vm3416_vm12 }
  0xb7   : > { %vm3431_vm13 = vweird.f32 %v10792_v32  ;;  %v1998_v2 = vsel %vm12064_vm4, %v1997_v36, %v1993_v42  ;;  %v3427_v27 = vsub.f32 1.0, %v3426_v41  ;;  %v2221_v30 = vand.u32 2147483648, %v12083_v15  ;;  %10653 = vmatpush.bf16.msra.mxu3 %v11684_v6  ;;  %vm17406_vm15 = vmmov %vm17392_vm2 }
  0xb8   : > { %10795 = vrcp.f32 %v12099_v54  ;;  %v3863_v37 = vmul.f32 %v1998_v2, %v11833_v56  ;;  %4153 = vst.msk [vmem:[#allocation2 + $0x48] sm:$0xf] %vm17392_vm2, %v3990_v8  ;;  %v3413_v5 = vmul.f32 %v10790_v53, %v3412_v51  ;;  %v3437_v48 = vor.u32 1.1754944e-38, %v3436_v55  ;;  %vm12134_vm4 = vmor %vm3430_vm7, %vm3431_vm13 }
  0xb9   : > { %vm2215_vm3 = vweird.f32 %v12083_v15  ;;  %v3428_v49 = vmul.f32 %v10792_v32, %v3427_v27  ;;  %v2219_v28 = vand.u32 2147483647, %v12083_v15  ;;  %v2222_v50 = vor.u32 1.1754944e-38, %v2221_v30 }
  0xba   : > { %vm2230_vm1 = vweird.f32 %v12099_v54  ;;  %v3991_v56 = vpack.c.bf16 %v3863_v37, %v3863_v37  ;;  %v3414_v46 = vadd.f32 %v10790_v53, %v3413_v5  ;;  %v12139_v45 = vadd.f32 %v11766_v26, %v1172_v18 }
  0xbb   : > { %v12142_v33 = vadd.f32 %v11766_v26, %v1173_v61  ;;  %v10794_v11 = vpop.eup %10793  ;;  %v3429_v52 = vadd.f32 %v10792_v32, %v3428_v49  ;;  %v2234_v29 = vand.u32 2147483647, %v12099_v54  ;;  %v2236_v23 = vand.u32 2147483648, %v12099_v54  ;;  %10654 = vmatpush.bf16.msra.mxu3 %v11721_v13 }
  0xbc   : > { %v1268_v20 = vmul.f32 %v11755_v24, %v10144_v40  ;;  %4154 = vst.msk [vmem:[#allocation2 + $0x4c] sm:$0xf] %vm17397_vm5, %v3991_v56  ;;  %v3418_v47 = vsel %vm12125_vm0, %v10790_v53, %v3414_v46  ;;  %v2211_v36 = vmul.f32 %v10794_v11, %v12083_v15  ;;  %vm2216_vm6 = vweird.f32 %v10794_v11  ;;  %v10520_v40 = vld [vmem:[%s11703_s17 + $0x18] sm:$0xff]  }
  0xbd   : > { %v8581_v57 = vmul.f32 -1.442695, %v12139_v45  ;;  %v3423_v38 = vsel %vm12078_vm8, %v12073_v1, %v3418_v47  ;;  %v3433_v35 = vsel %vm12134_vm4, %v10792_v32, %v3429_v52  ;;  %v8582_v21 = vmul.f32 -1.442695, %v12142_v33  ;;  %vm12173_vm8 = vmor %vm2215_vm3, %vm2216_vm6 }
  0xbe   : > { %v10796_v34 = vpop.eup %10795  ;;  %v1269_v63 = vmul.f32 %v11755_v24, %v10145_v17  ;;  %v3438_v31 = vsel %vm12095_vm11, %v3437_v48, %v3433_v35  ;;  %v3958_v39 = vmul.f32 %v3423_v38, %v11839_v58  ;;  %v2212_v22 = vsub.f32 1.0, %v2211_v36  ;;  %vm17403_vm11 = vmmov %vm17392_vm2  ;;  %v9741_v38 = vld [vmem:[#allocation2 + $0x18] sm:$0xff] }
  0xbf   : > { %v2226_v13 = vmul.f32 %v10796_v34, %v12099_v54  ;;  %v3959_v12 = vmul.f32 %v3438_v31, %v11844_v60  ;;  %vm2231_vm7 = vweird.f32 %v10796_v34  ;;  %10797 = vpow2.f32 %v8581_v57  ;;  %10655 = vmatpush.bf16.msra.mxu3 %v11763_v25  ;;  %vm17407_vm2 = vmmov %vm17390_vm14 }
  0xc0   : > { %v12167_v1 = vadd.f32 %v11766_v26, %v1268_v20  ;;  %v4086_v14 = vpack.c.bf16 %v3958_v39, %v3958_v39  ;;  %v2213_v55 = vmul.f32 %v10794_v11, %v2212_v22  ;;  %10799 = vpow2.f32 %v8582_v21  ;;  %vm12191_vm12 = vmor %vm2230_vm1, %vm2231_vm7 }
  0xc1   : > { %v2227_v53 = vsub.f32 1.0, %v2226_v13  ;;  %v4087_v44 = vpack.c.bf16 %v3959_v12, %v3959_v12  ;;  %v12178_v60 = vadd.f32 %v11766_v26, %v1269_v63  ;;  %v9984_v59 = vunpack.c.l.bf16 %v10527_v10  ;;  %vm17408_vm3 = vmmov %vm17397_vm5 }
  0xc2   : > { %v8677_v62 = vmul.f32 -1.442695, %v12167_v1  ;;  %4249 = vst.msk [vmem:[#allocation2 + $0x1c8] sm:$0xf] %vm17400_vm9, %v4086_v14  ;;  %v2214_v17 = vadd.f32 %v10794_v11, %v2213_v55  ;;  %vm12183_vm10 = vcmp.eq.f32.partialorder %v2219_v28, 8.507059e+37  ;;  %v9985_v15 = vunpack.c.h.bf16 %v10527_v10 }
  0xc3   : > { %v2228_v32 = vmul.f32 %v10796_v34, %v2227_v53  ;;  %v9807_v7 = vld [vmem:[#allocation2 + $0x48] sm:$0xff]  ;;  %4250 = vst.msk [vmem:[#allocation2 + $0x1cc] sm:$0xf] %vm17403_vm11, %v4087_v44  ;;  %v2237_v3 = vor.u32 1.1754944e-38, %v2236_v23  ;;  %v8678_v18 = vmul.f32 -1.442695, %v12178_v60  ;;  %v1188_v0 = vmul.f32 %v11755_v24, %v9984_v59 }
  0xc4   : > { %10801 = vpow2.f32 %v8677_v62  ;;  %v2218_v41 = vsel %vm12173_vm8, %v10794_v11, %v2214_v17  ;;  %vm2235_vm13 = vcmp.eq.f32.partialorder %v2234_v29, 8.507059e+37  ;;  %v9956_v61 = vunpack.c.l.bf16 %v10520_v40  ;;  %8986 = vmatmul.msk.bf16.gmra.mxu0 %vm17390_vm14, %v9807_v7  ;;  %v12261_v62 = vld [vmem:[%s11703_s17 + $0x198] sm:$0xff]   ;;  %vm17419_vm14 = vmmov %vm17407_vm2 }
  0xc5   : > { %v2229_v4 = vadd.f32 %v10796_v34, %v2228_v32  ;;  %v10798_v42 = vpop.eup %10797  ;;  %v2223_v54 = vsel %vm12183_vm10, %v2222_v50, %v2218_v41  ;;  %10803 = vpow2.f32 %v8678_v18  ;;  %v1189_v8 = vmul.f32 %v11755_v24, %v9985_v15 }
  0xc6   : > { %v12204_v51 = vadd.f32 %v11766_v26, %v1188_v0  ;;  %v10800_v2 = vpop.eup %10799  ;;  %v3878_v30 = vmul.f32 %v2223_v54, %v11874_v16  ;;  %v12209_v37 = vadd.f32 1.0, %v10798_v42  ;;  %v9957_v49 = vunpack.c.h.bf16 %v10520_v40 }
  0xc7   : > { %v2233_v27 = vsel %vm12191_vm12, %v10796_v34, %v2229_v4  ;;  %v12211_v48 = vadd.f32 1.0, %v10800_v2  ;;  %v1174_v56 = vmul.f32 %v11755_v24, %v9956_v61  ;;  %v12221_v11 = vadd.f32 %v11766_v26, %v1189_v8  ;;  %v10528_v61 = vld [vmem:[%s11703_s17 + $0x58] sm:$0xff]  }
  0xc8   : > { %v2238_v5 = vsel %vm2235_vm13, %v2237_v3, %v2233_v27  ;;  %v8597_v43 = vmul.f32 -1.442695, %v12204_v51  ;;  %v4006_v50 = vpack.c.bf16 %v3878_v30, %v3878_v30  ;;  %10805 = vrcp.f32 %v12209_v37 }
  0xc9   : > { %v3879_v28 = vmul.f32 %v2238_v5, %v11890_v19  ;;  %v2009_v6 = vand.u32 2147483647, %v12209_v37  ;;  %v2011_v16 = vand.u32 2147483648, %v12209_v37  ;;  %10807 = vrcp.f32 %v12211_v48 }
  0xca   : > { %v10802_v46 = vpop.eup %10801  ;;  %v9855_v52 = vld [vmem:[#allocation2 + $0x1c8] sm:$0xff]  ;;  %4169 = vst.msk [vmem:[#allocation2 + $0x88] sm:$0xf] %vm17406_vm15, %v4006_v50  ;;  %v2024_v19 = vand.u32 2147483647, %v12211_v48  ;;  %10809 = vpow2.f32 %v8597_v43  ;;  %v2026_v20 = vand.u32 2147483648, %v12211_v48  ;;  %v1175_v36 = vmul.f32 %v11755_v24, %v9957_v49 }
  0xcb   : > { %v4007_v29 = vpack.c.bf16 %v3879_v28, %v3879_v28  ;;  %v10804_v23 = vpop.eup %10803  ;;  %v12226_v47 = vadd.f32 1.0, %v10802_v46  ;;  %9034 = vmatmul.msk.bf16.gmra.mxu3 %vm17407_vm2, %v9855_v52  ;;  %vm2005_vm0 = vweird.f32 %v12209_v37  ;;  %vm2020_vm1 = vweird.f32 %v12211_v48 }
  0xcc   : > { %v12233_v57 = vadd.f32 1.0, %v10804_v23  ;;  %v12236_v34 = vadd.f32 %v11766_v26, %v1174_v56  ;;  %vm12238_vm4 = vcmp.eq.f32.partialorder %v2009_v6, 8.507059e+37  ;;  %v2012_v35 = vor.u32 1.1754944e-38, %v2011_v16 }
  0xcd   : > { %4170 = vst.msk [vmem:[#allocation2 + $0x8c] sm:$0xf] %vm17408_vm3, %v4007_v29  ;;  %10811 = vrcp.f32 %v12226_v47  ;;  %v3451_v21 = vand.u32 2147483648, %v12226_v47  ;;  %v8598_v63 = vmul.f32 -1.442695, %v12221_v11  ;;  %vm12245_vm5 = vcmp.eq.f32.partialorder %v2024_v19, 8.507059e+37 }
  0xce   : > { %v10806_v31 = vpop.eup %10805  ;;  %v3449_v22 = vand.u32 2147483647, %v12226_v47  ;;  %10813 = vrcp.f32 %v12233_v57  ;;  %v3466_v13 = vand.u32 2147483648, %v12233_v57  ;;  %v2027_v14 = vor.u32 1.1754944e-38, %v2026_v20 }
  0xcf   : > { %v10808_v10 = vpop.eup %10807  ;;  %v2001_v12 = vmul.f32 %v10806_v31, %v12209_v37  ;;  %v3464_v55 = vand.u32 2147483647, %v12233_v57  ;;  %v12255_v53 = vadd.f32 %v11766_v26, %v1175_v36  ;;  %vm2006_vm6 = vweird.f32 %v10806_v31  ;;  %v12413_v36 = vld [vmem:[%s11731_s23] ss:$0 sm:$0xff] }
  0xd0   : > { %v10810_v44 = vpop.eup %10809  ;;  %v2016_v58 = vmul.f32 %v10808_v10, %v12211_v48  ;;  %vm3445_vm7 = vweird.f32 %v12226_v47  ;;  %vm3460_vm8 = vweird.f32 %v12233_v57  ;;  %v12263_v40 = vor.u32 1.1754944e-38, %v3451_v21  ;;  %vm12284_vm12 = vmor %vm2005_vm0, %vm2006_vm6 }
  0xd1   : > { %v2002_v59 = vsub.f32 1.0, %v2001_v12  ;;  %10815 = vpow2.f32 %v8598_v63  ;;  %v12265_v17 = vadd.f32 1.0, %v10810_v44  ;;  %vm2021_vm9 = vweird.f32 %v10808_v10 }
  0xd2   : > { %v2017_v25 = vsub.f32 1.0, %v2016_v58  ;;  %vm12267_vm10 = vcmp.eq.f32.partialorder %v3449_v22, 8.507059e+37  ;;  %v12271_v32 = vor.u32 1.1754944e-38, %v3466_v13  ;;  %v8583_v15 = vmul.f32 -1.442695, %v12236_v34  ;;  %vm12295_vm15 = vmor %vm2020_vm1, %vm2021_vm9 }
  0xd3   : > { %v10812_v7 = vpop.eup %10811  ;;  %v2003_v3 = vmul.f32 %v10806_v31, %v2002_v59  ;;  %vm12274_vm11 = vcmp.eq.f32.partialorder %v3464_v55, 8.507059e+37  ;;  %10817 = vrcp.f32 %v12265_v17  ;;  %v8584_v0 = vmul.f32 -1.442695, %v12255_v53 }
  0xd4   : > { %v9875_v9 = vld [vmem:[#allocation2 + $0x88] sm:$0xff]  ;;  %v10148_v41 = vunpack.c.l.bf16 %v12261_v62  ;;  %v10814_v4 = vpop.eup %10813  ;;  %v2018_v42 = vmul.f32 %v10808_v10, %v2017_v25  ;;  %v3441_v54 = vmul.f32 %v10812_v7, %v12226_v47  ;;  %vm2245_vm13 = vweird.f32 %v12265_v17 }
  0xd5   : > { %v10149_v8 = vunpack.c.h.bf16 %v12261_v62  ;;  %9666 = vmatmul.msk.bf16.gmra.mxu2 %vm17419_vm14, %v9875_v9  ;;  %v2004_v2 = vadd.f32 %v10806_v31, %v2003_v3  ;;  %vm3446_vm2 = vweird.f32 %v10812_v7  ;;  %v3456_v30 = vmul.f32 %v10814_v4, %v12233_v57 }
  0xd6   : > { %v2249_v37 = vand.u32 2147483647, %v12265_v17  ;;  %v2019_v5 = vadd.f32 %v10808_v10, %v2018_v42  ;;  %v3442_v43 = vsub.f32 1.0, %v3441_v54  ;;  %v2251_v49 = vand.u32 2147483648, %v12265_v17  ;;  %vm12316_vm0 = vmor %vm3445_vm7, %vm3446_vm2 }
  0xd7   : > { %10819 = vpow2.f32 %v8583_v15  ;;  %v10816_v28 = vpop.eup %10815  ;;  %v2008_v50 = vsel %vm12284_vm12, %v10806_v31, %v2004_v2  ;;  %v3457_v56 = vsub.f32 1.0, %v3456_v30  ;;  %vm3461_vm3 = vweird.f32 %v10814_v4  ;;  %v12390_v30 = vld [vmem:[%s11737_s12] ss:$0 sm:$0xff] }
  0xd8   : > { %10821 = vpow2.f32 %v8584_v0  ;;  %v2013_v48 = vsel %vm12238_vm4, %v2012_v35, %v2008_v50  ;;  %v2023_v46 = vsel %vm12295_vm15, %v10808_v10, %v2019_v5  ;;  %v3443_v6 = vmul.f32 %v10812_v7, %v3442_v43  ;;  %vm12328_vm4 = vmor %vm3460_vm8, %vm3461_vm3 }
  0xd9   : > { %v12308_v16 = vadd.f32 1.0, %v10816_v28  ;;  %v10818_v52 = vpop.eup %10817  ;;  %v2028_v29 = vsel %vm12245_vm5, %v2027_v14, %v2023_v46  ;;  %v3864_v19 = vmul.f32 %v2013_v48, %v12139_v45  ;;  %v3458_v20 = vmul.f32 %v10814_v4, %v3457_v56  ;;  %vm17428_vm5 = vmmov %vm17419_vm14 }
  0xda   : > { %vm12320_vm1 = vcmp.eq.f32.partialorder %v2249_v37, 8.507059e+37  ;;  %v3865_v35 = vmul.f32 %v2028_v29, %v12142_v33  ;;  %v3444_v21 = vadd.f32 %v10812_v7, %v3443_v6  ;;  %v2241_v47 = vmul.f32 %v10818_v52, %v12265_v17  ;;  %9324 = vmatmul.msk.bf16.gmra.mxu1 %vm17428_vm5, %v9741_v38 }
  0xdb   : > { %v2252_v63 = vor.u32 1.1754944e-38, %v2251_v49  ;;  %v3992_v31 = vpack.c.bf16 %v3864_v19, %v3864_v19  ;;  %v3459_v39 = vadd.f32 %v10814_v4, %v3458_v20  ;;  %10823 = vrcp.f32 %v12308_v16 }
  0xdc   : > { %v1270_v22 = vmul.f32 %v11755_v24, %v10148_v41  ;;  %v3993_v13 = vpack.c.bf16 %v3865_v35, %v3865_v35  ;;  %v3448_v57 = vsel %vm12316_vm0, %v10812_v7, %v3444_v21  ;;  %v2242_v10 = vsub.f32 1.0, %v2241_v47 }
  0xdd   : > { %v10820_v33 = vpop.eup %10819  ;;  %vm2246_vm6 = vweird.f32 %v10818_v52  ;;  %vm17429_vm7 = vcmask 519168   ;;  %v3453_v14 = vsel %vm12267_vm10, %v12263_v40, %v3448_v57  ;;  %v3463_v55 = vsel %vm12328_vm4, %v10814_v4, %v3459_v39 }
  0xde   : > { %v10822_v12 = vpop.eup %10821  ;;  %4155 = vst.msk [vmem:[#allocation2 + $0x50] sm:$0xf] %vm17429_vm7, %v3992_v31  ;;  %v2264_v44 = vand.u32 2147483647, %v12308_v16  ;;  %v12345_v58 = vadd.f32 1.0, %v10820_v33  ;;  %vm17430_vm8 = vmmov %vm17429_vm7  ;;  %v3468_v62 = vsel %vm12274_vm11, %v12271_v32, %v3463_v55  ;;  %v3960_v59 = vmul.f32 %v3453_v14, %v12167_v1 }
  0xdf   : > { %4156 = vst.msk [vmem:[#allocation2 + $0x54] sm:$0xf] %vm17430_vm8, %v3993_v13  ;;  %v2243_v25 = vmul.f32 %v10818_v52, %v2242_v10  ;;  %v2266_v15 = vand.u32 2147483648, %v12308_v16  ;;  %v3961_v40 = vmul.f32 %v3468_v62, %v12178_v60  ;;  %vm12356_vm9 = vmor %vm2245_vm13, %vm2246_vm6  ;;  %v12360_v7 = vadd.f32 1.0, %v10822_v12  ;;  %v12518_v10 = vld [vmem:[%s11703_s17 + $0x60] sm:$0xff]  }
  0xe0   : > { %10825 = vrcp.f32 %v12345_v58  ;;  %v1271_v32 = vmul.f32 %v11755_v24, %v10149_v8  ;;  %v4088_v9 = vpack.c.bf16 %v3960_v59, %v3960_v59  ;;  %vm2260_vm10 = vweird.f32 %v12308_v16  ;;  %vm17435_vm12 = vmmov %vm17429_vm7 }
  0xe1   : > { %v2244_v1 = vadd.f32 %v10818_v52, %v2243_v25  ;;  %v2039_v3 = vand.u32 2147483647, %v12345_v58  ;;  %v10824_v60 = vpop.eup %10823  ;;  %v4089_v18 = vpack.c.bf16 %v3961_v40, %v3961_v40  ;;  %vm12366_vm11 = vcmp.eq.f32.partialorder %v2264_v44, 8.507059e+37  ;;  %vm17436_vm14 = vmmov %vm17429_vm7 }
  0xe2   : > { %v2041_v0 = vand.u32 2147483648, %v12345_v58  ;;  %10827 = vrcp.f32 %v12360_v7  ;;  %4251 = vst.msk [vmem:[#allocation2 + $0x1d0] sm:$0xf] %vm17435_vm12, %v4088_v9  ;;  %v2256_v41 = vmul.f32 %v10824_v60, %v12308_v16  ;;  %v2267_v4 = vor.u32 1.1754944e-38, %v2266_v15  ;;  %v10569_v15 = vld [vmem:[%s11703_s17 + $0x1a0] sm:$0xff]  }
  0xe3   : > { %v2248_v24 = vsel %vm12356_vm9, %v10818_v52, %v2244_v1  ;;  %vm2035_vm13 = vweird.f32 %v12345_v58  ;;  %4252 = vst.msk [vmem:[#allocation2 + $0x1d4] sm:$0xf] %vm17436_vm14, %v4089_v18  ;;  %vm2261_vm15 = vweird.f32 %v10824_v60  ;;  %vm2050_vm2 = vweird.f32 %v12360_v7  ;;  %v10521_v52 = vld [vmem:[%s11703_s17 + $0x20] sm:$0xff]  }
  0xe4   : > { %v2253_v42 = vsel %vm12320_vm1, %v2252_v63, %v2248_v24  ;;  %v12381_v54 = vor.u32 1.1754944e-38, %v2041_v0  ;;  %v2257_v8 = vsub.f32 1.0, %v2256_v41  ;;  %vm12385_vm3 = vcmp.eq.f32.partialorder %v2039_v3, 8.507059e+37  ;;  %vm17439_vm1 = vmmov %vm17428_vm5 }
  0xe5   : > { %v3880_v2 = vmul.f32 %v2253_v42, %v12204_v51  ;;  %v12393_v37 = vadd.f32 %v12390_v30, %v1270_v22  ;;  %v12396_v5 = vadd.f32 %v12390_v30, %v1271_v32  ;;  %v2054_v28 = vand.u32 2147483647, %v12360_v7  ;;  %vm12406_vm4 = vmor %vm2260_vm10, %vm2261_vm15 }
  0xe6   : > { %v10826_v43 = vpop.eup %10825  ;;  %v9808_v49 = vld [vmem:[#allocation2 + $0x50] sm:$0xff]  ;;  %v2056_v50 = vand.u32 2147483648, %v12360_v7  ;;  %v9988_v51 = vunpack.c.l.bf16 %v10528_v61  ;;  %v9989_v56 = vunpack.c.h.bf16 %v10528_v61  ;;  %v2258_v48 = vmul.f32 %v10824_v60, %v2257_v8  ;;  %vm17442_vm5 = vmmov %vm17429_vm7 }
  0xe7   : > { %v4008_v46 = vpack.c.bf16 %v3880_v2, %v3880_v2  ;;  %v2031_v6 = vmul.f32 %v10826_v43, %v12345_v58  ;;  %vm2036_vm0 = vweird.f32 %v10826_v43  ;;  %8987 = vmatmul.msk.bf16.gmra.mxu0 %vm17439_vm1, %v9808_v49  ;;  %v8679_v23 = vmul.f32 -1.442695, %v12393_v37  ;;  %vm17445_vm8 = vmmov %vm17439_vm1 }
  0xe8   : > { %v10828_v29 = vpop.eup %10827  ;;  %v8680_v20 = vmul.f32 -1.442695, %v12396_v5  ;;  %v1190_v38 = vmul.f32 %v12413_v36, %v9988_v51  ;;  %v1191_v35 = vmul.f32 %v12413_v36, %v9989_v56  ;;  %v2259_v21 = vadd.f32 %v10824_v60, %v2258_v48  ;;  %vm12432_vm7 = vmor %vm2035_vm13, %vm2036_vm0 }
  0xe9   : > { %4171 = vst.msk [vmem:[#allocation2 + $0x90] sm:$0xf] %vm17442_vm5, %v4008_v46  ;;  %v2032_v45 = vsub.f32 1.0, %v2031_v6  ;;  %v2046_v16 = vmul.f32 %v10828_v29, %v12360_v7  ;;  %vm2051_vm6 = vweird.f32 %v10828_v29  ;;  %10829 = vpow2.f32 %v8679_v23  ;;  %vm17451_vm12 = vmmov %vm17442_vm5 }
  0xea   : > { %v12420_v47 = vadd.f32 %v12390_v30, %v1190_v38  ;;  %v12423_v63 = vadd.f32 %v12390_v30, %v1191_v35  ;;  %v9960_v31 = vunpack.c.l.bf16 %v10521_v52  ;;  %v9856_v39 = vld [vmem:[#allocation2 + $0x1d0] sm:$0xff]  ;;  %v2263_v22 = vsel %vm12406_vm4, %v10824_v60, %v2259_v21  ;;  %vm12445_vm9 = vmor %vm2050_vm2, %vm2051_vm6 }
  0xeb   : > { %v2033_v33 = vmul.f32 %v10826_v43, %v2032_v45  ;;  %v2047_v13 = vsub.f32 1.0, %v2046_v16  ;;  %10831 = vpow2.f32 %v8680_v20  ;;  %v2268_v57 = vsel %vm12366_vm11, %v2267_v4, %v2263_v22  ;;  %9035 = vmatmul.msk.bf16.gmra.mxu3 %vm17445_vm8, %v9856_v39  ;;  %vm17450_vm11 = vmmov %vm17442_vm5 }
  0xec   : > { %v8599_v12 = vmul.f32 -1.442695, %v12420_v47  ;;  %v8600_v14 = vmul.f32 -1.442695, %v12423_v63  ;;  %v9961_v55 = vunpack.c.h.bf16 %v10521_v52  ;;  %v3881_v44 = vmul.f32 %v2268_v57, %v12221_v11  ;;  %v9742_v52 = vld [vmem:[#allocation2 + $0x20] sm:$0xff]  ;;  %vm17452_vm13 = vmmov %vm17442_vm5 }
  0xed   : > { %v2034_v62 = vadd.f32 %v10826_v43, %v2033_v33  ;;  %v2048_v59 = vmul.f32 %v10828_v29, %v2047_v13  ;;  %v1176_v25 = vmul.f32 %v12413_v36, %v9960_v31  ;;  %vm12449_vm10 = vcmp.eq.f32.partialorder %v2054_v28, 8.507059e+37  ;;  %vm17456_vm0 = vmmov %vm17439_vm1 }
  0xee   : > { %v2057_v26 = vor.u32 1.1754944e-38, %v2056_v50  ;;  %10833 = vpow2.f32 %v8599_v12  ;;  %v1177_v11 = vmul.f32 %v12413_v36, %v9961_v55  ;;  %v4009_v32 = vpack.c.bf16 %v3881_v44, %v3881_v44 }
  0xef   : > { %v2038_v9 = vsel %vm12432_vm7, %v10826_v43, %v2034_v62  ;;  %v2049_v1 = vadd.f32 %v10828_v29, %v2048_v59  ;;  %10835 = vpow2.f32 %v8600_v14  ;;  %v10830_v3 = vpop.eup %10829  ;;  %v12460_v60 = vadd.f32 %v12390_v30, %v1176_v25 }
  0xf0   : > { %v2043_v7 = vsel %vm12385_vm3, %v12381_v54, %v2038_v9  ;;  %v10152_v18 = vunpack.c.l.bf16 %v10569_v15  ;;  %4172 = vst.msk [vmem:[#allocation2 + $0x94] sm:$0xf] %vm17450_vm11, %v4009_v32  ;;  %v12466_v41 = vadd.f32 1.0, %v10830_v3  ;;  %v12469_v4 = vadd.f32 %v12390_v30, %v1177_v11  ;;  %vm17455_vm3 = vmmov %vm17439_vm1 }
  0xf1   : > { %v10832_v17 = vpop.eup %10831  ;;  %v2053_v0 = vsel %vm12445_vm9, %v10828_v29, %v2049_v1  ;;  %v3866_v24 = vmul.f32 %v2043_v7, %v12236_v34  ;;  %v8585_v54 = vmul.f32 -1.442695, %v12460_v60  ;;  %v10153_v27 = vunpack.c.h.bf16 %v10569_v15  ;;  %9325 = vmatmul.msk.bf16.gmra.mxu1 %vm17455_vm3, %v9742_v52 }
  0xf2   : > { %v2058_v61 = vsel %vm12449_vm10, %v2057_v26, %v2053_v0  ;;  %v12473_v42 = vadd.f32 1.0, %v10832_v17  ;;  %10837 = vrcp.f32 %v12466_v41  ;;  %v3479_v34 = vand.u32 2147483647, %v12466_v41 }
  0xf3   : > { %v3867_v8 = vmul.f32 %v2058_v61, %v12255_v53  ;;  %v3994_v2 = vpack.c.bf16 %v3866_v24, %v3866_v24  ;;  %v1272_v49 = vmul.f32 %v12413_v36, %v10152_v18  ;;  %v3481_v51 = vand.u32 2147483648, %v12466_v41  ;;  %v12547_v61 = vld [vmem:[%s11703_s17 + $0x28] sm:$0xff]  }
  0xf4   : > { %v10834_v43 = vpop.eup %10833  ;;  %10839 = vrcp.f32 %v12473_v42  ;;  %v8586_v53 = vmul.f32 -1.442695, %v12469_v4  ;;  %v3494_v48 = vand.u32 2147483647, %v12473_v42  ;;  %v3496_v46 = vand.u32 2147483648, %v12473_v42 }
  0xf5   : > { %v10836_v28 = vpop.eup %10835  ;;  %v3995_v50 = vpack.c.bf16 %v3867_v8, %v3867_v8  ;;  %4157 = vst.msk [vmem:[#allocation2 + $0x58] sm:$0xf] %vm17451_vm12, %v3994_v2  ;;  %v12483_v56 = vadd.f32 1.0, %v10834_v43  ;;  %10841 = vpow2.f32 %v8585_v54  ;;  %vm3475_vm14 = vweird.f32 %v12466_v41  ;;  %vm17465_vm12 = vmmov %vm17456_vm0 }
  0xf6   : > { %v12488_v6 = vadd.f32 1.0, %v10836_v28  ;;  %vm3490_vm15 = vweird.f32 %v12473_v42  ;;  %v1273_v29 = vmul.f32 %v12413_v36, %v10153_v27  ;;  %vm12495_vm2 = vcmp.eq.f32.partialorder %v3479_v34, 8.507059e+37 }
  0xf7   : > { %4158 = vst.msk [vmem:[#allocation2 + $0x5c] sm:$0xf] %vm17452_vm13, %v3995_v50  ;;  %10843 = vrcp.f32 %v12483_v56  ;;  %v9876_v19 = vld [vmem:[#allocation2 + $0x90] sm:$0xff]  ;;  %v2279_v20 = vand.u32 2147483647, %v12483_v56  ;;  %v2281_v38 = vand.u32 2147483648, %v12483_v56  ;;  %v12506_v16 = vadd.f32 %v12390_v30, %v1272_v49 }
  0xf8   : > { %10845 = vrcp.f32 %v12488_v6  ;;  %v10838_v35 = vpop.eup %10837  ;;  %v2294_v21 = vand.u32 2147483647, %v12488_v6  ;;  %v2296_v45 = vand.u32 2147483648, %v12488_v6  ;;  %9667 = vmatmul.msk.bf16.gmra.mxu2 %vm17456_vm0, %v9876_v19  ;;  %v3482_v22 = vor.u32 1.1754944e-38, %v3481_v51 }
  0xf9   : > { %10847 = vpow2.f32 %v8586_v53  ;;  %v3471_v39 = vmul.f32 %v10838_v35, %v12466_v41  ;;  %vm12510_vm1 = vcmp.eq.f32.partialorder %v3494_v48, 8.507059e+37  ;;  %v3497_v13 = vor.u32 1.1754944e-38, %v3496_v46 }
  0xfa   : > { %v10840_v31 = vpop.eup %10839  ;;  %vm3476_vm4 = vweird.f32 %v10838_v35  ;;  %vm2275_vm5 = vweird.f32 %v12483_v56  ;;  %vm2290_vm6 = vweird.f32 %v12488_v6  ;;  %vm12520_vm8 = vcmp.eq.f32.partialorder %v2279_v20, 8.507059e+37 }
  0xfb   : > { %v3486_v57 = vmul.f32 %v10840_v31, %v12473_v42  ;;  %v10842_v12 = vpop.eup %10841  ;;  %v3472_v14 = vsub.f32 1.0, %v3471_v39  ;;  %vm3491_vm7 = vweird.f32 %v10840_v31  ;;  %v2282_v44 = vor.u32 1.1754944e-38, %v2281_v38  ;;  %vm12540_vm10 = vmor %vm3475_vm14, %vm3476_vm4 }
  0xfc   : > { %v8681_v62 = vmul.f32 -1.442695, %v12506_v16  ;;  %vm12525_vm9 = vcmp.eq.f32.partialorder %v2294_v21, 8.507059e+37  ;;  %v2297_v58 = vor.u32 1.1754944e-38, %v2296_v45  ;;  %v12529_v40 = vadd.f32 1.0, %v10842_v12  ;;  %vm12553_vm13 = vmor %vm3490_vm15, %vm3491_vm7 }
  0xfd   : > { %v10844_v59 = vpop.eup %10843  ;;  %v3487_v25 = vsub.f32 1.0, %v3486_v57  ;;  %v12532_v26 = vadd.f32 %v12390_v30, %v1273_v29  ;;  %v3473_v9 = vmul.f32 %v10838_v35, %v3472_v14  ;;  %v9992_v3 = vunpack.c.l.bf16 %v12518_v10 }
  0xfe   : > { %v10846_v11 = vpop.eup %10845  ;;  %v9809_v32 = vld [vmem:[#allocation2 + $0x58] sm:$0xff]  ;;  %v2271_v1 = vmul.f32 %v10844_v59, %v12483_v56  ;;  %v9993_v7 = vunpack.c.h.bf16 %v12518_v10  ;;  %vm2276_vm11 = vweird.f32 %v10844_v59  ;;  %10849 = vrcp.f32 %v12529_v40 }
  0xff   : > { %v10848_v18 = vpop.eup %10847  ;;  %v3488_v0 = vmul.f32 %v10840_v31, %v3487_v25  ;;  %v2286_v24 = vmul.f32 %v10846_v11, %v12488_v6  ;;  %8988 = vmatmul.msk.bf16.gmra.mxu0 %vm17465_vm12, %v9809_v32  ;;  %v3474_v54 = vadd.f32 %v10838_v35, %v3473_v9  ;;  %10851 = vpow2.f32 %v8681_v62  ;;  %vm12571_vm15 = vmor %vm2275_vm5, %vm2276_vm11 }
 0x100   : > { %v2272_v8 = vsub.f32 1.0, %v2271_v1  ;;  %v12557_v2 = vadd.f32 1.0, %v10848_v18  ;;  %vm2291_vm14 = vweird.f32 %v10846_v11  ;;  %v2071_v34 = vand.u32 2147483648, %v12529_v40 }
 0x101   : > { %v3489_v27 = vadd.f32 %v10840_v31, %v3488_v0  ;;  %v2287_v43 = vsub.f32 1.0, %v2286_v24  ;;  %v3478_v49 = vsel %vm12540_vm10, %v10838_v35, %v3474_v54  ;;  %v9964_v42 = vunpack.c.l.bf16 %v12547_v61  ;;  %v10570_v54 = vld [vmem:[%s11703_s17 + $0x1a8] sm:$0xff]  }
 0x102   : > { %v2273_v28 = vmul.f32 %v10844_v59, %v2272_v8  ;;  %10853 = vrcp.f32 %v12557_v2  ;;  %v3483_v50 = vsel %vm12495_vm2, %v3482_v22, %v3478_v49  ;;  %vm2065_vm3 = vweird.f32 %v12529_v40  ;;  %vm12581_vm2 = vmor %vm2290_vm6, %vm2291_vm14 }
 0x103   : > { %v3493_v51 = vsel %vm12553_vm13, %v10840_v31, %v3489_v27  ;;  %v2288_v48 = vmul.f32 %v10846_v11, %v2287_v43  ;;  %v3962_v52 = vmul.f32 %v3483_v50, %v12393_v37  ;;  %v2069_v56 = vand.u32 2147483647, %v12529_v40 }
 0x104   : > { %v3498_v46 = vsel %vm12510_vm1, %v3497_v13, %v3493_v51  ;;  %v2274_v29 = vadd.f32 %v10844_v59, %v2273_v28  ;;  %v10850_v23 = vpop.eup %10849  ;;  %v2072_v35 = vor.u32 1.1754944e-38, %v2071_v34  ;;  %vm2080_vm0 = vweird.f32 %v12557_v2 }
 0x105   : > { %v3963_v20 = vmul.f32 %v3498_v46, %v12396_v5  ;;  %v2289_v38 = vadd.f32 %v10846_v11, %v2288_v48  ;;  %v10852_v21 = vpop.eup %10851  ;;  %v4090_v45 = vpack.c.bf16 %v3962_v52, %v3962_v52  ;;  %v2061_v6 = vmul.f32 %v10850_v23, %v12529_v40 }
 0x106   : > { %v2278_v37 = vsel %vm12571_vm15, %v10844_v59, %v2274_v29  ;;  %v2084_v31 = vand.u32 2147483647, %v12557_v2  ;;  %v2086_v33 = vand.u32 2147483648, %v12557_v2  ;;  %vm17472_vm1 = vcmask 519168  }
 0x107   : > { %v4091_v39 = vpack.c.bf16 %v3963_v20, %v3963_v20  ;;  %v2283_v22 = vsel %vm12520_vm8, %v2282_v44, %v2278_v37  ;;  %v2293_v5 = vsel %vm12581_vm2, %v10846_v11, %v2289_v38  ;;  %4253 = vst.msk [vmem:[#allocation2 + $0x1d8] sm:$0xf] %vm17472_vm1, %v4090_v45  ;;  %v2062_v14 = vsub.f32 1.0, %v2061_v6  ;;  %vm17473_vm5 = vmmov %vm17472_vm1  ;;  %v10530_v37 = vld [vmem:[%s11703_s17 + $0x68] sm:$0xff]  }
 0x108   : > { %v10854_v13 = vpop.eup %10853  ;;  %v2298_v57 = vsel %vm12525_vm9, %v2297_v58, %v2293_v5  ;;  %v3882_v12 = vmul.f32 %v2283_v22, %v12420_v47  ;;  %vm2066_vm4 = vweird.f32 %v10850_v23  ;;  %v8682_v62 = vmul.f32 -1.442695, %v12532_v26  ;;  %vm17476_vm8 = vmmov %vm17472_vm1 }
 0x109   : > { %4254 = vst.msk [vmem:[#allocation2 + $0x1dc] sm:$0xf] %vm17473_vm5, %v4091_v39  ;;  %v3883_v55 = vmul.f32 %v2298_v57, %v12423_v63  ;;  %v2076_v44 = vmul.f32 %v10854_v13, %v12557_v2  ;;  %vm2081_vm6 = vweird.f32 %v10854_v13  ;;  %v2063_v25 = vmul.f32 %v10850_v23, %v2062_v14  ;;  %vm12610_vm7 = vmor %vm2065_vm3, %vm2066_vm4 }
 0x10a   : > { %v4010_v59 = vpack.c.bf16 %v3882_v12, %v3882_v12  ;;  %v12605_v11 = vadd.f32 1.0, %v10852_v21  ;;  %v1192_v15 = vmul.f32 %v12413_v36, %v9992_v3  ;;  %10855 = vpow2.f32 %v8682_v62  ;;  %vm17477_vm10 = vmmov %vm17472_vm1 }
 0x10b   : > { %v4011_v58 = vpack.c.bf16 %v3883_v55, %v3883_v55  ;;  %v2077_v32 = vsub.f32 1.0, %v2076_v44  ;;  %v1193_v63 = vmul.f32 %v12413_v36, %v9993_v7  ;;  %v2064_v9 = vadd.f32 %v10850_v23, %v2063_v25  ;;  %vm12635_vm12 = vmor %vm2080_vm0, %vm2081_vm6 }
 0x10c   : > { %4173 = vst.msk [vmem:[#allocation2 + $0x98] sm:$0xf] %vm17476_vm8, %v4010_v59  ;;  %vm2070_vm9 = vcmp.eq.f32.partialorder %v2069_v56, 8.507059e+37  ;;  %10857 = vrcp.f32 %v12605_v11  ;;  %vm12620_vm11 = vcmp.eq.f32.partialorder %v2084_v31, 8.507059e+37  ;;  %v12625_v3 = vadd.f32 %v12390_v30, %v1192_v15  ;;  %vm17483_vm14 = vmmov %vm17472_vm1  ;;  %v9743_v15 = vld [vmem:[#allocation2 + $0x28] sm:$0xff] }
 0x10d   : > { %4174 = vst.msk [vmem:[#allocation2 + $0x9c] sm:$0xf] %vm17477_vm10, %v4011_v58  ;;  %v2078_v40 = vmul.f32 %v10854_v13, %v2077_v32  ;;  %v12628_v10 = vadd.f32 %v12390_v30, %v1193_v63  ;;  %v2068_v7 = vsel %vm12610_vm7, %v10850_v23, %v2064_v9  ;;  %v2087_v17 = vor.u32 1.1754944e-38, %v2086_v33 }
 0x10e   : > { %v9965_v0 = vunpack.c.h.bf16 %v12547_v61  ;;  %v1178_v24 = vmul.f32 %v12413_v36, %v9964_v42  ;;  %v2073_v41 = vsel %vm2070_vm9, %v2072_v35, %v2068_v7  ;;  %v3509_v27 = vand.u32 2147483647, %v12605_v11 }
 0x10f   : > { %v2079_v8 = vadd.f32 %v10854_v13, %v2078_v40  ;;  %v8601_v43 = vmul.f32 -1.442695, %v12625_v3  ;;  %v3868_v49 = vmul.f32 %v2073_v41, %v12460_v60  ;;  %v3511_v2 = vand.u32 2147483648, %v12605_v11 }
 0x110   : > { %v9857_v34 = vld [vmem:[#allocation2 + $0x1d8] sm:$0xff]  ;;  %v8602_v28 = vmul.f32 -1.442695, %v12628_v10  ;;  %v1179_v50 = vmul.f32 %v12413_v36, %v9965_v0  ;;  %v10856_v51 = vpop.eup %10855  ;;  %v12651_v42 = vadd.f32 %v12390_v30, %v1178_v24  ;;  %v10156_v53 = vunpack.c.l.bf16 %v10570_v54 }
 0x111   : > { %v2083_v61 = vsel %vm12635_vm12, %v10854_v13, %v2079_v8  ;;  %10859 = vpow2.f32 %v8601_v43  ;;  %vm17482_vm13 = vcmask 523264   ;;  %v3996_v46 = vpack.c.bf16 %v3868_v49, %v3868_v49 }
 0x112   : > { %v10858_v48 = vpop.eup %10857  ;;  %9036 = vmatmul.msk.bf16.gmra.mxu3 %vm17482_vm13, %v9857_v34  ;;  %v2088_v60 = vsel %vm12620_vm11, %v2087_v17, %v2083_v61  ;;  %v12656_v52 = vadd.f32 1.0, %v10856_v51  ;;  %10861 = vpow2.f32 %v8602_v28  ;;  %v12661_v56 = vadd.f32 %v12390_v30, %v1179_v50  ;;  %vm17484_vm2 = vmmov %vm17482_vm13 }
 0x113   : > { %v3869_v29 = vmul.f32 %v2088_v60, %v12469_v4  ;;  %v3501_v19 = vmul.f32 %v10858_v48, %v12605_v11  ;;  %v10157_v23 = vunpack.c.h.bf16 %v10570_v54  ;;  %4159 = vst.msk [vmem:[#allocation2 + $0x60] sm:$0xf] %vm17483_vm14, %v3996_v46  ;;  %vm3505_vm15 = vweird.f32 %v12605_v11  ;;  %vm17491_vm7 = vmmov %vm17484_vm2 }
 0x114   : > { %v9877_v20 = vld [vmem:[#allocation2 + $0x98] sm:$0xff]  ;;  %vm3506_vm3 = vweird.f32 %v10858_v48  ;;  %10863 = vrcp.f32 %v12656_v52  ;;  %v3524_v38 = vand.u32 2147483647, %v12656_v52  ;;  %v8587_v4 = vmul.f32 -1.442695, %v12651_v42  ;;  %9326 = vmatmul.msk.bf16.gmra.mxu1 %vm17491_vm7, %v9743_v15  ;;  %vm17494_vm12 = vmmov %vm17484_vm2 }
 0x115   : > { %v3997_v35 = vpack.c.bf16 %v3869_v29, %v3869_v29  ;;  %v3502_v21 = vsub.f32 1.0, %v3501_v19  ;;  %v8588_v45 = vmul.f32 -1.442695, %v12661_v56  ;;  %9668 = vmatmul.msk.bf16.gmra.mxu2 %vm17484_vm2, %v9877_v20  ;;  %vm12671_vm0 = vcmp.eq.f32.partialorder %v3509_v27, 8.507059e+37  ;;  %vm12682_vm4 = vmor %vm3505_vm15, %vm3506_vm3 }
 0x116   : > { %v3526_v31 = vand.u32 2147483648, %v12656_v52  ;;  %v1274_v39 = vmul.f32 %v12413_v36, %v10156_v53  ;;  %v3512_v33 = vor.u32 1.1754944e-38, %v3511_v2  ;;  %10865 = vpow2.f32 %v8587_v4  ;;  %vm17497_vm14 = vmmov %vm17472_vm1 }
 0x117   : > { %v10860_v22 = vpop.eup %10859  ;;  %4160 = vst.msk [vmem:[#allocation2 + $0x64] sm:$0xf] %vm17472_vm1, %v3997_v35  ;;  %v3503_v5 = vmul.f32 %v10858_v48, %v3502_v21  ;;  %v1275_v13 = vmul.f32 %v12413_v36, %v10157_v23  ;;  %10867 = vpow2.f32 %v8588_v45  ;;  %v9996_v55 = vunpack.c.l.bf16 %v10530_v37 }
 0x118   : > { %v10862_v57 = vpop.eup %10861  ;;  %v12686_v14 = vadd.f32 1.0, %v10860_v22  ;;  %v9997_v44 = vunpack.c.h.bf16 %v10530_v37  ;;  %vm3520_vm5 = vweird.f32 %v12656_v52  ;;  %vm12689_vm6 = vcmp.eq.f32.partialorder %v3524_v38, 8.507059e+37 }
 0x119   : > { %v3504_v62 = vadd.f32 %v10858_v48, %v3503_v5  ;;  %v12693_v25 = vadd.f32 1.0, %v10862_v57  ;;  %v3527_v58 = vor.u32 1.1754944e-38, %v3526_v31  ;;  %v12698_v32 = vadd.f32 %v12390_v30, %v1274_v39 }
 0x11a   : > { %v10864_v11 = vpop.eup %10863  ;;  %10869 = vrcp.f32 %v12686_v14  ;;  %v2311_v47 = vand.u32 2147483648, %v12686_v14  ;;  %v2309_v40 = vand.u32 2147483647, %v12686_v14  ;;  %v12709_v7 = vadd.f32 %v12390_v30, %v1275_v13  ;;  %v9744_v13 = vld [vmem:[#allocation2 + $0x30] sm:$0xff] }
 0x11b   : > { %v3508_v63 = vsel %vm12682_vm4, %v10858_v48, %v3504_v62  ;;  %v3516_v9 = vmul.f32 %v10864_v11, %v12656_v52  ;;  %10871 = vrcp.f32 %v12693_v25  ;;  %v1194_v18 = vmul.f32 %v12413_v36, %v9996_v55 }
 0x11c   : > { %v3513_v1 = vsel %vm12671_vm0, %v3512_v33, %v3508_v63  ;;  %v1195_v17 = vmul.f32 %v12413_v36, %v9997_v44  ;;  %v10866_v0 = vpop.eup %10865  ;;  %vm3521_vm8 = vweird.f32 %v10864_v11  ;;  %v2324_v41 = vand.u32 2147483647, %v12693_v25 }
 0x11d   : > { %v3517_v24 = vsub.f32 1.0, %v3516_v9  ;;  %v3964_v54 = vmul.f32 %v3513_v1, %v12506_v16  ;;  %v10868_v8 = vpop.eup %10867  ;;  %vm2305_vm9 = vweird.f32 %v12686_v14  ;;  %v2312_v43 = vor.u32 1.1754944e-38, %v2311_v47  ;;  %vm12729_vm13 = vmor %vm3520_vm5, %vm3521_vm8 }
 0x11e   : > { %v9810_v27 = vld [vmem:[#allocation2 + $0x60] sm:$0xff]  ;;  %v2326_v34 = vand.u32 2147483648, %v12693_v25  ;;  %v12717_v49 = vadd.f32 1.0, %v10866_v0  ;;  %vm12719_vm10 = vcmp.eq.f32.partialorder %v2309_v40, 8.507059e+37  ;;  %vm2320_vm11 = vweird.f32 %v12693_v25  ;;  %vm17508_vm8 = vmmov %vm17497_vm14  ;;  %v10523_v40 = vld [vmem:[%s11703_s17 + $0x30] sm:$0xff]  }
 0x11f   : > { %v3518_v2 = vmul.f32 %v10864_v11, %v3517_v24  ;;  %v4092_v28 = vpack.c.bf16 %v3964_v54, %v3964_v54  ;;  %v8683_v16 = vmul.f32 -1.442695, %v12698_v32  ;;  %8989 = vmatmul.msk.bf16.gmra.mxu0 %vm17494_vm12, %v9810_v27  ;;  %v12733_v53 = vadd.f32 1.0, %v10868_v8 }
 0x120   : > { %v10870_v51 = vpop.eup %10869  ;;  %10873 = vrcp.f32 %v12717_v49  ;;  %v8684_v48 = vmul.f32 -1.442695, %v12709_v7  ;;  %v12738_v60 = vadd.f32 %v12390_v30, %v1194_v18  ;;  %vm12742_vm15 = vcmp.eq.f32.partialorder %v2324_v41, 8.507059e+37 }
 0x121   : > { %v10872_v46 = vpop.eup %10871  ;;  %v3519_v29 = vadd.f32 %v10864_v11, %v3518_v2  ;;  %4255 = vst.msk [vmem:[#allocation2 + $0x1e0] sm:$0xf] %vm17497_vm14, %v4092_v28  ;;  %v2301_v19 = vmul.f32 %v10870_v51, %v12686_v14  ;;  %v2099_v23 = vand.u32 2147483647, %v12717_v49  ;;  %v2327_v38 = vor.u32 1.1754944e-38, %v2326_v34  ;;  %vm17514_vm14 = vmmov %vm17508_vm8 }
 0x122   : > { %v2316_v20 = vmul.f32 %v10872_v46, %v12693_v25  ;;  %v2101_v35 = vand.u32 2147483648, %v12717_v49  ;;  %10875 = vrcp.f32 %v12733_v53  ;;  %vm2306_vm3 = vweird.f32 %v10870_v51 }
 0x123   : > { %v3523_v21 = vsel %vm12729_vm13, %v10864_v11, %v3519_v29  ;;  %v2302_v4 = vsub.f32 1.0, %v2301_v19  ;;  %vm2095_vm2 = vweird.f32 %v12717_v49  ;;  %vm2321_vm0 = vweird.f32 %v10872_v46  ;;  %vm12766_vm4 = vmor %vm2305_vm9, %vm2306_vm3 }
 0x124   : > { %v3528_v45 = vsel %vm12689_vm6, %v3527_v58, %v3523_v21  ;;  %v2317_v37 = vsub.f32 1.0, %v2316_v20  ;;  %v2114_v6 = vand.u32 2147483647, %v12733_v53  ;;  %vm12757_vm1 = vcmp.eq.f32.partialorder %v2099_v23, 8.507059e+37  ;;  %vm12774_vm6 = vmor %vm2320_vm11, %vm2321_vm0 }
 0x125   : > { %v3965_v31 = vmul.f32 %v3528_v45, %v12532_v26  ;;  %v2303_v39 = vmul.f32 %v10870_v51, %v2302_v4  ;;  %10877 = vpow2.f32 %v8683_v16  ;;  %v12762_v5 = vadd.f32 %v12390_v30, %v1195_v17  ;;  %vm17513_vm13 = vmmov %vm17508_vm8 }
 0x126   : > { %v10874_v33 = vpop.eup %10873  ;;  %v2318_v57 = vmul.f32 %v10872_v46, %v2317_v37  ;;  %v2102_v12 = vor.u32 1.1754944e-38, %v2101_v35  ;;  %vm2110_vm5 = vweird.f32 %v12733_v53  ;;  %10879 = vpow2.f32 %v8684_v48 }
 0x127   : > { %v4093_v26 = vpack.c.bf16 %v3965_v31, %v3965_v31  ;;  %v2304_v55 = vadd.f32 %v10870_v51, %v2303_v39  ;;  %v2091_v14 = vmul.f32 %v10874_v33, %v12717_v49  ;;  %v2116_v62 = vand.u32 2147483648, %v12733_v53 }
 0x128   : > { %v10876_v59 = vpop.eup %10875  ;;  %v2319_v15 = vadd.f32 %v10872_v46, %v2318_v57  ;;  %vm12780_vm7 = vcmp.eq.f32.partialorder %v2114_v6, 8.507059e+37  ;;  %v8603_v58 = vmul.f32 -1.442695, %v12738_v60  ;;  %v8604_v47 = vmul.f32 -1.442695, %v12762_v5 }
 0x129   : > { %4256 = vst.msk [vmem:[#allocation2 + $0x1e4] sm:$0xf] %vm17508_vm8, %v4093_v26  ;;  %v2308_v25 = vsel %vm12766_vm4, %v10870_v51, %v2304_v55  ;;  %v2092_v63 = vsub.f32 1.0, %v2091_v14  ;;  %vm2096_vm9 = vweird.f32 %v10874_v33  ;;  %v2106_v9 = vmul.f32 %v10876_v59, %v12733_v53  ;;  %vm17520_vm4 = vmmov %vm17508_vm8 }
 0x12a   : > { %v2313_v1 = vsel %vm12719_vm10, %v2312_v43, %v2308_v25  ;;  %v2323_v18 = vsel %vm12774_vm6, %v10872_v46, %v2319_v15  ;;  %vm2111_vm11 = vweird.f32 %v10876_v59  ;;  %10881 = vpow2.f32 %v8603_v58  ;;  %vm12801_vm12 = vmor %vm2095_vm2, %vm2096_vm9  ;;  %v10571_v15 = vld [vmem:[%s11703_s17 + $0x1b0] sm:$0xff]  }
 0x12b   : > { %v10878_v17 = vpop.eup %10877  ;;  %v2328_v0 = vsel %vm12742_vm15, %v2327_v38, %v2323_v18  ;;  %v3884_v24 = vmul.f32 %v2313_v1, %v12625_v3  ;;  %v2093_v54 = vmul.f32 %v10874_v33, %v2092_v63  ;;  %v2107_v41 = vsub.f32 1.0, %v2106_v9  ;;  %vm12812_vm10 = vmor %vm2110_vm5, %vm2111_vm11 }
 0x12c   : > { %v10880_v8 = vpop.eup %10879  ;;  %v3885_v27 = vmul.f32 %v2328_v0, %v12628_v10  ;;  %v12805_v34 = vadd.f32 1.0, %v10878_v17  ;;  %10883 = vpow2.f32 %v8604_v47  ;;  %v9968_v2 = vunpack.c.l.bf16 %v10523_v40  ;;  %vm17522_vm8 = vmmov %vm17520_vm4 }
 0x12d   : > { %v4012_v28 = vpack.c.bf16 %v3884_v24, %v3884_v24  ;;  %v2094_v50 = vadd.f32 %v10874_v33, %v2093_v54  ;;  %v2108_v16 = vmul.f32 %v10876_v59, %v2107_v41  ;;  %v12807_v51 = vadd.f32 1.0, %v10880_v8 }
 0x12e   : > { %v4013_v3 = vpack.c.bf16 %v3885_v27, %v3885_v27  ;;  %v2117_v49 = vor.u32 1.1754944e-38, %v2116_v62  ;;  %10885 = vrcp.f32 %v12805_v34  ;;  %v3539_v61 = vand.u32 2147483647, %v12805_v34 }
 0x12f   : > { %4175 = vst.msk [vmem:[#allocation2 + $0xa0] sm:$0xf] %vm17513_vm13, %v4012_v28  ;;  %v2098_v48 = vsel %vm12801_vm12, %v10874_v33, %v2094_v50  ;;  %v2109_v46 = vadd.f32 %v10876_v59, %v2108_v16  ;;  %v3541_v29 = vand.u32 2147483648, %v12805_v34  ;;  %10887 = vrcp.f32 %v12807_v51 }
 0x130   : > { %v10882_v53 = vpop.eup %10881  ;;  %v9858_v19 = vld [vmem:[#allocation2 + $0x1e0] sm:$0xff]  ;;  %4176 = vst.msk [vmem:[#allocation2 + $0xa4] sm:$0xf] %vm17514_vm14, %v4013_v3  ;;  %v2103_v52 = vsel %vm12757_vm1, %v2102_v12, %v2098_v48  ;;  %v3554_v23 = vand.u32 2147483647, %v12807_v51  ;;  %v9969_v20 = vunpack.c.h.bf16 %v10523_v40  ;;  %v3556_v21 = vand.u32 2147483648, %v12807_v51 }
 0x131   : > { %v2113_v38 = vsel %vm12812_vm10, %v10876_v59, %v2109_v46  ;;  %v3870_v35 = vmul.f32 %v2103_v52, %v12651_v42  ;;  %v1180_v4 = vmul.f32 %v12413_v36, %v9968_v2  ;;  %vm17515_vm15 = vcmask 523264  }
 0x132   : > { %v10884_v45 = vpop.eup %10883  ;;  %9037 = vmatmul.msk.bf16.gmra.mxu3 %vm17515_vm15, %v9858_v19  ;;  %v2118_v37 = vsel %vm12780_vm7, %v2117_v49, %v2113_v38  ;;  %vm3535_vm3 = vweird.f32 %v12805_v34  ;;  %vm3550_vm2 = vweird.f32 %v12807_v51  ;;  %v12837_v6 = vadd.f32 1.0, %v10882_v53  ;;  %vm17521_vm5 = vmmov %vm17515_vm15  ;;  %v10531_v19 = vld [vmem:[%s11703_s17 + $0x70] sm:$0xff]  }
 0x133   : > { %v3871_v31 = vmul.f32 %v2118_v37, %v12661_v56  ;;  %v3998_v39 = vpack.c.bf16 %v3870_v35, %v3870_v35  ;;  %vm12840_vm0 = vcmp.eq.f32.partialorder %v3539_v61, 8.507059e+37  ;;  %v3542_v22 = vor.u32 1.1754944e-38, %v3541_v29  ;;  %9327 = vmatmul.msk.bf16.gmra.mxu1 %vm17521_vm5, %v9744_v13  ;;  %vm17523_vm11 = vmmov %vm17521_vm5 }
 0x134   : > { %v12844_v33 = vadd.f32 1.0, %v10884_v45  ;;  %v10886_v57 = vpop.eup %10885  ;;  %vm12846_vm1 = vcmp.eq.f32.partialorder %v3554_v23, 8.507059e+37  ;;  %v3557_v26 = vor.u32 1.1754944e-38, %v3556_v21  ;;  %10889 = vrcp.f32 %v12837_v6 }
 0x135   : > { %v2341_v56 = vand.u32 2147483648, %v12837_v6  ;;  %v1181_v55 = vmul.f32 %v12413_v36, %v9969_v20  ;;  %v10888_v44 = vpop.eup %10887  ;;  %v3999_v14 = vpack.c.bf16 %v3871_v31, %v3871_v31  ;;  %4161 = vst.msk [vmem:[#allocation2 + $0x68] sm:$0xf] %vm17520_vm4, %v3998_v39  ;;  %v3531_v62 = vmul.f32 %v10886_v57, %v12805_v34  ;;  %vm17532_vm4 = vmmov %vm17521_vm5 }
 0x136   : > { %v2339_v59 = vand.u32 2147483647, %v12837_v6  ;;  %10891 = vrcp.f32 %v12844_v33  ;;  %vm3536_vm6 = vweird.f32 %v10886_v57  ;;  %v3546_v11 = vmul.f32 %v10888_v44, %v12807_v51  ;;  %vm17537_vm5 = vmmov %vm17522_vm8 }
 0x137   : > { %vm2335_vm7 = vweird.f32 %v12837_v6  ;;  %v12861_v58 = vor.u32 1.1754944e-38, %v2341_v56  ;;  %v9878_v47 = vld [vmem:[#allocation2 + $0xa0] sm:$0xff]  ;;  %4162 = vst.msk [vmem:[#allocation2 + $0x6c] sm:$0xf] %vm17522_vm8, %v3999_v14  ;;  %v3532_v25 = vsub.f32 1.0, %v3531_v62  ;;  %vm3551_vm9 = vweird.f32 %v10888_v44  ;;  %vm12882_vm13 = vmor %vm3535_vm3, %vm3536_vm6 }
 0x138   : > { %v2354_v63 = vand.u32 2147483647, %v12844_v33  ;;  %v12866_v9 = vadd.f32 %v12390_v30, %v1180_v4  ;;  %v3547_v40 = vsub.f32 1.0, %v3546_v11  ;;  %v2356_v1 = vand.u32 2147483648, %v12844_v33  ;;  %9669 = vmatmul.msk.bf16.gmra.mxu2 %vm17523_vm11, %v9878_v47  ;;  %vm12895_vm15 = vmor %vm3550_vm2, %vm3551_vm9 }
 0x139   : > { %v12870_v18 = vadd.f32 %v12390_v30, %v1181_v55  ;;  %v10160_v17 = vunpack.c.l.bf16 %v10571_v15  ;;  %v3533_v0 = vmul.f32 %v10886_v57, %v3532_v25  ;;  %vm12873_vm12 = vcmp.eq.f32.partialorder %v2339_v59, 8.507059e+37  ;;  %vm17538_vm6 = vmmov %vm17537_vm5 }
 0x13a   : > { %vm2350_vm10 = vweird.f32 %v12844_v33  ;;  %v8589_v54 = vmul.f32 -1.442695, %v12866_v9  ;;  %v10161_v41 = vunpack.c.h.bf16 %v10571_v15  ;;  %v10890_v8 = vpop.eup %10889  ;;  %v3548_v43 = vmul.f32 %v10888_v44, %v3547_v40  ;;  %vm17539_vm8 = vmmov %vm17537_vm5 }
 0x13b   : > { %vm12886_vm14 = vcmp.eq.f32.partialorder %v2354_v63, 8.507059e+37  ;;  %v8590_v28 = vmul.f32 -1.442695, %v12870_v18  ;;  %v1276_v50 = vmul.f32 %v12413_v36, %v10160_v17  ;;  %v3534_v3 = vadd.f32 %v10886_v57, %v3533_v0 }
 0x13c   : > { %v10892_v16 = vpop.eup %10891  ;;  %v2331_v10 = vmul.f32 %v10890_v8, %v12837_v6  ;;  %v2357_v49 = vor.u32 1.1754944e-38, %v2356_v1  ;;  %10893 = vpow2.f32 %v8589_v54  ;;  %v3549_v61 = vadd.f32 %v10888_v44, %v3548_v43  ;;  %v12974_v43 = vld [vmem:[%s11703_s17 + $0x1b8] sm:$0xff]  }
 0x13d   : > { %vm2336_vm3 = vweird.f32 %v10890_v8  ;;  %v2346_v48 = vmul.f32 %v10892_v16, %v12844_v33  ;;  %10895 = vpow2.f32 %v8590_v28  ;;  %v3538_v46 = vsel %vm12882_vm13, %v10886_v57, %v3534_v3  ;;  %vm17545_vm13 = vmmov %vm17532_vm4 }
 0x13e   : > { %v2332_v29 = vsub.f32 1.0, %v2331_v10  ;;  %v1277_v53 = vmul.f32 %v12413_v36, %v10161_v41  ;;  %v12905_v51 = vadd.f32 %v12390_v30, %v1276_v50  ;;  %v9811_v52 = vld [vmem:[#allocation2 + $0x68] sm:$0xff]  ;;  %v3543_v23 = vsel %vm12840_vm0, %v3542_v22, %v3538_v46  ;;  %vm12923_vm0 = vmor %vm2335_vm7, %vm2336_vm3  ;;  %v10524_v41 = vld [vmem:[%s11703_s17 + $0x38] sm:$0xff]  }
 0x13f   : > { %v3553_v20 = vsel %vm12895_vm15, %v10888_v44, %v3549_v61  ;;  %v2347_v38 = vsub.f32 1.0, %v2346_v48  ;;  %vm2351_vm2 = vweird.f32 %v10892_v16  ;;  %v3966_v21 = vmul.f32 %v3543_v23, %v12698_v32  ;;  %8990 = vmatmul.msk.bf16.gmra.mxu0 %vm17532_vm4, %v9811_v52  ;;  %v12982_v50 = vld [vmem:[%s11737_s12] ss:$0 sm:$0xff] }
 0x140   : > { %v3558_v35 = vsel %vm12846_vm1, %v3557_v26, %v3553_v20  ;;  %v2333_v4 = vmul.f32 %v10890_v8, %v2332_v29  ;;  %v12916_v45 = vadd.f32 %v12390_v30, %v1277_v53  ;;  %v8685_v42 = vmul.f32 -1.442695, %v12905_v51  ;;  %vm12930_vm1 = vmor %vm2350_vm10, %vm2351_vm2 }
 0x141   : > { %v3967_v37 = vmul.f32 %v3558_v35, %v12709_v7  ;;  %v2348_v39 = vmul.f32 %v10892_v16, %v2347_v38  ;;  %v10000_v22 = vunpack.c.l.bf16 %v10531_v19  ;;  %v4094_v13 = vpack.c.bf16 %v3966_v21, %v3966_v21 }
 0x142   : > { %v10894_v32 = vpop.eup %10893  ;;  %v2334_v57 = vadd.f32 %v10890_v8, %v2333_v4  ;;  %v8686_v7 = vmul.f32 -1.442695, %v12916_v45  ;;  %v10001_v6 = vunpack.c.h.bf16 %v10531_v19  ;;  %10897 = vpow2.f32 %v8685_v42 }
 0x143   : > { %v10896_v26 = vpop.eup %10895  ;;  %v4095_v56 = vpack.c.bf16 %v3967_v37, %v3967_v37  ;;  %v2349_v55 = vadd.f32 %v10892_v16, %v2348_v39  ;;  %v12935_v44 = vadd.f32 1.0, %v10894_v32  ;;  %4257 = vst.msk [vmem:[#allocation2 + $0x1e8] sm:$0xf] %vm17537_vm5, %v4094_v13  ;;  %v1196_v15 = vmul.f32 %v12413_v36, %v10000_v22  ;;  %v13017_v22 = vld [vmem:[%s11731_s23] ss:$0 sm:$0xff] }
 0x144   : > { %v2338_v14 = vsel %vm12923_vm0, %v10890_v8, %v2334_v57  ;;  %v12940_v62 = vadd.f32 1.0, %v10896_v26  ;;  %10899 = vpow2.f32 %v8686_v7  ;;  %v9972_v61 = vunpack.c.l.bf16 %v10524_v41 }
 0x145   : > { %4258 = vst.msk [vmem:[#allocation2 + $0x1ec] sm:$0xf] %vm17538_vm6, %v4095_v56  ;;  %v2343_v33 = vsel %vm12873_vm12, %v12861_v58, %v2338_v14  ;;  %v2353_v59 = vsel %vm12930_vm1, %v10892_v16, %v2349_v55  ;;  %10901 = vrcp.f32 %v12935_v44  ;;  %v2129_v25 = vand.u32 2147483647, %v12935_v44  ;;  %vm17542_vm12 = vmmov %vm17537_vm5 }
 0x146   : > { %v2358_v11 = vsel %vm12886_vm14, %v2357_v49, %v2353_v59  ;;  %v3886_v47 = vmul.f32 %v2343_v33, %v12738_v60  ;;  %v2131_v63 = vand.u32 2147483648, %v12935_v44  ;;  %10903 = vrcp.f32 %v12940_v62 }
 0x147   : > { %v3887_v40 = vmul.f32 %v2358_v11, %v12762_v5  ;;  %v1197_v58 = vmul.f32 %v12413_v36, %v10001_v6  ;;  %v2144_v17 = vand.u32 2147483647, %v12940_v62  ;;  %v2146_v0 = vand.u32 2147483648, %v12940_v62 }
 0x148   : > { %v4014_v1 = vpack.c.bf16 %v3886_v47, %v3886_v47  ;;  %v10898_v24 = vpop.eup %10897  ;;  %vm2125_vm7 = vweird.f32 %v12935_v44  ;;  %v12962_v60 = vadd.f32 %v12390_v30, %v1196_v15  ;;  %vm12966_vm9 = vcmp.eq.f32.partialorder %v2129_v25, 8.507059e+37 }
 0x149   : > { %v4015_v54 = vpack.c.bf16 %v3887_v40, %v3887_v40  ;;  %v2132_v36 = vor.u32 1.1754944e-38, %v2131_v63  ;;  %vm2140_vm11 = vweird.f32 %v12940_v62  ;;  %v12971_v27 = vadd.f32 1.0, %v10898_v24 }
 0x14a   : > { %v10900_v5 = vpop.eup %10899  ;;  %4177 = vst.msk [vmem:[#allocation2 + $0xa8] sm:$0xf] %vm17539_vm8, %v4014_v1  ;;  %v12977_v30 = vor.u32 1.1754944e-38, %v2146_v0  ;;  %v12985_v16 = vadd.f32 %v12982_v50, %v1197_v58  ;;  %v8605_v3 = vmul.f32 -1.442695, %v12962_v60  ;;  %vm12989_vm10 = vcmp.eq.f32.partialorder %v2144_v17, 8.507059e+37 }
 0x14b   : > { %v10902_v2 = vpop.eup %10901  ;;  %4178 = vst.msk [vmem:[#allocation2 + $0xac] sm:$0xf] %vm17542_vm12, %v4015_v54  ;;  %v12979_v28 = vadd.f32 1.0, %v10900_v5  ;;  %10905 = vrcp.f32 %v12971_v27  ;;  %v9973_v48 = vunpack.c.h.bf16 %v10524_v41  ;;  %v3569_v29 = vand.u32 2147483647, %v12971_v27 }
 0x14c   : > { %v9859_v34 = vld [vmem:[#allocation2 + $0x1e8] sm:$0xff]  ;;  %v2121_v10 = vmul.f32 %v10902_v2, %v12935_v44  ;;  %v10904_v46 = vpop.eup %10903  ;;  %v3571_v53 = vand.u32 2147483648, %v12971_v27  ;;  %v10164_v19 = vunpack.c.l.bf16 %v12974_v43  ;;  %vm2126_vm14 = vweird.f32 %v10902_v2 }
 0x14d   : > { %10907 = vrcp.f32 %v12979_v28  ;;  %9038 = vmatmul.msk.bf16.gmra.mxu3 %vm17545_vm13, %v9859_v34  ;;  %v2136_v23 = vmul.f32 %v10904_v46, %v12940_v62  ;;  %v3584_v20 = vand.u32 2147483647, %v12979_v28  ;;  %vm3565_vm15 = vweird.f32 %v12971_v27  ;;  %vm13007_vm4 = vmor %vm2125_vm7, %vm2126_vm14 }
 0x14e   : > { %v2122_v52 = vsub.f32 1.0, %v2121_v10  ;;  %vm3580_vm3 = vweird.f32 %v12979_v28  ;;  %10909 = vpow2.f32 %v8605_v3  ;;  %v10165_v38 = vunpack.c.h.bf16 %v12974_v43  ;;  %vm17554_vm7 = vmmov %vm17545_vm13 }
 0x14f   : > { %v2137_v21 = vsub.f32 1.0, %v2136_v23  ;;  %vm2141_vm2 = vweird.f32 %v10904_v46  ;;  %v8606_v4 = vmul.f32 -1.442695, %v12985_v16  ;;  %vm13011_vm0 = vcmp.eq.f32.partialorder %v3569_v29, 8.507059e+37  ;;  %vm17560_vm13 = vmmov %vm17542_vm12 }
 0x150   : > { %v2123_v35 = vmul.f32 %v10902_v2, %v2122_v52  ;;  %v3572_v39 = vor.u32 1.1754944e-38, %v3571_v53  ;;  %v3586_v42 = vand.u32 2147483648, %v12979_v28  ;;  %v1182_v32 = vmul.f32 %v13017_v22, %v9972_v61  ;;  %vm13029_vm5 = vmor %vm2140_vm11, %vm2141_vm2 }
 0x151   : > { %v1183_v13 = vmul.f32 %v13017_v22, %v9973_v48  ;;  %v10906_v57 = vpop.eup %10905  ;;  %v2138_v6 = vmul.f32 %v10904_v46, %v2137_v21  ;;  %vm13021_vm1 = vcmp.eq.f32.partialorder %v3584_v20, 8.507059e+37  ;;  %10911 = vpow2.f32 %v8606_v4 }
 0x152   : > { %v9879_v12 = vld [vmem:[#allocation2 + $0xa8] sm:$0xff]  ;;  %v2124_v7 = vadd.f32 %v10902_v2, %v2123_v35  ;;  %v1278_v56 = vmul.f32 %v13017_v22, %v10164_v19  ;;  %v3561_v14 = vmul.f32 %v10906_v57, %v12971_v27  ;;  %vm3566_vm6 = vweird.f32 %v10906_v57  ;;  %v9745_v27 = vld [vmem:[#allocation2 + $0x38] sm:$0xff] }
 0x153   : > { %v10908_v55 = vpop.eup %10907  ;;  %v13035_v33 = vadd.f32 %v12982_v50, %v1182_v32  ;;  %v13038_v59 = vadd.f32 %v12982_v50, %v1183_v13  ;;  %9670 = vmatmul.msk.bf16.gmra.mxu2 %vm17554_vm7, %v9879_v12  ;;  %v2139_v11 = vadd.f32 %v10904_v46, %v2138_v6  ;;  %v3587_v5 = vor.u32 1.1754944e-38, %v3586_v42 }
 0x154   : > { %v2128_v15 = vsel %vm13007_vm4, %v10902_v2, %v2124_v7  ;;  %v3576_v62 = vmul.f32 %v10908_v55, %v12979_v28  ;;  %vm3581_vm8 = vweird.f32 %v10908_v55  ;;  %v10910_v47 = vpop.eup %10909  ;;  %v3562_v63 = vsub.f32 1.0, %v3561_v14  ;;  %vm17563_vm4 = vmmov %vm17542_vm12 }
 0x155   : > { %v2133_v25 = vsel %vm12966_vm9, %v2132_v36, %v2128_v15  ;;  %v8591_v40 = vmul.f32 -1.442695, %v13035_v33  ;;  %v8592_v58 = vmul.f32 -1.442695, %v13038_v59  ;;  %v2143_v1 = vsel %vm13029_vm5, %v10904_v46, %v2139_v11  ;;  %vm13060_vm9 = vmor %vm3565_vm15, %vm3566_vm6 }
 0x156   : > { %v3872_v17 = vmul.f32 %v2133_v25, %v12866_v9  ;;  %v3577_v0 = vsub.f32 1.0, %v3576_v62  ;;  %v13051_v24 = vadd.f32 1.0, %v10910_v47  ;;  %v2148_v54 = vsel %vm12989_vm10, %v12977_v30, %v2143_v1  ;;  %vm13068_vm11 = vmor %vm3580_vm3, %vm3581_vm8 }
 0x157   : > { %v3563_v41 = vmul.f32 %v10906_v57, %v3562_v63  ;;  %10913 = vpow2.f32 %v8591_v40  ;;  %v10912_v8 = vpop.eup %10911  ;;  %v3873_v36 = vmul.f32 %v2148_v54, %v12870_v18  ;;  %v1279_v10 = vmul.f32 %v13017_v22, %v10165_v38  ;;  %vm17559_vm10 = vmmov %vm17554_vm7  ;;  %v13134_v40 = vld [vmem:[%s11703_s17 + $0x1c0] sm:$0xff]  }
 0x158   : > { %v4000_v43 = vpack.c.bf16 %v3872_v17, %v3872_v17  ;;  %v3578_v9 = vmul.f32 %v10908_v55, %v3577_v0  ;;  %10915 = vrcp.f32 %v13051_v24  ;;  %v13072_v18 = vadd.f32 1.0, %v10912_v8  ;;  %9328 = vmatmul.msk.bf16.gmra.mxu1 %vm17559_vm10, %v9745_v27  ;;  %vm17569_vm8 = vmmov %vm17559_vm10 }
 0x159   : > { %v3564_v3 = vadd.f32 %v10906_v57, %v3563_v41  ;;  %v2369_v34 = vand.u32 2147483647, %v13051_v24  ;;  %v4001_v49 = vpack.c.bf16 %v3873_v36, %v3873_v36  ;;  %10917 = vpow2.f32 %v8592_v58 }
 0x15a   : > { %4163 = vst.msk [vmem:[#allocation2 + $0x70] sm:$0xf] %vm17542_vm12, %v4000_v43  ;;  %v3579_v61 = vadd.f32 %v10908_v55, %v3578_v9  ;;  %v13078_v48 = vadd.f32 %v12982_v50, %v1278_v56  ;;  %10919 = vrcp.f32 %v13072_v18  ;;  %vm2365_vm14 = vweird.f32 %v13051_v24  ;;  %v10574_v43 = vld [vmem:[%s11703_s17 + $0x1c8] sm:$0xff]  }
 0x15b   : > { %v3568_v28 = vsel %vm13060_vm9, %v10906_v57, %v3564_v3  ;;  %4164 = vst.msk [vmem:[#allocation2 + $0x74] sm:$0xf] %vm17560_vm13, %v4001_v49  ;;  %v2371_v53 = vand.u32 2147483648, %v13051_v24  ;;  %vm13094_vm15 = vcmp.eq.f32.partialorder %v2369_v34, 8.507059e+37  ;;  %v2384_v38 = vand.u32 2147483647, %v13072_v18 }
 0x15c   : > { %v3573_v46 = vsel %vm13011_vm0, %v3572_v39, %v3568_v28  ;;  %v3583_v29 = vsel %vm13068_vm11, %v10908_v55, %v3579_v61  ;;  %v13103_v37 = vadd.f32 %v12982_v50, %v1279_v10  ;;  %v8687_v31 = vmul.f32 -1.442695, %v13078_v48  ;;  %vm17564_vm0 = vmmov %vm17563_vm4 }
 0x15d   : > { %v10914_v19 = vpop.eup %10913  ;;  %v3588_v52 = vsel %vm13021_vm1, %v3587_v5, %v3583_v29  ;;  %v3968_v23 = vmul.f32 %v3573_v46, %v12905_v51  ;;  %vm2380_vm3 = vweird.f32 %v13072_v18  ;;  %v2386_v42 = vand.u32 2147483648, %v13072_v18 }
 0x15e   : > { %v10916_v35 = vpop.eup %10915  ;;  %v3969_v21 = vmul.f32 %v3588_v52, %v12916_v45  ;;  %v13100_v4 = vadd.f32 1.0, %v10914_v19  ;;  %v2372_v57 = vor.u32 1.1754944e-38, %v2371_v53  ;;  %v10532_v45 = vld [vmem:[%s11703_s17 + $0x78] sm:$0xff]   ;;  %vm13117_vm1 = vcmp.eq.f32.partialorder %v2384_v38, 8.507059e+37 }
 0x15f   : > { %v4096_v39 = vpack.c.bf16 %v3968_v23, %v3968_v23  ;;  %v2361_v51 = vmul.f32 %v10916_v35, %v13051_v24  ;;  %v10918_v32 = vpop.eup %10917  ;;  %vm2366_vm2 = vweird.f32 %v10916_v35  ;;  %v8688_v14 = vmul.f32 -1.442695, %v13103_v37 }
 0x160   : > { %v4097_v13 = vpack.c.bf16 %v3969_v21, %v3969_v21  ;;  %10921 = vrcp.f32 %v13100_v4  ;;  %v10920_v12 = vpop.eup %10919  ;;  %v13112_v6 = vadd.f32 1.0, %v10918_v32  ;;  %v2159_v26 = vand.u32 2147483647, %v13100_v4  ;;  %vm13128_vm6 = vmor %vm2365_vm14, %vm2366_vm2 }
 0x161   : > { %4259 = vst.msk [vmem:[#allocation2 + $0x1f0] sm:$0xf] %vm17563_vm4, %v4096_v39  ;;  %v2362_v7 = vsub.f32 1.0, %v2361_v51  ;;  %10923 = vpow2.f32 %v8687_v31  ;;  %v2376_v56 = vmul.f32 %v10920_v12, %v13072_v18  ;;  %v2161_v44 = vand.u32 2147483648, %v13100_v4  ;;  %vm17576_vm14 = vmmov %vm17569_vm8 }
 0x162   : > { %4260 = vst.msk [vmem:[#allocation2 + $0x1f4] sm:$0xf] %vm17564_vm0, %v4097_v13  ;;  %v9812_v15 = vld [vmem:[#allocation2 + $0x70] sm:$0xff]  ;;  %v2387_v62 = vor.u32 1.1754944e-38, %v2386_v42  ;;  %vm2155_vm5 = vweird.f32 %v13100_v4  ;;  %10925 = vrcp.f32 %v13112_v6  ;;  %vm2381_vm7 = vweird.f32 %v10920_v12  ;;  %vm17579_vm2 = vmmov %vm17564_vm0 }
 0x163   : > { %v2363_v11 = vmul.f32 %v10916_v35, %v2362_v7  ;;  %v2377_v25 = vsub.f32 1.0, %v2376_v56  ;;  %v2174_v63 = vand.u32 2147483647, %v13112_v6  ;;  %10927 = vpow2.f32 %v8688_v14  ;;  %8991 = vmatmul.msk.bf16.gmra.mxu0 %vm17569_vm8, %v9812_v15  ;;  %vm13148_vm12 = vmor %vm2380_vm3, %vm2381_vm7 }
 0x164   : > { %vm13137_vm9 = vcmp.eq.f32.partialorder %v2159_v26, 8.507059e+37  ;;  %v10004_v17 = vunpack.c.l.bf16 %v10532_v45  ;;  %v10005_v0 = vunpack.c.h.bf16 %v10532_v45  ;;  %v2162_v41 = vor.u32 1.1754944e-38, %v2161_v44  ;;  %vm17585_vm8 = vmmov %vm17579_vm2 }
 0x165   : > { %v2364_v58 = vadd.f32 %v10916_v35, %v2363_v11  ;;  %v2378_v54 = vmul.f32 %v10920_v12, %v2377_v25  ;;  %vm2170_vm11 = vweird.f32 %v13112_v6  ;;  %v2176_v5 = vand.u32 2147483648, %v13112_v6 }
 0x166   : > { %v10922_v24 = vpop.eup %10921  ;;  %v1198_v9 = vmul.f32 %v13017_v22, %v10004_v17  ;;  %v10168_v3 = vunpack.c.l.bf16 %v13134_v40  ;;  %vm13157_vm10 = vcmp.eq.f32.partialorder %v2174_v63, 8.507059e+37  ;;  %v1199_v46 = vmul.f32 %v13017_v22, %v10005_v0  ;;  %v10533_v63 = vld [vmem:[%s11703_s17 + $0x80] sm:$0xff]  }
 0x167   : > { %v10924_v8 = vpop.eup %10923  ;;  %v2368_v36 = vsel %vm13128_vm6, %v10916_v35, %v2364_v58  ;;  %v2151_v2 = vmul.f32 %v10922_v24, %v13100_v4  ;;  %v2379_v34 = vadd.f32 %v10920_v12, %v2378_v54  ;;  %vm2156_vm13 = vweird.f32 %v10922_v24 }
 0x168   : > { %v2373_v30 = vsel %vm13094_vm15, %v2372_v57, %v2368_v36  ;;  %v13161_v10 = vadd.f32 1.0, %v10924_v8  ;;  %v10926_v18 = vpop.eup %10925  ;;  %v13170_v52 = vadd.f32 %v12982_v50, %v1198_v9  ;;  %vm13180_vm15 = vmor %vm2155_vm5, %vm2156_vm13  ;;  %v2177_v42 = vor.u32 1.1754944e-38, %v2176_v5 }
 0x169   : > { %v9860_v49 = vld [vmem:[#allocation2 + $0x1f0] sm:$0xff]  ;;  %v3888_v61 = vmul.f32 %v2373_v30, %v12962_v60  ;;  %v2152_v28 = vsub.f32 1.0, %v2151_v2  ;;  %v10928_v29 = vpop.eup %10927  ;;  %v2383_v53 = vsel %vm13148_vm12, %v10920_v12, %v2379_v34  ;;  %v2166_v19 = vmul.f32 %v10926_v18, %v13112_v6  ;;  %vm17582_vm5 = vmmov %vm17579_vm2 }
 0x16a   : > { %10929 = vrcp.f32 %v13161_v10  ;;  %9039 = vmatmul.msk.bf16.gmra.mxu3 %vm17576_vm14, %v9860_v49  ;;  %v2388_v60 = vsel %vm13117_vm1, %v2387_v62, %v2383_v53  ;;  %v13175_v38 = vadd.f32 1.0, %v10928_v29  ;;  %vm2171_vm3 = vweird.f32 %v10926_v18  ;;  %vm17588_vm12 = vmmov %vm17579_vm2 }
 0x16b   : > { %v4016_v23 = vpack.c.bf16 %v3888_v61, %v3888_v61  ;;  %v2153_v20 = vmul.f32 %v10922_v24, %v2152_v28  ;;  %v3889_v35 = vmul.f32 %v2388_v60, %v12985_v16  ;;  %v2167_v31 = vsub.f32 1.0, %v2166_v19  ;;  %vm13194_vm0 = vmor %vm2170_vm11, %vm2171_vm3 }
 0x16c   : > { %v3599_v39 = vand.u32 2147483647, %v13161_v10  ;;  %10931 = vrcp.f32 %v13175_v38  ;;  %v10169_v32 = vunpack.c.h.bf16 %v13134_v40  ;;  %vm3595_vm4 = vweird.f32 %v13161_v10  ;;  %vm17593_vm3 = vmmov %vm17579_vm2 }
 0x16d   : > { %4179 = vst.msk [vmem:[#allocation2 + $0xb0] sm:$0xf] %vm17579_vm2, %v4016_v23  ;;  %v2154_v51 = vadd.f32 %v10922_v24, %v2153_v20  ;;  %v4017_v13 = vpack.c.bf16 %v3889_v35, %v3889_v35  ;;  %v2168_v16 = vmul.f32 %v10926_v18, %v2167_v31  ;;  %v1280_v4 = vmul.f32 %v13017_v22, %v10168_v3 }
 0x16e   : > { %v3601_v12 = vand.u32 2147483648, %v13161_v10  ;;  %vm3610_vm1 = vweird.f32 %v13175_v38  ;;  %v13201_v7 = vadd.f32 %v12982_v50, %v1199_v46  ;;  %vm13206_vm6 = vcmp.eq.f32.partialorder %v3599_v39, 8.507059e+37 }
 0x16f   : > { %v2158_v57 = vsel %vm13180_vm15, %v10922_v24, %v2154_v51  ;;  %4180 = vst.msk [vmem:[#allocation2 + $0xb4] sm:$0xf] %vm17582_vm5, %v4017_v13  ;;  %v2169_v55 = vadd.f32 %v10926_v18, %v2168_v16  ;;  %v8607_v44 = vmul.f32 -1.442695, %v13170_v52  ;;  %v3614_v11 = vand.u32 2147483647, %v13175_v38  ;;  %vm17597_vm5 = vmmov %vm17593_vm3 }
 0x170   : > { %v10930_v26 = vpop.eup %10929  ;;  %v2163_v56 = vsel %vm13137_vm9, %v2162_v41, %v2158_v57  ;;  %v8608_v47 = vmul.f32 -1.442695, %v13201_v7  ;;  %v1281_v25 = vmul.f32 %v13017_v22, %v10169_v32  ;;  %v13222_v17 = vadd.f32 %v12982_v50, %v1280_v4 }
 0x171   : > { %v3874_v14 = vmul.f32 %v2163_v56, %v13035_v33  ;;  %v3591_v15 = vmul.f32 %v10930_v26, %v13161_v10  ;;  %vm3596_vm7 = vweird.f32 %v10930_v26  ;;  %v2173_v62 = vsel %vm13194_vm0, %v10926_v18, %v2169_v55 }
 0x172   : > { %10933 = vpow2.f32 %v8607_v44  ;;  %v10932_v40 = vpop.eup %10931  ;;  %v2178_v58 = vsel %vm13157_vm10, %v2177_v42, %v2173_v62  ;;  %v3616_v54 = vand.u32 2147483648, %v13175_v38  ;;  %v13229_v5 = vadd.f32 %v12982_v50, %v1281_v25  ;;  %vm13236_vm9 = vmor %vm3595_vm4, %vm3596_vm7 }
 0x173   : > { %v4002_v33 = vpack.c.bf16 %v3874_v14, %v3874_v14  ;;  %v3592_v1 = vsub.f32 1.0, %v3591_v15  ;;  %v3875_v0 = vmul.f32 %v2178_v58, %v13038_v59  ;;  %v3606_v24 = vmul.f32 %v10932_v40, %v13175_v38  ;;  %vm17589_vm10 = vmmov %vm17576_vm14  ;;  %v9746_v38 = vld [vmem:[#allocation2 + $0x40] sm:$0xff] }
 0x174   : > { %10935 = vpow2.f32 %v8608_v47  ;;  %v8689_v8 = vmul.f32 -1.442695, %v13222_v17  ;;  %v10008_v36 = vunpack.c.l.bf16 %v10533_v63  ;;  %v3602_v9 = vor.u32 1.1754944e-38, %v3601_v12  ;;  %vm17592_vm15 = vmmov %vm17589_vm10 }
 0x175   : > { %4165 = vst.msk [vmem:[#allocation2 + $0x78] sm:$0xf] %vm17585_vm8, %v4002_v33  ;;  %v3593_v41 = vmul.f32 %v10930_v26, %v3592_v1  ;;  %v4003_v2 = vpack.c.bf16 %v3875_v0, %v3875_v0  ;;  %v3607_v3 = vsub.f32 1.0, %v3606_v24  ;;  %vm3611_vm11 = vweird.f32 %v10932_v40  ;;  %9329 = vmatmul.msk.bf16.gmra.mxu1 %vm17592_vm15, %v9746_v38 }
 0x176   : > { %v9880_v30 = vld [vmem:[#allocation2 + $0xb0] sm:$0xff]  ;;  %10937 = vpow2.f32 %v8689_v8  ;;  %v8690_v27 = vmul.f32 -1.442695, %v13229_v5  ;;  %v10009_v18 = vunpack.c.h.bf16 %v10533_v63  ;;  %v1200_v28 = vmul.f32 %v13017_v22, %v10008_v36  ;;  %vm13248_vm13 = vmor %vm3610_vm1, %vm3611_vm11 }
 0x177   : > { %v3594_v34 = vadd.f32 %v10930_v26, %v3593_v41  ;;  %4166 = vst.msk [vmem:[#allocation2 + $0x7c] sm:$0xf] %vm17588_vm12, %v4003_v2  ;;  %v3608_v61 = vmul.f32 %v10932_v40, %v3607_v3  ;;  %v10172_v10 = vunpack.c.l.bf16 %v10574_v43  ;;  %9671 = vmatmul.msk.bf16.gmra.mxu2 %vm17589_vm10, %v9880_v30  ;;  %v3617_v53 = vor.u32 1.1754944e-38, %v3616_v54  ;;  %vm17596_vm1 = vmmov %vm17589_vm10 }
 0x178   : > { %v10934_v49 = vpop.eup %10933  ;;  %10939 = vpow2.f32 %v8690_v27  ;;  %vm3615_vm14 = vcmp.eq.f32.partialorder %v3614_v11, 8.507059e+37  ;;  %v10173_v35 = vunpack.c.h.bf16 %v10574_v43  ;;  %v1201_v39 = vmul.f32 %v13017_v22, %v10009_v18  ;;  %v10534_v43 = vld [vmem:[%s11703_s17 + $0x88] sm:$0xff]   ;;  %vm17606_vm15 = vmmov %vm17596_vm1 }
 0x179   : > { %v3598_v46 = vsel %vm13236_vm9, %v10930_v26, %v3594_v34  ;;  %v13252_v19 = vadd.f32 1.0, %v10934_v49  ;;  %v3609_v20 = vadd.f32 %v10932_v40, %v3608_v61  ;;  %v13265_v32 = vadd.f32 %v12982_v50, %v1200_v28 }
 0x17a   : > { %v10936_v60 = vpop.eup %10935  ;;  %v3603_v23 = vsel %vm13206_vm6, %v3602_v9, %v3598_v46  ;;  %v1282_v13 = vmul.f32 %v13017_v22, %v10172_v10  ;;  %v1283_v26 = vmul.f32 %v13017_v22, %v10173_v35  ;;  %v13280_v14 = vadd.f32 %v12982_v50, %v1201_v39 }
 0x17b   : > { %v3970_v21 = vmul.f32 %v3603_v23, %v13078_v48  ;;  %v13257_v31 = vadd.f32 1.0, %v10936_v60  ;;  %10941 = vrcp.f32 %v13252_v19  ;;  %v3613_v51 = vsel %vm13248_vm13, %v10932_v40, %v3609_v20  ;;  %v5098_v20 = vpop.f32.mrf.mxu0 }
 0x17c   : > { %v2399_v42 = vand.u32 2147483647, %v13252_v19  ;;  %v10938_v16 = vpop.eup %10937  ;;  %v3618_v4 = vsel %vm3615_vm14, %v3617_v53, %v3613_v51  ;;  %v2401_v57 = vand.u32 2147483648, %v13252_v19  ;;  %vm2395_vm2 = vweird.f32 %v13252_v19 }
 0x17d   : > { %v4098_v48 = vpack.c.bf16 %v3970_v21, %v3970_v21  ;;  %10943 = vrcp.f32 %v13257_v31  ;;  %v3971_v45 = vmul.f32 %v3618_v4, %v13103_v37  ;;  %v2414_v12 = vand.u32 2147483647, %v13257_v31 }
 0x17e   : > { %v10940_v56 = vpop.eup %10939  ;;  %v9813_v55 = vld [vmem:[#allocation2 + $0x78] sm:$0xff]  ;;  %v2416_v6 = vand.u32 2147483648, %v13257_v31  ;;  %v13277_v44 = vadd.f32 1.0, %v10938_v16  ;;  %vm13282_vm4 = vcmp.eq.f32.partialorder %v2399_v42, 8.507059e+37  ;;  %vm2410_vm0 = vweird.f32 %v13257_v31  ;;  %v5963_v16 = vpop.f32.mrf.mxu1 }
 0x17f   : > { %4261 = vst.msk [vmem:[#allocation2 + $0x1f8] sm:$0xf] %vm17593_vm3, %v4098_v48  ;;  %v4099_v15 = vpack.c.bf16 %v3971_v45, %v3971_v45  ;;  %v13287_v11 = vadd.f32 1.0, %v10940_v56  ;;  %8992 = vmatmul.msk.bf16.gmra.mxu0 %vm17596_vm1, %v9813_v55  ;;  %v2402_v47 = vor.u32 1.1754944e-38, %v2401_v57  ;;  %v8609_v25 = vmul.f32 -1.442695, %v13265_v32  ;;  %vm17614_vm1 = vmmov %vm17597_vm5 }
 0x180   : > { %10945 = vrcp.f32 %v13277_v44  ;;  %v13293_v63 = vadd.f32 %v12982_v50, %v1282_v13  ;;  %v3629_v58 = vand.u32 2147483647, %v13277_v44  ;;  %v13300_v33 = vadd.f32 %v12982_v50, %v1283_v26  ;;  %v9814_v55 = vld [vmem:[#allocation2 + $0x80] sm:$0xff] }
 0x181   : > { %v10942_v62 = vpop.eup %10941  ;;  %4262 = vst.msk [vmem:[#allocation2 + $0x1fc] sm:$0xf] %vm17597_vm5, %v4099_v15  ;;  %10947 = vrcp.f32 %v13287_v11  ;;  %vm13302_vm6 = vcmp.eq.f32.partialorder %v2414_v12, 8.507059e+37  ;;  %v2417_v24 = vor.u32 1.1754944e-38, %v2416_v6  ;;  %vm3625_vm7 = vweird.f32 %v13277_v44  ;;  %vm17615_vm5 = vmmov %vm17606_vm15 }
 0x182   : > { %v2391_v40 = vmul.f32 %v10942_v62, %v13252_v19  ;;  %v3631_v54 = vand.u32 2147483648, %v13277_v44  ;;  %vm2396_vm8 = vweird.f32 %v10942_v62  ;;  %v3646_v36 = vand.u32 2147483648, %v13287_v11 }
 0x183   : > { %v10944_v1 = vpop.eup %10943  ;;  %vm3640_vm9 = vweird.f32 %v13287_v11  ;;  %v3644_v2 = vand.u32 2147483647, %v13287_v11  ;;  %10949 = vpow2.f32 %v8609_v25  ;;  %v8610_v59 = vmul.f32 -1.442695, %v13280_v14  ;;  %vm13323_vm10 = vmor %vm2395_vm2, %vm2396_vm8 }
 0x184   : > { %v2392_v41 = vsub.f32 1.0, %v2391_v40  ;;  %v2406_v8 = vmul.f32 %v10944_v1, %v13257_v31  ;;  %vm2411_vm11 = vweird.f32 %v10944_v1  ;;  %vm13314_vm12 = vcmp.eq.f32.partialorder %v3629_v58, 8.507059e+37  ;;  %v9747_v58 = vld [vmem:[#allocation2 + $0x48] sm:$0xff] }
 0x185   : > { %v8691_v34 = vmul.f32 -1.442695, %v13293_v63  ;;  %v3632_v49 = vor.u32 1.1754944e-38, %v3631_v54  ;;  %10951 = vpow2.f32 %v8610_v59  ;;  %v8692_v61 = vmul.f32 -1.442695, %v13300_v33  ;;  %vm13335_vm13 = vmor %vm2410_vm0, %vm2411_vm11  ;;  %9330 = vmatmul.msk.bf16.gmra.mxu1 %vm17615_vm5, %v9747_v58 }
 0x186   : > { %v2393_v9 = vmul.f32 %v10942_v62, %v2392_v41  ;;  %v2407_v3 = vsub.f32 1.0, %v2406_v8  ;;  %v13319_v27 = vpop.eup %10945  ;;  %v10012_v28 = vunpack.c.l.bf16 %v10534_v43  ;;  %v3647_v60 = vor.u32 1.1754944e-38, %v3646_v36  ;;  %v7546_v36 = vld [vmem:[%s13370_s21] sm:$0xff] }
 0x187   : > { %v13328_v10 = vpop.eup %10947  ;;  %v3621_v53 = vmul.f32 %v13319_v27, %v13277_v44  ;;  %vm3626_vm14 = vweird.f32 %v13319_v27  ;;  %v10013_v21 = vunpack.c.h.bf16 %v10534_v43  ;;  %10953 = vpow2.f32 %v8691_v34 }
 0x188   : > { %v2394_v46 = vadd.f32 %v10942_v62, %v2393_v9  ;;  %v2408_v29 = vmul.f32 %v10944_v1, %v2407_v3  ;;  %v9861_v23 = vld [vmem:[#allocation2 + $0x1f8] sm:$0xff]  ;;  %v3636_v35 = vmul.f32 %v13328_v10, %v13287_v11  ;;  %v1202_v38 = vmul.f32 %v13017_v22, %v10012_v28  ;;  %vm13362_vm2 = vmor %vm3625_vm7, %vm3626_vm14  ;;  %v13411_v9 = vld [vmem:[%s17617_s4] ss:$0 sm:$0xff] }
 0x189   : > { %v3622_v42 = vsub.f32 1.0, %v3621_v53  ;;  %v10950_v31 = vpop.eup %10949  ;;  %9040 = vmatmul.msk.bf16.gmra.mxu3 %vm17606_vm15, %v9861_v23  ;;  %vm3641_vm3 = vweird.f32 %v13328_v10  ;;  %10955 = vpow2.f32 %v8692_v61  ;;  %vm13389_vm0 = vcmp.eq.f32.partialorder %v3644_v2, 8.507059e+37  ;;  %vm17618_vm7 = vmmov %vm17614_vm1 }
 0x18a   : > { %v2398_v39 = vsel %vm13323_vm10, %v10942_v62, %v2394_v46  ;;  %v2409_v51 = vadd.f32 %v10944_v1, %v2408_v29  ;;  %v3637_v4 = vsub.f32 1.0, %v3636_v35  ;;  %v13354_v12 = vadd.f32 1.0, %v10950_v31  ;;  %v5100_v46 = vpop.f32.mrf.mxu0  ;;  %vm17622_vm10 = vmmov %vm17614_vm1 }
 0x18b   : > { %v2403_v13 = vsel %vm13282_vm4, %v2402_v47, %v2398_v39  ;;  %v3623_v45 = vmul.f32 %v13319_v27, %v3622_v42  ;;  %v10952_v26 = vpop.eup %10951  ;;  %v13374_v37 = vadd.f32 %v12982_v50, %v1202_v38  ;;  %vm13382_vm4 = vmor %vm3640_vm9, %vm3641_vm3 }
 0x18c   : > { %v2413_v48 = vsel %vm13335_vm13, %v10944_v1, %v2409_v51  ;;  %v3890_v57 = vmul.f32 %v2403_v13, %v13170_v52  ;;  %v3638_v15 = vmul.f32 %v13328_v10, %v3637_v4  ;;  %v1203_v52 = vmul.f32 %v13017_v22, %v10013_v21 }
 0x18d   : > { %v2418_v56 = vsel %vm13302_vm6, %v2417_v24, %v2413_v48  ;;  %v3624_v44 = vadd.f32 %v13319_v27, %v3623_v45  ;;  %v13386_v40 = vadd.f32 1.0, %v10952_v26  ;;  %v5964_v1 = vadd.f32 %v5963_v16, %v5098_v20  ;;  %v6966_v24 = vpop.f32.mrf.mxu2  ;;  %v10954_v54 = vpop.eup %10953  ;;  %vm17616_vm6 = vmmov %vm17615_vm5 }
 0x18e   : > { %v3891_v62 = vmul.f32 %v2418_v56, %v13201_v7  ;;  %v4018_v47 = vpack.c.bf16 %v3890_v57, %v3890_v57  ;;  %v3639_v0 = vadd.f32 %v13328_v10, %v3638_v15  ;;  %10957 = vrcp.f32 %v13354_v12 }
 0x18f   : > { %v3628_v11 = vsel %vm13362_vm2, %v13319_v27, %v3624_v44  ;;  %v2429_v8 = vand.u32 2147483647, %v13354_v12  ;;  %10959 = vrcp.f32 %v13386_v40  ;;  %v10956_v43 = vpop.eup %10955  ;;  %8993 = vmatmul.msk.bf16.gmra.mxu0 %vm17616_vm6, %v9814_v55  ;;  %v13414_v3 = vadd.f32 %v12982_v50, %v1203_v52  ;;  %vm17625_vm2 = vmmov %vm17615_vm5 }
 0x190   : > { %v4019_v41 = vpack.c.bf16 %v3891_v62, %v3891_v62  ;;  %4181 = vst.msk [vmem:[#allocation2 + $0xb8] sm:$0xf] %vm17614_vm1, %v4018_v47  ;;  %v3633_v2 = vsel %vm13314_vm12, %v3632_v49, %v3628_v11  ;;  %v3643_v59 = vsel %vm13382_vm4, %v13328_v10, %v3639_v0  ;;  %v8611_v34 = vmul.f32 -1.442695, %v13374_v37  ;;  %vm17621_vm12 = vmmov %vm17614_vm1  ;;  %v10575_v62 = vld [vmem:[%s11703_s17 + $0x1d0] sm:$0xff]  }
 0x191   : > { %v3648_v30 = vsel %vm13389_vm0, %v3647_v60, %v3643_v59  ;;  %v3972_v27 = vmul.f32 %v3633_v2, %v13222_v17  ;;  %vm2425_vm8 = vweird.f32 %v13354_v12  ;;  %v2431_v18 = vand.u32 2147483648, %v13354_v12 }
 0x192   : > { %4182 = vst.msk [vmem:[#allocation2 + $0xbc] sm:$0xf] %vm17618_vm7, %v4019_v41  ;;  %v3973_v49 = vmul.f32 %v3648_v30, %v13229_v5  ;;  %v2444_v61 = vand.u32 2147483647, %v13386_v40  ;;  %v7286_v28 = vadd.f32 %v6966_v24, %v5964_v1  ;;  %v13425_v10 = vperm.slane %v7546_v36, 0  ;;  %v5965_v5 = vpop.f32.mrf.mxu1  ;;  %v9815_v41 = vld [vmem:[#allocation2 + $0x88] sm:$0xff]  ;;  %vm17632_vm7 = vmmov %vm17625_vm2 }
 0x193   : > { %v4100_v29 = vpack.c.bf16 %v3972_v27, %v3972_v27  ;;  %vm13427_vm9 = vcmp.eq.f32.partialorder %v2429_v8, 8.507059e+37  ;;  %vm2440_vm11 = vweird.f32 %v13386_v40  ;;  %v13432_v17 = vadd.f32 1.0, %v10954_v54 }
 0x194   : > { %v10958_v60 = vpop.eup %10957  ;;  %v4101_v23 = vpack.c.bf16 %v3973_v49, %v3973_v49  ;;  %v2446_v19 = vand.u32 2147483648, %v13386_v40  ;;  %v7418_v20 = vadd.f32 %v13411_v9, %v7286_v28  ;;  %v13436_v35 = vadd.f32 1.0, %v10956_v43 }
 0x195   : > { %v10960_v21 = vpop.eup %10959  ;;  %4263 = vst.msk [vmem:[#allocation2 + $0x200] sm:$0xf] %vm17621_vm12, %v4100_v29  ;;  %v2421_v38 = vmul.f32 %v10958_v60, %v13354_v12  ;;  %v2432_v39 = vor.u32 1.1754944e-38, %v2431_v18  ;;  %v5966_v51 = vadd.f32 %v5965_v5, %v5100_v46  ;;  %10961 = vrcp.f32 %v13432_v17  ;;  %v6968_v16 = vpop.f32.mrf.mxu2  ;;  %vm17637_vm12 = vmmov %vm17622_vm10 }
 0x196   : > { %4264 = vst.msk [vmem:[#allocation2 + $0x204] sm:$0xf] %vm17622_vm10, %v4101_v23  ;;  %v2436_v42 = vmul.f32 %v10960_v21, %v13386_v40  ;;  %vm13443_vm13 = vcmp.eq.f32.partialorder %v2444_v61, 8.507059e+37  ;;  %v7571_v13 = vadd.f32 %v13425_v10, %v7418_v20  ;;  %v3659_v4 = vand.u32 2147483647, %v13432_v17  ;;  %v10535_v20 = vld [vmem:[%s11703_s17 + $0x90] sm:$0xff]  }
 0x197   : > { %v2422_v48 = vsub.f32 1.0, %v2421_v38  ;;  %vm2426_vm14 = vweird.f32 %v10958_v60  ;;  %v7287_v57 = vadd.f32 %v6968_v16, %v5966_v51  ;;  %v3661_v45 = vand.u32 2147483648, %v13432_v17 }
 0x198   : > { %v2437_v56 = vsub.f32 1.0, %v2436_v42  ;;  %vm2441_vm15 = vweird.f32 %v10960_v21  ;;  %v2447_v55 = vor.u32 1.1754944e-38, %v2446_v19  ;;  %10963 = vrcp.f32 %v13436_v35  ;;  %vm13457_vm4 = vmor %vm2425_vm8, %vm2426_vm14  ;;  %v5103_v19 = vpop.f32.mrf.mxu0 }
 0x199   : > { %v9881_v26 = vld [vmem:[#allocation2 + $0xb8] sm:$0xff]  ;;  %v2423_v6 = vmul.f32 %v10958_v60, %v2422_v48  ;;  %v7832_v15 = vmul.f32 %v7571_v13, %v7571_v13  ;;  %v7419_v52 = vadd.f32 %v13411_v9, %v7287_v57  ;;  %vm3655_vm3 = vweird.f32 %v13432_v17  ;;  %vm13468_vm1 = vmor %vm2440_vm11, %vm2441_vm15 }
 0x19a   : > { %9672 = vmatmul.msk.bf16.gmra.mxu2 %vm17625_vm2, %v9881_v26  ;;  %v2438_v44 = vmul.f32 %v10960_v21, %v2437_v56  ;;  %vm13461_vm0 = vcmp.eq.f32.partialorder %v3659_v4, 8.507059e+37  ;;  %v3662_v58 = vor.u32 1.1754944e-38, %v3661_v45  ;;  %10965 = vpow2.f32 %v8611_v34  ;;  %v5968_v23 = vpop.f32.mrf.mxu1  ;;  %vm17634_vm8 = vmmov %vm17625_vm2 }
 0x19b   : > { %v10962_v1 = vpop.eup %10961  ;;  %v2424_v0 = vadd.f32 %v10958_v60, %v2423_v6  ;;  %v7572_v12 = vadd.f32 %v13425_v10, %v7419_v52  ;;  %vm3670_vm5 = vweird.f32 %v13436_v35  ;;  %v3674_v24 = vand.u32 2147483647, %v13436_v35 }
 0x19c   : > { %v2439_v54 = vadd.f32 %v10960_v21, %v2438_v44  ;;  %v3651_v11 = vmul.f32 %v10962_v1, %v13432_v17  ;;  %v8612_v8 = vmul.f32 -1.442695, %v13414_v3  ;;  %v10176_v36 = vunpack.c.l.bf16 %v10575_v62 }
 0x19d   : > { %v9862_v43 = vld [vmem:[#allocation2 + $0x200] sm:$0xff]  ;;  %v2428_v40 = vsel %vm13457_vm4, %v10958_v60, %v2424_v0  ;;  %v13479_v2 = vadd.f32 %v7572_v12, %v7571_v13  ;;  %v7833_v59 = vmul.f32 %v7572_v12, %v7572_v12  ;;  %v10201_v34 = vpack.c.bf16 %v7572_v12, %v7571_v13 }
 0x19e   : > { %v13481_v30 = vpop.eup %10963  ;;  %v2433_v27 = vsel %vm13427_vm9, %v2432_v39, %v2428_v40  ;;  %v2443_v18 = vsel %vm13468_vm1, %v10960_v21, %v2439_v54  ;;  %v3652_v49 = vsub.f32 1.0, %v3651_v11  ;;  %vm3656_vm6 = vweird.f32 %v10962_v1  ;;  %9041 = vmatmul.msk.bf16.gmra.mxu3 %vm17632_vm7, %v9862_v43 }
 0x19f   : > { %v2448_v61 = vsel %vm13443_vm13, %v2447_v55, %v2443_v18  ;;  %v3892_v28 = vmul.f32 %v2433_v27, %v13265_v32  ;;  %v13491_v46 = vadd.f32 %v7833_v59, %v7832_v15  ;;  %10202 = vst [vmem:[%s13495_s14] sm:$0xff] %v10201_v34   ;;  %v3676_v29 = vand.u32 2147483648, %v13436_v35  ;;  %8994 = vmatmul.msk.bf16.gmra.mxu0 %vm17634_vm8, %v9815_v41  ;;  %vm13507_vm9 = vmor %vm3655_vm3, %vm3656_vm6 }
 0x1a0   : > { %v10966_v53 = vpop.eup %10965  ;;  %v3893_v60 = vmul.f32 %v2448_v61, %v13280_v14  ;;  %v3653_v5 = vmul.f32 %v10962_v1, %v3652_v49  ;;  %v3666_v32 = vmul.f32 %v13481_v30, %v13436_v35  ;;  %10967 = vpow2.f32 %v8612_v8  ;;  %vm17642_vm3 = vmmov %vm17625_vm2 }
 0x1a1   : > { %v4020_v21 = vpack.c.bf16 %v3892_v28, %v3892_v28  ;;  %v13511_v39 = vadd.f32 1.0, %v10966_v53  ;;  %v10177_v14 = vunpack.c.h.bf16 %v10575_v62  ;;  %v1284_v51 = vmul.f32 %v13017_v22, %v10176_v36  ;;  %vm17643_vm2 = vmmov %vm17622_vm10  ;;  %v13572_v53 = vld [vmem:[%s11737_s12] ss:$0 sm:$0xff] }
 0x1a2   : > { %v4021_v42 = vpack.c.bf16 %v3893_v60, %v3893_v60  ;;  %v3654_v31 = vadd.f32 %v10962_v1, %v3653_v5  ;;  %v3667_v13 = vsub.f32 1.0, %v3666_v32  ;;  %vm3671_vm11 = vweird.f32 %v13481_v30  ;;  %v5970_v34 = vpop.f32.mrf.mxu1  ;;  %vm17646_vm1 = vmmov %vm17642_vm3  ;;  %v13581_v32 = vld [vmem:[%s11703_s17 + $0x98] sm:$0xff]  }
 0x1a3   : > { %4183 = vst.msk [vmem:[#allocation2 + $0xc0] sm:$0xf] %vm17637_vm12, %v4020_v21  ;;  %v5969_v16 = vadd.f32 %v5968_v23, %v5103_v19  ;;  %10969 = vrcp.f32 %v13511_v39  ;;  %v10016_v17 = vunpack.c.l.bf16 %v10535_v20  ;;  %v1285_v57 = vmul.f32 %v13017_v22, %v10177_v14  ;;  %vm13529_vm13 = vmor %vm3670_vm5, %vm3671_vm11 }
 0x1a4   : > { %4184 = vst.msk [vmem:[#allocation2 + $0xc4] sm:$0xf] %vm17622_vm10, %v4021_v42  ;;  %v3658_v4 = vsel %vm13507_vm9, %v10962_v1, %v3654_v31  ;;  %v3668_v48 = vmul.f32 %v13481_v30, %v3667_v13  ;;  %v13523_v45 = vadd.f32 %v12982_v50, %v1284_v51  ;;  %vm13533_vm14 = vcmp.eq.f32.partialorder %v3674_v24, 8.507059e+37  ;;  %v9748_v1 = vld [vmem:[#allocation2 + $0x50] sm:$0xff]  ;;  %v13553_v24 = vld [vmem:[%s11703_s17 + $0x1d8] sm:$0xff]   ;;  %vm17647_vm6 = vmmov %vm17643_vm2 }
 0x1a5   : > { %v3663_v26 = vsel %vm13461_vm0, %v3662_v58, %v3658_v4  ;;  %v3677_v6 = vor.u32 1.1754944e-38, %v3676_v29  ;;  %v10017_v15 = vunpack.c.h.bf16 %v10535_v20  ;;  %v13540_v44 = vadd.f32 %v12982_v50, %v1285_v57  ;;  %9331 = vmatmul.msk.bf16.gmra.mxu1 %vm17642_vm3, %v9748_v1  ;;  %v9816_v29 = vld [vmem:[#allocation2 + $0x90] sm:$0xff]  ;;  %vm17652_vm9 = vmmov %vm17646_vm1 }
 0x1a6   : > { %v10968_v52 = vpop.eup %10967  ;;  %v3669_v62 = vadd.f32 %v13481_v30, %v3668_v48  ;;  %v3974_v47 = vmul.f32 %v3663_v26, %v13293_v63  ;;  %v8693_v35 = vmul.f32 -1.442695, %v13523_v45  ;;  %vm2455_vm15 = vweird.f32 %v13511_v39  ;;  %v6971_v63 = vpop.f32.mrf.mxu2 }
 0x1a7   : > { %v13543_v25 = vadd.f32 1.0, %v10968_v52  ;;  %v2459_v58 = vand.u32 2147483647, %v13511_v39  ;;  %v1204_v0 = vmul.f32 %v13017_v22, %v10016_v17  ;;  %v8694_v50 = vmul.f32 -1.442695, %v13540_v44 }
 0x1a8   : > { %v3673_v7 = vsel %vm13529_vm13, %v13481_v30, %v3669_v62  ;;  %v4102_v12 = vpack.c.bf16 %v3974_v47, %v3974_v47  ;;  %10971 = vpow2.f32 %v8693_v35  ;;  %v2461_v11 = vand.u32 2147483648, %v13511_v39  ;;  %v5105_v30 = vpop.f32.mrf.mxu0  ;;  %vm17655_vm13 = vmmov %vm17646_vm1 }
 0x1a9   : > { %v10970_v54 = vpop.eup %10969  ;;  %v3678_v41 = vsel %vm13533_vm14, %v3677_v6, %v3673_v7  ;;  %10973 = vrcp.f32 %v13543_v25  ;;  %v1205_v8 = vmul.f32 %v13017_v22, %v10017_v15  ;;  %v2474_v40 = vand.u32 2147483647, %v13543_v25  ;;  %vm17656_vm14 = vmmov %vm17643_vm2 }
 0x1aa   : > { %v3975_v36 = vmul.f32 %v3678_v41, %v13300_v33  ;;  %4265 = vst.msk [vmem:[#allocation2 + $0x208] sm:$0xf] %vm17643_vm2, %v4102_v12  ;;  %v2451_v43 = vmul.f32 %v10970_v54, %v13511_v39  ;;  %v2476_v59 = vand.u32 2147483648, %v13543_v25  ;;  %vm13566_vm4 = vcmp.eq.f32.partialorder %v2459_v58, 8.507059e+37  ;;  %v5973_v12 = vpop.f32.mrf.mxu1 }
 0x1ab   : > { %v9882_v27 = vld [vmem:[#allocation2 + $0xc0] sm:$0xff]  ;;  %v7288_v49 = vadd.f32 %v6971_v63, %v5969_v16  ;;  %10975 = vpow2.f32 %v8694_v50  ;;  %v10180_v33 = vunpack.c.l.bf16 %v13553_v24  ;;  %vm2456_vm0 = vweird.f32 %v10970_v54 }
 0x1ac   : > { %v4103_v61 = vpack.c.bf16 %v3975_v36, %v3975_v36  ;;  %v2452_v28 = vsub.f32 1.0, %v2451_v43  ;;  %v13575_v60 = vadd.f32 %v13572_v53, %v1204_v0  ;;  %9673 = vmatmul.msk.bf16.gmra.mxu2 %vm17646_vm1, %v9882_v27  ;;  %v2462_v23 = vor.u32 1.1754944e-38, %v2461_v11  ;;  %vm13595_vm8 = vmor %vm2455_vm15, %vm2456_vm0 }
 0x1ad   : > { %vm2470_vm5 = vweird.f32 %v13543_v25  ;;  %v7420_v19 = vadd.f32 %v13411_v9, %v7288_v49  ;;  %v5971_v5 = vadd.f32 %v5970_v34, %v5105_v30  ;;  %vm13584_vm7 = vcmp.eq.f32.partialorder %v2474_v40, 8.507059e+37  ;;  %vm17661_vm0 = vmmov %vm17647_vm6 }
 0x1ae   : > { %v10972_v20 = vpop.eup %10971  ;;  %4266 = vst.msk [vmem:[#allocation2 + $0x20c] sm:$0xf] %vm17647_vm6, %v4103_v61  ;;  %v2453_v21 = vmul.f32 %v10970_v54, %v2452_v28  ;;  %v2477_v14 = vor.u32 1.1754944e-38, %v2476_v59  ;;  %v13589_v51 = vadd.f32 %v13572_v53, %v1205_v8  ;;  %v8613_v42 = vmul.f32 -1.442695, %v13575_v60  ;;  %v6973_v56 = vpop.f32.mrf.mxu2 }
 0x1af   : > { %v10974_v31 = vpop.eup %10973  ;;  %v7573_v16 = vadd.f32 %v13425_v10, %v7420_v19  ;;  %v13600_v17 = vadd.f32 1.0, %v10972_v20  ;;  %v10181_v4 = vunpack.c.h.bf16 %v13553_v24  ;;  %v1286_v48 = vmul.f32 %v13017_v22, %v10180_v33  ;;  %8995 = vmatmul.msk.bf16.gmra.mxu0 %vm17652_vm9, %v9816_v29  ;;  %v13621_v24 = vld [vmem:[%s11731_s23] ss:$0 sm:$0xff] }
 0x1b0   : > { %v2454_v57 = vadd.f32 %v10970_v54, %v2453_v21  ;;  %v2466_v26 = vmul.f32 %v10974_v31, %v13543_v25  ;;  %10977 = vpow2.f32 %v8613_v42  ;;  %v10020_v39 = vunpack.c.l.bf16 %v13581_v32  ;;  %v5108_v63 = vpop.f32.mrf.mxu0 }
 0x1b1   : > { %v10976_v55 = vpop.eup %10975  ;;  %vm2471_vm11 = vweird.f32 %v10974_v31  ;;  %v7700_v6 = vadd.f32 %v13479_v2, %v7573_v16  ;;  %v7834_v15 = vmul.f32 %v7573_v16, %v7573_v16  ;;  %v7289_v52 = vadd.f32 %v6973_v56, %v5971_v5 }
 0x1b2   : > { %v2458_v62 = vsel %vm13595_vm8, %v10970_v54, %v2454_v57  ;;  %v2467_v22 = vsub.f32 1.0, %v2466_v26  ;;  %v13610_v47 = vadd.f32 1.0, %v10976_v55  ;;  %10979 = vrcp.f32 %v13600_v17  ;;  %vm13627_vm12 = vmor %vm2470_vm5, %vm2471_vm11 }
 0x1b3   : > { %v2463_v35 = vsel %vm13566_vm4, %v2462_v23, %v2458_v62  ;;  %v7961_v58 = vadd.f32 %v13491_v46, %v7834_v15  ;;  %v7421_v1 = vadd.f32 %v13411_v9, %v7289_v52  ;;  %v10021_v2 = vunpack.c.h.bf16 %v13581_v32  ;;  %vm17668_vm11 = vmmov %vm17652_vm9  ;;  %v13713_v32 = vld [vmem:[%s11703_s17 + $0x1e0] sm:$0xff]   ;;  %v5975_v46 = vpop.f32.mrf.mxu1 }
 0x1b4   : > { %v2468_v0 = vmul.f32 %v10974_v31, %v2467_v22  ;;  %v3894_v7 = vmul.f32 %v2463_v35, %v13374_v37  ;;  %v8614_v50 = vmul.f32 -1.442695, %v13589_v51  ;;  %v1287_v54 = vmul.f32 %v13621_v24, %v10181_v4  ;;  %v9749_v35 = vld [vmem:[#allocation2 + $0x58] sm:$0xff] }
 0x1b5   : > { %v9863_v41 = vld [vmem:[#allocation2 + $0x208] sm:$0xff]  ;;  %v7574_v11 = vadd.f32 %v13425_v10, %v7421_v1  ;;  %v13632_v8 = vadd.f32 %v5973_v12, %v5108_v63  ;;  %vm3685_vm10 = vweird.f32 %v13600_v17  ;;  %10981 = vrcp.f32 %v13610_v47  ;;  %9332 = vmatmul.msk.bf16.gmra.mxu1 %vm17652_vm9, %v9749_v35 }
 0x1b6   : > { %v10978_v37 = vpop.eup %10977  ;;  %v2469_v36 = vadd.f32 %v10974_v31, %v2468_v0  ;;  %v4022_v43 = vpack.c.bf16 %v3894_v7, %v3894_v7  ;;  %v3689_v40 = vand.u32 2147483647, %v13600_v17  ;;  %v3691_v25 = vand.u32 2147483648, %v13600_v17  ;;  %9042 = vmatmul.msk.bf16.gmra.mxu3 %vm17655_vm13, %v9863_v41  ;;  %v6976_v0 = vpop.f32.mrf.mxu2 }
 0x1b7   : > { %v13639_v59 = vadd.f32 %v7700_v6, %v7574_v11  ;;  %v7835_v34 = vmul.f32 %v7574_v11, %v7574_v11  ;;  %v10206_v30 = vpack.c.bf16 %v7574_v11, %v7573_v16  ;;  %v3704_v27 = vand.u32 2147483647, %v13610_v47 }
 0x1b8   : > { %v10980_v18 = vpop.eup %10979  ;;  %v2473_v49 = vsel %vm13627_vm12, %v10974_v31, %v2469_v36  ;;  %4185 = vst.msk [vmem:[#allocation2 + $0xc8] sm:$0xf] %vm17656_vm14, %v4022_v43  ;;  %v3706_v33 = vand.u32 2147483648, %v13610_v47  ;;  %10983 = vpow2.f32 %v8614_v50  ;;  %v13646_v61 = vadd.f32 1.0, %v10978_v37  ;;  %v5110_v11 = vpop.f32.mrf.mxu0  ;;  %vm17671_vm14 = vmmov %vm17652_vm9 }
 0x1b9   : > { %v2478_v28 = vsel %vm13584_vm7, %v2477_v14, %v2473_v49  ;;  %v13650_v29 = vadd.f32 %v7961_v58, %v7835_v34  ;;  %10581 = vst [vmem:[%s13495_s14 + $0x8] sm:$0xff] %v10206_v30   ;;  %v3681_v23 = vmul.f32 %v10980_v18, %v13600_v17  ;;  %vm3700_vm15 = vweird.f32 %v13610_v47  ;;  %v9817_v17 = vld [vmem:[#allocation2 + $0x98] sm:$0xff] }
 0x1ba   : > { %v3895_v19 = vmul.f32 %v2478_v28, %v13414_v3  ;;  %vm13656_vm3 = vcmp.eq.f32.partialorder %v3689_v40, 8.507059e+37  ;;  %v3692_v20 = vor.u32 1.1754944e-38, %v3691_v25  ;;  %10985 = vrcp.f32 %v13646_v61 }
 0x1bb   : > { %v10982_v21 = vpop.eup %10981  ;;  %v3682_v42 = vsub.f32 1.0, %v3681_v23  ;;  %vm3686_vm2 = vweird.f32 %v10980_v18  ;;  %vm13661_vm4 = vcmp.eq.f32.partialorder %v3704_v27, 8.507059e+37  ;;  %v13666_v14 = vadd.f32 %v13572_v53, %v1286_v48 }
 0x1bc   : > { %v4023_v31 = vpack.c.bf16 %v3895_v19, %v3895_v19  ;;  %v3696_v3 = vmul.f32 %v10982_v21, %v13610_v47  ;;  %v3707_v13 = vor.u32 1.1754944e-38, %v3706_v33  ;;  %v13670_v16 = vadd.f32 %v13572_v53, %v1287_v54  ;;  %vm13678_vm1 = vmor %vm3685_vm10, %vm3686_vm2 }
 0x1bd   : > { %v3683_v4 = vmul.f32 %v10980_v18, %v3682_v42  ;;  %v2489_v57 = vand.u32 2147483647, %v13646_v61  ;;  %v2491_v26 = vand.u32 2147483648, %v13646_v61  ;;  %v8695_v56 = vmul.f32 -1.442695, %v13666_v14 }
 0x1be   : > { %v10984_v55 = vpop.eup %10983  ;;  %4186 = vst.msk [vmem:[#allocation2 + $0xcc] sm:$0xf] %vm17661_vm0, %v4023_v31  ;;  %v3697_v6 = vsub.f32 1.0, %v3696_v3  ;;  %vm3701_vm5 = vweird.f32 %v10982_v21  ;;  %v8696_v15 = vmul.f32 -1.442695, %v13670_v16  ;;  %v1206_v52 = vmul.f32 %v13621_v24, %v10020_v39 }
 0x1bf   : > { %v3684_v62 = vadd.f32 %v10980_v18, %v3683_v4  ;;  %v13686_v22 = vadd.f32 1.0, %v10984_v55  ;;  %vm2485_vm6 = vweird.f32 %v13646_v61  ;;  %10987 = vpow2.f32 %v8695_v56  ;;  %vm13700_vm7 = vmor %vm3700_vm15, %vm3701_vm5  ;;  %8996 = vmatmul.msk.bf16.gmra.mxu0 %vm17668_vm11, %v9817_v17  ;;  %v6978_v4 = vpop.f32.mrf.mxu2 }
 0x1c0   : > { %v10986_v58 = vpop.eup %10985  ;;  %v3698_v1 = vmul.f32 %v10982_v21, %v3697_v6  ;;  %10989 = vpow2.f32 %v8696_v15  ;;  %v1207_v7 = vmul.f32 %v13621_v24, %v10021_v2  ;;  %v13693_v12 = vadd.f32 %v13572_v53, %v1206_v52  ;;  %vm17672_vm15 = vmmov %vm17661_vm0 }
 0x1c1   : > { %v3688_v39 = vsel %vm13678_vm1, %v10980_v18, %v3684_v62  ;;  %v2481_v50 = vmul.f32 %v10986_v58, %v13646_v61  ;;  %vm13705_vm8 = vcmp.eq.f32.partialorder %v2489_v57, 8.507059e+37  ;;  %10991 = vrcp.f32 %v13686_v22 }
 0x1c2   : > { %v3693_v47 = vsel %vm13656_vm3, %v3692_v20, %v3688_v39  ;;  %v3699_v2 = vadd.f32 %v10982_v21, %v3698_v1  ;;  %vm2486_vm12 = vweird.f32 %v10986_v58  ;;  %v2492_v41 = vor.u32 1.1754944e-38, %v2491_v26  ;;  %v5113_v39 = vpop.f32.mrf.mxu0 }
 0x1c3   : > { %v3976_v37 = vmul.f32 %v3693_v47, %v13523_v45  ;;  %v2482_v36 = vsub.f32 1.0, %v2481_v50  ;;  %v2504_v43 = vand.u32 2147483647, %v13686_v22  ;;  %v7290_v40 = vadd.f32 %v6976_v0, %v13632_v8  ;;  %vm13734_vm13 = vmor %vm2485_vm6, %vm2486_vm12 }
 0x1c4   : > { %v3703_v25 = vsel %vm13700_vm7, %v10982_v21, %v3699_v2  ;;  %v13723_v34 = vadd.f32 %v13572_v53, %v1207_v7  ;;  %v8615_v30 = vmul.f32 -1.442695, %v13693_v12  ;;  %v10184_v27 = vunpack.c.l.bf16 %v13713_v32  ;;  %v5978_v7 = vpop.f32.mrf.mxu1 }
 0x1c5   : > { %v10988_v18 = vpop.eup %10987  ;;  %v9883_v49 = vld [vmem:[#allocation2 + $0xc8] sm:$0xff]  ;;  %v3708_v45 = vsel %vm13661_vm4, %v3707_v13, %v3703_v25  ;;  %v4104_v33 = vpack.c.bf16 %v3976_v37, %v3976_v37  ;;  %v2483_v28 = vmul.f32 %v10986_v58, %v2482_v36  ;;  %vm2500_vm10 = vweird.f32 %v13686_v22  ;;  %vm17675_vm4 = vmmov %vm17661_vm0 }
 0x1c6   : > { %v10990_v8 = vpop.eup %10989  ;;  %v3977_v23 = vmul.f32 %v3708_v45, %v13540_v44  ;;  %v2506_v5 = vand.u32 2147483648, %v13686_v22  ;;  %v7422_v20 = vadd.f32 %v13411_v9, %v7290_v40  ;;  %v13740_v21 = vadd.f32 1.0, %v10988_v18  ;;  %9674 = vmatmul.msk.bf16.gmra.mxu2 %vm17671_vm14, %v9883_v49  ;;  %vm17680_vm6 = vmmov %vm17675_vm4 }
 0x1c7   : > { %v10992_v42 = vpop.eup %10991  ;;  %4267 = vst.msk [vmem:[#allocation2 + $0x210] sm:$0xf] %vm17672_vm15, %v4104_v33  ;;  %v2484_v38 = vadd.f32 %v10986_v58, %v2483_v28  ;;  %vm13744_vm3 = vcmp.eq.f32.partialorder %v2504_v43, 8.507059e+37  ;;  %v5976_v61 = vadd.f32 %v5975_v46, %v5110_v11  ;;  %10993 = vpow2.f32 %v8615_v30  ;;  %v13797_v28 = vpop.f32.mrf.mxu3 }
 0x1c8   : > { %v4105_v31 = vpack.c.bf16 %v3977_v23, %v3977_v23  ;;  %v2496_v3 = vmul.f32 %v10992_v42, %v13686_v22  ;;  %v7575_v13 = vadd.f32 %v13425_v10, %v7422_v20  ;;  %v13750_v57 = vadd.f32 1.0, %v10990_v8 }
 0x1c9   : > { %v2488_v26 = vsel %vm13734_vm13, %v10986_v58, %v2484_v38  ;;  %vm2501_vm2 = vweird.f32 %v10992_v42  ;;  %v7291_v56 = vadd.f32 %v6978_v4, %v5976_v61  ;;  %10995 = vrcp.f32 %v13740_v21 }
 0x1ca   : > { %4268 = vst.msk [vmem:[#allocation2 + $0x214] sm:$0xf] %vm17675_vm4, %v4105_v31  ;;  %v2493_v55 = vsel %vm13705_vm8, %v2492_v41, %v2488_v26  ;;  %v2497_v48 = vsub.f32 1.0, %v2496_v3  ;;  %v7702_v6 = vadd.f32 %v13639_v59, %v7575_v13  ;;  %v7836_v15 = vmul.f32 %v7575_v13, %v7575_v13  ;;  %vm13768_vm0 = vmor %vm2500_vm10, %vm2501_vm2 }
 0x1cb   : > { %v3896_v52 = vmul.f32 %v2493_v55, %v13575_v60  ;;  %v7423_v62 = vadd.f32 %v13411_v9, %v7291_v56  ;;  %v3719_v35 = vand.u32 2147483647, %v13740_v21  ;;  %v8616_v17 = vmul.f32 -1.442695, %v13723_v34  ;;  %vm17681_vm8 = vmmov %vm17652_vm9 }
 0x1cc   : > { %v2498_v58 = vmul.f32 %v10992_v42, %v2497_v48  ;;  %v2507_v1 = vor.u32 1.1754944e-38, %v2506_v5  ;;  %v7963_v0 = vadd.f32 %v13650_v29, %v7836_v15  ;;  %10997 = vrcp.f32 %v13750_v57  ;;  %vm17684_vm10 = vmmov %vm17675_vm4  ;;  %v9750_v48 = vld [vmem:[#allocation2 + $0x60] sm:$0xff] }
 0x1cd   : > { %v10994_v63 = vpop.eup %10993  ;;  %v4024_v59 = vpack.c.bf16 %v3896_v52, %v3896_v52  ;;  %v7576_v50 = vadd.f32 %v13425_v10, %v7423_v62  ;;  %v13773_v54 = vadd.f32 %v5978_v7, %v5113_v39  ;;  %v10185_v47 = vunpack.c.h.bf16 %v13713_v32  ;;  %v10537_v32 = vld [vmem:[%s11703_s17 + $0xa0] sm:$0xff]   ;;  %v6981_v52 = vpop.f32.mrf.mxu2  ;;  %vm17691_vm2 = vmmov %vm17681_vm8 }
 0x1ce   : > { %v2499_v29 = vadd.f32 %v10992_v42, %v2498_v58  ;;  %vm3715_vm1 = vweird.f32 %v13740_v21  ;;  %vm13777_vm5 = vcmp.eq.f32.partialorder %v3719_v35, 8.507059e+37  ;;  %v3721_v22 = vand.u32 2147483648, %v13740_v21  ;;  %v9818_v62 = vld [vmem:[#allocation2 + $0xa0] sm:$0xff]  ;;  %9333 = vmatmul.msk.bf16.gmra.mxu1 %vm17691_vm2, %v9750_v48  ;;  %vm17692_vm4 = vmmov %vm17691_vm2 }
 0x1cf   : > { %v10996_v41 = vpop.eup %10995  ;;  %4187 = vst.msk [vmem:[#allocation2 + $0xd0] sm:$0xf] %vm17680_vm6, %v4024_v59  ;;  %v13783_v46 = vadd.f32 %v7702_v6, %v7576_v50  ;;  %v7837_v11 = vmul.f32 %v7576_v50, %v7576_v50  ;;  %v10211_v37 = vpack.c.bf16 %v7576_v50, %v7575_v13  ;;  %10999 = vpow2.f32 %v8616_v17  ;;  %8997 = vmatmul.msk.bf16.gmra.mxu0 %vm17692_vm4, %v9818_v62 }
 0x1d0   : > { %v2503_v36 = vsel %vm13768_vm0, %v10992_v42, %v2499_v29  ;;  %v3711_v43 = vmul.f32 %v10996_v41, %v13740_v21  ;;  %v3734_v40 = vand.u32 2147483647, %v13750_v57  ;;  %v3736_v25 = vand.u32 2147483648, %v13750_v57 }
 0x1d1   : > { %v9864_v30 = vld [vmem:[#allocation2 + $0x210] sm:$0xff]  ;;  %v2508_v18 = vsel %vm13744_vm3, %v2507_v1, %v2503_v36  ;;  %v13792_v49 = vadd.f32 %v7963_v0, %v7837_v11  ;;  %10582 = vst [vmem:[%s13495_s14 + $0x10] sm:$0xff] %v10211_v37   ;;  %vm3716_vm7 = vweird.f32 %v10996_v41  ;;  %v13795_v45 = vadd.f32 1.0, %v10994_v63  ;;  %v5115_v11 = vpop.f32.mrf.mxu0  ;;  %v10578_v37 = vld [vmem:[%s11703_s17 + $0x1e8] sm:$0xff]  }
 0x1d2   : > { %v10998_v33 = vpop.eup %10997  ;;  %v3897_v8 = vmul.f32 %v2508_v18, %v13589_v51  ;;  %v3712_v23 = vsub.f32 1.0, %v3711_v43  ;;  %v1288_v19 = vmul.f32 %v13621_v24, %v10184_v27  ;;  %v1289_v5 = vmul.f32 %v13621_v24, %v10185_v47  ;;  %9043 = vmatmul.msk.bf16.gmra.mxu3 %vm17681_vm8, %v9864_v30  ;;  %vm13814_vm11 = vmor %vm3715_vm1, %vm3716_vm7  ;;  %v5980_v18 = vpop.f32.mrf.mxu1 }
 0x1d3   : > { %v3722_v20 = vor.u32 1.1754944e-38, %v3721_v22  ;;  %v3726_v42 = vmul.f32 %v10998_v33, %v13750_v57  ;;  %vm3730_vm9 = vweird.f32 %v13750_v57  ;;  %11001 = vrcp.f32 %v13795_v45  ;;  %vm17695_vm7 = vmmov %vm17691_vm2 }
 0x1d4   : > { %v4025_v38 = vpack.c.bf16 %v3897_v8, %v3897_v8  ;;  %v3713_v44 = vmul.f32 %v10996_v41, %v3712_v23  ;;  %v2519_v51 = vand.u32 2147483647, %v13795_v45  ;;  %v2521_v61 = vand.u32 2147483648, %v13795_v45 }
 0x1d5   : > { %v11000_v31 = vpop.eup %10999  ;;  %v3727_v3 = vsub.f32 1.0, %v3726_v42  ;;  %vm3731_vm12 = vweird.f32 %v10998_v33  ;;  %v13819_v13 = vadd.f32 %v13572_v53, %v1288_v19  ;;  %v13822_v4 = vadd.f32 %v13572_v53, %v1289_v5 }
 0x1d6   : > { %4188 = vst.msk [vmem:[#allocation2 + $0xd4] sm:$0xf] %vm17684_vm10, %v4025_v38  ;;  %v3714_v26 = vadd.f32 %v10996_v41, %v3713_v44  ;;  %vm13825_vm13 = vcmp.eq.f32.partialorder %v3734_v40, 8.507059e+37  ;;  %v3737_v21 = vor.u32 1.1754944e-38, %v3736_v25  ;;  %v13829_v55 = vadd.f32 1.0, %v11000_v31  ;;  %vm13839_vm15 = vmor %vm3730_vm9, %vm3731_vm12  ;;  %v10579_v38 = vld [vmem:[%s11703_s17 + $0x1f0] sm:$0xff]  }
 0x1d7   : > { %v3728_v6 = vmul.f32 %v10998_v33, %v3727_v3  ;;  %vm2515_vm14 = vweird.f32 %v13795_v45  ;;  %v13832_v15 = vor.u32 1.1754944e-38, %v2521_v61  ;;  %v10024_v35 = vunpack.c.l.bf16 %v10537_v32  ;;  %v6983_v61 = vpop.f32.mrf.mxu2  ;;  %vm17698_vm9 = vmmov %vm17680_vm6 }
 0x1d8   : > { %v3718_v17 = vsel %vm13814_vm11, %v10996_v41, %v3714_v26  ;;  %vm13843_vm3 = vcmp.eq.f32.partialorder %v2519_v51, 8.507059e+37  ;;  %11003 = vrcp.f32 %v13829_v55  ;;  %v8697_v0 = vmul.f32 -1.442695, %v13819_v13  ;;  %vm17701_vm10 = vmmov %vm17680_vm6 }
 0x1d9   : > { %v8698_v7 = vmul.f32 -1.442695, %v13822_v4  ;;  %v11002_v39 = vpop.eup %11001  ;;  %v3723_v57 = vsel %vm13777_vm5, %v3722_v20, %v3718_v17  ;;  %v3729_v63 = vadd.f32 %v10998_v33, %v3728_v6  ;;  %v2534_v60 = vand.u32 2147483647, %v13829_v55 }
 0x1da   : > { %v7292_v59 = vadd.f32 %v6981_v52, %v13773_v54  ;;  %v3978_v50 = vmul.f32 %v3723_v57, %v13666_v14  ;;  %v2511_v47 = vmul.f32 %v11002_v39, %v13795_v45  ;;  %vm2530_vm0 = vweird.f32 %v13829_v55  ;;  %v13864_v54 = vpop.f32.mrf.mxu3 }
 0x1db   : > { %v10025_v29 = vunpack.c.h.bf16 %v10537_v32  ;;  %v3733_v22 = vsel %vm13839_vm15, %v10998_v33, %v3729_v63  ;;  %vm2516_vm1 = vweird.f32 %v11002_v39  ;;  %v2536_v2 = vand.u32 2147483648, %v13829_v55 }
 0x1dc   : > { %v7424_v41 = vadd.f32 %v13411_v9, %v7292_v59  ;;  %v3738_v14 = vsel %vm13825_vm13, %v3737_v21, %v3733_v22  ;;  %v4106_v36 = vpack.c.bf16 %v3978_v50, %v3978_v50  ;;  %v2512_v43 = vsub.f32 1.0, %v2511_v47  ;;  %vm13881_vm8 = vmor %vm2515_vm14, %vm2516_vm1  ;;  %v5983_v22 = vpop.f32.mrf.mxu1 }
 0x1dd   : > { %11005 = vpow2.f32 %v8697_v0  ;;  %v9884_v40 = vld [vmem:[#allocation2 + $0xd0] sm:$0xff]  ;;  %v3979_v25 = vmul.f32 %v3738_v14, %v13670_v16  ;;  %vm13869_vm5 = vcmp.eq.f32.partialorder %v2534_v60, 8.507059e+37  ;;  %v1208_v8 = vmul.f32 %v13621_v24, %v10024_v35  ;;  %vm17702_vm14 = vmmov %vm17691_vm2 }
 0x1de   : > { %v7577_v33 = vadd.f32 %v13425_v10, %v7424_v41  ;;  %11007 = vpow2.f32 %v8698_v7  ;;  %v11004_v23 = vpop.eup %11003  ;;  %4269 = vst.msk [vmem:[#allocation2 + $0x218] sm:$0xf] %vm17680_vm6, %v4106_v36  ;;  %v2513_v19 = vmul.f32 %v11002_v39, %v2512_v43  ;;  %v5981_v5 = vadd.f32 %v5980_v18, %v5115_v11  ;;  %9675 = vmatmul.msk.bf16.gmra.mxu2 %vm17695_vm7, %v9884_v40  ;;  %v10538_v36 = vld [vmem:[%s11703_s17 + $0xa8] sm:$0xff]   ;;  %vm17705_vm2 = vmmov %vm17680_vm6 }
 0x1df   : > { %v1209_v20 = vmul.f32 %v13621_v24, %v10025_v29  ;;  %v10188_v42 = vunpack.c.l.bf16 %v10578_v37  ;;  %v4107_v16 = vpack.c.bf16 %v3979_v25, %v3979_v25  ;;  %v2526_v44 = vmul.f32 %v11004_v23, %v13829_v55 }
 0x1e0   : > { %v7704_v51 = vadd.f32 %v13783_v46, %v7577_v33  ;;  %v10189_v32 = vunpack.c.h.bf16 %v10578_v37  ;;  %v2514_v31 = vadd.f32 %v11002_v39, %v2513_v19  ;;  %v2537_v27 = vor.u32 1.1754944e-38, %v2536_v2  ;;  %v5118_v2 = vpop.f32.mrf.mxu0 }
 0x1e1   : > { %v7838_v3 = vmul.f32 %v7577_v33, %v7577_v33  ;;  %v7293_v26 = vadd.f32 %v6983_v61, %v5981_v5  ;;  %4270 = vst.msk [vmem:[#allocation2 + $0x21c] sm:$0xf] %vm17698_vm9, %v4107_v16  ;;  %v2527_v56 = vsub.f32 1.0, %v2526_v44  ;;  %vm2531_vm11 = vweird.f32 %v11004_v23 }
 0x1e2   : > { %v13889_v45 = vadd.f32 %v13572_v53, %v1208_v8  ;;  %v13892_v21 = vadd.f32 %v13572_v53, %v1209_v20  ;;  %v2518_v46 = vsel %vm13881_vm8, %v11002_v39, %v2514_v31  ;;  %v1290_v62 = vmul.f32 %v13621_v24, %v10188_v42  ;;  %vm13907_vm12 = vmor %vm2530_vm0, %vm2531_vm11  ;;  %v13919_v60 = vpop.f32.mrf.mxu3 }
 0x1e3   : > { %v11006_v48 = vpop.eup %11005  ;;  %v7965_v6 = vadd.f32 %v13792_v49, %v7838_v3  ;;  %v7425_v52 = vadd.f32 %v13411_v9, %v7293_v26  ;;  %v2523_v17 = vsel %vm13843_vm3, %v13832_v15, %v2518_v46  ;;  %v2528_v58 = vmul.f32 %v11004_v23, %v2527_v56  ;;  %vm17712_vm8 = vmmov %vm17695_vm7 }
 0x1e4   : > { %v11008_v35 = vpop.eup %11007  ;;  %v13902_v0 = vadd.f32 1.0, %v11006_v48  ;;  %v1291_v7 = vmul.f32 %v13621_v24, %v10189_v32  ;;  %v3898_v9 = vmul.f32 %v2523_v17, %v13693_v12  ;;  %v8617_v1 = vmul.f32 -1.442695, %v13889_v45  ;;  %vm17713_vm11 = vmmov %vm17695_vm7 }
 0x1e5   : > { %v7578_v49 = vadd.f32 %v13425_v10, %v7425_v52  ;;  %v13913_v57 = vadd.f32 1.0, %v11008_v35  ;;  %v2529_v15 = vadd.f32 %v11004_v23, %v2528_v58  ;;  %v8618_v55 = vmul.f32 -1.442695, %v13892_v21 }
 0x1e6   : > { %11009 = vrcp.f32 %v13902_v0  ;;  %v3749_v63 = vand.u32 2147483647, %v13902_v0  ;;  %v4026_v59 = vpack.c.bf16 %v3898_v9, %v3898_v9  ;;  %v13931_v14 = vadd.f32 %v5983_v22, %v5118_v2 }
 0x1e7   : > { %v13921_v50 = vadd.f32 %v7704_v51, %v7578_v49  ;;  %v7839_v12 = vmul.f32 %v7578_v49, %v7578_v49  ;;  %v10216_v47 = vpack.c.bf16 %v7578_v49, %v7577_v33  ;;  %v2533_v29 = vsel %vm13907_vm12, %v11004_v23, %v2529_v15  ;;  %v9751_v49 = vld [vmem:[#allocation2 + $0x68] sm:$0xff] }
 0x1e8   : > { %11011 = vrcp.f32 %v13913_v57  ;;  %v9865_v41 = vld [vmem:[#allocation2 + $0x218] sm:$0xff]  ;;  %v2538_v11 = vsel %vm13869_vm5, %v2537_v27, %v2533_v29  ;;  %4189 = vst.msk [vmem:[#allocation2 + $0xd8] sm:$0xf] %vm17701_vm10, %v4026_v59  ;;  %vm3745_vm13 = vweird.f32 %v13902_v0  ;;  %v3751_v40 = vand.u32 2147483648, %v13902_v0  ;;  %9334 = vmatmul.msk.bf16.gmra.mxu1 %vm17695_vm7, %v9751_v49 }
 0x1e9   : > { %v13929_v37 = vadd.f32 %v7965_v6, %v7839_v12  ;;  %v3899_v43 = vmul.f32 %v2538_v11, %v13723_v34  ;;  %10583 = vst [vmem:[%s13495_s14 + $0x18] sm:$0xff] %v10216_v47   ;;  %11013 = vpow2.f32 %v8617_v1  ;;  %9044 = vmatmul.msk.bf16.gmra.mxu3 %vm17702_vm14, %v9865_v41  ;;  %vm13939_vm15 = vcmp.eq.f32.partialorder %v3749_v63, 8.507059e+37  ;;  %v9819_v1 = vld [vmem:[#allocation2 + $0xa8] sm:$0xff]  ;;  %v13989_v12 = vld [vmem:[%s11703_s17 + $0xb0] sm:$0xff]   ;;  %vm17718_vm14 = vmmov %vm17705_vm2 }
 0x1ea   : > { %vm3760_vm3 = vweird.f32 %v13913_v57  ;;  %11015 = vpow2.f32 %v8618_v55  ;;  %v13945_v30 = vadd.f32 %v13572_v53, %v1290_v62  ;;  %v13948_v34 = vadd.f32 %v13572_v53, %v1291_v7  ;;  %v13966_v17 = vpop.f32.mrf.mxu3  ;;  %8998 = vmatmul.msk.bf16.gmra.mxu0 %vm17712_vm8, %v9819_v1 }
 0x1eb   : > { %v4027_v33 = vpack.c.bf16 %v3899_v43, %v3899_v43  ;;  %v3764_v8 = vand.u32 2147483647, %v13913_v57  ;;  %v10028_v23 = vunpack.c.l.bf16 %v10538_v36  ;;  %v10029_v19 = vunpack.c.h.bf16 %v10538_v36 }
 0x1ec   : > { %v11010_v18 = vpop.eup %11009  ;;  %v3766_v20 = vand.u32 2147483648, %v13913_v57  ;;  %v8699_v42 = vmul.f32 -1.442695, %v13945_v30  ;;  %v8700_v16 = vmul.f32 -1.442695, %v13948_v34  ;;  %v10192_v32 = vunpack.c.l.bf16 %v10579_v38 }
 0x1ed   : > { %v3741_v5 = vmul.f32 %v11010_v18, %v13902_v0  ;;  %4190 = vst.msk [vmem:[#allocation2 + $0xdc] sm:$0xf] %vm17705_vm2, %v4027_v33  ;;  %vm3746_vm4 = vweird.f32 %v11010_v18  ;;  %v1210_v51 = vmul.f32 %v13621_v24, %v10028_v23  ;;  %v1211_v61 = vmul.f32 %v13621_v24, %v10029_v19  ;;  %v6986_v0 = vpop.f32.mrf.mxu2  ;;  %v5120_v19 = vpop.f32.mrf.mxu0 }
 0x1ee   : > { %v11012_v44 = vpop.eup %11011  ;;  %11017 = vpow2.f32 %v8699_v42  ;;  %v10193_v3 = vunpack.c.h.bf16 %v10579_v38  ;;  %v3752_v56 = vor.u32 1.1754944e-38, %v3751_v40  ;;  %v1292_v35 = vmul.f32 %v13621_v24, %v10192_v32  ;;  %vm13971_vm1 = vmor %vm3745_vm13, %vm3746_vm4  ;;  %v5985_v38 = vpop.f32.mrf.mxu1 }
 0x1ef   : > { %v3742_v31 = vsub.f32 1.0, %v3741_v5  ;;  %v3756_v27 = vmul.f32 %v11012_v44, %v13913_v57  ;;  %v11014_v26 = vpop.eup %11013  ;;  %vm3761_vm0 = vweird.f32 %v11012_v44  ;;  %11019 = vpow2.f32 %v8700_v16 }
 0x1f0   : > { %v13961_v48 = vadd.f32 %v13572_v53, %v1210_v51  ;;  %v11016_v46 = vpop.eup %11015  ;;  %v13963_v62 = vadd.f32 1.0, %v11014_v26  ;;  %vm13975_vm5 = vcmp.eq.f32.partialorder %v3764_v8, 8.507059e+37  ;;  %v3767_v39 = vor.u32 1.1754944e-38, %v3766_v20  ;;  %vm13994_vm6 = vmor %vm3760_vm3, %vm3761_vm0  ;;  %v14030_v51 = vld [vmem:[%s17617_s4] ss:$0 sm:$0xff] }
 0x1f1   : > { %v3743_v6 = vmul.f32 %v11010_v18, %v3742_v31  ;;  %v3757_v52 = vsub.f32 1.0, %v3756_v27  ;;  %v13979_v9 = vadd.f32 1.0, %v11016_v46  ;;  %v13982_v15 = vadd.f32 %v13572_v53, %v1211_v61  ;;  %vm17719_vm3 = vmmov %vm17705_vm2 }
 0x1f2   : > { %11021 = vrcp.f32 %v13963_v62  ;;  %v13986_v59 = vmul.f32 %v13621_v24, %v10193_v3  ;;  %v2549_v29 = vand.u32 2147483647, %v13963_v62  ;;  %v2551_v22 = vand.u32 2147483648, %v13963_v62  ;;  %v14047_v58 = vpop.f32.mrf.mxu3 }
 0x1f3   : > { %v3744_v63 = vadd.f32 %v11010_v18, %v3743_v6  ;;  %v3758_v55 = vmul.f32 %v11012_v44, %v3757_v52  ;;  %11023 = vrcp.f32 %v13979_v9  ;;  %v8619_v2 = vmul.f32 -1.442695, %v13961_v48 }
 0x1f4   : > { %v11018_v41 = vpop.eup %11017  ;;  %v9885_v11 = vld [vmem:[#allocation2 + $0xd8] sm:$0xff]  ;;  %v2564_v43 = vand.u32 2147483647, %v13979_v9  ;;  %v14008_v40 = vadd.f32 %v13572_v53, %v1292_v35  ;;  %vm2545_vm9 = vweird.f32 %v13963_v62  ;;  %v7294_v23 = vadd.f32 %v6986_v0, %v13931_v14 }
 0x1f5   : > { %v3748_v57 = vsel %vm13971_vm1, %v11010_v18, %v3744_v63  ;;  %v3759_v36 = vadd.f32 %v11012_v44, %v3758_v55  ;;  %v11020_v33 = vpop.eup %11019  ;;  %v10032_v5 = vunpack.c.l.bf16 %v13989_v12  ;;  %9676 = vmatmul.msk.bf16.gmra.mxu2 %vm17713_vm11, %v9885_v11  ;;  %vm2560_vm12 = vweird.f32 %v13979_v9  ;;  %v6988_v35 = vpop.f32.mrf.mxu2 }
 0x1f6   : > { %v3753_v8 = vsel %vm13939_vm15, %v3752_v56, %v3748_v57  ;;  %v2566_v42 = vand.u32 2147483648, %v13979_v9  ;;  %vm14023_vm10 = vcmp.eq.f32.partialorder %v2549_v29, 8.507059e+37  ;;  %v2552_v14 = vor.u32 1.1754944e-38, %v2551_v22  ;;  %v5123_v27 = vpop.f32.mrf.mxu0 }
 0x1f7   : > { %v3763_v18 = vsel %vm13994_vm6, %v11012_v44, %v3759_v36  ;;  %v3980_v20 = vmul.f32 %v3753_v8, %v13819_v13  ;;  %v7426_v13 = vadd.f32 %v14030_v51, %v7294_v23  ;;  %v14033_v44 = vadd.f32 1.0, %v11018_v41 }
 0x1f8   : > { %v3768_v25 = vsel %vm13975_vm5, %v3767_v39, %v3763_v18  ;;  %v11022_v61 = vpop.eup %11021  ;;  %vm14036_vm13 = vcmp.eq.f32.partialorder %v2564_v43, 8.507059e+37  ;;  %v5986_v3 = vadd.f32 %v5985_v38, %v5120_v19  ;;  %v14042_v6 = vadd.f32 1.0, %v11020_v33 }
 0x1f9   : > { %v3981_v32 = vmul.f32 %v3768_v25, %v13822_v4  ;;  %v4108_v31 = vpack.c.bf16 %v3980_v20, %v3980_v20  ;;  %v11024_v26 = vpop.eup %11023  ;;  %v2541_v56 = vmul.f32 %v11022_v61, %v13963_v62  ;;  %v7579_v46 = vadd.f32 %v13425_v10, %v7426_v13 }
 0x1fa   : > { %11025 = vrcp.f32 %v14033_v44  ;;  %vm2546_vm15 = vweird.f32 %v11022_v61  ;;  %v2556_v4 = vmul.f32 %v11024_v26, %v13979_v9  ;;  %v7295_v1 = vadd.f32 %v6988_v35, %v5986_v3 }
 0x1fb   : > { %v4109_v52 = vpack.c.bf16 %v3981_v32, %v3981_v32  ;;  %4271 = vst.msk [vmem:[#allocation2 + $0x220] sm:$0xf] %vm17718_vm14, %v4108_v31  ;;  %11027 = vpow2.f32 %v8619_v2  ;;  %v2542_v7 = vsub.f32 1.0, %v2541_v56  ;;  %v7706_v39 = vadd.f32 %v13921_v50, %v7579_v46  ;;  %vm14059_vm4 = vmor %vm2545_vm9, %vm2546_vm15 }
 0x1fc   : > { %v7840_v49 = vmul.f32 %v7579_v46, %v7579_v46  ;;  %v2557_v63 = vsub.f32 1.0, %v2556_v4  ;;  %vm2561_vm2 = vweird.f32 %v11024_v26  ;;  %v3779_v55 = vand.u32 2147483647, %v14033_v44  ;;  %vm17726_vm9 = vmmov %vm17713_vm11 }
 0x1fd   : > { %4272 = vst.msk [vmem:[#allocation2 + $0x224] sm:$0xf] %vm17719_vm3, %v4109_v52  ;;  %v3781_v0 = vand.u32 2147483648, %v14033_v44  ;;  %v2543_v47 = vmul.f32 %v11022_v61, %v2542_v7  ;;  %v7427_v22 = vadd.f32 %v14030_v51, %v7295_v1  ;;  %11029 = vrcp.f32 %v14042_v6  ;;  %vm14070_vm5 = vmor %vm2560_vm12, %vm2561_vm2 }
 0x1fe   : > { %v7967_v29 = vadd.f32 %v13929_v37, %v7840_v49  ;;  %v2558_v2 = vmul.f32 %v11024_v26, %v2557_v63  ;;  %v2567_v41 = vor.u32 1.1754944e-38, %v2566_v42  ;;  %vm3775_vm0 = vweird.f32 %v14033_v44  ;;  %v5988_v49 = vpop.f32.mrf.mxu1  ;;  %vm17729_vm12 = vmmov %vm17719_vm3 }
 0x1ff   : > { %vm14064_vm1 = vcmp.eq.f32.partialorder %v3779_v55, 8.507059e+37  ;;  %v2544_v57 = vadd.f32 %v11022_v61, %v2543_v47  ;;  %v7580_v62 = vadd.f32 %v13425_v10, %v7427_v22  ;;  %v3782_v43 = vor.u32 1.1754944e-38, %v3781_v0 }
 0x200   : > { %v11026_v37 = vpop.eup %11025  ;;  %vm3790_vm6 = vweird.f32 %v14042_v6  ;;  %v2559_v8 = vadd.f32 %v11024_v26, %v2558_v2  ;;  %v3794_v19 = vand.u32 2147483647, %v14042_v6  ;;  %v8620_v18 = vmul.f32 -1.442695, %v13982_v15 }
 0x201   : > { %v11028_v33 = vpop.eup %11027  ;;  %v3771_v23 = vmul.f32 %v11026_v37, %v14033_v44  ;;  %v2548_v9 = vsel %vm14059_vm4, %v11022_v61, %v2544_v57  ;;  %v14081_v20 = vadd.f32 %v7706_v39, %v7580_v62  ;;  %v7841_v42 = vmul.f32 %v7580_v62, %v7580_v62  ;;  %vm17738_vm4 = vmmov %vm17726_vm9 }
 0x202   : > { %v10221_v25 = vpack.c.bf16 %v7580_v62, %v7579_v46  ;;  %v2553_v38 = vsel %vm14023_vm10, %v2552_v14, %v2548_v9  ;;  %v2563_v13 = vsel %vm14070_vm5, %v11024_v26, %v2559_v8  ;;  %vm3776_vm7 = vweird.f32 %v11026_v37  ;;  %v14096_v26 = vpop.f32.mrf.mxu3  ;;  %vm17730_vm10 = vmmov %vm17719_vm3 }
 0x203   : > { %v3772_v32 = vsub.f32 1.0, %v3771_v23  ;;  %v11030_v31 = vpop.eup %11029  ;;  %v2568_v56 = vsel %vm14036_vm13, %v2567_v41, %v2563_v13  ;;  %v3900_v52 = vmul.f32 %v2553_v38, %v13889_v45  ;;  %v14090_v61 = vadd.f32 %v7967_v29, %v7841_v42  ;;  %vm14102_vm11 = vmor %vm3775_vm0, %vm3776_vm7  ;;  %v14156_v38 = vld [vmem:[%s11737_s12] ss:$0 sm:$0xff] }
 0x204   : > { %v9866_v3 = vld [vmem:[#allocation2 + $0x220] sm:$0xff]  ;;  %10584 = vst [vmem:[%s13495_s14 + $0x20] sm:$0xff] %v10221_v25   ;;  %v3796_v46 = vand.u32 2147483648, %v14042_v6  ;;  %v3901_v16 = vmul.f32 %v2568_v56, %v13892_v21  ;;  %v3786_v4 = vmul.f32 %v11030_v31, %v14042_v6  ;;  %vm3791_vm8 = vweird.f32 %v11030_v31  ;;  %v10580_v6 = vld [vmem:[%s11703_s17 + $0x1f8] sm:$0xff]   ;;  %v6991_v25 = vpop.f32.mrf.mxu2  ;;  %vm17737_vm2 = vmmov %vm17730_vm10 }
 0x205   : > { %v3773_v14 = vmul.f32 %v11026_v37, %v3772_v32  ;;  %9045 = vmatmul.msk.bf16.gmra.mxu3 %vm17726_vm9, %v9866_v3  ;;  %v4028_v35 = vpack.c.bf16 %v3900_v52, %v3900_v52  ;;  %11031 = vpow2.f32 %v8620_v18  ;;  %v14106_v7 = vadd.f32 1.0, %v11028_v33  ;;  %vm14126_vm13 = vmor %vm3790_vm6, %vm3791_vm8  ;;  %v14143_v33 = vld [vmem:[%s11703_s17 + $0xb8] sm:$0xff]   ;;  %v9820_v18 = vld [vmem:[#allocation2 + $0xb0] sm:$0xff] }
 0x206   : > { %v14110_v21 = vadd.f32 %v13572_v53, %v13986_v59  ;;  %v4029_v39 = vpack.c.bf16 %v3901_v16, %v3901_v16  ;;  %v3787_v63 = vsub.f32 1.0, %v3786_v4  ;;  %v8701_v55 = vmul.f32 -1.442695, %v14008_v40  ;;  %vm17739_vm0 = vmmov %vm17738_vm4 }
 0x207   : > { %v3774_v1 = vadd.f32 %v11026_v37, %v3773_v14  ;;  %4191 = vst.msk [vmem:[#allocation2 + $0xe0] sm:$0xf] %vm17729_vm12, %v4028_v35  ;;  %11033 = vrcp.f32 %v14106_v7  ;;  %v2579_v44 = vand.u32 2147483647, %v14106_v7  ;;  %v2581_v0 = vand.u32 2147483648, %v14106_v7  ;;  %8999 = vmatmul.msk.bf16.gmra.mxu0 %vm17739_vm0, %v9820_v18  ;;  %vm17740_vm5 = vmmov %vm17739_vm0 }
 0x208   : > { %4192 = vst.msk [vmem:[#allocation2 + $0xe4] sm:$0xf] %vm17730_vm10, %v4029_v39  ;;  %v3788_v59 = vmul.f32 %v11030_v31, %v3787_v63  ;;  %11035 = vpow2.f32 %v8701_v55  ;;  %v8702_v47 = vmul.f32 -1.442695, %v14110_v21  ;;  %vm14130_vm14 = vcmp.eq.f32.partialorder %v3794_v19, 8.507059e+37  ;;  %v9752_v19 = vld [vmem:[#allocation2 + $0x70] sm:$0xff]  ;;  %v5990_v63 = vpop.f32.mrf.mxu1  ;;  %vm17741_vm6 = vmmov %vm17737_vm2 }
 0x209   : > { %v3778_v53 = vsel %vm14102_vm11, %v11026_v37, %v3774_v1  ;;  %v3797_v2 = vor.u32 1.1754944e-38, %v3796_v46  ;;  %v10033_v41 = vunpack.c.h.bf16 %v13989_v12  ;;  %v1212_v11 = vmul.f32 %v13621_v24, %v10032_v5  ;;  %9335 = vmatmul.msk.bf16.gmra.mxu1 %vm17738_vm4, %v9752_v19  ;;  %vm17751_vm4 = vmmov %vm17741_vm6 }
 0x20a   : > { %v3783_v29 = vsel %vm14064_vm1, %v3782_v43, %v3778_v53  ;;  %v3789_v37 = vadd.f32 %v11030_v31, %v3788_v59  ;;  %11037 = vpow2.f32 %v8702_v47  ;;  %v5989_v62 = vadd.f32 %v5988_v49, %v5123_v27  ;;  %v14168_v16 = vpop.f32.mrf.mxu3 }
 0x20b   : > { %v3982_v57 = vmul.f32 %v3783_v29, %v13945_v30  ;;  %v11032_v36 = vpop.eup %11031  ;;  %vm2575_vm15 = vweird.f32 %v14106_v7  ;;  %v1213_v43 = vmul.f32 %v13621_v24, %v10033_v41  ;;  %vm14149_vm3 = vcmp.eq.f32.partialorder %v2579_v44, 8.507059e+37 }
 0x20c   : > { %v3793_v8 = vsel %vm14126_vm13, %v11030_v31, %v3789_v37  ;;  %v14147_v30 = vadd.f32 1.0, %v11032_v36  ;;  %v2582_v5 = vor.u32 1.1754944e-38, %v2581_v0  ;;  %v14159_v13 = vadd.f32 %v14156_v38, %v1212_v11 }
 0x20d   : > { %v4110_v23 = vpack.c.bf16 %v3982_v57, %v3982_v57  ;;  %v11034_v9 = vpop.eup %11033  ;;  %v3798_v42 = vsel %vm14130_vm14, %v3797_v2, %v3793_v8  ;;  %v10196_v32 = vunpack.c.l.bf16 %v10580_v6  ;;  %v10197_v31 = vunpack.c.h.bf16 %v10580_v6 }
 0x20e   : > { %v11036_v3 = vpop.eup %11035  ;;  %v3983_v56 = vmul.f32 %v3798_v42, %v13948_v34  ;;  %v2571_v52 = vmul.f32 %v11034_v9, %v14106_v7  ;;  %11039 = vrcp.f32 %v14147_v30  ;;  %v10036_v46 = vunpack.c.l.bf16 %v14143_v33  ;;  %v5125_v34 = vpop.f32.mrf.mxu0 }
 0x20f   : > { %4273 = vst.msk [vmem:[#allocation2 + $0x228] sm:$0xf] %vm17737_vm2, %v4110_v23  ;;  %v9886_v14 = vld [vmem:[#allocation2 + $0xe0] sm:$0xff]  ;;  %vm2576_vm1 = vweird.f32 %v11034_v9  ;;  %v2594_v4 = vand.u32 2147483647, %v14147_v30  ;;  %v7296_v35 = vadd.f32 %v6991_v25, %v5989_v62  ;;  %v14172_v27 = vadd.f32 %v14156_v38, %v1213_v43  ;;  %v6993_v43 = vpop.f32.mrf.mxu2  ;;  %vm17750_vm2 = vmmov %vm17739_vm0 }
 0x210   : > { %v11038_v45 = vpop.eup %11037  ;;  %v4111_v39 = vpack.c.bf16 %v3983_v56, %v3983_v56  ;;  %v2572_v49 = vsub.f32 1.0, %v2571_v52  ;;  %v2596_v1 = vand.u32 2147483648, %v14147_v30  ;;  %v14175_v55 = vadd.f32 1.0, %v11036_v3  ;;  %9677 = vmatmul.msk.bf16.gmra.mxu2 %vm17740_vm5, %v9886_v14  ;;  %vm14191_vm8 = vmor %vm2575_vm15, %vm2576_vm1 }
 0x211   : > { %v7428_v44 = vadd.f32 %v14030_v51, %v7296_v35  ;;  %v14179_v0 = vadd.f32 1.0, %v11038_v45  ;;  %v1294_v53 = vmul.f32 %v13621_v24, %v10196_v32  ;;  %v14183_v59 = vmul.f32 %v13621_v24, %v10197_v31  ;;  %v5993_v45 = vpop.f32.mrf.mxu1 }
 0x212   : > { %4274 = vst.msk [vmem:[#allocation2 + $0x22c] sm:$0xf] %vm17741_vm6, %v4111_v39  ;;  %v2573_v47 = vmul.f32 %v11034_v9, %v2572_v49  ;;  %vm2590_vm7 = vweird.f32 %v14147_v30  ;;  %v5991_v29 = vadd.f32 %v5990_v63, %v5125_v34  ;;  %11041 = vrcp.f32 %v14175_v55  ;;  %vm17758_vm6 = vmmov %vm17751_vm4 }
 0x213   : > { %vm14195_vm9 = vcmp.eq.f32.partialorder %v2594_v4, 8.507059e+37  ;;  %v7581_v24 = vadd.f32 %v13425_v10, %v7428_v44  ;;  %v3809_v2 = vand.u32 2147483647, %v14175_v55  ;;  %v3811_v41 = vand.u32 2147483648, %v14175_v55  ;;  %v14221_v4 = vpop.f32.mrf.mxu3 }
 0x214   : > { %11043 = vrcp.f32 %v14179_v0  ;;  %v11040_v37 = vpop.eup %11039  ;;  %v2574_v57 = vadd.f32 %v11034_v9, %v2573_v47  ;;  %v2597_v11 = vor.u32 1.1754944e-38, %v2596_v1  ;;  %vm3805_vm11 = vweird.f32 %v14175_v55 }
 0x215   : > { %v3826_v7 = vand.u32 2147483648, %v14179_v0  ;;  %v2586_v6 = vmul.f32 %v11040_v37, %v14147_v30  ;;  %v7708_v36 = vadd.f32 %v14081_v20, %v7581_v24  ;;  %v7842_v62 = vmul.f32 %v7581_v24, %v7581_v24 }
 0x216   : > { %vm3820_vm12 = vweird.f32 %v14179_v0  ;;  %v2578_v8 = vsel %vm14191_vm8, %v11034_v9, %v2574_v57  ;;  %vm2591_vm10 = vweird.f32 %v11040_v37  ;;  %v7297_v23 = vadd.f32 %v6993_v43, %v5991_v29  ;;  %v5128_v63 = vpop.f32.mrf.mxu0  ;;  %vm17760_vm8 = vmmov %vm17750_vm2 }
 0x217   : > { %v3824_v19 = vand.u32 2147483647, %v14179_v0  ;;  %v2583_v18 = vsel %vm14149_vm3, %v2582_v5, %v2578_v8  ;;  %v2587_v42 = vsub.f32 1.0, %v2586_v6  ;;  %v7969_v25 = vadd.f32 %v14090_v61, %v7842_v62  ;;  %vm14228_vm15 = vmor %vm2590_vm7, %vm2591_vm10 }
 0x218   : > { %vm14214_vm13 = vcmp.eq.f32.partialorder %v3809_v2, 8.507059e+37  ;;  %v3812_v20 = vor.u32 1.1754944e-38, %v3811_v41  ;;  %v11042_v31 = vpop.eup %11041  ;;  %v3902_v3 = vmul.f32 %v2583_v18, %v13961_v48  ;;  %v7429_v9 = vadd.f32 %v14030_v51, %v7297_v23  ;;  %v14275_v23 = vld [vmem:[%s11731_s23] ss:$0 sm:$0xff]  ;;  %v9821_v48 = vld [vmem:[#allocation2 + $0xb8] sm:$0xff]  ;;  %vm17759_vm7 = vmmov %vm17750_vm2 }
 0x219   : > { %v3827_v56 = vor.u32 1.1754944e-38, %v3826_v7  ;;  %v8621_v52 = vmul.f32 -1.442695, %v14159_v13  ;;  %v9867_v12 = vld [vmem:[#allocation2 + $0x228] sm:$0xff]  ;;  %v2588_v5 = vmul.f32 %v11040_v37, %v2587_v42  ;;  %v3801_v61 = vmul.f32 %v11042_v31, %v14175_v55  ;;  %9000 = vmatmul.msk.bf16.gmra.mxu0 %vm17760_vm8, %v9821_v48 }
 0x21a   : > { %v11044_v14 = vpop.eup %11043  ;;  %vm3806_vm14 = vweird.f32 %v11042_v31  ;;  %v8622_v35 = vmul.f32 -1.442695, %v14172_v27  ;;  %v4030_v34 = vpack.c.bf16 %v3902_v3, %v3902_v3  ;;  %v7582_v39 = vadd.f32 %v13425_v10, %v7429_v9  ;;  %9046 = vmatmul.msk.bf16.gmra.mxu3 %vm17750_vm2, %v9867_v12 }
 0x21b   : > { %v3816_v49 = vmul.f32 %v11044_v14, %v14179_v0  ;;  %vm3821_vm3 = vweird.f32 %v11044_v14  ;;  %v2589_v1 = vadd.f32 %v11040_v37, %v2588_v5  ;;  %v3802_v44 = vsub.f32 1.0, %v3801_v61  ;;  %vm14255_vm0 = vmor %vm3805_vm11, %vm3806_vm14  ;;  %v5995_v61 = vpop.f32.mrf.mxu1 }
 0x21c   : > { %11045 = vpow2.f32 %v8621_v52  ;;  %v14236_v30 = vadd.f32 %v14156_v38, %v1294_v53  ;;  %4193 = vst.msk [vmem:[#allocation2 + $0xe8] sm:$0xf] %vm17751_vm4, %v4030_v34  ;;  %v14239_v47 = vadd.f32 %v7708_v36, %v7582_v39  ;;  %v7843_v29 = vmul.f32 %v7582_v39, %v7582_v39  ;;  %vm14264_vm1 = vmor %vm3820_vm12, %vm3821_vm3  ;;  %v14292_v52 = vpop.f32.mrf.mxu3 }
 0x21d   : > { %v10226_v22 = vpack.c.bf16 %v7582_v39, %v7581_v24  ;;  %v3817_v2 = vsub.f32 1.0, %v3816_v49  ;;  %v2593_v41 = vsel %vm14228_vm15, %v11040_v37, %v2589_v1  ;;  %v3803_v57 = vmul.f32 %v11042_v31, %v3802_v44  ;;  %v6996_v49 = vpop.f32.mrf.mxu2  ;;  %vm17762_vm12 = vmmov %vm17751_vm4 }
 0x21e   : > { %11047 = vpow2.f32 %v8622_v35  ;;  %v14245_v7 = vadd.f32 %v14156_v38, %v14183_v59  ;;  %v2598_v53 = vsel %vm14195_vm9, %v2597_v11, %v2593_v41  ;;  %v14249_v6 = vadd.f32 %v7969_v25, %v7843_v29  ;;  %v9753_v35 = vld [vmem:[#allocation2 + $0x78] sm:$0xff]  ;;  %vm17761_vm9 = vmmov %vm17751_vm4 }
 0x21f   : > { %10585 = vst [vmem:[%s13495_s14 + $0x28] sm:$0xff] %v10226_v22   ;;  %v3818_v37 = vmul.f32 %v11044_v14, %v3817_v2  ;;  %v8703_v36 = vmul.f32 -1.442695, %v14236_v30  ;;  %v3903_v62 = vmul.f32 %v2598_v53, %v13982_v15  ;;  %v3804_v59 = vadd.f32 %v11042_v31, %v3803_v57  ;;  %9336 = vmatmul.msk.bf16.gmra.mxu1 %vm17759_vm7, %v9753_v35  ;;  %vm17767_vm15 = vmmov %vm17750_vm2 }
 0x220   : > { %v8704_v11 = vmul.f32 -1.442695, %v14245_v7  ;;  %v10037_v55 = vunpack.c.h.bf16 %v14143_v33  ;;  %vm14270_vm5 = vcmp.eq.f32.partialorder %v3824_v19, 8.507059e+37  ;;  %v1214_v15 = vmul.f32 %v14275_v23, %v10036_v46 }
 0x221   : > { %v3819_v43 = vadd.f32 %v11044_v14, %v3818_v37  ;;  %11049 = vpow2.f32 %v8703_v36  ;;  %v4031_v18 = vpack.c.bf16 %v3903_v62, %v3903_v62  ;;  %v3808_v42 = vsel %vm14255_vm0, %v11042_v31, %v3804_v59 }
 0x222   : > { %v11046_v0 = vpop.eup %11045  ;;  %11051 = vpow2.f32 %v8704_v11  ;;  %v1215_v25 = vmul.f32 %v14275_v23, %v10037_v55  ;;  %v3813_v19 = vsel %vm14214_vm13, %v3812_v20, %v3808_v42  ;;  %v14290_v33 = vadd.f32 %v14156_v38, %v1214_v15  ;;  %v14299_v20 = vld [vmem:[%s11703_s17 + $0x140] sm:$0xff]  }
 0x223   : > { %v3823_v3 = vsel %vm14264_vm1, %v11044_v14, %v3819_v43  ;;  %v14287_v9 = vadd.f32 1.0, %v11046_v0  ;;  %4194 = vst.msk [vmem:[#allocation2 + $0xec] sm:$0xf] %vm17758_vm6, %v4031_v18  ;;  %v5994_v31 = vadd.f32 %v5993_v45, %v5128_v63  ;;  %v3984_v32 = vmul.f32 %v3813_v19, %v14008_v40  ;;  %v5998_v35 = vpop.f32.mrf.mxu1  ;;  %vm17772_vm6 = vmmov %vm17759_vm7 }
 0x224   : > { %v11048_v46 = vpop.eup %11047  ;;  %v3828_v12 = vsel %vm14270_vm5, %v3827_v56, %v3823_v3  ;;  %v5130_v56 = vpop.f32.mrf.mxu0  ;;  %v8623_v40 = vmul.f32 -1.442695, %v14290_v33  ;;  %v10104_v44 = vunpack.c.l.bf16 %v14299_v20  ;;  %v10105_v41 = vunpack.c.h.bf16 %v14299_v20 }
 0x225   : > { %v3985_v14 = vmul.f32 %v3828_v12, %v14110_v21  ;;  %v14302_v5 = vadd.f32 1.0, %v11048_v46  ;;  %11053 = vrcp.f32 %v14287_v9  ;;  %v4112_v34 = vpack.c.bf16 %v3984_v32, %v3984_v32  ;;  %v14346_v3 = vpop.f32.mrf.mxu3  ;;  %v6998_v32 = vpop.f32.mrf.mxu2 }
 0x226   : > { %v2609_v39 = vand.u32 2147483647, %v14287_v9  ;;  %v2611_v45 = vand.u32 2147483648, %v14287_v9  ;;  %v14312_v21 = vadd.f32 %v14156_v38, %v1215_v25  ;;  %vm2605_vm11 = vweird.f32 %v14287_v9 }
 0x227   : > { %v11050_v1 = vpop.eup %11049  ;;  %v4113_v63 = vpack.c.bf16 %v3985_v14, %v3985_v14  ;;  %11055 = vrcp.f32 %v14302_v5  ;;  %4275 = vst.msk [vmem:[#allocation2 + $0x230] sm:$0xf] %vm17761_vm9, %v4112_v34  ;;  %v2624_v22 = vand.u32 2147483647, %v14302_v5  ;;  %v7298_v2 = vadd.f32 %v6996_v49, %v5994_v31 }
 0x228   : > { %v11052_v29 = vpop.eup %11051  ;;  %vm2620_vm10 = vweird.f32 %v14302_v5  ;;  %v2626_v57 = vand.u32 2147483648, %v14302_v5  ;;  %v14322_v53 = vadd.f32 1.0, %v11050_v1  ;;  %vm14326_vm13 = vcmp.eq.f32.partialorder %v2609_v39, 8.507059e+37 }
 0x229   : > { %4276 = vst.msk [vmem:[#allocation2 + $0x234] sm:$0xf] %vm17762_vm12, %v4113_v63  ;;  %v14324_v24 = vadd.f32 1.0, %v11052_v29  ;;  %v2612_v36 = vor.u32 1.1754944e-38, %v2611_v45  ;;  %v7430_v62 = vadd.f32 %v14030_v51, %v7298_v2  ;;  %11057 = vpow2.f32 %v8623_v40 }
 0x22a   : > { %v9887_v50 = vld [vmem:[#allocation2 + $0xe8] sm:$0xff]  ;;  %v5996_v11 = vadd.f32 %v5995_v61, %v5130_v56  ;;  %11059 = vrcp.f32 %v14322_v53  ;;  %v3841_v55 = vand.u32 2147483648, %v14322_v53  ;;  %v8624_v43 = vmul.f32 -1.442695, %v14312_v21 }
 0x22b   : > { %v11054_v59 = vpop.eup %11053  ;;  %vm14335_vm14 = vcmp.eq.f32.partialorder %v2624_v22, 8.507059e+37  ;;  %v7583_v0 = vadd.f32 %v13425_v10, %v7430_v62  ;;  %v3839_v18 = vand.u32 2147483647, %v14322_v53  ;;  %11061 = vrcp.f32 %v14324_v24  ;;  %9678 = vmatmul.msk.bf16.gmra.mxu2 %vm17767_vm15, %v9887_v50  ;;  %vm17782_vm15 = vmmov %vm17772_vm6 }
 0x22c   : > { %v2601_v8 = vmul.f32 %v11054_v59, %v14287_v9  ;;  %vm2606_vm3 = vweird.f32 %v11054_v59  ;;  %v2627_v25 = vor.u32 1.1754944e-38, %v2626_v57  ;;  %vm3835_vm2 = vweird.f32 %v14322_v53  ;;  %v5133_v34 = vpop.f32.mrf.mxu0 }
 0x22d   : > { %v11056_v42 = vpop.eup %11055  ;;  %v14344_v19 = vor.u32 1.1754944e-38, %v3841_v55  ;;  %v7710_v12 = vadd.f32 %v14239_v47, %v7583_v0  ;;  %v3854_v14 = vand.u32 2147483647, %v14324_v24  ;;  %v7844_v61 = vmul.f32 %v7583_v0, %v7583_v0  ;;  %vm14361_vm5 = vmor %vm2605_vm11, %vm2606_vm3 }
 0x22e   : > { %v2602_v46 = vsub.f32 1.0, %v2601_v8  ;;  %v2616_v31 = vmul.f32 %v11056_v42, %v14302_v5  ;;  %vm2621_vm4 = vweird.f32 %v11056_v42  ;;  %v7299_v48 = vadd.f32 %v6998_v32, %v5996_v11 }
 0x22f   : > { %vm3850_vm0 = vweird.f32 %v14324_v24  ;;  %v11058_v39 = vpop.eup %11057  ;;  %v14352_v40 = vadd.f32 %v5998_v35, %v5133_v34  ;;  %vm14354_vm1 = vcmp.eq.f32.partialorder %v3839_v18, 8.507059e+37  ;;  %11063 = vpow2.f32 %v8624_v43  ;;  %vm14386_vm8 = vmor %vm2620_vm10, %vm2621_vm4 }
 0x230   : > { %v9868_v45 = vld [vmem:[#allocation2 + $0x230] sm:$0xff]  ;;  %v2603_v49 = vmul.f32 %v11054_v59, %v2602_v46  ;;  %v2617_v56 = vsub.f32 1.0, %v2616_v31  ;;  %v11060_v47 = vpop.eup %11059  ;;  %v7971_v29 = vadd.f32 %v14249_v6, %v7844_v61  ;;  %v7431_v22 = vadd.f32 %v14030_v51, %v7299_v48 }
 0x231   : > { %v3856_v2 = vand.u32 2147483648, %v14324_v24  ;;  %v14368_v57 = vadd.f32 1.0, %v11058_v39  ;;  %v14370_v62 = vpop.eup %11061  ;;  %9047 = vmatmul.msk.bf16.gmra.mxu3 %vm17772_vm6, %v9868_v45  ;;  %v3831_v9 = vmul.f32 %v11060_v47, %v14322_v53  ;;  %vm14374_vm7 = vcmp.eq.f32.partialorder %v3854_v14, 8.507059e+37 }
 0x232   : > { %v2604_v50 = vadd.f32 %v11054_v59, %v2603_v49  ;;  %v2618_v11 = vmul.f32 %v11056_v42, %v2617_v56  ;;  %v14381_v6 = vmul.f32 %v14275_v23, %v10104_v44  ;;  %v7584_v8 = vadd.f32 %v13425_v10, %v7431_v22 }
 0x233   : > { %vm3836_vm9 = vweird.f32 %v11060_v47  ;;  %v3846_v18 = vmul.f32 %v14370_v62, %v14324_v24  ;;  %vm3851_vm11 = vweird.f32 %v14370_v62  ;;  %v3832_v31 = vsub.f32 1.0, %v3831_v9 }
 0x234   : > { %v2608_v44 = vsel %vm14361_vm5, %v11054_v59, %v2604_v50  ;;  %v2619_v46 = vadd.f32 %v11056_v42, %v2618_v11  ;;  %11065 = vrcp.f32 %v14368_v57  ;;  %v14399_v32 = vadd.f32 %v7710_v12, %v7584_v8  ;;  %vm14412_vm12 = vmor %vm3835_vm2, %vm3836_vm9  ;;  %v14418_v12 = vpop.f32.mrf.mxu3 }
 0x235   : > { %v2613_v5 = vsel %vm14326_vm13, %v2612_v36, %v2608_v44  ;;  %v7845_v14 = vmul.f32 %v7584_v8, %v7584_v8  ;;  %v10231_v61 = vpack.c.bf16 %v7584_v8, %v7583_v0  ;;  %v11064_v35 = vpop.eup %11063  ;;  %v3833_v39 = vmul.f32 %v11060_v47, %v3832_v31  ;;  %vm14426_vm10 = vmor %vm3850_vm0, %vm3851_vm11 }
 0x236   : > { %v2623_v48 = vsel %vm14386_vm8, %v11056_v42, %v2619_v46  ;;  %v3904_v34 = vmul.f32 %v2613_v5, %v14159_v13  ;;  %v3847_v45 = vsub.f32 1.0, %v3846_v18  ;;  %v3857_v36 = vor.u32 1.1754944e-38, %v3856_v2  ;;  %v9754_v42 = vld [vmem:[#allocation2 + $0x80] sm:$0xff] }
 0x237   : > { %v2628_v59 = vsel %vm14335_vm14, %v2627_v25, %v2623_v48  ;;  %v14406_v49 = vadd.f32 %v7971_v29, %v7845_v14  ;;  %10586 = vst [vmem:[%s13495_s14 + $0x30] sm:$0xff] %v10231_v61   ;;  %v14416_v0 = vadd.f32 1.0, %v11064_v35  ;;  %v9822_v13 = vld [vmem:[#allocation2 + $0xc0] sm:$0xff]  ;;  %v3834_v56 = vadd.f32 %v11060_v47, %v3833_v39  ;;  %v7001_v29 = vpop.f32.mrf.mxu2  ;;  %vm17781_vm14 = vmmov %vm17772_vm6  ;;  %v6000_v35 = vpop.f32.mrf.mxu1 }
 0x238   : > { %v3905_v15 = vmul.f32 %v2628_v59, %v14172_v27  ;;  %v4032_v25 = vpack.c.bf16 %v3904_v34, %v3904_v34  ;;  %v3848_v63 = vmul.f32 %v14370_v62, %v3847_v45  ;;  %vm2635_vm13 = vweird.f32 %v14368_v57  ;;  %9337 = vmatmul.msk.bf16.gmra.mxu1 %vm17781_vm14, %v9754_v42  ;;  %9001 = vmatmul.msk.bf16.gmra.mxu0 %vm17782_vm15, %v9822_v13  ;;  %vm17793_vm11 = vmmov %vm17781_vm14 }
 0x239   : > { %v2639_v22 = vand.u32 2147483647, %v14368_v57  ;;  %v2641_v2 = vand.u32 2147483648, %v14368_v57  ;;  %11067 = vrcp.f32 %v14416_v0  ;;  %vm17783_vm3 = vcmask 519168  }
 0x23a   : > { %v11066_v27 = vpop.eup %11065  ;;  %v4033_v50 = vpack.c.bf16 %v3905_v15, %v3905_v15  ;;  %4195 = vst.msk [vmem:[#allocation2 + $0xf0] sm:$0xf] %vm17783_vm3, %v4032_v25  ;;  %v3838_v24 = vsel %vm14412_vm12, %v11060_v47, %v3834_v56  ;;  %v3849_v11 = vadd.f32 %v14370_v62, %v3848_v63  ;;  %v2654_v9 = vand.u32 2147483647, %v14416_v0  ;;  %vm17784_vm0 = vmmov %vm17783_vm3 }
 0x23b   : > { %v3843_v43 = vsel %vm14354_vm1, %v14344_v19, %v3838_v24  ;;  %v2631_v8 = vmul.f32 %v11066_v27, %v14368_v57  ;;  %vm2636_vm2 = vweird.f32 %v11066_v27  ;;  %vm2650_vm4 = vweird.f32 %v14416_v0  ;;  %v5135_v19 = vpop.f32.mrf.mxu0  ;;  %vm17789_vm6 = vmmov %vm17784_vm0 }
 0x23c   : > { %4196 = vst.msk [vmem:[#allocation2 + $0xf4] sm:$0xf] %vm17784_vm0, %v4033_v50  ;;  %v3853_v18 = vsel %vm14426_vm10, %v14370_v62, %v3849_v11  ;;  %v3986_v47 = vmul.f32 %v3843_v43, %v14236_v30  ;;  %vm14451_vm5 = vcmp.eq.f32.partialorder %v2639_v22, 8.507059e+37  ;;  %v2642_v46 = vor.u32 1.1754944e-38, %v2641_v2  ;;  %v14486_v25 = vpop.f32.mrf.mxu3  ;;  %vm17792_vm9 = vmmov %vm17784_vm0  ;;  %v10558_v11 = vld [vmem:[%s11703_s17 + $0x148] sm:$0xff]  }
 0x23d   : > { %v3858_v1 = vsel %vm14374_vm7, %v3857_v36, %v3853_v18  ;;  %v2632_v31 = vsub.f32 1.0, %v2631_v8  ;;  %v2656_v5 = vand.u32 2147483648, %v14416_v0  ;;  %v7300_v14 = vadd.f32 %v7001_v29, %v14352_v40  ;;  %vm14477_vm7 = vmor %vm2635_vm13, %vm2636_vm2 }
 0x23e   : > { %v3987_v61 = vmul.f32 %v3858_v1, %v14245_v7  ;;  %v4114_v62 = vpack.c.bf16 %v3986_v47, %v3986_v47  ;;  %vm14460_vm1 = vcmp.eq.f32.partialorder %v2654_v9, 8.507059e+37  ;;  %v1249_v48 = vmul.f32 %v14275_v23, %v10105_v41  ;;  %v10541_v7 = vld [vmem:[%s11703_s17 + $0xc0] sm:$0xff]   ;;  %v10542_v1 = vld [vmem:[%s11703_s17 + $0xc8] sm:$0xff]   ;;  %vm17796_vm10 = vmmov %vm17784_vm0 }
 0x23f   : > { %v11068_v34 = vpop.eup %11067  ;;  %v2633_v55 = vmul.f32 %v11066_v27, %v2632_v31  ;;  %v7432_v39 = vadd.f32 %v14030_v51, %v7300_v14  ;;  %v6001_v45 = vadd.f32 %v6000_v35, %v5135_v19  ;;  %v14470_v40 = vadd.f32 %v14156_v38, %v14381_v6  ;;  %v7003_v36 = vpop.f32.mrf.mxu2  ;;  %vm17797_vm13 = vmmov %vm17793_vm11 }
 0x240   : > { %v4115_v59 = vpack.c.bf16 %v3987_v61, %v3987_v61  ;;  %4277 = vst.msk [vmem:[#allocation2 + $0x238] sm:$0xf] %vm17789_vm6, %v4114_v62  ;;  %v2646_v41 = vmul.f32 %v11068_v34, %v14416_v0  ;;  %v2657_v37 = vor.u32 1.1754944e-38, %v2656_v5  ;;  %v14483_v42 = vadd.f32 %v14156_v38, %v1249_v48  ;;  %vm17799_vm14 = vmmov %vm17784_vm0 }
 0x241   : > { %v2634_v6 = vadd.f32 %v11066_v27, %v2633_v55  ;;  %vm2651_vm8 = vweird.f32 %v11068_v34  ;;  %v7585_v13 = vadd.f32 %v13425_v10, %v7432_v39  ;;  %v7301_v15 = vadd.f32 %v7003_v36, %v6001_v45 }
 0x242   : > { %4278 = vst.msk [vmem:[#allocation2 + $0x23c] sm:$0xf] %vm17792_vm9, %v4115_v59  ;;  %v2647_v57 = vsub.f32 1.0, %v2646_v41  ;;  %v8657_v56 = vmul.f32 -1.442695, %v14470_v40  ;;  %v10040_v63 = vunpack.c.l.bf16 %v10541_v7  ;;  %v10041_v29 = vunpack.c.h.bf16 %v10541_v7  ;;  %vm14502_vm12 = vmor %vm2650_vm4, %vm2651_vm8 }
 0x243   : > { %v9888_v53 = vld [vmem:[#allocation2 + $0xf0] sm:$0xff]  ;;  %v2638_v22 = vsel %vm14477_vm7, %v11066_v27, %v2634_v6  ;;  %v7712_v2 = vadd.f32 %v14399_v32, %v7585_v13  ;;  %v7846_v50 = vmul.f32 %v7585_v13, %v7585_v13  ;;  %v7433_v24 = vadd.f32 %v14030_v51, %v7301_v15 }
 0x244   : > { %v2643_v9 = vsel %vm14451_vm5, %v2642_v46, %v2638_v22  ;;  %v2648_v43 = vmul.f32 %v11068_v34, %v2647_v57  ;;  %11069 = vpow2.f32 %v8657_v56  ;;  %v8658_v8 = vmul.f32 -1.442695, %v14483_v42  ;;  %9679 = vmatmul.msk.bf16.gmra.mxu2 %vm17793_vm11, %v9888_v53  ;;  %v14539_v6 = vpop.f32.mrf.mxu3  ;;  %v6003_v56 = vpop.f32.mrf.mxu1  ;;  %vm17805_vm5 = vmmov %vm17793_vm11 }
 0x245   : > { %v3906_v51 = vmul.f32 %v2643_v9, %v14290_v33  ;;  %v7973_v32 = vadd.f32 %v14406_v49, %v7846_v50  ;;  %v7586_v18 = vadd.f32 %v13425_v10, %v7433_v24  ;;  %v1216_v47 = vmul.f32 %v14275_v23, %v10040_v63  ;;  %17798 = vst [vmem:[#allocation13_spill] sm:$0xff] %v14539_v6  ;;  %v5138_v63 = vpop.f32.mrf.mxu0  ;;  %vm17806_vm6 = vmmov %vm17805_vm5 }
 0x246   : > { %v2649_v44 = vadd.f32 %v11068_v34, %v2648_v43  ;;  %11071 = vpow2.f32 %v8658_v8  ;;  %v1217_v46 = vmul.f32 %v14275_v23, %v10041_v29  ;;  %v10108_v19 = vunpack.c.l.bf16 %v10558_v11  ;;  %v10559_v43 = vld [vmem:[%s11703_s17 + $0x150] sm:$0xff]   ;;  %vm17807_vm9 = vmmov %vm17805_vm5 }
 0x247   : > { %v4034_v31 = vpack.c.bf16 %v3906_v51, %v3906_v51  ;;  %v14512_v0 = vadd.f32 %v7712_v2, %v7586_v18  ;;  %v7847_v5 = vmul.f32 %v7586_v18, %v7586_v18  ;;  %v10236_v14 = vpack.c.bf16 %v7586_v18, %v7585_v13 }
 0x248   : > { %v2653_v33 = vsel %vm14502_vm12, %v11068_v34, %v2649_v44  ;;  %v14517_v49 = vadd.f32 %v14156_v38, %v1216_v47  ;;  %v14520_v10 = vadd.f32 %v14156_v38, %v1217_v46  ;;  %v10109_v61 = vunpack.c.h.bf16 %v10558_v11 }
 0x249   : > { %v9869_v62 = vld [vmem:[#allocation2 + $0x238] sm:$0xff]  ;;  %v2658_v35 = vsel %vm14460_vm1, %v2657_v37, %v2653_v33  ;;  %4197 = vst.msk [vmem:[#allocation2 + $0xf8] sm:$0xf] %vm17796_vm10, %v4034_v31  ;;  %v14525_v48 = vadd.f32 %v7973_v32, %v7847_v5  ;;  %v1250_v55 = vmul.f32 %v14275_v23, %v10108_v19  ;;  %v10044_v39 = vunpack.c.l.bf16 %v10542_v1  ;;  %v14565_v32 = vld [vmem:[%s11703_s17 + $0xd0] sm:$0xff]  }
 0x24a   : > { %v11070_v45 = vpop.eup %11069  ;;  %v3907_v34 = vmul.f32 %v2658_v35, %v14312_v21  ;;  %10587 = vst [vmem:[%s13495_s14 + $0x38] sm:$0xff] %v10236_v14   ;;  %v8625_v7 = vmul.f32 -1.442695, %v14517_v49  ;;  %v8626_v59 = vmul.f32 -1.442695, %v14520_v10  ;;  %v1251_v20 = vmul.f32 %v14275_v23, %v10109_v61  ;;  %9048 = vmatmul.msk.bf16.gmra.mxu3 %vm17797_vm13, %v9869_v62 }
 0x24b   : > { %v14534_v30 = vadd.f32 1.0, %v11070_v45  ;;  %v14537_v41 = vadd.f32 %v14156_v38, %v1250_v55  ;;  %v10045_v37 = vunpack.c.h.bf16 %v10542_v1  ;;  %v1218_v57 = vmul.f32 %v14275_v23, %v10044_v39 }
 0x24c   : > { %v11072_v36 = vpop.eup %11071  ;;  %v4035_v13 = vpack.c.bf16 %v3907_v34, %v3907_v34  ;;  %11073 = vpow2.f32 %v8625_v7  ;;  %v14542_v21 = vadd.f32 %v14156_v38, %v1251_v20  ;;  %v6004_v50 = vadd.f32 %v6003_v56, %v5138_v63  ;;  %v9755_v34 = vld [vmem:[#allocation2 + $0x88] sm:$0xff] }
 0x24d   : > { %v14544_v15 = vadd.f32 1.0, %v11072_v36  ;;  %11075 = vrcp.f32 %v14534_v30  ;;  %v3149_v29 = vand.u32 2147483647, %v14534_v30  ;;  %v8659_v53 = vmul.f32 -1.442695, %v14537_v41  ;;  %v9823_v56 = vld [vmem:[#allocation2 + $0xc8] sm:$0xff]  ;;  %9338 = vmatmul.msk.bf16.gmra.mxu1 %vm17806_vm6, %v9755_v34 }
 0x24e   : > { %4198 = vst.msk [vmem:[#allocation2 + $0xfc] sm:$0xf] %vm17799_vm14, %v4035_v13  ;;  %11077 = vpow2.f32 %v8626_v59  ;;  %v1219_v22 = vmul.f32 %v14275_v23, %v10045_v37  ;;  %v3151_v2 = vand.u32 2147483648, %v14534_v30  ;;  %v8660_v9 = vmul.f32 -1.442695, %v14542_v21  ;;  %v14601_v59 = vpop.f32.mrf.mxu3  ;;  %9002 = vmatmul.msk.bf16.gmra.mxu0 %vm17807_vm9, %v9823_v56 }
 0x24f   : > { %11079 = vrcp.f32 %v14544_v15  ;;  %v3164_v24 = vand.u32 2147483647, %v14544_v15  ;;  %v3166_v11 = vand.u32 2147483648, %v14544_v15  ;;  %v14559_v8 = vadd.f32 %v14156_v38, %v1218_v57  ;;  %17804 = vst [vmem:[#allocation14_spill] sm:$0xff] %v14601_v59  ;;  %v7006_v57 = vpop.f32.mrf.mxu2 }
 0x250   : > { %11081 = vpow2.f32 %v8659_v53  ;;  %v14562_v27 = vadd.f32 %v14156_v38, %v1219_v22  ;;  %v10112_v51 = vunpack.c.l.bf16 %v10559_v43  ;;  %vm3145_vm15 = vweird.f32 %v14534_v30 }
 0x251   : > { %vm14568_vm3 = vcmp.eq.f32.partialorder %v3149_v29, 8.507059e+37  ;;  %vm3160_vm2 = vweird.f32 %v14544_v15  ;;  %11083 = vpow2.f32 %v8660_v9  ;;  %v14575_v46 = vor.u32 1.1754944e-38, %v3151_v2  ;;  %v5140_v9 = vpop.f32.mrf.mxu0 }
 0x252   : > { %v11074_v18 = vpop.eup %11073  ;;  %v14577_v19 = vor.u32 1.1754944e-38, %v3166_v11  ;;  %v10113_v31 = vunpack.c.h.bf16 %v10559_v43  ;;  %vm14583_vm4 = vcmp.eq.f32.partialorder %v3164_v24, 8.507059e+37  ;;  %v8627_v61 = vmul.f32 -1.442695, %v14559_v8  ;;  %v6005_v11 = vpop.f32.mrf.mxu1 }
 0x253   : > { %v14573_v44 = vpop.eup %11075  ;;  %v14579_v1 = vadd.f32 1.0, %v11074_v18  ;;  %v14589_v62 = vmul.f32 -1.442695, %v14562_v27  ;;  %v14599_v7 = vmul.f32 %v14275_v23, %v10112_v51 }
 0x254   : > { %v11078_v5 = vpop.eup %11077  ;;  %v3141_v14 = vmul.f32 %v14573_v44, %v14534_v30  ;;  %vm3146_vm0 = vweird.f32 %v14573_v44  ;;  %v14612_v29 = vmul.f32 %v14275_v23, %v10113_v31  ;;  %v7302_v31 = vadd.f32 %v7006_v57, %v6004_v50 }
 0x255   : > { %v14592_v55 = vpop.eup %11079  ;;  %v9889_v39 = vld [vmem:[#allocation2 + $0xf8] sm:$0xff]  ;;  %v14595_v45 = vadd.f32 1.0, %v11078_v5  ;;  %11085 = vrcp.f32 %v14579_v1  ;;  %v2669_v36 = vand.u32 2147483647, %v14579_v1  ;;  %v2671_v13 = vand.u32 2147483648, %v14579_v1  ;;  %vm14623_vm11 = vmor %vm3145_vm15, %vm3146_vm0  ;;  %v11270_v5 = vld [vmem:[%s13370_s21] sm:$0xff] }
 0x256   : > { %v3142_v20 = vsub.f32 1.0, %v3141_v14  ;;  %v3156_v37 = vmul.f32 %v14592_v55, %v14544_v15  ;;  %v11082_v63 = vpop.eup %11081  ;;  %9680 = vmatmul.msk.bf16.gmra.mxu2 %vm17805_vm5, %v9889_v39  ;;  %vm2665_vm1 = vweird.f32 %v14579_v1  ;;  %vm3161_vm7 = vweird.f32 %v14592_v55 }
 0x257   : > { %11087 = vrcp.f32 %v14595_v45  ;;  %v11084_v22 = vpop.eup %11083  ;;  %vm2680_vm8 = vweird.f32 %v14595_v45  ;;  %v14627_v51 = vor.u32 1.1754944e-38, %v2671_v13  ;;  %v2684_v18 = vand.u32 2147483647, %v14595_v45  ;;  %vm14644_vm10 = vmor %vm3160_vm2, %vm3161_vm7 }
 0x258   : > { %v3143_v2 = vmul.f32 %v14573_v44, %v3142_v20  ;;  %v3157_v24 = vsub.f32 1.0, %v3156_v37  ;;  %v7548_v14 = vrot.slane %v11270_v5, 1  ;;  %vm14633_vm12 = vcmp.eq.f32.partialorder %v2669_v36, 8.507059e+37  ;;  %v14651_v36 = vld [vmem:[%s17617_s4] ss:$0 sm:$0xff] }
 0x259   : > { %v2686_v30 = vand.u32 2147483648, %v14595_v45  ;;  %v14638_v37 = vadd.f32 1.0, %v11082_v63  ;;  %v7434_v13 = vadd.f32 %v14651_v36, %v7302_v31  ;;  %v6006_v63 = vadd.f32 %v6005_v11, %v5140_v9 }
 0x25a   : > { %v3144_v39 = vadd.f32 %v14573_v44, %v3143_v2  ;;  %v3158_v34 = vmul.f32 %v14592_v55, %v3157_v24  ;;  %v14654_v57 = vperm.slane %v7548_v14, 0  ;;  %v14656_v2 = vadd.f32 1.0, %v11084_v22  ;;  %v14677_v14 = vpop.f32.mrf.mxu3 }
 0x25b   : > { %v11086_v56 = vpop.eup %11085  ;;  %11089 = vpow2.f32 %v8627_v61  ;;  %v7008_v61 = vpop.f32.mrf.mxu2  ;;  %17814 = vst [vmem:[#allocation15_spill] sm:$0xff] %v14677_v14  ;;  %vm17819_vm2 = vcmask 519168  }
 0x25c   : > { %v3148_v15 = vsel %vm14623_vm11, %v14573_v44, %v3144_v39  ;;  %v3159_v24 = vadd.f32 %v14592_v55, %v3158_v34  ;;  %v2661_v5 = vmul.f32 %v11086_v56, %v14579_v1  ;;  %vm2666_vm13 = vweird.f32 %v11086_v56  ;;  %v5143_v1 = vpop.f32.mrf.mxu0  ;;  %vm17822_vm5 = vmmov %vm17819_vm2 }
 0x25d   : > { %v11088_v53 = vpop.eup %11087  ;;  %v3153_v35 = vsel %vm14568_vm3, %v14575_v46, %v3148_v15  ;;  %v7587_v31 = vadd.f32 %v14654_v57, %v7434_v13  ;;  %11091 = vrcp.f32 %v14638_v37  ;;  %vm14683_vm15 = vmor %vm2665_vm1, %vm2666_vm13  ;;  %vm14687_vm3 = vcmp.eq.f32.partialorder %v2684_v18, 8.507059e+37 }
 0x25e   : > { %v3163_v22 = vsel %vm14644_vm10, %v14592_v55, %v3159_v24  ;;  %v3940_v44 = vmul.f32 %v3153_v35, %v14470_v40  ;;  %v2662_v11 = vsub.f32 1.0, %v2661_v5  ;;  %v2676_v9 = vmul.f32 %v11088_v53, %v14595_v45  ;;  %v6008_v5 = vpop.f32.mrf.mxu1  ;;  %vm17831_vm10 = vmmov %vm17819_vm2 }
 0x25f   : > { %v3168_v47 = vsel %vm14583_vm4, %v14577_v19, %v3163_v22  ;;  %vm2681_vm14 = vweird.f32 %v11088_v53  ;;  %v7714_v46 = vadd.f32 %v14512_v0, %v7587_v31  ;;  %v7848_v43 = vmul.f32 %v7587_v31, %v7587_v31 }
 0x260   : > { %v3941_v39 = vmul.f32 %v3168_v47, %v14483_v42  ;;  %v4068_v34 = vpack.c.bf16 %v3940_v44, %v3940_v44  ;;  %v2663_v55 = vmul.f32 %v11086_v56, %v2662_v11  ;;  %v2677_v50 = vsub.f32 1.0, %v2676_v9  ;;  %vm14697_vm0 = vmor %vm2680_vm8, %vm2681_vm14 }
 0x261   : > { %v2687_v0 = vor.u32 1.1754944e-38, %v2686_v30  ;;  %v7975_v33 = vadd.f32 %v14525_v48, %v7848_v43  ;;  %v7303_v35 = vadd.f32 %v7008_v61, %v6006_v63  ;;  %v11090_v13 = vpop.eup %11089  ;;  %vm3175_vm4 = vweird.f32 %v14638_v37  ;;  %vm17828_vm8 = vmmov %vm17819_vm2 }
 0x262   : > { %v4069_v42 = vpack.c.bf16 %v3941_v39, %v3941_v39  ;;  %4231 = vst.msk [vmem:[#allocation2 + $0x180] sm:$0xf] %vm17819_vm2, %v4068_v34  ;;  %v2664_v15 = vadd.f32 %v11086_v56, %v2663_v55  ;;  %v2678_v24 = vmul.f32 %v11088_v53, %v2677_v50  ;;  %v14702_v30 = vadd.f32 %v6008_v5, %v5143_v1  ;;  %v14744_v19 = vpop.f32.mrf.mxu3 }
 0x263   : > { %v11092_v22 = vpop.eup %11091  ;;  %v7435_v48 = vadd.f32 %v14651_v36, %v7303_v35  ;;  %v3179_v63 = vand.u32 2147483647, %v14638_v37  ;;  %11093 = vrcp.f32 %v14656_v2  ;;  %v3181_v9 = vand.u32 2147483648, %v14638_v37  ;;  %17827 = vst [vmem:[#allocation16_spill] sm:$0xff] %v14744_v19 }
 0x264   : > { %4232 = vst.msk [vmem:[#allocation2 + $0x184] sm:$0xf] %vm17822_vm5, %v4069_v42  ;;  %v2668_v44 = vsel %vm14683_vm15, %v11086_v56, %v2664_v15  ;;  %v2679_v11 = vadd.f32 %v11088_v53, %v2678_v24  ;;  %v3171_v45 = vmul.f32 %v11092_v22, %v14638_v37  ;;  %vm3176_vm1 = vweird.f32 %v11092_v22  ;;  %v7011_v24 = vpop.f32.mrf.mxu2 }
 0x265   : > { %v2673_v61 = vsel %vm14633_vm12, %v14627_v51, %v2668_v44  ;;  %v7588_v47 = vadd.f32 %v14654_v57, %v7435_v48  ;;  %v3194_v43 = vand.u32 2147483647, %v14656_v2  ;;  %v3196_v55 = vand.u32 2147483648, %v14656_v2  ;;  %vm14737_vm7 = vmor %vm3175_vm4, %vm3176_vm1  ;;  %v14768_v44 = vld [vmem:[%s11703_s17 + $0x158] sm:$0xff]  }
 0x266   : > { %v2683_v39 = vsel %vm14697_vm0, %v11088_v53, %v2679_v11  ;;  %v3908_v56 = vmul.f32 %v2673_v61, %v14517_v49  ;;  %v3172_v34 = vsub.f32 1.0, %v3171_v45  ;;  %vm14725_vm6 = vcmp.eq.f32.partialorder %v3179_v63, 8.507059e+37 }
 0x267   : > { %v2688_v50 = vsel %vm14687_vm3, %v2687_v0, %v2683_v39  ;;  %v14722_v40 = vadd.f32 %v7714_v46, %v7588_v47  ;;  %v7849_v51 = vmul.f32 %v7588_v47, %v7588_v47  ;;  %v10241_v20 = vpack.c.bf16 %v7588_v47, %v7587_v31  ;;  %v5145_v46 = vpop.f32.mrf.mxu0 }
 0x268   : > { %v3909_v35 = vmul.f32 %v2688_v50, %v14520_v10  ;;  %v4036_v42 = vpack.c.bf16 %v3908_v56, %v3908_v56  ;;  %v3173_v15 = vmul.f32 %v11092_v22, %v3172_v34  ;;  %v3182_v31 = vor.u32 1.1754944e-38, %v3181_v9 }
 0x269   : > { %v14729_v53 = vpop.eup %11093  ;;  %v14731_v49 = vadd.f32 %v7975_v33, %v7849_v51  ;;  %10588 = vst [vmem:[%s13495_s14 + $0x40] sm:$0xff] %v10241_v20   ;;  %11095 = vpow2.f32 %v14589_v62  ;;  %v14742_v10 = vadd.f32 1.0, %v11090_v13  ;;  %vm3190_vm9 = vweird.f32 %v14656_v2 }
 0x26a   : > { %v4037_v0 = vpack.c.bf16 %v3909_v35, %v3909_v35  ;;  %4199 = vst.msk [vmem:[#allocation2 + $0x100] sm:$0xf] %vm17828_vm8, %v4036_v42  ;;  %v3174_v33 = vadd.f32 %v11092_v22, %v3173_v15  ;;  %v3186_v5 = vmul.f32 %v14729_v53, %v14656_v2  ;;  %vm3191_vm11 = vweird.f32 %v14729_v53  ;;  %v9756_v35 = vld [vmem:[#allocation2 + $0x90] sm:$0xff] }
 0x26b   : > { %v9786_v37 = vld [vmem:[#allocation2 + $0x180] sm:$0xff]  ;;  %vm14751_vm12 = vcmp.eq.f32.partialorder %v3194_v43, 8.507059e+37  ;;  %v3197_v62 = vor.u32 1.1754944e-38, %v3196_v55  ;;  %11097 = vrcp.f32 %v14742_v10  ;;  %v14761_v48 = vadd.f32 %v14156_v38, %v14599_v7  ;;  %vm14786_vm15 = vmor %vm3190_vm9, %vm3191_vm11  ;;  %v9824_v42 = vld [vmem:[#allocation2 + $0xd0] sm:$0xff] }
 0x26c   : > { %4200 = vst.msk [vmem:[#allocation2 + $0x104] sm:$0xf] %vm17831_vm10, %v4037_v0  ;;  %v3178_v13 = vsel %vm14737_vm7, %v11092_v22, %v3174_v33  ;;  %v3187_v18 = vsub.f32 1.0, %v3186_v5  ;;  %v14765_v63 = vadd.f32 %v14156_v38, %v14612_v29  ;;  %vm17832_vm13 = vcmask 523264   ;;  %vm17847_vm9 = vmmov %vm17819_vm2 }
 0x26d   : > { %9369 = vmatmul.msk.bf16.vlgmr.msrb.gmra.mxu3 %vm17832_vm13, %v9786_v37  ;;  %v3183_v11 = vsel %vm14725_vm6, %v3182_v31, %v3178_v13  ;;  %vm2695_vm14 = vweird.f32 %v14742_v10  ;;  %v2699_v22 = vand.u32 2147483647, %v14742_v10  ;;  %v17833_v45 = vunpack.c.l.bf16 %v14565_v32  ;;  %v6010_v37 = vpop.f32.mrf.mxu1  ;;  %vm17839_vm4 = vmmov %vm17832_vm13 }
 0x26e   : > { %v3188_v9 = vmul.f32 %v14729_v53, %v3187_v18  ;;  %v3942_v38 = vmul.f32 %v3183_v11, %v14537_v41  ;;  %v8661_v29 = vmul.f32 -1.442695, %v14761_v48  ;;  %v8662_v61 = vmul.f32 -1.442695, %v14765_v63  ;;  %v14795_v41 = vld [vmem:[%s11737_s12] ss:$0 sm:$0xff]  ;;  %9339 = vmatmul.msk.bf16.gmra.mxu1 %vm17839_vm4, %v9756_v35  ;;  %vm17840_vm0 = vmmov %vm17839_vm4 }
 0x26f   : > { %v1220_v7 = vmul.f32 %v14275_v23, %v17833_v45  ;;  %v11096_v47 = vpop.eup %11095  ;;  %v2701_v39 = vand.u32 2147483648, %v14742_v10  ;;  %v17836_v56 = vunpack.c.h.bf16 %v14565_v32  ;;  %v10116_v50 = vunpack.c.l.bf16 %v14768_v44  ;;  %9003 = vmatmul.msk.bf16.gmra.mxu0 %vm17840_vm0, %v9824_v42  ;;  %v14826_v45 = vpop.f32.mrf.mxu3  ;;  %vm17842_vm1 = vmmov %vm17840_vm0 }
 0x270   : > { %v3189_v51 = vadd.f32 %v14729_v53, %v3188_v9  ;;  %v4070_v2 = vpack.c.bf16 %v3942_v38, %v3942_v38  ;;  %v14802_v20 = vadd.f32 1.0, %v11096_v47  ;;  %11099 = vpow2.f32 %v8661_v29  ;;  %17841 = vst [vmem:[#allocation17_spill] sm:$0xff] %v14826_v45 }
 0x271   : > { %v1221_v34 = vmul.f32 %v14275_v23, %v17836_v56  ;;  %v14798_v55 = vadd.f32 %v14795_v41, %v1220_v7  ;;  %v11098_v15 = vpop.eup %11097  ;;  %vm14804_vm3 = vcmp.eq.f32.partialorder %v2699_v22, 8.507059e+37  ;;  %11101 = vpow2.f32 %v8662_v61 }
 0x272   : > { %v10117_v0 = vunpack.c.h.bf16 %v14768_v44  ;;  %v3193_v33 = vsel %vm14786_vm15, %v14729_v53, %v3189_v51  ;;  %4233 = vst.msk [vmem:[#allocation2 + $0x188] sm:$0xf] %vm17819_vm2, %v4070_v2  ;;  %v2691_v5 = vmul.f32 %v11098_v15, %v14742_v10  ;;  %11103 = vrcp.f32 %v14802_v20  ;;  %vm17854_vm15 = vmmov %vm17840_vm0 }
 0x273   : > { %v14809_v31 = vadd.f32 %v14795_v41, %v1221_v34  ;;  %v8629_v13 = vmul.f32 -1.442695, %v14798_v55  ;;  %v9890_v18 = vld [vmem:[#allocation2 + $0x100] sm:$0xff]  ;;  %v3198_v44 = vsel %vm14751_vm12, %v3197_v62, %v3193_v33  ;;  %v2714_v11 = vand.u32 2147483647, %v14802_v20  ;;  %v14835_v34 = vld [vmem:[%s11703_s17 + $0xd8] sm:$0xff]   ;;  %v7013_v33 = vpop.f32.mrf.mxu2 }
 0x274   : > { %v2716_v53 = vand.u32 2147483648, %v14802_v20  ;;  %v1254_v22 = vmul.f32 %v14275_v23, %v10116_v50  ;;  %v3943_v7 = vmul.f32 %v3198_v44, %v14542_v21  ;;  %v2692_v9 = vsub.f32 1.0, %v2691_v5  ;;  %9681 = vmatmul.msk.bf16.gmra.mxu2 %vm17842_vm1, %v9890_v18 }
 0x275   : > { %vm2696_vm5 = vweird.f32 %v11098_v15  ;;  %v7304_v38 = vadd.f32 %v7011_v24, %v14702_v30  ;;  %v2702_v29 = vor.u32 1.1754944e-38, %v2701_v39  ;;  %vm2710_vm6 = vweird.f32 %v14802_v20 }
 0x276   : > { %v6011_v1 = vadd.f32 %v6010_v37, %v5145_v46  ;;  %v8630_v62 = vmul.f32 -1.442695, %v14809_v31  ;;  %v11100_v61 = vpop.eup %11099  ;;  %v4071_v47 = vpack.c.bf16 %v3943_v7, %v3943_v7  ;;  %v2693_v43 = vmul.f32 %v11098_v15, %v2692_v9  ;;  %vm14839_vm7 = vmor %vm2695_vm14, %vm2696_vm5 }
 0x277   : > { %v7436_v56 = vadd.f32 %v14651_v36, %v7304_v38  ;;  %11105 = vpow2.f32 %v8629_v13  ;;  %v11102_v21 = vpop.eup %11101  ;;  %vm14843_vm8 = vcmp.eq.f32.partialorder %v2714_v11, 8.507059e+37  ;;  %v2717_v50 = vor.u32 1.1754944e-38, %v2716_v53  ;;  %v5148_v53 = vpop.f32.mrf.mxu0  ;;  %vm17853_vm14 = vmmov %vm17819_vm2 }
 0x278   : > { %v14847_v51 = vadd.f32 1.0, %v11100_v61  ;;  %11107 = vpow2.f32 %v8630_v62  ;;  %v11104_v2 = vpop.eup %11103  ;;  %4234 = vst.msk [vmem:[#allocation2 + $0x18c] sm:$0xf] %vm17847_vm9, %v4071_v47  ;;  %v2694_v35 = vadd.f32 %v11098_v15, %v2693_v43  ;;  %v1255_v10 = vmul.f32 %v14275_v23, %v10117_v0  ;;  %v6013_v62 = vpop.f32.mrf.mxu1  ;;  %vm17857_vm5 = vmmov %vm17840_vm0 }
 0x279   : > { %v7589_v42 = vadd.f32 %v14654_v57, %v7436_v56  ;;  %v14853_v24 = vadd.f32 %v14795_v41, %v1254_v22  ;;  %v2706_v46 = vmul.f32 %v11104_v2, %v14802_v20  ;;  %v14856_v5 = vadd.f32 1.0, %v11102_v21 }
 0x27a   : > { %11109 = vrcp.f32 %v14847_v51  ;;  %v10052_v37 = vunpack.c.l.bf16 %v14835_v34  ;;  %v2698_v13 = vsel %vm14839_vm7, %v11098_v15, %v2694_v35  ;;  %v7305_v11 = vadd.f32 %v7013_v33, %v6011_v1 }
 0x27b   : > { %v7716_v18 = vadd.f32 %v14722_v40, %v7589_v42  ;;  %v7850_v44 = vmul.f32 %v7589_v42, %v7589_v42  ;;  %v2703_v23 = vsel %vm14804_vm3, %v2702_v29, %v2698_v13  ;;  %v2707_v0 = vsub.f32 1.0, %v2706_v46  ;;  %v14874_v29 = vpop.f32.mrf.mxu3 }
 0x27c   : > { %vm2711_vm11 = vweird.f32 %v11104_v2  ;;  %v3209_v22 = vand.u32 2147483647, %v14847_v51  ;;  %v3910_v9 = vmul.f32 %v2703_v23, %v14559_v8  ;;  %v7437_v15 = vadd.f32 %v14651_v36, %v7305_v11  ;;  %17848 = vst [vmem:[#allocation18_spill] sm:$0xff] %v14874_v29 }
 0x27d   : > { %v11106_v7 = vpop.eup %11105  ;;  %v7977_v38 = vadd.f32 %v14731_v49, %v7850_v44  ;;  %v14870_v40 = vadd.f32 %v14795_v41, %v1255_v10  ;;  %v2708_v61 = vmul.f32 %v11104_v2, %v2707_v0  ;;  %v6014_v32 = vadd.f32 %v6013_v62, %v5148_v53  ;;  %vm14879_vm10 = vmor %vm2710_vm6, %vm2711_vm11 }
 0x27e   : > { %v11108_v1 = vpop.eup %11107  ;;  %vm3205_vm12 = vweird.f32 %v14847_v51  ;;  %11111 = vrcp.f32 %v14856_v5  ;;  %v4038_v49 = vpack.c.bf16 %v3910_v9, %v3910_v9  ;;  %v7590_v47 = vadd.f32 %v14654_v57, %v7437_v15 }
 0x27f   : > { %vm14884_vm13 = vcmp.eq.f32.partialorder %v3209_v22, 8.507059e+37  ;;  %v3211_v56 = vand.u32 2147483648, %v14847_v51  ;;  %v9787_v30 = vld [vmem:[#allocation2 + $0x188] sm:$0xff]  ;;  %v2709_v35 = vadd.f32 %v11104_v2, %v2708_v61  ;;  %v3224_v10 = vand.u32 2147483647, %v14856_v5  ;;  %v7016_v61 = vpop.f32.mrf.mxu2 }
 0x280   : > { %v11110_v21 = vpop.eup %11109  ;;  %v14890_v20 = vadd.f32 1.0, %v11106_v7  ;;  %v14892_v46 = vadd.f32 1.0, %v11108_v1  ;;  %4201 = vst.msk [vmem:[#allocation2 + $0x108] sm:$0xf] %vm17853_vm14, %v4038_v49  ;;  %v14895_v33 = vadd.f32 %v7716_v18, %v7590_v47  ;;  %v7851_v13 = vmul.f32 %v7590_v47, %v7590_v47  ;;  %9370 = vmatmul.msk.bf16.gmra.mxu3 %vm17854_vm15, %v9787_v30  ;;  %v9825_v7 = vld [vmem:[#allocation2 + $0xd8] sm:$0xff] }
 0x281   : > { %v10246_v44 = vpack.c.bf16 %v7590_v47, %v7589_v42  ;;  %v3201_v11 = vmul.f32 %v11110_v21, %v14847_v51  ;;  %v2713_v23 = vsel %vm14879_vm10, %v11104_v2, %v2709_v35  ;;  %vm3206_vm3 = vweird.f32 %v11110_v21  ;;  %v9757_v42 = vld [vmem:[#allocation2 + $0x98] sm:$0xff]  ;;  %9004 = vmatmul.msk.bf16.gmra.mxu0 %vm17857_vm5, %v9825_v7  ;;  %v5150_v47 = vpop.f32.mrf.mxu0 }
 0x282   : > { %vm3220_vm2 = vweird.f32 %v14856_v5  ;;  %v3226_v0 = vand.u32 2147483648, %v14856_v5  ;;  %v2718_v53 = vsel %vm14843_vm8, %v2717_v50, %v2713_v23  ;;  %v14905_v22 = vadd.f32 %v7977_v38, %v7851_v13  ;;  %9340 = vmatmul.msk.bf16.gmra.mxu1 %vm17840_vm0, %v9757_v42  ;;  %vm14923_vm1 = vmor %vm3205_vm12, %vm3206_vm3 }
 0x283   : > { %10589 = vst [vmem:[%s13495_s14 + $0x48] sm:$0xff] %v10246_v44   ;;  %v3202_v18 = vsub.f32 1.0, %v3201_v11  ;;  %11113 = vrcp.f32 %v14890_v20  ;;  %v3911_v62 = vmul.f32 %v2718_v53, %v14562_v27  ;;  %v3212_v2 = vor.u32 1.1754944e-38, %v3211_v56  ;;  %vm17860_vm8 = vmmov %vm17847_vm9  ;;  %v6015_v44 = vpop.f32.mrf.mxu1  ;;  %v14939_v53 = vpop.f32.mrf.mxu3 }
 0x284   : > { %v11112_v9 = vpop.eup %11111  ;;  %v2729_v15 = vand.u32 2147483647, %v14890_v20  ;;  %v2731_v1 = vand.u32 2147483648, %v14890_v20  ;;  %vm14913_vm4 = vcmp.eq.f32.partialorder %v3224_v10, 8.507059e+37  ;;  %11115 = vrcp.f32 %v14892_v46  ;;  %17863 = vst [vmem:[#allocation19_spill] sm:$0xff] %v14939_v53  ;;  %vm17868_vm15 = vmmov %vm17860_vm8 }
 0x285   : > { %v3203_v8 = vmul.f32 %v11110_v21, %v3202_v18  ;;  %v3216_v39 = vmul.f32 %v11112_v9, %v14856_v5  ;;  %v4039_v27 = vpack.c.bf16 %v3911_v62, %v3911_v62  ;;  %vm3221_vm6 = vweird.f32 %v11112_v9 }
 0x286   : > { %v3227_v49 = vor.u32 1.1754944e-38, %v3226_v0  ;;  %vm2725_vm7 = vweird.f32 %v14890_v20  ;;  %v14928_v35 = vor.u32 1.1754944e-38, %v2731_v1  ;;  %v2744_v10 = vand.u32 2147483647, %v14892_v46  ;;  %vm14949_vm12 = vmor %vm3220_vm2, %vm3221_vm6 }
 0x287   : > { %v3204_v56 = vadd.f32 %v11110_v21, %v3203_v8  ;;  %v3217_v30 = vsub.f32 1.0, %v3216_v39  ;;  %4202 = vst.msk [vmem:[#allocation2 + $0x10c] sm:$0xf] %vm17860_vm8, %v4039_v27  ;;  %vm14932_vm9 = vcmp.eq.f32.partialorder %v2729_v15, 8.507059e+37  ;;  %vm2740_vm11 = vweird.f32 %v14892_v46  ;;  %v7018_v38 = vpop.f32.mrf.mxu2  ;;  %vm17871_vm2 = vmmov %vm17840_vm0 }
 0x288   : > { %v2746_v51 = vand.u32 2147483648, %v14892_v46  ;;  %v7306_v11 = vadd.f32 %v7016_v61, %v6014_v32  ;;  %v8663_v23 = vmul.f32 -1.442695, %v14853_v24  ;;  %v6016_v7 = vadd.f32 %v6015_v44, %v5150_v47  ;;  %v14979_v32 = vld [vmem:[%s11731_s23] ss:$0 sm:$0xff]  ;;  %vm17875_vm0 = vmmov %vm17860_vm8 }
 0x289   : > { %v11114_v0 = vpop.eup %11113  ;;  %v3208_v18 = vsel %vm14923_vm1, %v11110_v21, %v3204_v56  ;;  %v3218_v42 = vmul.f32 %v11112_v9, %v3217_v30  ;;  %v8664_v62 = vmul.f32 -1.442695, %v14870_v40  ;;  %vm14954_vm10 = vcmp.eq.f32.partialorder %v2744_v10, 8.507059e+37  ;;  %vm17876_vm5 = vmmov %vm17875_vm0 }
 0x28a   : > { %v3213_v15 = vsel %vm14884_vm13, %v3212_v2, %v3208_v18  ;;  %v2721_v1 = vmul.f32 %v11114_v0, %v14890_v20  ;;  %v7438_v21 = vadd.f32 %v14651_v36, %v7306_v11  ;;  %v11116_v8 = vpop.eup %11115  ;;  %vm2726_vm13 = vweird.f32 %v11114_v0  ;;  %vm17877_vm6 = vmmov %vm17875_vm0 }
 0x28b   : > { %v3219_v39 = vadd.f32 %v11112_v9, %v3218_v42  ;;  %v3944_v43 = vmul.f32 %v3213_v15, %v14761_v48  ;;  %11117 = vpow2.f32 %v8663_v23  ;;  %v2736_v5 = vmul.f32 %v11116_v8, %v14892_v46  ;;  %vm14973_vm3 = vmor %vm2725_vm7, %vm2726_vm13  ;;  %v10561_v46 = vld [vmem:[%s11703_s17 + $0x160] sm:$0xff]  }
 0x28c   : > { %v2722_v2 = vsub.f32 1.0, %v2721_v1  ;;  %v7591_v27 = vadd.f32 %v14654_v57, %v7438_v21  ;;  %v10053_v47 = vunpack.c.h.bf16 %v14835_v34  ;;  %vm2741_vm14 = vweird.f32 %v11116_v8  ;;  %vm17880_vm8 = vmmov %vm17871_vm2 }
 0x28d   : > { %v3223_v56 = vsel %vm14949_vm12, %v11112_v9, %v3219_v39  ;;  %v4072_v30 = vpack.c.bf16 %v3944_v43, %v3944_v43  ;;  %v7307_v10 = vadd.f32 %v7018_v38, %v6016_v7  ;;  %v2737_v11 = vsub.f32 1.0, %v2736_v5  ;;  %v15003_v5 = vpop.f32.mrf.mxu3 }
 0x28e   : > { %v3228_v48 = vsel %vm14913_vm4, %v3227_v49, %v3223_v56  ;;  %v2723_v44 = vmul.f32 %v11114_v0, %v2722_v2  ;;  %v7718_v23 = vadd.f32 %v14895_v33, %v7591_v27  ;;  %v9891_v18 = vld [vmem:[#allocation2 + $0x108] sm:$0xff]  ;;  %v7852_v7 = vmul.f32 %v7591_v27, %v7591_v27  ;;  %vm14988_vm4 = vmor %vm2740_vm11, %vm2741_vm14  ;;  %17874 = vst [vmem:[#allocation20_spill] sm:$0xff] %v15003_v5 }
 0x28f   : > { %v3945_v42 = vmul.f32 %v3228_v48, %v14765_v63  ;;  %4235 = vst.msk [vmem:[#allocation2 + $0x190] sm:$0xf] %vm17868_vm15, %v4072_v30  ;;  %v7439_v50 = vadd.f32 %v14651_v36, %v7307_v10  ;;  %11119 = vpow2.f32 %v8664_v62  ;;  %v2738_v15 = vmul.f32 %v11116_v8, %v2737_v11  ;;  %9682 = vmatmul.msk.bf16.gmra.mxu2 %vm17871_vm2, %v9891_v18  ;;  %v5153_v18 = vpop.f32.mrf.mxu0  ;;  %vm17886_vm14 = vmmov %vm17871_vm2 }
 0x290   : > { %v2724_v49 = vadd.f32 %v11114_v0, %v2723_v44  ;;  %v2747_v33 = vor.u32 1.1754944e-38, %v2746_v51  ;;  %v1222_v63 = vmul.f32 %v14979_v32, %v10052_v37  ;;  %v7979_v62 = vadd.f32 %v14905_v22, %v7852_v7  ;;  %v10545_v7 = vld [vmem:[%s11703_s17 + $0xe0] sm:$0xff]  }
 0x291   : > { %v11118_v1 = vpop.eup %11117  ;;  %v4073_v20 = vpack.c.bf16 %v3945_v42, %v3945_v42  ;;  %v7592_v51 = vadd.f32 %v14654_v57, %v7439_v50  ;;  %v1223_v39 = vmul.f32 %v14979_v32, %v10053_v47  ;;  %v2739_v37 = vadd.f32 %v11116_v8, %v2738_v15 }
 0x292   : > { %v2728_v34 = vsel %vm14973_vm3, %v11114_v0, %v2724_v49  ;;  %v14997_v43 = vadd.f32 1.0, %v11118_v1  ;;  %v15000_v2 = vadd.f32 %v14795_v41, %v1222_v63  ;;  %v10120_v13 = vunpack.c.l.bf16 %v10561_v46  ;;  %vm17889_vm3 = vmmov %vm17871_vm2 }
 0x293   : > { %4236 = vst.msk [vmem:[#allocation2 + $0x194] sm:$0xf] %vm17875_vm0, %v4073_v20  ;;  %v2733_v22 = vsel %vm14932_vm9, %v14928_v35, %v2728_v34  ;;  %v15009_v38 = vadd.f32 %v7718_v23, %v7592_v51  ;;  %v7853_v47 = vmul.f32 %v7592_v51, %v7592_v51  ;;  %v10251_v0 = vpack.c.bf16 %v7592_v51, %v7591_v27 }
 0x294   : > { %v2743_v56 = vsel %vm14988_vm4, %v11116_v8, %v2739_v37  ;;  %v3912_v30 = vmul.f32 %v2733_v22, %v14798_v55  ;;  %11121 = vrcp.f32 %v14997_v43  ;;  %v3239_v35 = vand.u32 2147483647, %v14997_v43  ;;  %v6018_v8 = vpop.f32.mrf.mxu1 }
 0x295   : > { %v11120_v10 = vpop.eup %11119  ;;  %v2748_v48 = vsel %vm14954_vm10, %v2747_v33, %v2743_v56  ;;  %v15017_v44 = vadd.f32 %v7979_v62, %v7853_v47  ;;  %10590 = vst [vmem:[%s13495_s14 + $0x50] sm:$0xff] %v10251_v0   ;;  %v15025_v55 = vadd.f32 %v14795_v41, %v1223_v39  ;;  %v3241_v42 = vand.u32 2147483648, %v14997_v43 }
 0x296   : > { %v3913_v27 = vmul.f32 %v2748_v48, %v14809_v31  ;;  %v4040_v11 = vpack.c.bf16 %v3912_v30, %v3912_v30  ;;  %v15022_v23 = vadd.f32 1.0, %v11120_v10  ;;  %v8631_v61 = vmul.f32 -1.442695, %v15000_v2  ;;  %v15056_v30 = vpop.f32.mrf.mxu3 }
 0x297   : > { %v10121_v9 = vunpack.c.h.bf16 %v10561_v46  ;;  %v15031_v49 = vadd.f32 %v6018_v8, %v5153_v18  ;;  %vm3235_vm1 = vweird.f32 %v14997_v43  ;;  %v8632_v15 = vmul.f32 -1.442695, %v15025_v55  ;;  %v10562_v46 = vld [vmem:[%s11703_s17 + $0x168] sm:$0xff]   ;;  %17881 = vst [vmem:[#allocation21_spill] sm:$0xff] %v15056_v30 }
 0x298   : > { %v4041_v50 = vpack.c.bf16 %v3913_v27, %v3913_v27  ;;  %4203 = vst.msk [vmem:[#allocation2 + $0x110] sm:$0xf] %vm17876_vm5, %v4040_v11  ;;  %11123 = vrcp.f32 %v15022_v23  ;;  %v3254_v31 = vand.u32 2147483647, %v15022_v23  ;;  %v1256_v33 = vmul.f32 %v14979_v32, %v10120_v13 }
 0x299   : > { %11125 = vpow2.f32 %v8631_v61  ;;  %vm15039_vm7 = vcmp.eq.f32.partialorder %v3239_v35, 8.507059e+37  ;;  %v1257_v21 = vmul.f32 %v14979_v32, %v10121_v9  ;;  %v10056_v62 = vunpack.c.l.bf16 %v10545_v7  ;;  %v15064_v35 = vld [vmem:[%s11703_s17 + $0xe8] sm:$0xff]  }
 0x29a   : > { %v11122_v63 = vpop.eup %11121  ;;  %v9788_v1 = vld [vmem:[#allocation2 + $0x190] sm:$0xff]  ;;  %4204 = vst.msk [vmem:[#allocation2 + $0x114] sm:$0xf] %vm17877_vm6, %v4041_v50  ;;  %v10057_v51 = vunpack.c.h.bf16 %v10545_v7  ;;  %v3242_v34 = vor.u32 1.1754944e-38, %v3241_v42  ;;  %v3256_v37 = vand.u32 2147483648, %v15022_v23  ;;  %11127 = vpow2.f32 %v8632_v15 }
 0x29b   : > { %v3231_v39 = vmul.f32 %v11122_v63, %v14997_v43  ;;  %9371 = vmatmul.msk.bf16.gmra.mxu3 %vm17880_vm8, %v9788_v1  ;;  %v15049_v22 = vadd.f32 %v14795_v41, %v1256_v33  ;;  %v15052_v47 = vadd.f32 %v14795_v41, %v1257_v21  ;;  %v1224_v0 = vmul.f32 %v14979_v32, %v10056_v62 }
 0x29c   : > { %v1225_v56 = vmul.f32 %v14979_v32, %v10057_v51  ;;  %vm3236_vm9 = vweird.f32 %v11122_v63  ;;  %vm3250_vm11 = vweird.f32 %v15022_v23  ;;  %vm15059_vm12 = vcmp.eq.f32.partialorder %v3254_v31, 8.507059e+37  ;;  %v6020_v43 = vpop.f32.mrf.mxu1 }
 0x29d   : > { %v3232_v10 = vsub.f32 1.0, %v3231_v39  ;;  %v8665_v27 = vmul.f32 -1.442695, %v15049_v22  ;;  %v8666_v11 = vmul.f32 -1.442695, %v15052_v47  ;;  %v15069_v8 = vadd.f32 %v14795_v41, %v1224_v0  ;;  %vm15074_vm10 = vmor %vm3235_vm1, %vm3236_vm9  ;;  %v9826_v0 = vld [vmem:[#allocation2 + $0xe0] sm:$0xff] }
 0x29e   : > { %v11124_v13 = vpop.eup %11123  ;;  %v10124_v18 = vunpack.c.l.bf16 %v10562_v46  ;;  %v3257_v7 = vor.u32 1.1754944e-38, %v3256_v37  ;;  %v10125_v50 = vunpack.c.h.bf16 %v10562_v46  ;;  %v15081_v33 = vadd.f32 %v14795_v41, %v1225_v56  ;;  %v9758_v46 = vld [vmem:[#allocation2 + $0xa0] sm:$0xff]  ;;  %9005 = vmatmul.msk.bf16.gmra.mxu0 %vm17871_vm2, %v9826_v0  ;;  %v15119_v0 = vpop.f32.mrf.mxu3  ;;  %vm17893_vm1 = vmmov %vm17877_vm6 }
 0x29f   : > { %v11126_v42 = vpop.eup %11125  ;;  %v3233_v61 = vmul.f32 %v11122_v63, %v3232_v10  ;;  %v3246_v9 = vmul.f32 %v11124_v13, %v15022_v23  ;;  %11129 = vpow2.f32 %v8665_v27  ;;  %vm3251_vm13 = vweird.f32 %v11124_v13  ;;  %9341 = vmatmul.msk.bf16.gmra.mxu1 %vm17889_vm3, %v9758_v46  ;;  %17890 = vst [vmem:[#allocation22_spill] sm:$0xff] %v15119_v0  ;;  %vm17896_vm8 = vmmov %vm17893_vm1 }
 0x2a0   : > { %v15078_v15 = vadd.f32 1.0, %v11126_v42  ;;  %v11128_v21 = vpop.eup %11127  ;;  %11131 = vpow2.f32 %v8666_v11  ;;  %v8633_v10 = vmul.f32 -1.442695, %v15069_v8  ;;  %v15089_v56 = vmul.f32 %v14979_v32, %v10124_v18  ;;  %vm15101_vm15 = vmor %vm3250_vm11, %vm3251_vm13 }
 0x2a1   : > { %v9892_v62 = vld [vmem:[#allocation2 + $0x110] sm:$0xff]  ;;  %v3234_v51 = vadd.f32 %v11122_v63, %v3233_v61  ;;  %v3247_v39 = vsub.f32 1.0, %v3246_v9  ;;  %v15084_v37 = vadd.f32 1.0, %v11128_v21  ;;  %v7021_v9 = vpop.f32.mrf.mxu2  ;;  %v5155_v21 = vpop.f32.mrf.mxu0  ;;  %v15110_v31 = vmul.f32 %v14979_v32, %v10125_v50 }
 0x2a2   : > { %11133 = vrcp.f32 %v15078_v15  ;;  %9683 = vmatmul.msk.bf16.gmra.mxu2 %vm17886_vm14, %v9892_v62  ;;  %v2759_v11 = vand.u32 2147483647, %v15078_v15  ;;  %v2761_v61 = vand.u32 2147483648, %v15078_v15  ;;  %vm2755_vm4 = vweird.f32 %v15078_v15 }
 0x2a3   : > { %v3238_v27 = vsel %vm15074_vm10, %v11122_v63, %v3234_v51  ;;  %v3248_v42 = vmul.f32 %v11124_v13, %v3247_v39  ;;  %11135 = vrcp.f32 %v15084_v37  ;;  %v8634_v63 = vmul.f32 -1.442695, %v15081_v33 }
 0x2a4   : > { %v3243_v1 = vsel %vm15039_vm7, %v3242_v34, %v3238_v27  ;;  %v2774_v23 = vand.u32 2147483647, %v15084_v37  ;;  %v15115_v51 = vor.u32 1.1754944e-38, %v2761_v61  ;;  %vm2770_vm0 = vweird.f32 %v15084_v37  ;;  %v6023_v0 = vpop.f32.mrf.mxu1 }
 0x2a5   : > { %v3249_v20 = vadd.f32 %v11124_v13, %v3248_v42  ;;  %v3946_v34 = vmul.f32 %v3243_v1, %v14853_v24  ;;  %v11130_v62 = vpop.eup %11129  ;;  %v7308_v39 = vadd.f32 %v7021_v9, %v15031_v49  ;;  %11137 = vpow2.f32 %v8633_v10 }
 0x2a6   : > { %v11132_v46 = vpop.eup %11131  ;;  %vm15123_vm5 = vcmp.eq.f32.partialorder %v2759_v11, 8.507059e+37  ;;  %v2776_v1 = vand.u32 2147483648, %v15084_v37  ;;  %v15128_v42 = vadd.f32 1.0, %v11130_v62  ;;  %v6021_v9 = vadd.f32 %v6020_v43, %v5155_v21 }
 0x2a7   : > { %v3253_v50 = vsel %vm15101_vm15, %v11124_v13, %v3249_v20  ;;  %v4074_v27 = vpack.c.bf16 %v3946_v34, %v3946_v34  ;;  %v7440_v10 = vadd.f32 %v14651_v36, %v7308_v39  ;;  %11139 = vpow2.f32 %v8634_v63 }
 0x2a8   : > { %v11134_v61 = vpop.eup %11133  ;;  %v3258_v49 = vsel %vm15059_vm12, %v3257_v7, %v3253_v50  ;;  %vm15136_vm6 = vcmp.eq.f32.partialorder %v2774_v23, 8.507059e+37  ;;  %11141 = vrcp.f32 %v15128_v42  ;;  %v15142_v7 = vadd.f32 1.0, %v11132_v46 }
 0x2a9   : > { %v3947_v18 = vmul.f32 %v3258_v49, %v14870_v40  ;;  %4237 = vst.msk [vmem:[#allocation2 + $0x198] sm:$0xf] %vm17893_vm1, %v4074_v27  ;;  %v2751_v13 = vmul.f32 %v11134_v61, %v15078_v15  ;;  %v11136_v20 = vpop.eup %11135  ;;  %vm2756_vm7 = vweird.f32 %v11134_v61  ;;  %v7593_v48 = vadd.f32 %v14654_v57, %v7440_v10  ;;  %v7023_v34 = vpop.f32.mrf.mxu2 }
 0x2aa   : > { %v3269_v43 = vand.u32 2147483647, %v15128_v42  ;;  %v2766_v63 = vmul.f32 %v11136_v20, %v15084_v37  ;;  %v3271_v23 = vand.u32 2147483648, %v15128_v42  ;;  %v2777_v39 = vor.u32 1.1754944e-38, %v2776_v1  ;;  %v5158_v30 = vpop.f32.mrf.mxu0  ;;  %vm15153_vm12 = vmor %vm2755_vm4, %vm2756_vm7 }
 0x2ab   : > { %v4075_v21 = vpack.c.bf16 %v3947_v18, %v3947_v18  ;;  %v2752_v40 = vsub.f32 1.0, %v2751_v13  ;;  %v11138_v62 = vpop.eup %11137  ;;  %v7720_v50 = vadd.f32 %v15009_v38, %v7593_v48  ;;  %v7854_v27 = vmul.f32 %v7593_v48, %v7593_v48 }
 0x2ac   : > { %v7309_v49 = vadd.f32 %v7023_v34, %v6021_v9  ;;  %v2767_v46 = vsub.f32 1.0, %v2766_v63  ;;  %vm2771_vm9 = vweird.f32 %v11136_v20  ;;  %vm3265_vm11 = vweird.f32 %v15128_v42 }
 0x2ad   : > { %4238 = vst.msk [vmem:[#allocation2 + $0x19c] sm:$0xf] %vm17896_vm8, %v4075_v21  ;;  %v2753_v10 = vmul.f32 %v11134_v61, %v2752_v40  ;;  %v11140_v18 = vpop.eup %11139  ;;  %v7981_v38 = vadd.f32 %v15017_v44, %v7854_v27  ;;  %v15159_v9 = vadd.f32 %v6023_v0, %v5158_v30  ;;  %11143 = vrcp.f32 %v15142_v7  ;;  %vm15172_vm14 = vmor %vm2770_vm0, %vm2771_vm9 }
 0x2ae   : > { %v7441_v1 = vadd.f32 %v14651_v36, %v7309_v49  ;;  %v15162_v21 = vpop.eup %11141  ;;  %v2768_v63 = vmul.f32 %v11136_v20, %v2767_v46  ;;  %vm15164_vm10 = vcmp.eq.f32.partialorder %v3269_v43, 8.507059e+37  ;;  %v3272_v15 = vor.u32 1.1754944e-38, %v3271_v23  ;;  %v15184_v49 = vpop.f32.mrf.mxu3  ;;  %vm17908_vm0 = vmmov %vm17871_vm2 }
 0x2af   : > { %v2754_v40 = vadd.f32 %v11134_v61, %v2753_v10  ;;  %vm3280_vm13 = vweird.f32 %v15142_v7  ;;  %v3261_v30 = vmul.f32 %v15162_v21, %v15128_v42  ;;  %v3284_v0 = vand.u32 2147483647, %v15142_v7  ;;  %17903 = vst [vmem:[#allocation23_spill] sm:$0xff] %v15184_v49 }
 0x2b0   : > { %v7594_v44 = vadd.f32 %v14654_v57, %v7441_v1  ;;  %v15180_v43 = vadd.f32 1.0, %v11138_v62  ;;  %v2769_v27 = vadd.f32 %v11136_v20, %v2768_v63  ;;  %vm3266_vm15 = vweird.f32 %v15162_v21 }
 0x2b1   : > { %v2758_v23 = vsel %vm15153_vm12, %v11134_v61, %v2754_v40  ;;  %v3286_v37 = vand.u32 2147483648, %v15142_v7  ;;  %v3262_v40 = vsub.f32 1.0, %v3261_v30  ;;  %v15196_v63 = vadd.f32 1.0, %v11140_v18  ;;  %vm15219_vm4 = vmor %vm3265_vm11, %vm3266_vm15 }
 0x2b2   : > { %v2763_v10 = vsel %vm15123_vm5, %v15115_v51, %v2758_v23  ;;  %v15191_v46 = vadd.f32 %v7720_v50, %v7594_v44  ;;  %v7855_v1 = vmul.f32 %v7594_v44, %v7594_v44  ;;  %v10256_v62 = vpack.c.bf16 %v7594_v44, %v7593_v48  ;;  %vm17909_vm5 = vmmov %vm17893_vm1  ;;  %v5160_v42 = vpop.f32.mrf.mxu0 }
 0x2b3   : > { %v2773_v13 = vsel %vm15172_vm14, %v11136_v20, %v2769_v27  ;;  %v3914_v61 = vmul.f32 %v2763_v10, %v15000_v2  ;;  %v15198_v49 = vpop.eup %11143  ;;  %vm15205_vm3 = vcmp.eq.f32.partialorder %v3284_v0, 8.507059e+37  ;;  %11145 = vrcp.f32 %v15180_v43  ;;  %v9759_v20 = vld [vmem:[#allocation2 + $0xa8] sm:$0xff]  ;;  %vm17911_vm9 = vmmov %vm17909_vm5 }
 0x2b4   : > { %v9789_v5 = vld [vmem:[#allocation2 + $0x198] sm:$0xff]  ;;  %v2778_v53 = vsel %vm15136_vm6, %v2777_v39, %v2773_v13  ;;  %v15202_v24 = vadd.f32 %v7981_v38, %v7855_v1  ;;  %10591 = vst [vmem:[%s13495_s14 + $0x58] sm:$0xff] %v10256_v62   ;;  %v9827_v2 = vld [vmem:[#allocation2 + $0xe8] sm:$0xff]  ;;  %v3263_v18 = vmul.f32 %v15162_v21, %v3262_v40  ;;  %v3276_v11 = vmul.f32 %v15198_v49, %v15142_v7  ;;  %v7026_v39 = vpop.f32.mrf.mxu2  ;;  %vm17910_vm6 = vmmov %vm17908_vm0  ;;  %v6025_v1 = vpop.f32.mrf.mxu1 }
 0x2b5   : > { %v3915_v48 = vmul.f32 %v2778_v53, %v15025_v55  ;;  %v4042_v50 = vpack.c.bf16 %v3914_v61, %v3914_v61  ;;  %9372 = vmatmul.msk.bf16.gmra.mxu3 %vm17871_vm2, %v9789_v5  ;;  %v3287_v36 = vor.u32 1.1754944e-38, %v3286_v37  ;;  %v2789_v53 = vand.u32 2147483647, %v15180_v43  ;;  %9342 = vmatmul.msk.bf16.gmra.mxu1 %vm17908_vm0, %v9759_v20  ;;  %vm17919_vm14 = vmmov %vm17909_vm5 }
 0x2b6   : > { %v2791_v55 = vand.u32 2147483648, %v15180_v43  ;;  %11147 = vrcp.f32 %v15196_v63  ;;  %v3264_v5 = vadd.f32 %v15162_v21, %v3263_v18  ;;  %v3277_v30 = vsub.f32 1.0, %v3276_v11  ;;  %9006 = vmatmul.msk.bf16.gmra.mxu0 %vm17910_vm6, %v9827_v2 }
 0x2b7   : > { %v4043_v44 = vpack.c.bf16 %v3915_v48, %v3915_v48  ;;  %4205 = vst.msk [vmem:[#allocation2 + $0x118] sm:$0xf] %vm17909_vm5, %v4042_v50  ;;  %vm3281_vm1 = vweird.f32 %v15198_v49  ;;  %vm2785_vm7 = vweird.f32 %v15180_v43  ;;  %vm2800_vm8 = vweird.f32 %v15196_v63  ;;  %v15259_v48 = vpop.f32.mrf.mxu3 }
 0x2b8   : > { %v2804_v0 = vand.u32 2147483647, %v15196_v63  ;;  %v2806_v23 = vand.u32 2147483648, %v15196_v63  ;;  %v3268_v27 = vsel %vm15219_vm4, %v15162_v21, %v3264_v5  ;;  %v3278_v37 = vmul.f32 %v15198_v49, %v3277_v30  ;;  %vm15251_vm12 = vmor %vm3280_vm13, %vm3281_vm1  ;;  %17916 = vst [vmem:[#allocation24_spill] sm:$0xff] %v15259_v48 }
 0x2b9   : > { %4206 = vst.msk [vmem:[#allocation2 + $0x11c] sm:$0xf] %vm17911_vm9, %v4043_v44  ;;  %vm15240_vm11 = vcmp.eq.f32.partialorder %v2789_v53, 8.507059e+37  ;;  %v7310_v62 = vadd.f32 %v7026_v39, %v15159_v9  ;;  %v11146_v13 = vpop.eup %11145  ;;  %v3273_v61 = vsel %vm15164_vm10, %v3272_v15, %v3268_v27  ;;  %v2792_v21 = vor.u32 1.1754944e-38, %v2791_v55 }
 0x2ba   : > { %v6026_v20 = vadd.f32 %v6025_v1, %v5160_v42  ;;  %v15257_v2 = vadd.f32 %v14795_v41, %v15089_v56  ;;  %v3279_v9 = vadd.f32 %v15198_v49, %v3278_v37  ;;  %v3948_v34 = vmul.f32 %v3273_v61, %v15049_v22  ;;  %v15271_v56 = vld [vmem:[%s17617_s4] ss:$0 sm:$0xff] }
 0x2bb   : > { %v2781_v15 = vmul.f32 %v11146_v13, %v15180_v43  ;;  %vm15264_vm10 = vcmp.eq.f32.partialorder %v2804_v0, 8.507059e+37  ;;  %v2807_v50 = vor.u32 1.1754944e-38, %v2806_v23  ;;  %vm2786_vm13 = vweird.f32 %v11146_v13 }
 0x2bc   : > { %v11148_v18 = vpop.eup %11147  ;;  %v7442_v11 = vadd.f32 %v15271_v56, %v7310_v62  ;;  %v15276_v39 = vadd.f32 %v14795_v41, %v15110_v31  ;;  %v8667_v22 = vmul.f32 -1.442695, %v15257_v2  ;;  %v3283_v38 = vsel %vm15251_vm12, %v15198_v49, %v3279_v9  ;;  %v7028_v5 = vpop.f32.mrf.mxu2  ;;  %vm15292_vm2 = vmor %vm2785_vm7, %vm2786_vm13 }
 0x2bd   : > { %v4076_v53 = vpack.c.bf16 %v3948_v34, %v3948_v34  ;;  %v2782_v55 = vsub.f32 1.0, %v2781_v15  ;;  %v2796_v44 = vmul.f32 %v11148_v18, %v15196_v63  ;;  %v3288_v30 = vsel %vm15205_vm3, %v3287_v36, %v3283_v38  ;;  %vm17922_vm3 = vmmov %vm17908_vm0 }
 0x2be   : > { %v7595_v42 = vadd.f32 %v14654_v57, %v7442_v11  ;;  %v7311_v0 = vadd.f32 %v7028_v5, %v6026_v20  ;;  %v10061_v31 = vunpack.c.h.bf16 %v15064_v35  ;;  %v3949_v23 = vmul.f32 %v3288_v30, %v15052_v47  ;;  %v10563_v47 = vld [vmem:[%s11703_s17 + $0x170] sm:$0xff]   ;;  %vm17926_vm0 = vmmov %vm17909_vm5 }
 0x2bf   : > { %4239 = vst.msk [vmem:[#allocation2 + $0x1a0] sm:$0xf] %vm17919_vm14, %v4076_v53  ;;  %v2783_v27 = vmul.f32 %v11146_v13, %v2782_v55  ;;  %v2797_v49 = vsub.f32 1.0, %v2796_v44  ;;  %vm2801_vm15 = vweird.f32 %v11148_v18  ;;  %11149 = vpow2.f32 %v8667_v22  ;;  %vm17928_vm5 = vmmov %vm17926_vm0 }
 0x2c0   : > { %v9893_v37 = vld [vmem:[#allocation2 + $0x118] sm:$0xff]  ;;  %v7722_v36 = vadd.f32 %v15191_v46, %v7595_v42  ;;  %v7856_v1 = vmul.f32 %v7595_v42, %v7595_v42  ;;  %v7443_v62 = vadd.f32 %v15271_v56, %v7311_v0  ;;  %v4077_v61 = vpack.c.bf16 %v3949_v23, %v3949_v23  ;;  %vm15303_vm4 = vmor %vm2800_vm8, %vm2801_vm15  ;;  %v15323_v0 = vpop.f32.mrf.mxu3 }
 0x2c1   : > { %v2784_v40 = vadd.f32 %v11146_v13, %v2783_v27  ;;  %v2798_v20 = vmul.f32 %v11148_v18, %v2797_v49  ;;  %v8668_v9 = vmul.f32 -1.442695, %v15276_v39  ;;  %9684 = vmatmul.msk.bf16.gmra.mxu2 %vm17922_vm3, %v9893_v37  ;;  %v17925_v15 = vunpack.c.l.bf16 %v15064_v35  ;;  %17927 = vst [vmem:[#allocation25_spill] sm:$0xff] %v15323_v0  ;;  %v10547_v27 = vld [vmem:[%s11703_s17 + $0xf0] sm:$0xff]   ;;  %vm17929_vm1 = vmmov %vm17926_vm0 }
 0x2c2   : > { %v7983_v46 = vadd.f32 %v15202_v24, %v7856_v1  ;;  %v7596_v34 = vadd.f32 %v14654_v57, %v7443_v62  ;;  %v1227_v22 = vmul.f32 %v14979_v32, %v10061_v31  ;;  %4240 = vst.msk [vmem:[#allocation2 + $0x1a4] sm:$0xf] %vm17926_vm0, %v4077_v61  ;;  %v10128_v53 = vunpack.c.l.bf16 %v10563_v47  ;;  %vm17930_vm6 = vmmov %vm17922_vm3 }
 0x2c3   : > { %v1226_v11 = vmul.f32 %v14979_v32, %v17925_v15  ;;  %v2788_v38 = vsel %vm15292_vm2, %v11146_v13, %v2784_v40  ;;  %v2799_v63 = vadd.f32 %v11148_v18, %v2798_v20  ;;  %11151 = vpow2.f32 %v8668_v9  ;;  %v6028_v20 = vpop.f32.mrf.mxu1  ;;  %v5163_v9 = vpop.f32.mrf.mxu0  ;;  %vm17937_vm13 = vmmov %vm17922_vm3 }
 0x2c4   : > { %v2793_v24 = vsel %vm15240_vm11, %v2792_v21, %v2788_v38  ;;  %v15318_v55 = vadd.f32 %v7722_v36, %v7596_v34  ;;  %v7857_v35 = vmul.f32 %v7596_v34, %v7596_v34  ;;  %v10261_v44 = vpack.c.bf16 %v7596_v34, %v7595_v42  ;;  %vm17940_vm2 = vmmov %vm17922_vm3 }
 0x2c5   : > { %v2803_v5 = vsel %vm15303_vm4, %v11148_v18, %v2799_v63  ;;  %v3916_v30 = vmul.f32 %v2793_v24, %v15069_v8  ;;  %v15326_v13 = vadd.f32 %v14795_v41, %v1226_v11  ;;  %v15329_v31 = vadd.f32 %v14795_v41, %v1227_v22  ;;  %v11150_v10 = vpop.eup %11149  ;;  %v10564_v63 = vld [vmem:[%s11703_s17 + $0x178] sm:$0xff]  }
 0x2c6   : > { %v2808_v21 = vsel %vm15264_vm10, %v2807_v50, %v2803_v5  ;;  %v15333_v23 = vadd.f32 %v7983_v46, %v7857_v35  ;;  %10592 = vst [vmem:[%s13495_s14 + $0x60] sm:$0xff] %v10261_v44   ;;  %v10129_v42 = vunpack.c.h.bf16 %v10563_v47  ;;  %v1260_v18 = vmul.f32 %v14979_v32, %v10128_v53  ;;  %v15368_v44 = vld [vmem:[%s11703_s17 + $0xf8] sm:$0xff]   ;;  %vm17936_vm10 = vmmov %vm17922_vm3 }
 0x2c7   : > { %v3917_v8 = vmul.f32 %v2808_v21, %v15081_v33  ;;  %v4044_v49 = vpack.c.bf16 %v3916_v30, %v3916_v30  ;;  %v15339_v37 = vadd.f32 1.0, %v11150_v10  ;;  %v8635_v51 = vmul.f32 -1.442695, %v15326_v13  ;;  %v15379_v21 = vld [vmem:[%s11737_s12] ss:$0 sm:$0xff] }
 0x2c8   : > { %v8636_v36 = vmul.f32 -1.442695, %v15329_v31  ;;  %v1261_v1 = vmul.f32 %v14979_v32, %v10129_v42  ;;  %v15345_v7 = vadd.f32 %v14795_v41, %v1260_v18  ;;  %v10064_v47 = vunpack.c.l.bf16 %v10547_v27  ;;  %v15372_v30 = vpop.f32.mrf.mxu3 }
 0x2c9   : > { %v11152_v50 = vpop.eup %11151  ;;  %v4045_v62 = vpack.c.bf16 %v3917_v8, %v3917_v8  ;;  %4207 = vst.msk [vmem:[#allocation2 + $0x120] sm:$0xf] %vm17928_vm5, %v4044_v49  ;;  %11153 = vrcp.f32 %v15339_v37  ;;  %v9790_v33 = vld [vmem:[#allocation2 + $0x1a0] sm:$0xff]  ;;  %v3299_v43 = vand.u32 2147483647, %v15339_v37  ;;  %v10065_v34 = vunpack.c.h.bf16 %v10547_v27 }
 0x2ca   : > { %v15349_v61 = vadd.f32 1.0, %v11152_v50  ;;  %11155 = vpow2.f32 %v8635_v51  ;;  %v15352_v40 = vadd.f32 %v14795_v41, %v1261_v1  ;;  %v8669_v46 = vmul.f32 -1.442695, %v15345_v7  ;;  %9373 = vmatmul.msk.bf16.gmra.mxu3 %vm17930_vm6, %v9790_v33  ;;  %17931 = vst [vmem:[#allocation26_spill] sm:$0xff] %v15372_v30 }
 0x2cb   : > { %4208 = vst.msk [vmem:[#allocation2 + $0x124] sm:$0xf] %vm17929_vm1, %v4045_v62  ;;  %11157 = vpow2.f32 %v8636_v36  ;;  %v3301_v15 = vand.u32 2147483648, %v15339_v37  ;;  %v1228_v38 = vmul.f32 %v14979_v32, %v10064_v47  ;;  %v6029_v53 = vadd.f32 %v6028_v20, %v5163_v9 }
 0x2cc   : > { %11159 = vrcp.f32 %v15349_v61  ;;  %v3314_v41 = vand.u32 2147483647, %v15349_v61  ;;  %v3316_v11 = vand.u32 2147483648, %v15349_v61  ;;  %v8670_v22 = vmul.f32 -1.442695, %v15352_v40 }
 0x2cd   : > { %vm3295_vm7 = vweird.f32 %v15339_v37  ;;  %v1229_v24 = vmul.f32 %v14979_v32, %v10065_v34  ;;  %v10132_v35 = vunpack.c.l.bf16 %v10564_v63  ;;  %vm15374_vm8 = vcmp.eq.f32.partialorder %v3299_v43, 8.507059e+37  ;;  %v9828_v34 = vld [vmem:[#allocation2 + $0xf0] sm:$0xff] }
 0x2ce   : > { %11161 = vpow2.f32 %v8669_v46  ;;  %v15382_v42 = vadd.f32 %v15379_v21, %v1228_v38  ;;  %v10133_v18 = vunpack.c.h.bf16 %v10564_v63  ;;  %v3302_v49 = vor.u32 1.1754944e-38, %v3301_v15  ;;  %v9760_v46 = vld [vmem:[#allocation2 + $0xb0] sm:$0xff]  ;;  %9007 = vmatmul.msk.bf16.gmra.mxu0 %vm17940_vm2, %v9828_v34 }
 0x2cf   : > { %v15370_v5 = vpop.eup %11153  ;;  %vm3310_vm9 = vweird.f32 %v15349_v61  ;;  %11163 = vpow2.f32 %v8670_v22  ;;  %vm15387_vm11 = vcmp.eq.f32.partialorder %v3314_v41, 8.507059e+37  ;;  %v15391_v1 = vor.u32 1.1754944e-38, %v3316_v11  ;;  %v7031_v11 = vpop.f32.mrf.mxu2  ;;  %9343 = vmatmul.msk.bf16.gmra.mxu1 %vm17937_vm13, %v9760_v46 }
 0x2d0   : > { %v11156_v27 = vpop.eup %11155  ;;  %v3291_v8 = vmul.f32 %v15370_v5, %v15339_v37  ;;  %v1262_v62 = vmul.f32 %v14979_v32, %v10132_v35  ;;  %v10068_v47 = vunpack.c.l.bf16 %v15368_v44  ;;  %vm3296_vm12 = vweird.f32 %v15370_v5 }
 0x2d1   : > { %v11158_v51 = vpop.eup %11157  ;;  %v15393_v50 = vadd.f32 1.0, %v11156_v27  ;;  %v15401_v15 = vadd.f32 %v15379_v21, %v1229_v24  ;;  %v8637_v22 = vmul.f32 -1.442695, %v15382_v42  ;;  %v15407_v38 = vmul.f32 %v14979_v32, %v10133_v18  ;;  %vm15419_vm14 = vmor %vm3295_vm7, %vm3296_vm12  ;;  %v15455_v18 = vpop.f32.mrf.mxu3 }
 0x2d2   : > { %v11160_v33 = vpop.eup %11159  ;;  %v9894_v20 = vld [vmem:[#allocation2 + $0x120] sm:$0xff]  ;;  %v3292_v9 = vsub.f32 1.0, %v3291_v8  ;;  %v15398_v43 = vadd.f32 1.0, %v11158_v51  ;;  %v6030_v51 = vpop.f32.mrf.mxu1  ;;  %v15428_v46 = vmul.f32 %v14979_v32, %v10068_v47  ;;  %v7312_v0 = vadd.f32 %v7031_v11, %v6029_v53  ;;  %17945 = vst [vmem:[#allocation27_spill] sm:$0xff] %v15455_v18 }
 0x2d3   : > { %v3306_v41 = vmul.f32 %v11160_v33, %v15349_v61  ;;  %11165 = vrcp.f32 %v15393_v50  ;;  %9685 = vmatmul.msk.bf16.gmra.mxu2 %vm17936_vm10, %v9894_v20  ;;  %v2819_v35 = vand.u32 2147483647, %v15393_v50  ;;  %vm3311_vm15 = vweird.f32 %v11160_v33  ;;  %v5165_v20 = vpop.f32.mrf.mxu0 }
 0x2d4   : > { %v3293_v63 = vmul.f32 %v15370_v5, %v3292_v9  ;;  %11167 = vrcp.f32 %v15398_v43  ;;  %v11162_v27 = vpop.eup %11161  ;;  %v15425_v9 = vadd.f32 %v15379_v21, %v1262_v62  ;;  %vm2815_vm3 = vweird.f32 %v15393_v50  ;;  %vm15442_vm0 = vmor %vm3310_vm9, %vm3311_vm15 }
 0x2d5   : > { %v3307_v8 = vsub.f32 1.0, %v3306_v41  ;;  %v11164_v24 = vpop.eup %11163  ;;  %v2821_v37 = vand.u32 2147483648, %v15393_v50  ;;  %vm2830_vm4 = vweird.f32 %v15398_v43  ;;  %v2834_v48 = vand.u32 2147483647, %v15398_v43 }
 0x2d6   : > { %v3294_v30 = vadd.f32 %v15370_v5, %v3293_v63  ;;  %v2836_v34 = vand.u32 2147483648, %v15398_v43  ;;  %vm15446_vm5 = vcmp.eq.f32.partialorder %v2819_v35, 8.507059e+37  ;;  %v7444_v11 = vadd.f32 %v15271_v56, %v7312_v0 }
 0x2d7   : > { %v3308_v41 = vmul.f32 %v11160_v33, %v3307_v8  ;;  %v6031_v63 = vadd.f32 %v6030_v51, %v5165_v20  ;;  %v15451_v8 = vadd.f32 1.0, %v11162_v27  ;;  %v15457_v61 = vadd.f32 1.0, %v11164_v24 }
 0x2d8   : > { %v3298_v62 = vsel %vm15419_vm14, %v15370_v5, %v3294_v30  ;;  %11169 = vpow2.f32 %v8637_v22  ;;  %v7597_v0 = vadd.f32 %v14654_v57, %v7444_v11  ;;  %vm17946_vm7 = vcmask 519168  }
 0x2d9   : > { %v11166_v29 = vpop.eup %11165  ;;  %v3303_v5 = vsel %vm15374_vm8, %v3302_v49, %v3298_v62  ;;  %v3309_v30 = vadd.f32 %v11160_v33, %v3308_v41  ;;  %v7033_v49 = vpop.f32.mrf.mxu2  ;;  %11171 = vrcp.f32 %v15451_v8  ;;  %v2822_v11 = vor.u32 1.1754944e-38, %v2821_v37  ;;  %vm17953_vm12 = vmmov %vm17946_vm7 }
 0x2da   : > { %v11168_v45 = vpop.eup %11167  ;;  %v3950_v35 = vmul.f32 %v3303_v5, %v15257_v2  ;;  %v2811_v19 = vmul.f32 %v11166_v29, %v15393_v50  ;;  %vm2816_vm1 = vweird.f32 %v11166_v29  ;;  %v7724_v51 = vadd.f32 %v15318_v55, %v7597_v0 }
 0x2db   : > { %v3313_v27 = vsel %vm15442_vm0, %v11160_v33, %v3309_v30  ;;  %v2826_v10 = vmul.f32 %v11168_v45, %v15398_v43  ;;  %vm2831_vm6 = vweird.f32 %v11168_v45  ;;  %v7858_v62 = vmul.f32 %v7597_v0, %v7597_v0  ;;  %vm15479_vm9 = vmor %vm2815_vm3, %vm2816_vm1 }
 0x2dc   : > { %v3318_v22 = vsel %vm15387_vm11, %v15391_v1, %v3313_v27  ;;  %v4078_v24 = vpack.c.bf16 %v3950_v35, %v3950_v35  ;;  %v2812_v2 = vsub.f32 1.0, %v2811_v19  ;;  %v7313_v47 = vadd.f32 %v7033_v49, %v6031_v63  ;;  %v6033_v63 = vpop.f32.mrf.mxu1  ;;  %vm15488_vm11 = vmor %vm2830_vm4, %vm2831_vm6 }
 0x2dd   : > { %v3951_v20 = vmul.f32 %v3318_v22, %v15276_v39  ;;  %v2827_v41 = vsub.f32 1.0, %v2826_v10  ;;  %vm15472_vm8 = vcmp.eq.f32.partialorder %v2834_v48, 8.507059e+37  ;;  %v2837_v30 = vor.u32 1.1754944e-38, %v2836_v34  ;;  %v5168_v48 = vpop.f32.mrf.mxu0  ;;  %vm17959_vm3 = vmmov %vm17946_vm7 }
 0x2de   : > { %4241 = vst.msk [vmem:[#allocation2 + $0x1a8] sm:$0xf] %vm17946_vm7, %v4078_v24  ;;  %v2813_v33 = vmul.f32 %v11166_v29, %v2812_v2  ;;  %v11170_v36 = vpop.eup %11169  ;;  %v7985_v55 = vadd.f32 %v15333_v23, %v7858_v62  ;;  %v7445_v37 = vadd.f32 %v15271_v56, %v7313_v47  ;;  %v15492_v50 = vadd.f32 %v6033_v63, %v5168_v48  ;;  %v15508_v62 = vpop.f32.mrf.mxu3  ;;  %vm17960_vm4 = vmmov %vm17959_vm3 }
 0x2df   : > { %v4079_v1 = vpack.c.bf16 %v3951_v20, %v3951_v20  ;;  %v2828_v39 = vmul.f32 %v11168_v45, %v2827_v41  ;;  %11173 = vrcp.f32 %v15457_v61  ;;  %v8638_v27 = vmul.f32 -1.442695, %v15401_v15  ;;  %v11172_v10 = vpop.eup %11171  ;;  %17954 = vst [vmem:[#allocation28_spill] sm:$0xff] %v15508_v62 }
 0x2e0   : > { %v2814_v35 = vadd.f32 %v11166_v29, %v2813_v33  ;;  %v7598_v49 = vadd.f32 %v14654_v57, %v7445_v37  ;;  %vm3325_vm10 = vweird.f32 %v15451_v8  ;;  %v3329_v43 = vand.u32 2147483647, %v15451_v8 }
 0x2e1   : > { %4242 = vst.msk [vmem:[#allocation2 + $0x1ac] sm:$0xf] %vm17953_vm12, %v4079_v1  ;;  %v2829_v23 = vadd.f32 %v11168_v45, %v2828_v39  ;;  %v3321_v24 = vmul.f32 %v11172_v10, %v15451_v8  ;;  %vm3326_vm13 = vweird.f32 %v11172_v10  ;;  %v3331_v2 = vand.u32 2147483648, %v15451_v8  ;;  %vm17972_vm12 = vmmov %vm17959_vm3 }
 0x2e2   : > { %v2818_v22 = vsel %vm15479_vm9, %v11166_v29, %v2814_v35  ;;  %v15510_v47 = vadd.f32 %v7724_v51, %v7598_v49  ;;  %v7859_v33 = vmul.f32 %v7598_v49, %v7598_v49  ;;  %v10266_v19 = vpack.c.bf16 %v7598_v49, %v7597_v0  ;;  %vm15529_vm2 = vmor %vm3325_vm10, %vm3326_vm13 }
 0x2e3   : > { %v2823_v20 = vsel %vm15446_vm5, %v2822_v11, %v2818_v22  ;;  %v2833_v41 = vsel %vm15488_vm11, %v11168_v45, %v2829_v23  ;;  %v3322_v39 = vsub.f32 1.0, %v3321_v24  ;;  %vm15518_vm14 = vcmp.eq.f32.partialorder %v3329_v43, 8.507059e+37  ;;  %v9761_v11 = vld [vmem:[#allocation2 + $0xb8] sm:$0xff] }
 0x2e4   : > { %v2838_v29 = vsel %vm15472_vm8, %v2837_v30, %v2833_v41  ;;  %v3918_v1 = vmul.f32 %v2823_v20, %v15326_v13  ;;  %v15516_v53 = vadd.f32 %v7985_v55, %v7859_v33  ;;  %vm3340_vm15 = vweird.f32 %v15457_v61  ;;  %10593 = vst [vmem:[%s13495_s14 + $0x68] sm:$0xff] %v10266_v19  }
 0x2e5   : > { %v3919_v63 = vmul.f32 %v2838_v29, %v15329_v31  ;;  %v11174_v45 = vpop.eup %11173  ;;  %v3323_v37 = vmul.f32 %v11172_v10, %v3322_v39  ;;  %11175 = vpow2.f32 %v8638_v27  ;;  %v15524_v5 = vadd.f32 1.0, %v11170_v36 }
 0x2e6   : > { %v4046_v51 = vpack.c.bf16 %v3918_v1, %v3918_v1  ;;  %v3332_v0 = vor.u32 1.1754944e-38, %v3331_v2  ;;  %v3336_v30 = vmul.f32 %v11174_v45, %v15457_v61  ;;  %v3344_v55 = vand.u32 2147483647, %v15457_v61 }
 0x2e7   : > { %v4047_v13 = vpack.c.bf16 %v3919_v63, %v3919_v63  ;;  %v3324_v35 = vadd.f32 %v11172_v10, %v3323_v37  ;;  %v3346_v36 = vand.u32 2147483648, %v15457_v61  ;;  %11177 = vrcp.f32 %v15524_v5  ;;  %v6035_v61 = vpop.f32.mrf.mxu1  ;;  %v15580_v63 = vpop.f32.mrf.mxu3 }
 0x2e8   : > { %v9791_v48 = vld [vmem:[#allocation2 + $0x1a8] sm:$0xff]  ;;  %4209 = vst.msk [vmem:[#allocation2 + $0x128] sm:$0xf] %vm17959_vm3, %v4046_v51  ;;  %v2849_v34 = vand.u32 2147483647, %v15524_v5  ;;  %v3337_v8 = vsub.f32 1.0, %v3336_v30  ;;  %vm3341_vm0 = vweird.f32 %v11174_v45  ;;  %v15542_v27 = vadd.f32 %v15379_v21, %v15407_v38  ;;  %v5170_v30 = vpop.f32.mrf.mxu0 }
 0x2e9   : > { %4210 = vst.msk [vmem:[#allocation2 + $0x12c] sm:$0xf] %vm17960_vm4, %v4047_v13  ;;  %v8671_v23 = vmul.f32 -1.442695, %v15425_v9  ;;  %vm17961_vm5 = vcmask 523264   ;;  %v3328_v49 = vsel %vm15529_vm2, %v11172_v10, %v3324_v35  ;;  %v2851_v43 = vand.u32 2147483648, %v15524_v5  ;;  %vm15564_vm6 = vmor %vm3340_vm15, %vm3341_vm0 }
 0x2ea   : > { %9374 = vmatmul.msk.bf16.gmra.mxu3 %vm17961_vm5, %v9791_v48  ;;  %v17962_v22 = vunpack.c.h.bf16 %v15368_v44  ;;  %v15554_v2 = vadd.f32 %v15379_v21, %v15428_v46  ;;  %v3333_v38 = vsel %vm15518_vm14, %v3332_v0, %v3328_v49  ;;  %v3338_v20 = vmul.f32 %v11174_v45, %v3337_v8  ;;  %17969 = vst [vmem:[#allocation29_spill] sm:$0xff] %v15580_v63  ;;  %v9829_v51 = vld [vmem:[#allocation2 + $0xf8] sm:$0xff]  ;;  %v7036_v0 = vpop.f32.mrf.mxu2  ;;  %vm17970_vm9 = vmmov %vm17961_vm5 }
 0x2eb   : > { %vm15558_vm1 = vcmp.eq.f32.partialorder %v3344_v55, 8.507059e+37  ;;  %11179 = vpow2.f32 %v8671_v23  ;;  %v11176_v10 = vpop.eup %11175  ;;  %v3952_v46 = vmul.f32 %v3333_v38, %v15345_v7  ;;  %v8672_v33 = vmul.f32 -1.442695, %v15542_v27  ;;  %v15583_v7 = vld [vmem:[%s11703_s17 + $0x100] sm:$0xff]   ;;  %9344 = vmatmul.msk.bf16.gmra.mxu1 %vm17970_vm9, %v9761_v11  ;;  %vm17971_vm11 = vmmov %vm17961_vm5 }
 0x2ec   : > { %v1231_v24 = vmul.f32 %v14979_v32, %v17962_v22  ;;  %v3347_v32 = vor.u32 1.1754944e-38, %v3346_v36  ;;  %v3339_v1 = vadd.f32 %v11174_v45, %v3338_v20  ;;  %v15573_v19 = vadd.f32 1.0, %v11176_v10  ;;  %9008 = vmatmul.msk.bf16.gmra.mxu0 %vm17971_vm11, %v9829_v51  ;;  %vm17973_vm13 = vmmov %vm17961_vm5 }
 0x2ed   : > { %vm2845_vm7 = vweird.f32 %v15524_v5  ;;  %vm15576_vm8 = vcmp.eq.f32.partialorder %v2849_v34, 8.507059e+37  ;;  %v11178_v37 = vpop.eup %11177  ;;  %v4080_v13 = vpack.c.bf16 %v3952_v46, %v3952_v46  ;;  %v2852_v31 = vor.u32 1.1754944e-38, %v2851_v43 }
 0x2ee   : > { %v15571_v29 = vadd.f32 %v15379_v21, %v1231_v24  ;;  %11181 = vpow2.f32 %v8672_v33  ;;  %v8639_v55 = vmul.f32 -1.442695, %v15554_v2  ;;  %v3343_v48 = vsel %vm15564_vm6, %v11174_v45, %v3339_v1 }
 0x2ef   : > { %v2841_v35 = vmul.f32 %v11178_v37, %v15524_v5  ;;  %11183 = vrcp.f32 %v15573_v19  ;;  %v3348_v8 = vsel %vm15558_vm1, %v3347_v32, %v3343_v48  ;;  %4243 = vst.msk [vmem:[#allocation2 + $0x1b0] sm:$0xf] %vm17972_vm12, %v4080_v13  ;;  %v2864_v23 = vand.u32 2147483647, %v15573_v19  ;;  %v6038_v5 = vpop.f32.mrf.mxu1 }
 0x2f0   : > { %v8640_v36 = vmul.f32 -1.442695, %v15571_v29  ;;  %v9895_v34 = vld [vmem:[#allocation2 + $0x128] sm:$0xff]  ;;  %v2866_v45 = vand.u32 2147483648, %v15573_v19  ;;  %v10072_v49 = vunpack.c.l.bf16 %v15583_v7  ;;  %v3953_v22 = vmul.f32 %v3348_v8, %v15352_v40 }
 0x2f1   : > { %v11180_v43 = vpop.eup %11179  ;;  %v2842_v24 = vsub.f32 1.0, %v2841_v35  ;;  %vm2846_vm10 = vweird.f32 %v11178_v37  ;;  %v7314_v38 = vadd.f32 %v7036_v0, %v15492_v50  ;;  %9686 = vmatmul.msk.bf16.gmra.mxu2 %vm17973_vm13, %v9895_v34  ;;  %vm2860_vm14 = vweird.f32 %v15573_v19  ;;  %v15624_v35 = vpop.f32.mrf.mxu3 }
 0x2f2   : > { %v15603_v20 = vadd.f32 1.0, %v11180_v43  ;;  %11185 = vpow2.f32 %v8639_v55  ;;  %v10073_v41 = vunpack.c.h.bf16 %v15583_v7  ;;  %v4081_v10 = vpack.c.bf16 %v3953_v22, %v3953_v22  ;;  %vm15609_vm15 = vmor %vm2845_vm7, %vm2846_vm10  ;;  %17978 = vst [vmem:[#allocation30_spill] sm:$0xff] %v15624_v35  ;;  %v5173_v22 = vpop.f32.mrf.mxu0 }
 0x2f3   : > { %v2843_v44 = vmul.f32 %v11178_v37, %v2842_v24  ;;  %v7446_v32 = vadd.f32 %v15271_v56, %v7314_v38  ;;  %11187 = vpow2.f32 %v8640_v36  ;;  %vm15613_vm2 = vcmp.eq.f32.partialorder %v2864_v23, 8.507059e+37  ;;  %v7038_v36 = vpop.f32.mrf.mxu2  ;;  %vm17983_vm7 = vmmov %vm17959_vm3 }
 0x2f4   : > { %v11182_v46 = vpop.eup %11181  ;;  %v2867_v33 = vor.u32 1.1754944e-38, %v2866_v45  ;;  %v6036_v1 = vadd.f32 %v6035_v61, %v5170_v30  ;;  %11189 = vrcp.f32 %v15603_v20  ;;  %4244 = vst.msk [vmem:[#allocation2 + $0x1b4] sm:$0xf] %vm17959_vm3, %v4081_v10  ;;  %v3359_v55 = vand.u32 2147483647, %v15603_v20 }
 0x2f5   : > { %v11184_v11 = vpop.eup %11183  ;;  %v2844_v51 = vadd.f32 %v11178_v37, %v2843_v44  ;;  %v7599_v13 = vadd.f32 %v14654_v57, %v7446_v32  ;;  %v15620_v0 = vadd.f32 1.0, %v11182_v46  ;;  %vm3355_vm4 = vweird.f32 %v15603_v20  ;;  %v15629_v30 = vld [vmem:[%s11731_s23] ss:$0 sm:$0xff] }
 0x2f6   : > { %v2856_v48 = vmul.f32 %v11184_v11, %v15573_v19  ;;  %v3361_v61 = vand.u32 2147483648, %v15603_v20  ;;  %v15632_v34 = vmul.f32 %v15629_v30, %v10072_v49  ;;  %v7315_v43 = vadd.f32 %v7038_v36, %v6036_v1 }
 0x2f7   : > { %v2848_v8 = vsel %vm15609_vm15, %v11178_v37, %v2844_v51  ;;  %v7726_v23 = vadd.f32 %v15510_v47, %v7599_v13  ;;  %v7860_v45 = vmul.f32 %v7599_v13, %v7599_v13  ;;  %vm2861_vm0 = vweird.f32 %v11184_v11 }
 0x2f8   : > { %v11186_v24 = vpop.eup %11185  ;;  %v2853_v38 = vsel %vm15576_vm8, %v2852_v31, %v2848_v8  ;;  %v2857_v10 = vsub.f32 1.0, %v2856_v48  ;;  %11191 = vrcp.f32 %v15620_v0  ;;  %v7447_v37 = vadd.f32 %v15271_v56, %v7315_v43  ;;  %vm15651_vm1 = vmor %vm2860_vm14, %vm2861_vm0 }
 0x2f9   : > { %v11188_v44 = vpop.eup %11187  ;;  %v3920_v49 = vmul.f32 %v2853_v38, %v15382_v42  ;;  %v7987_v32 = vadd.f32 %v15516_v53, %v7860_v45  ;;  %vm15643_vm5 = vcmp.eq.f32.partialorder %v3359_v55, 8.507059e+37  ;;  %v6039_v1 = vadd.f32 %v6038_v5, %v5173_v22  ;;  %vm17984_vm8 = vmmov %vm17970_vm9 }
 0x2fa   : > { %v11190_v46 = vpop.eup %11189  ;;  %v2858_v40 = vmul.f32 %v11184_v11, %v2857_v10  ;;  %v3362_v39 = vor.u32 1.1754944e-38, %v3361_v61  ;;  %v15647_v31 = vadd.f32 1.0, %v11186_v24  ;;  %v7600_v53 = vadd.f32 %v14654_v57, %v7447_v37  ;;  %v6040_v37 = vpop.f32.mrf.mxu1  ;;  %vm17990_vm13 = vmmov %vm17984_vm8 }
 0x2fb   : > { %v4048_v42 = vpack.c.bf16 %v3920_v49, %v3920_v49  ;;  %v3351_v55 = vmul.f32 %v11190_v46, %v15603_v20  ;;  %v3374_v48 = vand.u32 2147483647, %v15620_v0  ;;  %v9792_v36 = vld [vmem:[#allocation2 + $0x1b0] sm:$0xff]  ;;  %vm3356_vm6 = vweird.f32 %v11190_v46  ;;  %vm17991_vm14 = vmmov %vm17984_vm8 }
 0x2fc   : > { %v2859_v8 = vadd.f32 %v11184_v11, %v2858_v40  ;;  %v3376_v5 = vand.u32 2147483648, %v15620_v0  ;;  %v15659_v61 = vadd.f32 1.0, %v11188_v44  ;;  %v15662_v19 = vadd.f32 %v7726_v23, %v7600_v53  ;;  %9375 = vmatmul.msk.bf16.gmra.mxu3 %vm17984_vm8, %v9792_v36  ;;  %v9762_v40 = vld [vmem:[#allocation2 + $0xc0] sm:$0xff]  ;;  %vm15680_vm11 = vmor %vm3355_vm4, %vm3356_vm6 }
 0x2fd   : > { %4211 = vst.msk [vmem:[#allocation2 + $0x130] sm:$0xf] %vm17983_vm7, %v4048_v42  ;;  %v7861_v45 = vmul.f32 %v7600_v53, %v7600_v53  ;;  %v10271_v43 = vpack.c.bf16 %v7600_v53, %v7599_v13  ;;  %v3352_v22 = vsub.f32 1.0, %v3351_v55  ;;  %vm3370_vm9 = vweird.f32 %v15620_v0  ;;  %v9830_v42 = vld [vmem:[#allocation2 + $0x100] sm:$0xff]  ;;  %v15689_v53 = vpop.f32.mrf.mxu3  ;;  %v7041_v55 = vpop.f32.mrf.mxu2  ;;  %9345 = vmatmul.msk.bf16.gmra.mxu1 %vm17990_vm13, %v9762_v40  ;;  %vm17994_vm4 = vmmov %vm17983_vm7 }
 0x2fe   : > { %v11192_v24 = vpop.eup %11191  ;;  %v2863_v38 = vsel %vm15651_vm1, %v11184_v11, %v2859_v8  ;;  %11193 = vrcp.f32 %v15647_v31  ;;  %v2879_v10 = vand.u32 2147483647, %v15647_v31  ;;  %vm15684_vm12 = vcmp.eq.f32.partialorder %v3374_v48, 8.507059e+37  ;;  %17989 = vst [vmem:[#allocation31_spill] sm:$0xff] %v15689_v53  ;;  %9009 = vmatmul.msk.bf16.gmra.mxu0 %vm17991_vm14, %v9830_v42  ;;  %vm17999_vm6 = vmmov %vm17994_vm4  ;;  %v9764_v53 = vld [vmem:[#allocation2 + $0xd0] sm:$0xff] }
 0x2ff   : > { %v2868_v44 = vsel %vm15613_vm2, %v2867_v33, %v2863_v38  ;;  %v15672_v23 = vadd.f32 %v7987_v32, %v7861_v45  ;;  %10594 = vst [vmem:[%s13495_s14 + $0x70] sm:$0xff] %v10271_v43   ;;  %v3353_v13 = vmul.f32 %v11190_v46, %v3352_v22  ;;  %v3366_v49 = vmul.f32 %v11192_v24, %v15620_v0  ;;  %vm18009_vm14 = vmmov %vm17994_vm4 }
 0x300   : > { %v3921_v11 = vmul.f32 %v2868_v44, %v15401_v15  ;;  %v3377_v33 = vor.u32 1.1754944e-38, %v3376_v5  ;;  %v2881_v32 = vand.u32 2147483648, %v15647_v31  ;;  %vm3371_vm10 = vweird.f32 %v11192_v24  ;;  %v5175_v15 = vpop.f32.mrf.mxu0 }
 0x301   : > { %v3354_v36 = vadd.f32 %v11190_v46, %v3353_v13  ;;  %v3367_v8 = vsub.f32 1.0, %v3366_v49  ;;  %11195 = vrcp.f32 %v15659_v61  ;;  %vm2875_vm15 = vweird.f32 %v15647_v31  ;;  %vm15710_vm0 = vmor %vm3370_vm9, %vm3371_vm10 }
 0x302   : > { %v4049_v20 = vpack.c.bf16 %v3921_v11, %v3921_v11  ;;  %v2894_v48 = vand.u32 2147483647, %v15659_v61  ;;  %v2896_v5 = vand.u32 2147483648, %v15659_v61  ;;  %vm15699_vm2 = vcmp.eq.f32.partialorder %v2879_v10, 8.507059e+37  ;;  %vm18003_vm9 = vmmov %vm17990_vm13 }
 0x303   : > { %v3358_v45 = vsel %vm15680_vm11, %v11190_v46, %v3354_v36  ;;  %v3368_v43 = vmul.f32 %v11192_v24, %v3367_v8  ;;  %vm2890_vm3 = vweird.f32 %v15659_v61  ;;  %v7316_v38 = vadd.f32 %v7041_v55, %v6039_v1  ;;  %v10550_v1 = vld [vmem:[%s11703_s17 + $0x108] sm:$0xff]   ;;  %vm18004_vm11 = vmmov %vm17994_vm4 }
 0x304   : > { %v11194_v44 = vpop.eup %11193  ;;  %4212 = vst.msk [vmem:[#allocation2 + $0x134] sm:$0xf] %vm17994_vm4, %v4049_v20  ;;  %v3363_v13 = vsel %vm15643_vm5, %v3362_v39, %v3358_v45  ;;  %v2882_v46 = vor.u32 1.1754944e-38, %v2881_v32  ;;  %v6041_v10 = vadd.f32 %v6040_v37, %v5175_v15  ;;  %v1233_v40 = vmul.f32 %v15629_v30, %v10073_v41  ;;  %vm18007_vm10 = vmmov %vm17994_vm4 }
 0x305   : > { %v3369_v42 = vadd.f32 %v11192_v24, %v3368_v43  ;;  %v3954_v11 = vmul.f32 %v3363_v13, %v15425_v9  ;;  %v2871_v47 = vmul.f32 %v11194_v44, %v15647_v31  ;;  %v2897_v39 = vor.u32 1.1754944e-38, %v2896_v5  ;;  %v6043_v13 = vpop.f32.mrf.mxu1  ;;  %v15748_v49 = vpop.f32.mrf.mxu3  ;;  %vm18008_vm13 = vmmov %vm18003_vm9 }
 0x306   : > { %vm2876_vm5 = vweird.f32 %v11194_v44  ;;  %vm15720_vm1 = vcmp.eq.f32.partialorder %v2894_v48, 8.507059e+37  ;;  %v7448_v51 = vadd.f32 %v15271_v56, %v7316_v38  ;;  %v15727_v37 = vadd.f32 %v15379_v21, %v15632_v34  ;;  %v7043_v48 = vpop.f32.mrf.mxu2  ;;  %18002 = vst [vmem:[#allocation32_spill] sm:$0xff] %v15748_v49 }
 0x307   : > { %v15730_v7 = vadd.f32 %v15379_v21, %v1233_v40  ;;  %v11196_v41 = vpop.eup %11195  ;;  %v3373_v9 = vsel %vm15710_vm0, %v11192_v24, %v3369_v42  ;;  %v4082_v32 = vpack.c.bf16 %v3954_v11, %v3954_v11  ;;  %v2872_v55 = vsub.f32 1.0, %v2871_v47  ;;  %vm15743_vm8 = vmor %vm2875_vm15, %vm2876_vm5  ;;  %v10551_v47 = vld [vmem:[%s11703_s17 + $0x110] sm:$0xff]  }
 0x308   : > { %v10076_v36 = vunpack.c.l.bf16 %v10550_v1  ;;  %v3378_v8 = vsel %vm15684_vm12, %v3377_v33, %v3373_v9  ;;  %v2886_v15 = vmul.f32 %v11196_v41, %v15659_v61  ;;  %v7601_v20 = vadd.f32 %v14654_v57, %v7448_v51  ;;  %v5178_v11 = vpop.f32.mrf.mxu0  ;;  %vm18010_vm15 = vmmov %vm18003_vm9 }
 0x309   : > { %v10077_v34 = vunpack.c.h.bf16 %v10550_v1  ;;  %v3955_v5 = vmul.f32 %v3378_v8, %v15542_v27  ;;  %4245 = vst.msk [vmem:[#allocation2 + $0x1b8] sm:$0xf] %vm17999_vm6, %v4082_v32  ;;  %v2873_v45 = vmul.f32 %v11194_v44, %v2872_v55  ;;  %vm2891_vm7 = vweird.f32 %v11196_v41 }
 0x30a   : > { %v7317_v24 = vadd.f32 %v7043_v48, %v6041_v10  ;;  %v2887_v33 = vsub.f32 1.0, %v2886_v15  ;;  %v7728_v43 = vadd.f32 %v15662_v19, %v7601_v20  ;;  %v7862_v38 = vmul.f32 %v7601_v20, %v7601_v20  ;;  %vm15763_vm12 = vmor %vm2890_vm3, %vm2891_vm7 }
 0x30b   : > { %v8641_v27 = vmul.f32 -1.442695, %v15727_v37  ;;  %v9896_v40 = vld [vmem:[#allocation2 + $0x130] sm:$0xff]  ;;  %v4083_v1 = vpack.c.bf16 %v3955_v5, %v3955_v5  ;;  %v2874_v42 = vadd.f32 %v11194_v44, %v2873_v45  ;;  %v8642_v31 = vmul.f32 -1.442695, %v15730_v7 }
 0x30c   : > { %v7449_v10 = vadd.f32 %v15271_v56, %v7317_v24  ;;  %v2888_v51 = vmul.f32 %v11196_v41, %v2887_v33  ;;  %v7989_v9 = vadd.f32 %v15672_v23, %v7862_v38  ;;  %v1234_v19 = vmul.f32 %v15629_v30, %v10076_v36  ;;  %9687 = vmatmul.msk.bf16.gmra.mxu2 %vm18003_vm9, %v9896_v40 }
 0x30d   : > { %11197 = vpow2.f32 %v8641_v27  ;;  %4246 = vst.msk [vmem:[#allocation2 + $0x1bc] sm:$0xf] %vm18004_vm11, %v4083_v1  ;;  %v2878_v32 = vsel %vm15743_vm8, %v11194_v44, %v2874_v42  ;;  %v1235_v23 = vmul.f32 %v15629_v30, %v10077_v34  ;;  %v10080_v44 = vunpack.c.l.bf16 %v10551_v47 }
 0x30e   : > { %v7602_v8 = vadd.f32 %v14654_v57, %v7449_v10  ;;  %11199 = vpow2.f32 %v8642_v31  ;;  %v2883_v36 = vsel %vm15699_vm2, %v2882_v46, %v2878_v32  ;;  %v2889_v15 = vadd.f32 %v11196_v41, %v2888_v51  ;;  %v6045_v10 = vpop.f32.mrf.mxu1  ;;  %v15796_v31 = vpop.f32.mrf.mxu3  ;;  %vm18011_vm2 = vmmov %vm18003_vm9 }
 0x30f   : > { %v15772_v48 = vadd.f32 %v15379_v21, %v1234_v19  ;;  %v3922_v61 = vmul.f32 %v2883_v36, %v15554_v2  ;;  %v15780_v50 = vadd.f32 %v15379_v21, %v1235_v23  ;;  %v6044_v38 = vadd.f32 %v6043_v13, %v5178_v11  ;;  %v9831_v19 = vld [vmem:[#allocation2 + $0x108] sm:$0xff]  ;;  %v7046_v13 = vpop.f32.mrf.mxu2  ;;  %vm18016_vm6 = vmmov %vm18011_vm2 }
 0x310   : > { %v15775_v5 = vadd.f32 %v7728_v43, %v7602_v8  ;;  %v7863_v45 = vmul.f32 %v7602_v8, %v7602_v8  ;;  %v10276_v24 = vpack.c.bf16 %v7602_v8, %v7601_v20  ;;  %v2893_v57 = vsel %vm15763_vm12, %v11196_v41, %v2889_v15  ;;  %v5180_v11 = vpop.f32.mrf.mxu0  ;;  %9010 = vmatmul.msk.bf16.gmra.mxu0 %vm18011_vm2, %v9831_v19 }
 0x311   : > { %v8643_v22 = vmul.f32 -1.442695, %v15772_v48  ;;  %v2898_v46 = vsel %vm15720_vm1, %v2897_v39, %v2893_v57  ;;  %v4050_v34 = vpack.c.bf16 %v3922_v61, %v3922_v61  ;;  %v8644_v20 = vmul.f32 -1.442695, %v15780_v50  ;;  %v15820_v57 = vld [vmem:[%s11703_s17 + $0x118] sm:$0xff]  }
 0x312   : > { %v15785_v33 = vadd.f32 %v7989_v9, %v7863_v45  ;;  %10595 = vst [vmem:[%s13495_s14 + $0x78] sm:$0xff] %v10276_v24   ;;  %v3923_v43 = vmul.f32 %v2898_v46, %v15571_v29  ;;  %v10081_v40 = vunpack.c.h.bf16 %v10551_v47  ;;  %v1236_v39 = vmul.f32 %v15629_v30, %v10080_v44  ;;  %v11277_v29 = vld [vmem:[%s13370_s21] sm:$0xff]  ;;  %v9763_v9 = vld [vmem:[#allocation2 + $0xc8] sm:$0xff] }
 0x313   : > { %v11198_v2 = vpop.eup %11197  ;;  %11201 = vpow2.f32 %v8643_v22  ;;  %4213 = vst.msk [vmem:[#allocation2 + $0x138] sm:$0xf] %vm18007_vm10, %v4050_v34  ;;  %v7549_v51 = vrot.slane %v11277_v29, 2  ;;  %9346 = vmatmul.msk.bf16.gmra.mxu1 %vm18010_vm15, %v9763_v9  ;;  %v7318_v23 = vadd.f32 %v7046_v13, %v6044_v38  ;;  %vm18024_vm15 = vmmov %vm18011_vm2 }
 0x314   : > { %v11200_v41 = vpop.eup %11199  ;;  %v15791_v27 = vadd.f32 1.0, %v11198_v2  ;;  %v9793_v0 = vld [vmem:[#allocation2 + $0x1b8] sm:$0xff]  ;;  %v4051_v1 = vpack.c.bf16 %v3923_v43, %v3923_v43  ;;  %11203 = vpow2.f32 %v8644_v20  ;;  %v1237_v36 = vmul.f32 %v15629_v30, %v10081_v40 }
 0x315   : > { %v15794_v42 = vadd.f32 1.0, %v11200_v41  ;;  %9376 = vmatmul.msk.bf16.gmra.mxu3 %vm18008_vm13, %v9793_v0  ;;  %v15810_v44 = vperm.slane %v7549_v51, 0  ;;  %v15813_v61 = vadd.f32 %v15379_v21, %v1236_v39  ;;  %v7450_v45 = vadd.f32 %v15271_v56, %v7318_v23 }
 0x316   : > { %11205 = vrcp.f32 %v15791_v27  ;;  %4214 = vst.msk [vmem:[#allocation2 + $0x13c] sm:$0xf] %vm18009_vm14, %v4051_v1  ;;  %v2909_v47 = vand.u32 2147483647, %v15791_v27  ;;  %v2911_v32 = vand.u32 2147483648, %v15791_v27  ;;  %vm2905_vm3 = vweird.f32 %v15791_v27  ;;  %v6048_v0 = vpop.f32.mrf.mxu1  ;;  %v15841_v1 = vpop.f32.mrf.mxu3  ;;  %vm18023_vm14 = vmmov %vm18011_vm2 }
 0x317   : > { %11207 = vrcp.f32 %v15794_v42  ;;  %v2926_v55 = vand.u32 2147483648, %v15794_v42  ;;  %v2924_v8 = vand.u32 2147483647, %v15794_v42  ;;  %vm2920_vm0 = vweird.f32 %v15794_v42 }
 0x318   : > { %vm15822_vm4 = vcmp.eq.f32.partialorder %v2909_v47, 8.507059e+37  ;;  %v2912_v34 = vor.u32 1.1754944e-38, %v2911_v32  ;;  %v15834_v56 = vadd.f32 %v15810_v44, %v7450_v45  ;;  %v6046_v41 = vadd.f32 %v6045_v10, %v5180_v11  ;;  %v7048_v11 = vpop.f32.mrf.mxu2  ;;  %v5183_v47 = vpop.f32.mrf.mxu0 }
 0x319   : > { %v11202_v15 = vpop.eup %11201  ;;  %v15827_v2 = vor.u32 1.1754944e-38, %v2926_v55  ;;  %vm15829_vm5 = vcmp.eq.f32.partialorder %v2924_v8, 8.507059e+37  ;;  %v15838_v38 = vadd.f32 %v15379_v21, %v1237_v36  ;;  %v8645_v51 = vmul.f32 -1.442695, %v15813_v61 }
 0x31a   : > { %v15817_v24 = vadd.f32 1.0, %v11202_v15  ;;  %v11204_v22 = vpop.eup %11203  ;;  %v7730_v13 = vadd.f32 %v15775_v5, %v15834_v56  ;;  %v7864_v21 = vmul.f32 %v15834_v56, %v15834_v56  ;;  %v7319_v8 = vadd.f32 %v7048_v11, %v6046_v41  ;;  %v9794_v11 = vld [vmem:[#allocation2 + $0x1c0] sm:$0xff] }
 0x31b   : > { %v15843_v29 = vadd.f32 1.0, %v11204_v22  ;;  %v15860_v22 = vld [vmem:[%s17617_s4] ss:$0 sm:$0xff] }
 0x31c   : > { %v11206_v43 = vpop.eup %11205  ;;  %11209 = vrcp.f32 %v15817_v24  ;;  %v2939_v32 = vand.u32 2147483647, %v15817_v24  ;;  %v2941_v23 = vand.u32 2147483648, %v15817_v24  ;;  %v7991_v15 = vadd.f32 %v15785_v33, %v7864_v21 }
 0x31d   : > { %v11208_v40 = vpop.eup %11207  ;;  %v2901_v39 = vmul.f32 %v11206_v43, %v15791_v27  ;;  %v9897_v19 = vld [vmem:[#allocation2 + $0x138] sm:$0xff]  ;;  %vm2906_vm1 = vweird.f32 %v11206_v43  ;;  %vm2935_vm8 = vweird.f32 %v15817_v24  ;;  %11211 = vrcp.f32 %v15843_v29 }
 0x31e   : > { %v2916_v10 = vmul.f32 %v11208_v40, %v15794_v42  ;;  %9688 = vmatmul.msk.bf16.gmra.mxu2 %vm18016_vm6, %v9897_v19  ;;  %vm2921_vm7 = vweird.f32 %v11208_v40  ;;  %vm15867_vm9 = vmor %vm2905_vm3, %vm2906_vm1  ;;  %vm15871_vm11 = vcmp.eq.f32.partialorder %v2939_v32, 8.507059e+37  ;;  %11213 = vpow2.f32 %v8645_v51  ;;  %v6050_v49 = vpop.f32.mrf.mxu1 }
 0x31f   : > { %v2902_v55 = vsub.f32 1.0, %v2901_v39  ;;  %v7451_v39 = vadd.f32 %v15860_v22, %v7319_v8  ;;  %vm15878_vm12 = vmor %vm2920_vm0, %vm2921_vm7  ;;  %vm2950_vm10 = vweird.f32 %v15843_v29  ;;  %v8646_v51 = vmul.f32 -1.442695, %v15838_v38 }
 0x320   : > { %v2917_v36 = vsub.f32 1.0, %v2916_v10  ;;  %v6049_v10 = vadd.f32 %v6048_v0, %v5183_v47  ;;  %v2954_v47 = vand.u32 2147483647, %v15843_v29  ;;  %v7051_v19 = vpop.f32.mrf.mxu2  ;;  %v2956_v8 = vand.u32 2147483648, %v15843_v29 }
 0x321   : > { %v2903_v45 = vmul.f32 %v11206_v43, %v2902_v55  ;;  %v7604_v27 = vadd.f32 %v15810_v44, %v7451_v39  ;;  %v15890_v39 = vpop.f32.mrf.mxu3  ;;  %11215 = vpow2.f32 %v8646_v51  ;;  %vm18027_vm0 = vcmask 519168  }
 0x322   : > { %v11210_v41 = vpop.eup %11209  ;;  %v2918_v33 = vmul.f32 %v11208_v40, %v2917_v36  ;;  %v2942_v36 = vor.u32 1.1754944e-38, %v2941_v23  ;;  %v9832_v23 = vld [vmem:[#allocation2 + $0x110] sm:$0xff]  ;;  %vm15937_vm6 = vcmp.eq.f32.partialorder %v2954_v47, 8.507059e+37  ;;  %vm18035_vm7 = vmmov %vm18027_vm0 }
 0x323   : > { %v2904_v55 = vadd.f32 %v11206_v43, %v2903_v45  ;;  %v2931_v5 = vmul.f32 %v11210_v41, %v15817_v24  ;;  %v7731_v42 = vadd.f32 %v7730_v13, %v7604_v27  ;;  %v7865_v45 = vmul.f32 %v7604_v27, %v7604_v27  ;;  %v11212_v13 = vpop.eup %11211  ;;  %9347 = vmatmul.msk.bf16.gmra.mxu1 %vm18024_vm15, %v9764_v53 }
 0x324   : > { %v2919_v0 = vadd.f32 %v11208_v40, %v2918_v33  ;;  %v10281_v9 = vpack.c.bf16 %v7604_v27, %v15834_v56  ;;  %vm2936_vm13 = vweird.f32 %v11210_v41  ;;  %v11214_v46 = vpop.eup %11213  ;;  %9011 = vmatmul.msk.bf16.gmra.mxu0 %vm18011_vm2, %v9832_v23  ;;  %v7320_v53 = vadd.f32 %v7051_v19, %v6049_v10 }
 0x325   : > { %v2908_v32 = vsel %vm15867_vm9, %v11206_v43, %v2904_v55  ;;  %v2932_v63 = vsub.f32 1.0, %v2931_v5  ;;  %v5185_v43 = vpop.f32.mrf.mxu0  ;;  %9377 = vmatmul.msk.bf16.gmra.mxu3 %vm18023_vm14, %v9794_v11  ;;  %v7992_v27 = vadd.f32 %v7991_v15, %v7865_v45  ;;  %v2946_v5 = vmul.f32 %v11212_v13, %v15843_v29  ;;  %vm15910_vm3 = vmor %vm2935_vm8, %vm2936_vm13 }
 0x326   : > { %v2913_v33 = vsel %vm15822_vm4, %v2912_v34, %v2908_v32  ;;  %v2923_v35 = vsel %vm15878_vm12, %v11208_v40, %v2919_v0  ;;  %10596 = vst [vmem:[%s13495_s14 + $0x80] sm:$0xff] %v10281_v9   ;;  %vm2951_vm4 = vweird.f32 %v11212_v13  ;;  %v7452_v20 = vadd.f32 %v15860_v22, %v7320_v53  ;;  %v6053_v23 = vpop.f32.mrf.mxu1  ;;  %vm18038_vm12 = vmmov %vm18011_vm2 }
 0x327   : > { %v2928_v56 = vsel %vm15829_vm5, %v15827_v2, %v2923_v35  ;;  %v3924_v55 = vmul.f32 %v2913_v33, %v15727_v37  ;;  %v2933_v40 = vmul.f32 %v11210_v41, %v2932_v63  ;;  %v2947_v63 = vsub.f32 1.0, %v2946_v5  ;;  %vm18028_vm5 = vmmov %vm18027_vm0 }
 0x328   : > { %v3925_v34 = vmul.f32 %v2928_v56, %v15730_v7  ;;  %v15914_v2 = vadd.f32 1.0, %v11214_v46  ;;  %v18029_v15 = vunpack.c.l.bf16 %v15820_v57  ;;  %vm15930_vm1 = vmor %vm2950_vm10, %vm2951_vm4  ;;  %v2957_v32 = vor.u32 1.1754944e-38, %v2956_v8  ;;  %v7053_v29 = vpop.f32.mrf.mxu2 }
 0x329   : > { %v4052_v11 = vpack.c.bf16 %v3924_v55, %v3924_v55  ;;  %v2934_v7 = vadd.f32 %v11210_v41, %v2933_v40  ;;  %v2948_v9 = vmul.f32 %v11212_v13, %v2947_v63  ;;  %v6051_v45 = vadd.f32 %v6050_v49, %v5185_v43  ;;  %v15935_v33 = vpop.f32.mrf.mxu3  ;;  %v11216_v49 = vpop.eup %11215  ;;  %vm18039_vm10 = vmmov %vm18027_vm0 }
 0x32a   : > { %v4053_v37 = vpack.c.bf16 %v3925_v34, %v3925_v34  ;;  %11217 = vrcp.f32 %v15914_v2  ;;  %v1238_v10 = vmul.f32 %v15629_v30, %v18029_v15  ;;  %v18034_v55 = vunpack.c.h.bf16 %v15820_v57  ;;  %v15946_v34 = vld [vmem:[%s11703_s17 + $0x120] sm:$0xff]   ;;  %vm18040_vm13 = vmmov %vm18011_vm2 }
 0x32b   : > { %4215 = vst.msk [vmem:[#allocation2 + $0x140] sm:$0xf] %vm18027_vm0, %v4052_v11  ;;  %v2938_v24 = vsel %vm15910_vm3, %v11210_v41, %v2934_v7  ;;  %v7605_v41 = vadd.f32 %v15810_v44, %v7452_v20  ;;  %v2949_v19 = vadd.f32 %v11212_v13, %v2948_v9  ;;  %v7321_v5 = vadd.f32 %v7053_v29, %v6051_v45  ;;  %v9795_v9 = vld [vmem:[#allocation2 + $0x1c8] sm:$0xff]  ;;  %vm18041_vm14 = vmmov %vm18011_vm2 }
 0x32c   : > { %4216 = vst.msk [vmem:[#allocation2 + $0x144] sm:$0xf] %vm18028_vm5, %v4053_v37  ;;  %v2943_v0 = vsel %vm15871_vm11, %v2942_v36, %v2938_v24  ;;  %v1239_v46 = vmul.f32 %v15629_v30, %v18034_v55  ;;  %v2969_v8 = vand.u32 2147483647, %v15914_v2  ;;  %v15951_v35 = vadd.f32 1.0, %v11216_v49  ;;  %v9833_v55 = vld [vmem:[#allocation2 + $0x118] sm:$0xff] }
 0x32d   : > { %v3926_v21 = vmul.f32 %v2943_v0, %v15772_v48  ;;  %v5188_v36 = vpop.f32.mrf.mxu0  ;;  %v7732_v43 = vadd.f32 %v7731_v42, %v7605_v41  ;;  %v7866_v40 = vmul.f32 %v7605_v41, %v7605_v41  ;;  %v2953_v47 = vsel %vm15930_vm1, %v11212_v13, %v2949_v19  ;;  %v15954_v48 = vld [vmem:[%s11737_s12] ss:$0 sm:$0xff]  ;;  %vm18048_vm1 = vmmov %vm18035_vm7 }
 0x32e   : > { %v15957_v57 = vadd.f32 %v15954_v48, %v1238_v10  ;;  %v2958_v53 = vsel %vm15937_vm6, %v2957_v32, %v2953_v47  ;;  %v7453_v42 = vadd.f32 %v15860_v22, %v7321_v5  ;;  %v10088_v7 = vunpack.c.l.bf16 %v15946_v34  ;;  %vm18049_vm6 = vmmov %vm18011_vm2 }
 0x32f   : > { %v4054_v11 = vpack.c.bf16 %v3926_v21, %v3926_v21  ;;  %v7993_v37 = vadd.f32 %v7992_v27, %v7866_v40  ;;  %v3927_v20 = vmul.f32 %v2958_v53, %v15780_v50  ;;  %vm2965_vm8 = vweird.f32 %v15914_v2  ;;  %v6055_v21 = vpop.f32.mrf.mxu1 }
 0x330   : > { %v11218_v63 = vpop.eup %11217  ;;  %v2971_v13 = vand.u32 2147483648, %v15914_v2  ;;  %11219 = vrcp.f32 %v15951_v35  ;;  %v7606_v15 = vadd.f32 %v15810_v44, %v7453_v42  ;;  %v6054_v27 = vadd.f32 %v6053_v23, %v5188_v36  ;;  %v9765_v36 = vld [vmem:[#allocation2 + $0xd8] sm:$0xff] }
 0x331   : > { %4217 = vst.msk [vmem:[#allocation2 + $0x148] sm:$0xf] %vm18035_vm7, %v4054_v11  ;;  %v2961_v10 = vmul.f32 %v11218_v63, %v15914_v2  ;;  %vm15970_vm9 = vcmp.eq.f32.partialorder %v2969_v8, 8.507059e+37  ;;  %v4055_v50 = vpack.c.bf16 %v3927_v20, %v3927_v20  ;;  %vm2966_vm11 = vweird.f32 %v11218_v63  ;;  %v15979_v29 = vpop.f32.mrf.mxu3 }
 0x332   : > { %v15975_v51 = vadd.f32 %v15954_v48, %v1239_v46  ;;  %v8647_v32 = vmul.f32 -1.442695, %v15957_v57  ;;  %v7733_v45 = vadd.f32 %v7732_v43, %v7606_v15  ;;  %v7867_v19 = vmul.f32 %v7606_v15, %v7606_v15  ;;  %v7056_v46 = vpop.f32.mrf.mxu2  ;;  %vm15990_vm15 = vmor %vm2965_vm8, %vm2966_vm11 }
 0x333   : > { %v9898_v24 = vld [vmem:[#allocation2 + $0x140] sm:$0xff]  ;;  %v10286_v56 = vpack.c.bf16 %v7606_v15, %v7605_v41  ;;  %v2962_v23 = vsub.f32 1.0, %v2961_v10  ;;  %4218 = vst.msk [vmem:[#allocation2 + $0x14c] sm:$0xf] %vm18039_vm10, %v4055_v50  ;;  %v2984_v49 = vand.u32 2147483647, %v15951_v35  ;;  %v7322_v8 = vadd.f32 %v7056_v46, %v6054_v27  ;;  %9348 = vmatmul.msk.bf16.gmra.mxu1 %vm18041_vm14, %v9765_v36  ;;  %vm18050_vm8 = vmmov %vm18011_vm2 }
 0x334   : > { %9689 = vmatmul.msk.bf16.gmra.mxu2 %vm18038_vm12, %v9898_v24  ;;  %11221 = vpow2.f32 %v8647_v32  ;;  %v8648_v5 = vmul.f32 -1.442695, %v15975_v51  ;;  %v7994_v43 = vadd.f32 %v7993_v37, %v7867_v19  ;;  %v2972_v53 = vor.u32 1.1754944e-38, %v2971_v13  ;;  %9012 = vmatmul.msk.bf16.gmra.mxu0 %vm18011_vm2, %v9833_v55  ;;  %v10554_v50 = vld [vmem:[%s11703_s17 + $0x128] sm:$0xff]   ;;  %vm18057_vm14 = vmmov %vm18011_vm2 }
 0x335   : > { %v5190_v40 = vpop.f32.mrf.mxu0  ;;  %9378 = vmatmul.msk.bf16.gmra.mxu3 %vm18040_vm13, %v9795_v9  ;;  %10597 = vst [vmem:[%s13495_s14 + $0x88] sm:$0xff] %v10286_v56   ;;  %v2963_v41 = vmul.f32 %v11218_v63, %v2962_v23  ;;  %v10089_v37 = vunpack.c.h.bf16 %v15946_v34  ;;  %v1240_v42 = vmul.f32 %v15629_v30, %v10088_v7  ;;  %vm2980_vm3 = vweird.f32 %v15951_v35  ;;  %vm18056_vm13 = vmmov %vm18011_vm2 }
 0x336   : > { %v11220_v47 = vpop.eup %11219  ;;  %11223 = vpow2.f32 %v8648_v5  ;;  %v7454_v2 = vadd.f32 %v15860_v22, %v7322_v8  ;;  %vm16000_vm4 = vcmp.eq.f32.partialorder %v2984_v49, 8.507059e+37  ;;  %v2986_v13 = vand.u32 2147483648, %v15951_v35 }
 0x337   : > { %v2964_v20 = vadd.f32 %v11218_v63, %v2963_v41  ;;  %v2976_v24 = vmul.f32 %v11220_v47, %v15951_v35  ;;  %v1241_v15 = vmul.f32 %v15629_v30, %v10089_v37  ;;  %v16007_v27 = vadd.f32 %v15954_v48, %v1240_v42  ;;  %v6058_v5 = vpop.f32.mrf.mxu1 }
 0x338   : > { %vm2981_vm0 = vweird.f32 %v11220_v47  ;;  %v16012_v10 = vadd.f32 %v15810_v44, %v7454_v2  ;;  %v6056_v56 = vadd.f32 %v6055_v21, %v5190_v40  ;;  %v2987_v21 = vor.u32 1.1754944e-38, %v2986_v13 }
 0x339   : > { %v2968_v34 = vsel %vm15990_vm15, %v11218_v63, %v2964_v20  ;;  %v2977_v7 = vsub.f32 1.0, %v2976_v24  ;;  %v16018_v23 = vadd.f32 %v15954_v48, %v1241_v15  ;;  %v8649_v36 = vmul.f32 -1.442695, %v16007_v27  ;;  %vm16027_vm5 = vmor %vm2980_vm3, %vm2981_vm0  ;;  %v16033_v20 = vpop.f32.mrf.mxu3 }
 0x33a   : > { %v11222_v32 = vpop.eup %11221  ;;  %v2973_v19 = vsel %vm15970_vm9, %v2972_v53, %v2968_v34  ;;  %v7734_v63 = vadd.f32 %v7733_v45, %v16012_v10  ;;  %v7868_v46 = vmul.f32 %v16012_v10, %v16012_v10  ;;  %v7058_v40 = vpop.f32.mrf.mxu2  ;;  %v9899_v2 = vld [vmem:[#allocation2 + $0x148] sm:$0xff]  ;;  %v10093_v34 = vunpack.c.h.bf16 %v10554_v50  ;;  %vm18051_vm9 = vmmov %vm18048_vm1 }
 0x33b   : > { %v2978_v55 = vmul.f32 %v11220_v47, %v2977_v7  ;;  %v3928_v49 = vmul.f32 %v2973_v19, %v15813_v61  ;;  %v16031_v11 = vadd.f32 1.0, %v11222_v32  ;;  %11225 = vpow2.f32 %v8649_v36  ;;  %v9796_v32 = vld [vmem:[#allocation2 + $0x1d0] sm:$0xff] }
 0x33c   : > { %v11224_v41 = vpop.eup %11223  ;;  %v10092_v61 = vunpack.c.l.bf16 %v10554_v50  ;;  %v7995_v37 = vadd.f32 %v7994_v43, %v7868_v46  ;;  %v7323_v42 = vadd.f32 %v7058_v40, %v6056_v56  ;;  %v8650_v35 = vmul.f32 -1.442695, %v16018_v23  ;;  %v9834_v40 = vld [vmem:[#allocation2 + $0x120] sm:$0xff] }
 0x33d   : > { %v5193_v8 = vpop.f32.mrf.mxu0  ;;  %v2979_v53 = vadd.f32 %v11220_v47, %v2978_v55  ;;  %v4056_v45 = vpack.c.bf16 %v3928_v49, %v3928_v49  ;;  %v16035_v24 = vadd.f32 1.0, %v11224_v41  ;;  %11227 = vrcp.f32 %v16031_v11 }
 0x33e   : > { %v7455_v15 = vadd.f32 %v15860_v22, %v7323_v42  ;;  %v1242_v7 = vmul.f32 %v15629_v30, %v10092_v61  ;;  %v6059_v36 = vadd.f32 %v6058_v5, %v5193_v8  ;;  %v3001_v49 = vand.u32 2147483648, %v16031_v11 }
 0x33f   : > { %v2983_v13 = vsel %vm16027_vm5, %v11220_v47, %v2979_v53  ;;  %4219 = vst.msk [vmem:[#allocation2 + $0x150] sm:$0xf] %vm18048_vm1, %v4056_v45  ;;  %11229 = vrcp.f32 %v16035_v24  ;;  %v2999_v47 = vand.u32 2147483647, %v16031_v11  ;;  %v3014_v46 = vand.u32 2147483647, %v16035_v24 }
 0x340   : > { %v2988_v43 = vsel %vm16000_vm4, %v2987_v21, %v2983_v13  ;;  %v7608_v56 = vadd.f32 %v15810_v44, %v7455_v15  ;;  %11231 = vpow2.f32 %v8650_v35  ;;  %v6060_v21 = vpop.f32.mrf.mxu1  ;;  %vm2995_vm7 = vweird.f32 %v16031_v11 }
 0x341   : > { %v3929_v19 = vmul.f32 %v2988_v43, %v15838_v38  ;;  %v11226_v55 = vpop.eup %11225  ;;  %v9766_v38 = vld [vmem:[#allocation2 + $0xe0] sm:$0xff]  ;;  %v1243_v45 = vmul.f32 %v15629_v30, %v10093_v34  ;;  %v16059_v42 = vadd.f32 %v15954_v48, %v1242_v7  ;;  %vm3010_vm11 = vweird.f32 %v16035_v24 }
 0x342   : > { %v7735_v50 = vadd.f32 %v7734_v63, %v7608_v56  ;;  %v7869_v41 = vmul.f32 %v7608_v56, %v7608_v56  ;;  %v10291_v0 = vpack.c.bf16 %v7608_v56, %v16012_v10  ;;  %v16055_v53 = vadd.f32 1.0, %v11226_v55 }
 0x343   : > { %v4057_v9 = vpack.c.bf16 %v3929_v19, %v3929_v19  ;;  %v11228_v5 = vpop.eup %11227  ;;  %vm16066_vm12 = vcmp.eq.f32.partialorder %v2999_v47, 8.507059e+37  ;;  %v3002_v30 = vor.u32 1.1754944e-38, %v3001_v49  ;;  %vm16070_vm10 = vcmp.eq.f32.partialorder %v3014_v46, 8.507059e+37  ;;  %9349 = vmatmul.msk.bf16.gmra.mxu1 %vm18056_vm13, %v9766_v38  ;;  %v16080_v19 = vpop.f32.mrf.mxu3 }
 0x344   : > { %9690 = vmatmul.msk.bf16.gmra.mxu2 %vm18049_vm6, %v9899_v2  ;;  %v7061_v8 = vpop.f32.mrf.mxu2  ;;  %v7996_v10 = vadd.f32 %v7995_v37, %v7869_v41  ;;  %v2991_v63 = vmul.f32 %v11228_v5, %v16031_v11  ;;  %10598 = vst [vmem:[%s13495_s14 + $0x90] sm:$0xff] %v10291_v0   ;;  %9013 = vmatmul.msk.bf16.gmra.mxu0 %vm18057_vm14, %v9834_v40  ;;  %11233 = vrcp.f32 %v16055_v53  ;;  %vm2996_vm15 = vweird.f32 %v11228_v5 }
 0x345   : > { %v5195_v61 = vpop.f32.mrf.mxu0  ;;  %9379 = vmatmul.msk.bf16.gmra.mxu3 %vm18050_vm8, %v9796_v32  ;;  %4220 = vst.msk [vmem:[#allocation2 + $0x154] sm:$0xf] %vm18051_vm9, %v4057_v9  ;;  %v7324_v35 = vadd.f32 %v7061_v8, %v6059_v36  ;;  %v11230_v2 = vpop.eup %11229  ;;  %v3016_v32 = vand.u32 2147483648, %v16035_v24  ;;  %v16083_v56 = vadd.f32 %v15954_v48, %v1243_v45  ;;  %v8651_v36 = vmul.f32 -1.442695, %v16059_v42  ;;  %vm16093_vm3 = vmor %vm2995_vm7, %vm2996_vm15 }
 0x346   : > { %v2992_v37 = vsub.f32 1.0, %v2991_v63  ;;  %v3006_v43 = vmul.f32 %v11230_v2, %v16035_v24  ;;  %v11232_v7 = vpop.eup %11231  ;;  %vm3011_vm2 = vweird.f32 %v11230_v2  ;;  %v6061_v41 = vadd.f32 %v6060_v21, %v5195_v61  ;;  %vm18064_vm7 = vmmov %vm18050_vm8 }
 0x347   : > { %v7456_v34 = vadd.f32 %v15860_v22, %v7324_v35  ;;  %v16089_v46 = vadd.f32 1.0, %v11232_v7  ;;  %v3029_v0 = vand.u32 2147483647, %v16055_v53  ;;  %v3031_v38 = vand.u32 2147483648, %v16055_v53  ;;  %vm16107_vm4 = vmor %vm3010_vm11, %vm3011_vm2 }
 0x348   : > { %v2993_v55 = vmul.f32 %v11228_v5, %v2992_v37  ;;  %v3007_v47 = vsub.f32 1.0, %v3006_v43  ;;  %11235 = vpow2.f32 %v8651_v36  ;;  %v6063_v35 = vpop.f32.mrf.mxu1  ;;  %v3017_v61 = vor.u32 1.1754944e-38, %v3016_v32  ;;  %vm18065_vm8 = vmmov %vm18051_vm9 }
 0x349   : > { %v16087_v49 = vadd.f32 %v15810_v44, %v7456_v34  ;;  %vm3025_vm0 = vweird.f32 %v16055_v53  ;;  %11237 = vrcp.f32 %v16089_v46  ;;  %v16115_v34 = vld [vmem:[%s11703_s17 + $0x130] sm:$0xff]   ;;  %vm16123_vm5 = vcmp.eq.f32.partialorder %v3029_v0, 8.507059e+37  ;;  %v9797_v0 = vld [vmem:[#allocation2 + $0x1d8] sm:$0xff]  ;;  %vm18068_vm11 = vmmov %vm18064_vm7 }
 0x34a   : > { %v2994_v40 = vadd.f32 %v11228_v5, %v2993_v55  ;;  %v3008_v8 = vmul.f32 %v11230_v2, %v3007_v47  ;;  %v16102_v11 = vpop.eup %11233  ;;  %v3032_v18 = vor.u32 1.1754944e-38, %v3031_v38  ;;  %v10096_v9 = vunpack.c.l.bf16 %v16115_v34  ;;  %vm18070_vm13 = vmmov %vm18064_vm7 }
 0x34b   : > { %v7736_v45 = vadd.f32 %v7735_v50, %v16087_v49  ;;  %v7870_v63 = vmul.f32 %v16087_v49, %v16087_v49  ;;  %v8652_v50 = vmul.f32 -1.442695, %v16083_v56  ;;  %v3021_v32 = vmul.f32 %v16102_v11, %v16055_v53  ;;  %vm18071_vm14 = vmmov %vm18064_vm7 }
 0x34c   : > { %v7063_v37 = vpop.f32.mrf.mxu2  ;;  %v2998_v7 = vsel %vm16093_vm3, %v11228_v5, %v2994_v40  ;;  %v3009_v36 = vadd.f32 %v11230_v2, %v3008_v8  ;;  %v9900_v14 = vld [vmem:[#allocation2 + $0x150] sm:$0xff]  ;;  %vm3026_vm1 = vweird.f32 %v16102_v11  ;;  %vm3040_vm6 = vweird.f32 %v16089_v46 }
 0x34d   : > { %v5198_v43 = vpop.f32.mrf.mxu0  ;;  %v7997_v24 = vadd.f32 %v7996_v10, %v7870_v63  ;;  %v7325_v55 = vadd.f32 %v7063_v37, %v6061_v41  ;;  %v3003_v47 = vsel %vm16066_vm12, %v3002_v30, %v2998_v7  ;;  %v3022_v41 = vsub.f32 1.0, %v3021_v32  ;;  %v16141_v63 = vpop.f32.mrf.mxu3  ;;  %vm16152_vm9 = vmor %vm3025_vm0, %vm3026_vm1  ;;  %v9835_v7 = vld [vmem:[#allocation2 + $0x128] sm:$0xff] }
 0x34e   : > { %v3013_v59 = vsel %vm16107_vm4, %v11230_v2, %v3009_v36  ;;  %v3930_v5 = vmul.f32 %v3003_v47, %v15957_v57  ;;  %v11236_v13 = vpop.eup %11235  ;;  %11239 = vpow2.f32 %v8652_v50  ;;  %v6064_v21 = vadd.f32 %v6063_v35, %v5198_v43  ;;  %v9767_v50 = vld [vmem:[#allocation2 + $0xe8] sm:$0xff]  ;;  %vm18069_vm12 = vmmov %vm18065_vm8  ;;  %v10556_v35 = vld [vmem:[%s11703_s17 + $0x138] sm:$0xff]  }
 0x34f   : > { %v7457_v10 = vadd.f32 %v15860_v22, %v7325_v55  ;;  %v3018_v30 = vsel %vm16070_vm10, %v3017_v61, %v3013_v59  ;;  %v16137_v8 = vadd.f32 1.0, %v11236_v13  ;;  %v16139_v57 = vpop.eup %11237  ;;  %v3023_v15 = vmul.f32 %v16102_v11, %v3022_v41  ;;  %vm18078_vm0 = vmmov %vm18065_vm8 }
 0x350   : > { %v3931_v38 = vmul.f32 %v3018_v30, %v15975_v51  ;;  %v4058_v40 = vpack.c.bf16 %v3930_v5, %v3930_v5  ;;  %v3044_v59 = vand.u32 2147483647, %v16089_v46  ;;  %v6065_v43 = vpop.f32.mrf.mxu1  ;;  %v3036_v55 = vmul.f32 %v16139_v57, %v16089_v46 }
 0x351   : > { %v7610_v2 = vadd.f32 %v15810_v44, %v7457_v10  ;;  %v3046_v53 = vand.u32 2147483648, %v16089_v46  ;;  %vm3041_vm10 = vweird.f32 %v16139_v57  ;;  %11241 = vrcp.f32 %v16137_v8 }
 0x352   : > { %v4059_v61 = vpack.c.bf16 %v3931_v38, %v3931_v38  ;;  %4221 = vst.msk [vmem:[#allocation2 + $0x158] sm:$0xf] %vm18065_vm8, %v4058_v40  ;;  %v3037_v13 = vsub.f32 1.0, %v3036_v55  ;;  %v3061_v41 = vand.u32 2147483648, %v16137_v8  ;;  %vm16184_vm15 = vcmp.eq.f32.partialorder %v3044_v59, 8.507059e+37  ;;  %vm16193_vm2 = vmor %vm3040_vm6, %vm3041_vm10 }
 0x353   : > { %v7737_v51 = vadd.f32 %v7736_v45, %v7610_v2  ;;  %v7871_v37 = vmul.f32 %v7610_v2, %v7610_v2  ;;  %v10296_v36 = vpack.c.bf16 %v7610_v2, %v16087_v49  ;;  %v3024_v45 = vadd.f32 %v16102_v11, %v3023_v15  ;;  %9350 = vmatmul.msk.bf16.gmra.mxu1 %vm18070_vm13, %v9767_v50 }
 0x354   : > { %9691 = vmatmul.msk.bf16.gmra.mxu2 %vm18064_vm7, %v9900_v14  ;;  %v10097_v14 = vunpack.c.h.bf16 %v16115_v34  ;;  %4222 = vst.msk [vmem:[#allocation2 + $0x15c] sm:$0xf] %vm18069_vm12, %v4059_v61  ;;  %v16167_v34 = vld [vmem:[%s11731_s23] ss:$0 sm:$0xff]  ;;  %v11240_v5 = vpop.eup %11239  ;;  %9014 = vmatmul.msk.bf16.gmra.mxu0 %vm18071_vm14, %v9835_v7  ;;  %v3047_v62 = vor.u32 1.1754944e-38, %v3046_v53  ;;  %vm3055_vm3 = vweird.f32 %v16137_v8  ;;  %vm18081_vm7 = vmmov %vm18078_vm0 }
 0x355   : > { %v5200_v47 = vpop.f32.mrf.mxu0  ;;  %9380 = vmatmul.msk.bf16.gmra.mxu3 %vm18068_vm11, %v9797_v0  ;;  %v7998_v32 = vadd.f32 %v7997_v24, %v7871_v37  ;;  %v1244_v49 = vmul.f32 %v16167_v34, %v10096_v9  ;;  %10599 = vst [vmem:[%s13495_s14 + $0x98] sm:$0xff] %v10296_v36   ;;  %v3028_v10 = vsel %vm16152_vm9, %v16102_v11, %v3024_v45  ;;  %v3059_v24 = vand.u32 2147483647, %v16137_v8  ;;  %v16221_v55 = vpop.f32.mrf.mxu3  ;;  %vm18082_vm9 = vmmov %vm18068_vm11 }
 0x356   : > { %v7066_v30 = vpop.f32.mrf.mxu2  ;;  %v3033_v0 = vsel %vm16123_vm5, %v3032_v18, %v3028_v10  ;;  %v16180_v38 = vadd.f32 1.0, %v11240_v5  ;;  %v1245_v40 = vmul.f32 %v16167_v34, %v10097_v14  ;;  %v3038_v11 = vmul.f32 %v16139_v57, %v3037_v13  ;;  %vm18083_vm11 = vmmov %vm18082_vm9 }
 0x357   : > { %v7326_v9 = vadd.f32 %v7066_v30, %v6064_v21  ;;  %v3932_v15 = vmul.f32 %v3033_v0, %v16007_v27  ;;  %v6066_v61 = vadd.f32 %v6065_v43, %v5200_v47  ;;  %v16202_v27 = vadd.f32 %v15954_v48, %v1244_v49  ;;  %v11242_v46 = vpop.eup %11241  ;;  %vm18086_vm13 = vmmov %vm18082_vm9 }
 0x358   : > { %11243 = vrcp.f32 %v16180_v38  ;;  %v3039_v59 = vadd.f32 %v16139_v57, %v3038_v11  ;;  %v16208_v7 = vpop.f32.mrf.mxu1  ;;  %vm16210_vm4 = vcmp.eq.f32.partialorder %v3059_v24, 8.507059e+37  ;;  %v3062_v43 = vor.u32 1.1754944e-38, %v3061_v41  ;;  %vm18087_vm14 = vmmov %vm18082_vm9 }
 0x359   : > { %v7458_v21 = vadd.f32 %v15860_v22, %v7326_v9  ;;  %v4060_v37 = vpack.c.bf16 %v3932_v15, %v3932_v15  ;;  %v16215_v36 = vadd.f32 %v15954_v48, %v1245_v40  ;;  %v3051_v47 = vmul.f32 %v11242_v46, %v16137_v8 }
 0x35a   : > { %v3043_v45 = vsel %vm16193_vm2, %v16139_v57, %v3039_v59  ;;  %vm3070_vm5 = vweird.f32 %v16180_v38  ;;  %v3074_v49 = vand.u32 2147483647, %v16180_v38  ;;  %v10100_v13 = vunpack.c.l.bf16 %v10556_v35  ;;  %vm18089_vm2 = vmmov %vm18078_vm0 }
 0x35b   : > { %v16206_v50 = vadd.f32 %v15810_v44, %v7458_v21  ;;  %4223 = vst.msk [vmem:[#allocation2 + $0x160] sm:$0xf] %vm18078_vm0, %v4060_v37  ;;  %v3048_v5 = vsel %vm16184_vm15, %v3047_v62, %v3043_v45  ;;  %v3052_v41 = vsub.f32 1.0, %v3051_v47  ;;  %vm3056_vm1 = vweird.f32 %v11242_v46  ;;  %v9901_v40 = vld [vmem:[#allocation2 + $0x158] sm:$0xff]  ;;  %v9798_v37 = vld [vmem:[#allocation2 + $0x1e0] sm:$0xff]  ;;  %vm18088_vm15 = vmmov %vm18078_vm0 }
 0x35c   : > { %v3933_v30 = vmul.f32 %v3048_v5, %v16018_v23  ;;  %v8653_v0 = vmul.f32 -1.442695, %v16202_v27  ;;  %v8654_v2 = vmul.f32 -1.442695, %v16215_v36  ;;  %v10101_v18 = vunpack.c.h.bf16 %v10556_v35  ;;  %vm16241_vm6 = vmor %vm3055_vm3, %vm3056_vm1 }
 0x35d   : > { %v16223_v53 = vpop.f32.mrf.mxu0  ;;  %v7738_v10 = vadd.f32 %v7737_v51, %v16206_v50  ;;  %v7872_v57 = vmul.f32 %v16206_v50, %v16206_v50  ;;  %v3053_v51 = vmul.f32 %v11242_v46, %v3052_v41  ;;  %v3076_v59 = vand.u32 2147483648, %v16180_v38  ;;  %vm18090_vm3 = vmmov %vm18082_vm9 }
 0x35e   : > { %v7068_v24 = vpop.f32.mrf.mxu2  ;;  %v11244_v9 = vpop.eup %11243  ;;  %v4061_v62 = vpack.c.bf16 %v3933_v30, %v3933_v30  ;;  %11245 = vpow2.f32 %v8653_v0  ;;  %vm3075_vm10 = vcmp.eq.f32.partialorder %v3074_v49, 8.507059e+37 }
 0x35f   : > { %v7999_v11 = vadd.f32 %v7998_v32, %v7872_v57  ;;  %v7327_v15 = vadd.f32 %v7068_v24, %v6066_v61  ;;  %v3066_v21 = vmul.f32 %v11244_v9, %v16180_v38  ;;  %v1246_v32 = vmul.f32 %v16167_v34, %v10100_v13 }
 0x360   : > { %v1247_v61 = vmul.f32 %v16167_v34, %v10101_v18  ;;  %4224 = vst.msk [vmem:[#allocation2 + $0x164] sm:$0xf] %vm18081_vm7, %v4061_v62  ;;  %v3054_v35 = vadd.f32 %v11242_v46, %v3053_v51  ;;  %vm3071_vm8 = vweird.f32 %v11244_v9  ;;  %11247 = vpow2.f32 %v8654_v2  ;;  %v16250_v8 = vpop.f32.mrf.mxu1  ;;  %v9836_v18 = vld [vmem:[#allocation2 + $0x130] sm:$0xff]  ;;  %v16273_v62 = vpop.f32.mrf.mxu3 }
 0x361   : > { %v7459_v23 = vadd.f32 %v15860_v22, %v7327_v15  ;;  %v3067_v47 = vsub.f32 1.0, %v3066_v21  ;;  %v16253_v57 = vadd.f32 %v15954_v48, %v1246_v32  ;;  %v3077_v24 = vor.u32 1.1754944e-38, %v3076_v59  ;;  %vm16269_vm12 = vmor %vm3070_vm5, %vm3071_vm8 }
 0x362   : > { %v16256_v30 = vadd.f32 %v15954_v48, %v1247_v61  ;;  %v3058_v34 = vsel %vm16241_vm6, %v11242_v46, %v3054_v35  ;;  %v9768_v46 = vld [vmem:[#allocation2 + $0xf0] sm:$0xff]  ;;  %vm18091_vm6 = vmmov %vm18090_vm3 }
 0x363   : > { %v7612_v5 = vadd.f32 %v15810_v44, %v7459_v23  ;;  %v3068_v13 = vmul.f32 %v11244_v9, %v3067_v47  ;;  %v3063_v2 = vsel %vm16210_vm4, %v3062_v43, %v3058_v34  ;;  %9351 = vmatmul.msk.bf16.gmra.mxu1 %vm18086_vm13, %v9768_v46 }
 0x364   : > { %9692 = vmatmul.msk.bf16.gmra.mxu2 %vm18082_vm9, %v9901_v40  ;;  %v11246_v21 = vpop.eup %11245  ;;  %9015 = vmatmul.msk.bf16.gmra.mxu0 %vm18087_vm14, %v9836_v18  ;;  %v8656_v38 = vmul.f32 -1.442695, %v16256_v30 }
 0x365   : > { %v5205_v41 = vpop.f32.mrf.mxu0  ;;  %9381 = vmatmul.msk.bf16.gmra.mxu3 %vm18083_vm11, %v9798_v37  ;;  %v16261_v0 = vadd.f32 %v7738_v10, %v7612_v5  ;;  %v7873_v40 = vmul.f32 %v7612_v5, %v7612_v5  ;;  %v10301_v15 = vpack.c.bf16 %v7612_v5, %v16206_v50  ;;  %v3069_v51 = vadd.f32 %v11244_v9, %v3068_v13 }
 0x366   : > { %v3934_v10 = vmul.f32 %v3063_v2, %v16059_v42  ;;  %v8655_v50 = vmul.f32 -1.442695, %v16253_v57  ;;  %v11248_v43 = vpop.eup %11247  ;;  %v1888_v49 = vadd.f32 1.0, %v11246_v21  ;;  %v6071_v21 = vadd.f32 %v16250_v8, %v5205_v41 }
 0x367   : > { %v16277_v14 = vadd.f32 %v7999_v11, %v7873_v40  ;;  %10600 = vst [vmem:[%s13495_s14 + $0xa0] sm:$0xff] %v10301_v15   ;;  %v3073_v59 = vsel %vm16269_vm12, %v11244_v9, %v3069_v51  ;;  %v1889_v23 = vadd.f32 1.0, %v11248_v43  ;;  %v9902_v47 = vld [vmem:[#allocation2 + $0x160] sm:$0xff]  ;;  %v9799_v15 = vld [vmem:[#allocation2 + $0x1e8] sm:$0xff] }
 0x368   : > { %v4062_v37 = vpack.c.bf16 %v3934_v10, %v3934_v10  ;;  %11249 = vpow2.f32 %v8655_v50  ;;  %v3078_v42 = vsel %vm3075_vm10, %v3077_v24, %v3073_v59  ;;  %v16287_v45 = vpop.f32.mrf.mxu1  ;;  %v3089_v48 = vand.u32 2147483647, %v1888_v49 }
 0x369   : > { %11251 = vpow2.f32 %v8656_v38  ;;  %v3935_v11 = vmul.f32 %v3078_v42, %v16083_v56  ;;  %v6069_v56 = vadd.f32 %v16208_v7, %v16223_v53  ;;  %v3091_v46 = vand.u32 2147483648, %v1888_v49 }
 0x36a   : > { %4225 = vst.msk [vmem:[#allocation2 + $0x168] sm:$0xf] %vm18088_vm15, %v4062_v37  ;;  %11253 = vrcp.f32 %v1888_v49  ;;  %v3104_v51 = vand.u32 2147483647, %v1889_v23  ;;  %v3106_v10 = vand.u32 2147483648, %v1889_v23  ;;  %vm3085_vm4 = vweird.f32 %v1888_v49 }
 0x36b   : > { %11255 = vrcp.f32 %v1889_v23  ;;  %v4063_v32 = vpack.c.bf16 %v3935_v11, %v3935_v11  ;;  %vm3100_vm5 = vweird.f32 %v1889_v23  ;;  %vm16307_vm7 = vcmp.eq.f32.partialorder %v3089_v48, 8.507059e+37 }
 0x36c   : > { %vm16315_vm9 = vcmp.eq.f32.partialorder %v3104_v51, 8.507059e+37  ;;  %v3107_v8 = vor.u32 1.1754944e-38, %v3106_v10 }
 0x36d   : > { %4226 = vst.msk [vmem:[#allocation2 + $0x16c] sm:$0xf] %vm18089_vm2, %v4063_v32  ;;  %v16290_v35 = vpop.f32.mrf.mxu0  ;;  %v16296_v13 = vpop.f32.mrf.mxu3 }
 0x36e   : > { %v11250_v61 = vpop.eup %11249 }
 0x36f   : > { %v11252_v9 = vpop.eup %11251  ;;  %v16292_v5 = vadd.f32 1.0, %v11250_v61 }
 0x370   : > { %v11254_v34 = vpop.eup %11253  ;;  %v16298_v24 = vadd.f32 1.0, %v11252_v9  ;;  %v16302_v7 = vpop.f32.mrf.mxu1 }
 0x371   : > { %v11256_v40 = vpop.eup %11255  ;;  %v3081_v2 = vmul.f32 %v11254_v34, %v1888_v49  ;;  %11257 = vrcp.f32 %v16292_v5  ;;  %vm3086_vm0 = vweird.f32 %v11254_v34  ;;  %v3092_v49 = vor.u32 1.1754944e-38, %v3091_v46 }
 0x372   : > { %v3096_v18 = vmul.f32 %v11256_v40, %v1889_v23  ;;  %11259 = vrcp.f32 %v16298_v24  ;;  %vm3101_vm1 = vweird.f32 %v11256_v40  ;;  %vm16311_vm8 = vmor %vm3085_vm4, %vm3086_vm0  ;;  %v3121_v41 = vand.u32 2147483648, %v16292_v5 }
 0x373   : > { %v3082_v50 = vsub.f32 1.0, %v3081_v2  ;;  %vm16322_vm11 = vmor %vm3100_vm5, %vm3101_vm1  ;;  %vm3115_vm12 = vweird.f32 %v16292_v5  ;;  %vm3130_vm10 = vweird.f32 %v16298_v24 }
 0x374   : > { %9693 = vmatmul.msk.bf16.gmra.mxu2 %vm18090_vm3, %v9902_v47  ;;  %v7071_v53 = vpop.f32.mrf.mxu2  ;;  %v3097_v38 = vsub.f32 1.0, %v3096_v18  ;;  %v3134_v18 = vand.u32 2147483647, %v16298_v24  ;;  %vm18105_vm3 = vcmask 519168   ;;  %vm18106_vm4 = vmmov %vm18091_vm6 }
 0x375   : > { %9382 = vmatmul.msk.bf16.gmra.mxu3 %vm18091_vm6, %v9799_v15  ;;  %v7328_v43 = vadd.f32 %v7071_v53, %v6069_v56  ;;  %v3083_v59 = vmul.f32 %v11254_v34, %v3082_v50  ;;  %v3119_v15 = vand.u32 2147483647, %v16292_v5  ;;  %v16328_v48 = vpop.f32.mrf.mxu0  ;;  %v3136_v50 = vand.u32 2147483648, %v16298_v24  ;;  %v16337_v53 = vpop.f32.mrf.mxu3  ;;  %vm18109_vm5 = vmmov %vm18105_vm3 }
 0x376   : > { %v3098_v11 = vmul.f32 %v11256_v40, %v3097_v38  ;;  %18100 = vst [vmem:[#allocation33_spill] sm:$0xff] %v16337_v53  ;;  %vm3135_vm1 = vcmp.eq.f32.partialorder %v3134_v18, 8.507059e+37  ;;  %vm18110_vm6 = vmmov %vm18106_vm4 }
 0x377   : > { %v11258_v61 = vpop.eup %11257  ;;  %v7460_v9 = vadd.f32 %v15860_v22, %v7328_v43  ;;  %v3084_v47 = vadd.f32 %v11254_v34, %v3083_v59  ;;  %vm16359_vm2 = vcmp.eq.f32.partialorder %v3119_v15, 8.507059e+37  ;;  %v9837_v15 = vld [vmem:[#allocation2 + $0x138] sm:$0xff] }
 0x378   : > { %v3099_v2 = vadd.f32 %v11256_v40, %v3098_v11  ;;  %v3111_v46 = vmul.f32 %v11258_v61, %v16292_v5  ;;  %v11260_v51 = vpop.eup %11259  ;;  %vm3116_vm13 = vweird.f32 %v11258_v61  ;;  %9016 = vmatmul.msk.bf16.gmra.mxu0 %vm18110_vm6, %v9837_v15 }
 0x379   : > { %v7613_v23 = vadd.f32 %v15810_v44, %v7460_v9  ;;  %v3088_v10 = vsel %vm16311_vm8, %v11254_v34, %v3084_v47  ;;  %v3126_v11 = vmul.f32 %v11260_v51, %v16298_v24  ;;  %v16348_v47 = vpop.f32.mrf.mxu1  ;;  %vm3131_vm14 = vweird.f32 %v11260_v51  ;;  %vm16355_vm15 = vmor %vm3115_vm12, %vm3116_vm13 }
 0x37a   : > { %v3093_v38 = vsel %vm16307_vm7, %v3092_v49, %v3088_v10  ;;  %v3103_v43 = vsel %vm16322_vm11, %v11256_v40, %v3099_v2  ;;  %v3112_v59 = vsub.f32 1.0, %v3111_v46  ;;  %v9769_v46 = vld [vmem:[#allocation2 + $0xf8] sm:$0xff]  ;;  %vm16369_vm0 = vmor %vm3130_vm10, %vm3131_vm14 }
 0x37b   : > { %v7740_v6 = vadd.f32 %v16261_v0, %v7613_v23  ;;  %v7874_v9 = vmul.f32 %v7613_v23, %v7613_v23  ;;  %v3108_v34 = vsel %vm16315_vm9, %v3107_v8, %v3103_v43  ;;  %v3936_v42 = vmul.f32 %v3093_v38, %v16202_v27  ;;  %v9903_v43 = vld [vmem:[#allocation2 + $0x168] sm:$0xff]  ;;  %9352 = vmatmul.msk.bf16.gmra.mxu1 %vm18106_vm4, %v9769_v46  ;;  %vm18111_vm7 = vmmov %vm18106_vm4  ;;  %v9770_v46 = vld [vmem:[#allocation2 + $0x100] sm:$0xff] }
 0x37c   : > { %v7073_v53 = vpop.f32.mrf.mxu2  ;;  %v3937_v37 = vmul.f32 %v3108_v34, %v16215_v36  ;;  %v3113_v49 = vmul.f32 %v11258_v61, %v3112_v59  ;;  %v3127_v10 = vsub.f32 1.0, %v3126_v11  ;;  %v3122_v27 = vor.u32 1.1754944e-38, %v3121_v41  ;;  %v9800_v11 = vld [vmem:[#allocation2 + $0x1f0] sm:$0xff]  ;;  %vm18112_vm8 = vmmov %vm18106_vm4  ;;  %v9838_v36 = vld [vmem:[#allocation2 + $0x140] sm:$0xff] }
 0x37d   : > { %v8001_v40 = vadd.f32 %v16277_v14, %v7874_v9  ;;  %v7329_v56 = vadd.f32 %v7073_v53, %v6071_v21  ;;  %v4064_v2 = vpack.c.bf16 %v3936_v42, %v3936_v42  ;;  %v3137_v21 = vor.u32 1.1754944e-38, %v3136_v50  ;;  %v5213_v41 = vpop.f32.mrf.mxu0  ;;  %vm18113_vm9 = vmmov %vm18105_vm3 }
 0x37e   : > { %v4065_v32 = vpack.c.bf16 %v3937_v37, %v3937_v37  ;;  %v3114_v8 = vadd.f32 %v11258_v61, %v3113_v49  ;;  %v3128_v38 = vmul.f32 %v11260_v51, %v3127_v10  ;;  %vm18114_vm11 = vmmov %vm18105_vm3 }
 0x37f   : > { %v7461_v14 = vadd.f32 %v15860_v22, %v7329_v56  ;;  %4227 = vst.msk [vmem:[#allocation2 + $0x170] sm:$0xf] %vm18105_vm3, %v4064_v2  ;;  %v16386_v49 = vpop.f32.mrf.mxu3  ;;  %vm18115_vm12 = vmmov %vm18106_vm4 }
 0x380   : > { %4228 = vst.msk [vmem:[#allocation2 + $0x174] sm:$0xf] %vm18109_vm5, %v4065_v32  ;;  %v3118_v53 = vsel %vm16355_vm15, %v11258_v61, %v3114_v8  ;;  %v3129_v22 = vadd.f32 %v11260_v51, %v3128_v38  ;;  %v9801_v8 = vld [vmem:[#allocation2 + $0x1f8] sm:$0xff]  ;;  %v16405_v38 = vld [vmem:[%s17617_s4] ss:$0 sm:$0xff]  ;;  %vm18116_vm10 = vmmov %vm18106_vm4 }
 0x381   : > { %v7614_v59 = vadd.f32 %v15810_v44, %v7461_v14  ;;  %v3123_v24 = vsel %vm16359_vm2, %v3122_v27, %v3118_v53  ;;  %v16384_v37 = vpop.f32.mrf.mxu1  ;;  %vm18117_vm13 = vmmov %vm18106_vm4 }
 0x382   : > { %v3133_v50 = vsel %vm16369_vm0, %v11260_v51, %v3129_v22  ;;  %v3938_v9 = vmul.f32 %v3123_v24, %v16253_v57  ;;  %vm18118_vm14 = vmmov %vm18106_vm4 }
 0x383   : > { %v7741_v34 = vadd.f32 %v7740_v6, %v7614_v59  ;;  %v7875_v61 = vmul.f32 %v7614_v59, %v7614_v59  ;;  %v10306_v42 = vpack.c.bf16 %v7614_v59, %v7613_v23  ;;  %v3138_v18 = vsel %vm3135_vm1, %v3137_v21, %v3133_v50  ;;  %vm18119_vm15 = vmmov %vm18106_vm4 }
 0x384   : > { %9694 = vmatmul.msk.bf16.gmra.mxu2 %vm18111_vm7, %v9903_v43  ;;  %v3939_v10 = vmul.f32 %v3138_v18, %v16256_v30  ;;  %v4066_v56 = vpack.c.bf16 %v3938_v9, %v3938_v9  ;;  %v6074_v23 = vadd.f32 %v16287_v45, %v16290_v35  ;;  %v6076_v21 = vadd.f32 %v16302_v7, %v16328_v48  ;;  %vm18120_vm2 = vmmov %vm18106_vm4 }
 0x385   : > { %v8002_v2 = vadd.f32 %v8001_v40, %v7875_v61  ;;  %10601 = vst [vmem:[%s13495_s14 + $0xa8] sm:$0xff] %v10306_v42   ;;  %9383 = vmatmul.msk.bf16.gmra.mxu3 %vm18112_vm8, %v9800_v11  ;;  %v5215_v6 = vpop.f32.mrf.mxu0  ;;  %v9771_v61 = vld [vmem:[#allocation2 + $0x108] sm:$0xff]  ;;  %v6079_v7 = vadd.f32 %v16348_v47, %v5213_v41  ;;  %vm18121_vm3 = vmmov %vm18120_vm2 }
 0x386   : > { %v4067_v51 = vpack.c.bf16 %v3939_v10, %v3939_v10  ;;  %4229 = vst.msk [vmem:[#allocation2 + $0x178] sm:$0xf] %vm18113_vm9, %v4066_v56  ;;  %vm18122_vm4 = vmmov %vm18120_vm2 }
 0x387   : > { %v16397_v0 = vpop.f32.mrf.mxu3  ;;  %v9904_v30 = vld [vmem:[#allocation2 + $0x170] sm:$0xff]  ;;  %vm18123_vm0 = vmmov %vm18120_vm2 }
 0x388   : > { %4230 = vst.msk [vmem:[#allocation2 + $0x17c] sm:$0xf] %vm18114_vm11, %v4067_v51  ;;  %9017 = vmatmul.msk.bf16.gmra.mxu0 %vm18117_vm13, %v9838_v36  ;;  %v6081_v36 = vadd.f32 %v16384_v37, %v5215_v6  ;;  %vm18124_vm5 = vmmov %vm18123_vm0 }
 0x389   : > { %v16393_v57 = vpop.f32.mrf.mxu1  ;;  %vm18125_vm1 = vmmov %vm18123_vm0 }
 0x38a   : > { %vm18126_vm6 = vmmov %vm18123_vm0 }
 0x38b   : > { %9353 = vmatmul.msk.bf16.gmra.mxu1 %vm18115_vm12, %v9770_v46  ;;  %v9839_v46 = vld [vmem:[#allocation2 + $0x148] sm:$0xff]  ;;  %vm18127_vm7 = vmmov %vm18123_vm0 }
 0x38c   : > { %vm18128_vm8 = vmmov %vm18123_vm0 }
 0x38d   : > { %v16400_v32 = vpop.f32.mrf.mxu0  ;;  %vm18129_vm9 = vmmov %vm18123_vm0 }
 0x38e   : > { %vm18130_vm11 = vmmov %vm18123_vm0 }
 0x38f   : > { %v7076_v27 = vpop.f32.mrf.mxu2  ;;  %v9905_v48 = vld [vmem:[#allocation2 + $0x178] sm:$0xff]  ;;  %vm18131_vm12 = vmmov %vm18123_vm0 }
 0x390   : > { %v7330_v40 = vadd.f32 %v7076_v27, %v6074_v23  ;;  %v9922_v23 = vld [vmem:[#allocation2 + $0x200] sm:$0xff]  ;;  %vm18133_vm13 = vmmov %vm18123_vm0 }
 0x391   : > { %v16410_v45 = vpop.f32.mrf.mxu1 }
 0x392   : > { %v7462_v43 = vadd.f32 %v16405_v38, %v7330_v40 }
 0x394   : > { %9695 = vmatmul.msk.bf16.gmra.mxu2 %vm18116_vm10, %v9904_v30  ;;  %v7615_v35 = vadd.f32 %v15810_v44, %v7462_v43  ;;  %vm18132_vm10 = vmmov %vm18123_vm0 }
 0x395   : > { %9384 = vmatmul.msk.bf16.gmra.mxu3 %vm18118_vm14, %v9801_v8  ;;  %v16418_v11 = vpop.f32.mrf.mxu0  ;;  %vm18134_vm14 = vmmov %vm18123_vm0 }
 0x396   : > { %v7742_v14 = vadd.f32 %v7741_v34, %v7615_v35  ;;  %v7876_v5 = vmul.f32 %v7615_v35, %v7615_v35 }
 0x397   : > { %v7078_v15 = vpop.f32.mrf.mxu2 }
 0x398   : > { %v8003_v53 = vadd.f32 %v8002_v2, %v7876_v5  ;;  %v7331_v22 = vadd.f32 %v7078_v15, %v6076_v21  ;;  %v16416_v59 = vpop.f32.mrf.mxu3  ;;  %9018 = vmatmul.msk.bf16.gmra.mxu0 %vm18121_vm3, %v9839_v46  ;;  %vm18139_vm3 = vmmov %vm18123_vm0 }
 0x399   : > { %v16422_v9 = vpop.f32.mrf.mxu1 }
 0x39a   : > { %v7463_v24 = vadd.f32 %v16405_v38, %v7331_v22  ;;  %v9772_v22 = vld [vmem:[#allocation2 + $0x110] sm:$0xff] }
 0x39b   : > { %9354 = vmatmul.msk.bf16.gmra.mxu1 %vm18119_vm15, %v9771_v61  ;;  %vm18136_vm15 = vmmov %vm18123_vm0 }
 0x39c   : > { %v7616_v50 = vadd.f32 %v15810_v44, %v7463_v24 }
 0x39d   : > { %v16429_v2 = vpop.f32.mrf.mxu0 }
 0x39e   : > { %v7743_v34 = vadd.f32 %v7742_v14, %v7616_v50  ;;  %v7877_v42 = vmul.f32 %v7616_v50, %v7616_v50  ;;  %v10311_v18 = vpack.c.bf16 %v7616_v50, %v7615_v35  ;;  %v9906_v50 = vld [vmem:[#allocation2 + $0x180] sm:$0xff] }
 0x3a0   : > { %v8004_v10 = vadd.f32 %v8003_v53, %v7877_v42  ;;  %10602 = vst [vmem:[%s13495_s14 + $0xb0] sm:$0xff] %v10311_v18   ;;  %v16427_v56 = vpop.f32.mrf.mxu3  ;;  %v9923_v18 = vld [vmem:[#allocation2 + $0x208] sm:$0xff] }
 0x3a1   : > { %v7081_v51 = vpop.f32.mrf.mxu2  ;;  %v16434_v47 = vpop.f32.mrf.mxu1 }
 0x3a2   : > { %v7332_v30 = vadd.f32 %v7081_v51, %v6079_v7  ;;  %v9840_v7 = vld [vmem:[#allocation2 + $0x150] sm:$0xff] }
 0x3a4   : > { %9696 = vmatmul.msk.bf16.gmra.mxu2 %vm18120_vm2, %v9905_v48  ;;  %v7464_v27 = vadd.f32 %v16405_v38, %v7332_v30  ;;  %vm18138_vm2 = vmmov %vm18123_vm0 }
 0x3a5   : > { %9713 = vmatmul.msk.bf16.vlgmr.msra.gmra.mxu3 %vm18122_vm4, %v9922_v23  ;;  %v16441_v35 = vpop.f32.mrf.mxu0  ;;  %vm18140_vm4 = vmmov %vm18123_vm0 }
 0x3a6   : > { %v7617_v41 = vadd.f32 %v15810_v44, %v7464_v27 }
 0x3a8   : > { %v7744_v40 = vadd.f32 %v7743_v34, %v7617_v41  ;;  %v7878_v8 = vmul.f32 %v7617_v41, %v7617_v41  ;;  %v16439_v43 = vpop.f32.mrf.mxu3  ;;  %9019 = vmatmul.msk.bf16.gmra.mxu0 %vm18125_vm1, %v9840_v7  ;;  %v9924_v7 = vld [vmem:[#allocation2 + $0x210] sm:$0xff]  ;;  %vm18144_vm1 = vmmov %vm18123_vm0 }
 0x3a9   : > { %v7083_v14 = vpop.f32.mrf.mxu2  ;;  %v16444_v53 = vpop.f32.mrf.mxu1 }
 0x3aa   : > { %v8005_v5 = vadd.f32 %v8004_v10, %v7878_v8  ;;  %v7333_v21 = vadd.f32 %v7083_v14, %v6081_v36  ;;  %v6084_v10 = vadd.f32 %v16393_v57, %v16400_v32 }
 0x3ab   : > { %9355 = vmatmul.msk.bf16.gmra.mxu1 %vm18123_vm0, %v9772_v22 }
 0x3ac   : > { %v7465_v15 = vadd.f32 %v16405_v38, %v7333_v21  ;;  %v9773_v21 = vld [vmem:[#allocation2 + $0x118] sm:$0xff] }
 0x3ad   : > { %v16450_v42 = vpop.f32.mrf.mxu0 }
 0x3ae   : > { %v7618_v24 = vadd.f32 %v15810_v44, %v7465_v15  ;;  %v16457_v44 = vld [vmem:[%s13370_s21] sm:$0xff] }
 0x3af   : > { %v7550_v51 = vrot.slane %v16457_v44, 3 }
 0x3b0   : > { %v7745_v37 = vadd.f32 %v7744_v40, %v7618_v24  ;;  %v7879_v6 = vmul.f32 %v7618_v24, %v7618_v24  ;;  %v10316_v61 = vpack.c.bf16 %v7618_v24, %v7617_v41  ;;  %v16448_v34 = vpop.f32.mrf.mxu3 }
 0x3b1   : > { %v16461_v23 = vpop.f32.mrf.mxu1  ;;  %v16464_v27 = vperm.slane %v7550_v51, 0 }
 0x3b2   : > { %v8006_v48 = vadd.f32 %v8005_v5, %v7879_v6  ;;  %10603 = vst [vmem:[%s13495_s14 + $0xb8] sm:$0xff] %v10316_v61   ;;  %v6086_v5 = vadd.f32 %v16410_v45, %v16418_v11  ;;  %v6089_v45 = vadd.f32 %v16422_v9, %v16429_v2 }
 0x3b4   : > { %9697 = vmatmul.msk.bf16.gmra.mxu2 %vm18124_vm5, %v9906_v50  ;;  %v9907_v50 = vld [vmem:[#allocation2 + $0x188] sm:$0xff]  ;;  %vm18143_vm5 = vmmov %vm18123_vm0 }
 0x3b5   : > { %9714 = vmatmul.msk.bf16.gmra.mxu3 %vm18126_vm6, %v9923_v18  ;;  %v16468_v40 = vpop.f32.mrf.mxu0  ;;  %vm18145_vm6 = vmmov %vm18123_vm0 }
 0x3b7   : > { %v7086_v46 = vpop.f32.mrf.mxu2 }
 0x3b8   : > { %v7334_v30 = vadd.f32 %v7086_v46, %v6084_v10  ;;  %v16466_v41 = vpop.f32.mrf.mxu3 }
 0x3b9   : > { %v16472_v8 = vpop.f32.mrf.mxu1 }
 0x3ba   : > { %v7466_v57 = vadd.f32 %v16405_v38, %v7334_v30 }
 0x3bb   : > { %9356 = vmatmul.msk.bf16.gmra.mxu1 %vm18127_vm7, %v9773_v21  ;;  %vm18147_vm7 = vmmov %vm18123_vm0 }
 0x3bc   : > { %v7619_v32 = vadd.f32 %v16464_v27, %v7466_v57 }
 0x3bd   : > { %v16479_v61 = vpop.f32.mrf.mxu0 }
 0x3be   : > { %v7746_v36 = vadd.f32 %v7745_v37, %v7619_v32  ;;  %v7880_v14 = vmul.f32 %v7619_v32, %v7619_v32  ;;  %v9841_v37 = vld [vmem:[#allocation2 + $0x158] sm:$0xff] }
 0x3bf   : > { %v7088_v15 = vpop.f32.mrf.mxu2  ;;  %9020 = vmatmul.msk.bf16.gmra.mxu0 %vm18129_vm9, %v9841_v37  ;;  %v9908_v37 = vld [vmem:[#allocation2 + $0x190] sm:$0xff]  ;;  %vm18150_vm9 = vmmov %vm18123_vm0 }
 0x3c0   : > { %v8007_v22 = vadd.f32 %v8006_v48, %v7880_v14  ;;  %v7335_v24 = vadd.f32 %v7088_v15, %v6086_v5  ;;  %v16477_v6 = vpop.f32.mrf.mxu3 }
 0x3c1   : > { %v16487_v11 = vpop.f32.mrf.mxu1 }
 0x3c2   : > { %v7467_v18 = vadd.f32 %v16405_v38, %v7335_v24 }
 0x3c4   : > { %v7620_v10 = vadd.f32 %v16464_v27, %v7467_v18  ;;  %9698 = vmatmul.msk.bf16.gmra.mxu2 %vm18128_vm8, %v9907_v50  ;;  %v9774_v50 = vld [vmem:[#allocation2 + $0x120] sm:$0xff]  ;;  %vm18149_vm8 = vmmov %vm18123_vm0 }
 0x3c5   : > { %9715 = vmatmul.msk.bf16.gmra.mxu3 %vm18130_vm11, %v9924_v7  ;;  %v16493_v21 = vpop.f32.mrf.mxu0  ;;  %vm18151_vm11 = vmmov %vm18123_vm0 }
 0x3c6   : > { %v7747_v48 = vadd.f32 %v7746_v36, %v7620_v10  ;;  %v7881_v51 = vmul.f32 %v7620_v10, %v7620_v10  ;;  %v10321_v46 = vpack.c.bf16 %v7620_v10, %v7619_v32  ;;  %v6091_v32 = vadd.f32 %v16434_v47, %v16441_v35 }
 0x3c7   : > { %v7091_v30 = vpop.f32.mrf.mxu2  ;;  %v6094_v47 = vadd.f32 %v16444_v53, %v16450_v42 }
 0x3c8   : > { %v8008_v57 = vadd.f32 %v8007_v22, %v7881_v51  ;;  %10604 = vst [vmem:[%s13495_s14 + $0xc0] sm:$0xff] %v10321_v46   ;;  %v7336_v14 = vadd.f32 %v7091_v30, %v6089_v45  ;;  %v16491_v5 = vpop.f32.mrf.mxu3  ;;  %v9925_v46 = vld [vmem:[#allocation2 + $0x218] sm:$0xff] }
 0x3c9   : > { %v16497_v15 = vpop.f32.mrf.mxu1 }
 0x3ca   : > { %v7468_v9 = vadd.f32 %v16405_v38, %v7336_v14 }
 0x3cb   : > { %9357 = vmatmul.msk.bf16.gmra.mxu1 %vm18131_vm12, %v9774_v50  ;;  %vm18153_vm12 = vmmov %vm18123_vm0 }
 0x3cc   : > { %v7621_v2 = vadd.f32 %v16464_v27, %v7468_v9 }
 0x3cd   : > { %v16504_v45 = vpop.f32.mrf.mxu0 }
 0x3ce   : > { %v7748_v24 = vadd.f32 %v7747_v48, %v7621_v2  ;;  %v7882_v36 = vmul.f32 %v7621_v2, %v7621_v2  ;;  %v9842_v48 = vld [vmem:[#allocation2 + $0x160] sm:$0xff] }
 0x3cf   : > { %v7093_v18 = vpop.f32.mrf.mxu2  ;;  %9021 = vmatmul.msk.bf16.gmra.mxu0 %vm18133_vm13, %v9842_v48  ;;  %vm18156_vm13 = vmmov %vm18123_vm0 }
 0x3d0   : > { %v8009_v22 = vadd.f32 %v8008_v57, %v7882_v36  ;;  %v7337_v7 = vadd.f32 %v7093_v18, %v6091_v32  ;;  %v16502_v10 = vpop.f32.mrf.mxu3 }
 0x3d1   : > { %v16512_v35 = vpop.f32.mrf.mxu1 }
 0x3d2   : > { %v7469_v51 = vadd.f32 %v16405_v38, %v7337_v7 }
 0x3d4   : > { %v7622_v30 = vadd.f32 %v16464_v27, %v7469_v51  ;;  %9699 = vmatmul.msk.bf16.gmra.mxu2 %vm18132_vm10, %v9908_v37  ;;  %vm18155_vm10 = vmmov %vm18123_vm0 }
 0x3d5   : > { %9716 = vmatmul.msk.bf16.gmra.mxu3 %vm18134_vm14, %v9925_v46  ;;  %v16518_v7 = vpop.f32.mrf.mxu0  ;;  %v9775_v46 = vld [vmem:[#allocation2 + $0x128] sm:$0xff]  ;;  %vm18157_vm14 = vmmov %vm18123_vm0 }
 0x3d6   : > { %v7749_v57 = vadd.f32 %v7748_v24, %v7622_v30  ;;  %v7883_v14 = vmul.f32 %v7622_v30, %v7622_v30  ;;  %v10326_v9 = vpack.c.bf16 %v7622_v30, %v7621_v2  ;;  %v6096_v2 = vadd.f32 %v16461_v23, %v16468_v40 }
 0x3d7   : > { %v7096_v36 = vpop.f32.mrf.mxu2  ;;  %v6099_v23 = vadd.f32 %v16472_v8, %v16479_v61 }
 0x3d8   : > { %v8010_v32 = vadd.f32 %v8009_v22, %v7883_v14  ;;  %10605 = vst [vmem:[%s13495_s14 + $0xc8] sm:$0xff] %v10326_v9   ;;  %v7338_v50 = vadd.f32 %v7096_v36, %v6094_v47  ;;  %v16516_v18 = vpop.f32.mrf.mxu3  ;;  %v9909_v47 = vld [vmem:[#allocation2 + $0x198] sm:$0xff] }
 0x3d9   : > { %18135 = vst [vmem:[#allocation34_spill] sm:$0xff] %v16516_v18  ;;  %v16522_v37 = vpop.f32.mrf.mxu1  ;;  %v9848_v18 = vld [vmem:[#allocation2 + $0x190] sm:$0xff] }
 0x3da   : > { %v7470_v53 = vadd.f32 %v16405_v38, %v7338_v50  ;;  %v9926_v50 = vld [vmem:[#allocation2 + $0x220] sm:$0xff] }
 0x3db   : > { %9358 = vmatmul.msk.bf16.gmra.mxu1 %vm18136_vm15, %v9775_v46  ;;  %vm18159_vm15 = vmmov %vm18123_vm0 }
 0x3dc   : > { %v7623_v42 = vadd.f32 %v16464_v27, %v7470_v53 }
 0x3dd   : > { %v16529_v9 = vpop.f32.mrf.mxu0 }
 0x3de   : > { %v7750_v51 = vadd.f32 %v7749_v57, %v7623_v42  ;;  %v7884_v24 = vmul.f32 %v7623_v42, %v7623_v42  ;;  %v9843_v57 = vld [vmem:[#allocation2 + $0x168] sm:$0xff] }
 0x3df   : > { %v7098_v48 = vpop.f32.mrf.mxu2  ;;  %9022 = vmatmul.msk.bf16.gmra.mxu0 %vm18139_vm3, %v9843_v57  ;;  %vm18162_vm3 = vmmov %vm18123_vm0 }
 0x3e0   : > { %v8011_v22 = vadd.f32 %v8010_v32, %v7884_v24  ;;  %v7339_v30 = vadd.f32 %v7098_v48, %v6096_v2  ;;  %v16527_v14 = vpop.f32.mrf.mxu3 }
 0x3e1   : > { %18137 = vst [vmem:[#allocation35_spill] sm:$0xff] %v16527_v14  ;;  %v16537_v40 = vpop.f32.mrf.mxu1 }
 0x3e2   : > { %v7471_v36 = vadd.f32 %v16405_v38, %v7339_v30 }
 0x3e4   : > { %v7624_v53 = vadd.f32 %v16464_v27, %v7471_v36  ;;  %9700 = vmatmul.msk.bf16.gmra.mxu2 %vm18138_vm2, %v9909_v47  ;;  %vm18161_vm2 = vmmov %vm18123_vm0 }
 0x3e5   : > { %9717 = vmatmul.msk.bf16.gmra.mxu3 %vm18140_vm4, %v9926_v50  ;;  %v16543_v36 = vpop.f32.mrf.mxu0  ;;  %v9776_v50 = vld [vmem:[#allocation2 + $0x130] sm:$0xff]  ;;  %vm18163_vm4 = vmmov %vm18123_vm0 }
 0x3e6   : > { %v7751_v32 = vadd.f32 %v7750_v51, %v7624_v53  ;;  %v7885_v24 = vmul.f32 %v7624_v53, %v7624_v53  ;;  %v10331_v2 = vpack.c.bf16 %v7624_v53, %v7623_v42  ;;  %v6101_v42 = vadd.f32 %v16487_v11, %v16493_v21 }
 0x3e7   : > { %v7101_v46 = vpop.f32.mrf.mxu2  ;;  %v6104_v11 = vadd.f32 %v16497_v15, %v16504_v45 }
 0x3e8   : > { %v8012_v48 = vadd.f32 %v8011_v22, %v7885_v24  ;;  %10606 = vst [vmem:[%s13495_s14 + $0xd0] sm:$0xff] %v10331_v2   ;;  %v7340_v30 = vadd.f32 %v7101_v46, %v6099_v23  ;;  %v16541_v14 = vpop.f32.mrf.mxu3  ;;  %v9910_v23 = vld [vmem:[#allocation2 + $0x1a0] sm:$0xff] }
 0x3e9   : > { %18141 = vst [vmem:[#allocation36_spill] sm:$0xff] %v16541_v14  ;;  %v16547_v47 = vpop.f32.mrf.mxu1 }
 0x3ea   : > { %v7472_v8 = vadd.f32 %v16405_v38, %v7340_v30 }
 0x3eb   : > { %9359 = vmatmul.msk.bf16.gmra.mxu1 %vm18123_vm0, %v9776_v50 }
 0x3ec   : > { %v7625_v61 = vadd.f32 %v16464_v27, %v7472_v8  ;;  %v9927_v8 = vld [vmem:[#allocation2 + $0x228] sm:$0xff] }
 0x3ed   : > { %v16554_v46 = vpop.f32.mrf.mxu0 }
 0x3ee   : > { %v7752_v57 = vadd.f32 %v7751_v32, %v7625_v61  ;;  %v7886_v51 = vmul.f32 %v7625_v61, %v7625_v61  ;;  %v9844_v32 = vld [vmem:[#allocation2 + $0x170] sm:$0xff] }
 0x3ef   : > { %v7103_v53 = vpop.f32.mrf.mxu2  ;;  %9023 = vmatmul.msk.bf16.gmra.mxu0 %vm18144_vm1, %v9844_v32  ;;  %vm18165_vm1 = vmmov %vm18123_vm0 }
 0x3f0   : > { %v8013_v22 = vadd.f32 %v8012_v48, %v7886_v51  ;;  %v7341_v24 = vadd.f32 %v7103_v53, %v6101_v42  ;;  %v16552_v2 = vpop.f32.mrf.mxu3 }
 0x3f1   : > { %18142 = vst [vmem:[#allocation37_spill] sm:$0xff] %v16552_v2  ;;  %v16562_v21 = vpop.f32.mrf.mxu1 }
 0x3f2   : > { %v7473_v30 = vadd.f32 %v16405_v38, %v7341_v24 }
 0x3f4   : > { %v7626_v14 = vadd.f32 %v16464_v27, %v7473_v30  ;;  %9701 = vmatmul.msk.bf16.gmra.mxu2 %vm18143_vm5, %v9910_v23  ;;  %vm18164_vm5 = vmmov %vm18123_vm0 }
 0x3f5   : > { %9718 = vmatmul.msk.bf16.gmra.mxu3 %vm18145_vm6, %v9927_v8  ;;  %v16568_v30 = vpop.f32.mrf.mxu0  ;;  %vm18166_vm6 = vmmov %vm18123_vm0 }
 0x3f6   : > { %v7753_v48 = vadd.f32 %v7752_v57, %v7626_v14  ;;  %v7887_v51 = vmul.f32 %v7626_v14, %v7626_v14  ;;  %v10336_v42 = vpack.c.bf16 %v7626_v14, %v7625_v61  ;;  %v6106_v14 = vadd.f32 %v16512_v35, %v16518_v7  ;;  %v9777_v61 = vld [vmem:[#allocation2 + $0x138] sm:$0xff] }
 0x3f7   : > { %v7106_v50 = vpop.f32.mrf.mxu2  ;;  %v6109_v35 = vadd.f32 %v16522_v37, %v16529_v9 }
 0x3f8   : > { %v8014_v53 = vadd.f32 %v8013_v22, %v7887_v51  ;;  %10607 = vst [vmem:[%s13495_s14 + $0xd8] sm:$0xff] %v10336_v42   ;;  %v7342_v24 = vadd.f32 %v7106_v50, %v6104_v11  ;;  %v16566_v2 = vpop.f32.mrf.mxu3  ;;  %v9911_v11 = vld [vmem:[#allocation2 + $0x1a8] sm:$0xff] }
 0x3f9   : > { %18146 = vst [vmem:[#allocation38_spill] sm:$0xff] %v16566_v2  ;;  %v16572_v23 = vpop.f32.mrf.mxu1 }
 0x3fa   : > { %v7474_v15 = vadd.f32 %v16405_v38, %v7342_v24 }
 0x3fb   : > { %9360 = vmatmul.msk.bf16.gmra.mxu1 %vm18147_vm7, %v9777_v61  ;;  %vm18167_vm7 = vmmov %vm18123_vm0 }
 0x3fc   : > { %v7627_v45 = vadd.f32 %v16464_v27, %v7474_v15  ;;  %v9928_v15 = vld [vmem:[#allocation2 + $0x230] sm:$0xff] }
 0x3fd   : > { %v16579_v50 = vpop.f32.mrf.mxu0 }
 0x3fe   : > { %v7754_v32 = vadd.f32 %v7753_v48, %v7627_v45  ;;  %v7888_v57 = vmul.f32 %v7627_v45, %v7627_v45  ;;  %v9845_v48 = vld [vmem:[#allocation2 + $0x178] sm:$0xff] }
 0x3ff   : > { %v7108_v8 = vpop.f32.mrf.mxu2  ;;  %9024 = vmatmul.msk.bf16.gmra.mxu0 %vm18150_vm9, %v9845_v48  ;;  %vm18169_vm9 = vmmov %vm18123_vm0 }
 0x400   : > { %v8015_v22 = vadd.f32 %v8014_v53, %v7888_v57  ;;  %v7343_v51 = vadd.f32 %v7108_v8, %v6106_v14  ;;  %v16577_v42 = vpop.f32.mrf.mxu3 }
 0x401   : > { %18148 = vst [vmem:[#allocation39_spill] sm:$0xff] %v16577_v42  ;;  %v16587_v7 = vpop.f32.mrf.mxu1 }
 0x402   : > { %v7475_v24 = vadd.f32 %v16405_v38, %v7343_v51 }
 0x404   : > { %v7628_v2 = vadd.f32 %v16464_v27, %v7475_v24  ;;  %9702 = vmatmul.msk.bf16.gmra.mxu2 %vm18149_vm8, %v9911_v11  ;;  %vm18168_vm8 = vmmov %vm18123_vm0 }
 0x405   : > { %9719 = vmatmul.msk.bf16.gmra.mxu3 %vm18151_vm11, %v9928_v15  ;;  %v16593_v24 = vpop.f32.mrf.mxu0  ;;  %vm18170_vm11 = vmmov %vm18123_vm0 }
 0x406   : > { %v7755_v53 = vadd.f32 %v7754_v32, %v7628_v2  ;;  %v7889_v57 = vmul.f32 %v7628_v2, %v7628_v2  ;;  %v10341_v14 = vpack.c.bf16 %v7628_v2, %v7627_v45  ;;  %v6111_v2 = vadd.f32 %v16537_v40, %v16543_v36  ;;  %v9778_v45 = vld [vmem:[#allocation2 + $0x140] sm:$0xff] }
 0x407   : > { %v7111_v61 = vpop.f32.mrf.mxu2  ;;  %v6114_v40 = vadd.f32 %v16547_v47, %v16554_v46 }
 0x408   : > { %v8016_v8 = vadd.f32 %v8015_v22, %v7889_v57  ;;  %10608 = vst [vmem:[%s13495_s14 + $0xe0] sm:$0xff] %v10341_v14   ;;  %v7344_v51 = vadd.f32 %v7111_v61, %v6109_v35  ;;  %v16591_v42 = vpop.f32.mrf.mxu3  ;;  %v9912_v35 = vld [vmem:[#allocation2 + $0x1b0] sm:$0xff] }
 0x409   : > { %18152 = vst [vmem:[#allocation40_spill] sm:$0xff] %v16591_v42  ;;  %v16597_v11 = vpop.f32.mrf.mxu1 }
 0x40a   : > { %v7476_v37 = vadd.f32 %v16405_v38, %v7344_v51 }
 0x40b   : > { %9361 = vmatmul.msk.bf16.gmra.mxu1 %vm18153_vm12, %v9778_v45  ;;  %vm18171_vm12 = vmmov %vm18123_vm0 }
 0x40c   : > { %v7629_v9 = vadd.f32 %v16464_v27, %v7476_v37  ;;  %v9929_v37 = vld [vmem:[#allocation2 + $0x238] sm:$0xff] }
 0x40d   : > { %v16604_v61 = vpop.f32.mrf.mxu0 }
 0x40e   : > { %v7756_v48 = vadd.f32 %v7755_v53, %v7629_v9  ;;  %v7890_v32 = vmul.f32 %v7629_v9, %v7629_v9  ;;  %v9846_v53 = vld [vmem:[#allocation2 + $0x180] sm:$0xff] }
 0x40f   : > { %v7113_v15 = vpop.f32.mrf.mxu2  ;;  %9025 = vmatmul.msk.bf16.gmra.mxu0 %vm18156_vm13, %v9846_v53  ;;  %vm18173_vm13 = vmmov %vm18123_vm0 }
 0x410   : > { %v8017_v22 = vadd.f32 %v8016_v8, %v7890_v32  ;;  %v7345_v57 = vadd.f32 %v7113_v15, %v6111_v2  ;;  %v16602_v14 = vpop.f32.mrf.mxu3 }
 0x411   : > { %18154 = vst [vmem:[#allocation41_spill] sm:$0xff] %v16602_v14  ;;  %v16612_v36 = vpop.f32.mrf.mxu1 }
 0x412   : > { %v7477_v51 = vadd.f32 %v16405_v38, %v7345_v57 }
 0x414   : > { %v7630_v42 = vadd.f32 %v16464_v27, %v7477_v51  ;;  %9703 = vmatmul.msk.bf16.gmra.mxu2 %vm18155_vm10, %v9912_v35  ;;  %vm18172_vm10 = vmmov %vm18123_vm0 }
 0x415   : > { %9720 = vmatmul.msk.bf16.gmra.mxu3 %vm18157_vm14, %v9929_v37  ;;  %v16618_v51 = vpop.f32.mrf.mxu0  ;;  %vm18174_vm14 = vmmov %vm18123_vm0 }
 0x416   : > { %v7757_v8 = vadd.f32 %v7756_v48, %v7630_v42  ;;  %v7891_v32 = vmul.f32 %v7630_v42, %v7630_v42  ;;  %v10346_v2 = vpack.c.bf16 %v7630_v42, %v7629_v9  ;;  %v6116_v42 = vadd.f32 %v16562_v21, %v16568_v30  ;;  %v9779_v9 = vld [vmem:[#allocation2 + $0x148] sm:$0xff] }
 0x417   : > { %v7116_v45 = vpop.f32.mrf.mxu2  ;;  %v6119_v21 = vadd.f32 %v16572_v23, %v16579_v50  ;;  %v6204_v50 = vadd.f32 %v15796_v31, %v13797_v28  ;;  %v9914_v28 = vld [vmem:[#allocation2 + $0x1c0] sm:$0xff] }
 0x418   : > { %v8018_v15 = vadd.f32 %v8017_v22, %v7891_v32  ;;  %10609 = vst [vmem:[%s13495_s14 + $0xe8] sm:$0xff] %v10346_v2   ;;  %v7346_v57 = vadd.f32 %v7116_v45, %v6114_v40  ;;  %v16616_v14 = vpop.f32.mrf.mxu3  ;;  %v9913_v40 = vld [vmem:[#allocation2 + $0x1b8] sm:$0xff] }
 0x419   : > { %18158 = vst [vmem:[#allocation42_spill] sm:$0xff] %v16616_v14  ;;  %v16622_v35 = vpop.f32.mrf.mxu1 }
 0x41a   : > { %v7478_v47 = vadd.f32 %v16405_v38, %v7346_v57 }
 0x41b   : > { %9362 = vmatmul.msk.bf16.gmra.mxu1 %vm18159_vm15, %v9779_v9  ;;  %vm18175_vm15 = vmmov %vm18123_vm0 }
 0x41c   : > { %v7631_v46 = vadd.f32 %v16464_v27, %v7478_v47  ;;  %v9930_v47 = vld [vmem:[#allocation2 + $0x240] sm:$0xff] }
 0x41d   : > { %v16629_v45 = vpop.f32.mrf.mxu0 }
 0x41e   : > { %v7758_v53 = vadd.f32 %v7757_v8, %v7631_v46  ;;  %v7892_v48 = vmul.f32 %v7631_v46, %v7631_v46  ;;  %v9847_v8 = vld [vmem:[#allocation2 + $0x188] sm:$0xff] }
 0x41f   : > { %v7118_v37 = vpop.f32.mrf.mxu2  ;;  %9026 = vmatmul.msk.bf16.gmra.mxu0 %vm18162_vm3, %v9847_v8  ;;  %vm18177_vm3 = vmmov %vm18123_vm0 }
 0x420   : > { %v8019_v22 = vadd.f32 %v8018_v15, %v7892_v48  ;;  %v7347_v32 = vadd.f32 %v7118_v37, %v6116_v42  ;;  %v16627_v2 = vpop.f32.mrf.mxu3 }
 0x421   : > { %18160 = vst [vmem:[#allocation43_spill] sm:$0xff] %v16627_v2  ;;  %v16637_v30 = vpop.f32.mrf.mxu1 }
 0x422   : > { %v7479_v57 = vadd.f32 %v16405_v38, %v7347_v32 }
 0x424   : > { %v7632_v14 = vadd.f32 %v16464_v27, %v7479_v57  ;;  %9704 = vmatmul.msk.bf16.gmra.mxu2 %vm18161_vm2, %v9913_v40  ;;  %vm18176_vm2 = vmmov %vm18123_vm0 }
 0x425   : > { %9721 = vmatmul.msk.bf16.gmra.mxu3 %vm18163_vm4, %v9930_v47  ;;  %v16641_v57 = vpop.f32.mrf.mxu0  ;;  %vm18178_vm4 = vmmov %vm18123_vm0 }
 0x426   : > { %v7759_v15 = vadd.f32 %v7758_v53, %v7632_v14  ;;  %v7893_v48 = vmul.f32 %v7632_v14, %v7632_v14  ;;  %v10351_v42 = vpack.c.bf16 %v7632_v14, %v7631_v46  ;;  %v7553_v53 = vrot.slane %v16457_v44, 6 }
 0x427   : > { %v7121_v9 = vpop.f32.mrf.mxu2 }
 0x428   : > { %v8020_v37 = vadd.f32 %v8019_v22, %v7893_v48  ;;  %10610 = vst [vmem:[%s13495_s14 + $0xf0] sm:$0xff] %v10351_v42   ;;  %v7348_v32 = vadd.f32 %v7121_v9, %v6119_v21  ;;  %v7206_v2 = vpop.f32.mrf.mxu3  ;;  %v6121_v22 = vadd.f32 %v16587_v7, %v16593_v24  ;;  %v9780_v21 = vld [vmem:[#allocation2 + $0x150] sm:$0xff]  ;;  %v6206_v42 = vadd.f32 %v15841_v1, %v13864_v54  ;;  %v9931_v24 = vld [vmem:[#allocation2 + $0x248] sm:$0xff] }
 0x429   : > { %v7382_v8 = vadd.f32 %v7206_v2, %v6204_v50  ;;  %v16648_v14 = vpop.f32.mrf.mxu1  ;;  %v16656_v2 = vperm.slane %v7553_v53, 0  ;;  %v6124_v1 = vadd.f32 %v16597_v11, %v16604_v61 }
 0x42a   : > { %v7480_v23 = vadd.f32 %v16405_v38, %v7348_v32 }
 0x42b   : > { %9363 = vmatmul.msk.bf16.gmra.mxu1 %vm18123_vm0, %v9780_v21  ;;  %v7514_v31 = vadd.f32 %v16405_v38, %v7382_v8 }
 0x42c   : > { %v7633_v40 = vadd.f32 %v16464_v27, %v7480_v23 }
 0x42d   : > { %v16669_v53 = vadd.f32 %v16656_v2, %v7514_v31 }
 0x42e   : > { %v7760_v46 = vadd.f32 %v7759_v15, %v7633_v40  ;;  %v7894_v47 = vmul.f32 %v7633_v40, %v7633_v40  ;;  %v16658_v15 = vpop.f32.mrf.mxu0 }
 0x42f   : > { %v7123_v48 = vpop.f32.mrf.mxu2  ;;  %9027 = vmatmul.msk.bf16.gmra.mxu0 %vm18165_vm1, %v9848_v18  ;;  %vm18180_vm1 = vmmov %vm18123_vm0 }
 0x430   : > { %v8021_v9 = vadd.f32 %v8020_v37, %v7894_v47  ;;  %v7349_v32 = vadd.f32 %v7123_v48, %v6121_v22  ;;  %v7208_v23 = vpop.f32.mrf.mxu3  ;;  %v7551_v37 = vrot.slane %v16457_v44, 4 }
 0x431   : > { %v7383_v7 = vadd.f32 %v7208_v23, %v6206_v42  ;;  %v16671_v47 = vpop.f32.mrf.mxu1 }
 0x432   : > { %v7481_v50 = vadd.f32 %v16405_v38, %v7349_v32  ;;  %v16678_v42 = vperm.slane %v7551_v37, 0  ;;  %v6211_v37 = vadd.f32 %v15935_v33, %v13966_v17  ;;  %v6129_v17 = vadd.f32 %v16622_v35, %v16629_v45 }
 0x433   : > { %v7515_v8 = vadd.f32 %v16405_v38, %v7383_v7 }
 0x434   : > { %v7634_v54 = vadd.f32 %v16464_v27, %v7481_v50  ;;  %9705 = vmatmul.msk.bf16.gmra.mxu2 %vm18164_vm5, %v9914_v28  ;;  %vm18179_vm5 = vmmov %vm18123_vm0 }
 0x435   : > { %v16674_v48 = vadd.f32 %v16656_v2, %v7515_v8  ;;  %9722 = vmatmul.msk.bf16.gmra.mxu3 %vm18166_vm6, %v9931_v24  ;;  %v6126_v24 = vadd.f32 %v16612_v36, %v16618_v51  ;;  %v9849_v36 = vld [vmem:[#allocation2 + $0x198] sm:$0xff]  ;;  %vm18181_vm6 = vmmov %vm18123_vm0 }
 0x436   : > { %v7761_v22 = vadd.f32 %v7760_v46, %v7634_v54  ;;  %v7895_v21 = vmul.f32 %v7634_v54, %v7634_v54  ;;  %v10356_v27 = vpack.c.bf16 %v7634_v54, %v7633_v40  ;;  %v16682_v28 = vpop.f32.mrf.mxu0  ;;  %v6209_v40 = vadd.f32 %v15890_v39, %v13919_v60  ;;  %v9781_v54 = vld [vmem:[#allocation2 + $0x158] sm:$0xff] }
 0x437   : > { %v7126_v11 = vpop.f32.mrf.mxu2  ;;  %v10441_v18 = vpack.c.bf16 %v16674_v48, %v16669_v53 }
 0x438   : > { %v8022_v44 = vadd.f32 %v8021_v9, %v7895_v21  ;;  %10611 = vst [vmem:[%s13495_s14 + $0xf8] sm:$0xff] %v10356_v27   ;;  %v7350_v61 = vadd.f32 %v7126_v11, %v6124_v1  ;;  %v7211_v32 = vpop.f32.mrf.mxu3  ;;  %v9915_v27 = vld [vmem:[#allocation2 + $0x1c8] sm:$0xff] }
 0x439   : > { %10628 = vst [vmem:[%s13495_s14 + $0x180] sm:$0xff] %v10441_v18   ;;  %v7384_v23 = vadd.f32 %v7211_v32, %v6209_v40  ;;  %v16689_v9 = vpop.f32.mrf.mxu1  ;;  %v9932_v18 = vld [vmem:[#allocation2 + $0x250] sm:$0xff] }
 0x43a   : > { %v7482_v46 = vadd.f32 %v16405_v38, %v7350_v61 }
 0x43b   : > { %9364 = vmatmul.msk.bf16.gmra.mxu1 %vm18167_vm7, %v9781_v54  ;;  %v7516_v60 = vadd.f32 %v16405_v38, %v7384_v23  ;;  %vm18183_vm7 = vmmov %vm18123_vm0 }
 0x43c   : > { %v7635_v31 = vadd.f32 %v16678_v42, %v7482_v46 }
 0x43e   : > { %v7762_v50 = vadd.f32 %v7761_v22, %v7635_v31  ;;  %v7896_v7 = vmul.f32 %v7635_v31, %v7635_v31  ;;  %v16697_v11 = vpop.f32.mrf.mxu0 }
 0x43f   : > { %v7128_v1 = vpop.f32.mrf.mxu2  ;;  %9028 = vmatmul.msk.bf16.gmra.mxu0 %vm18169_vm9, %v9849_v36  ;;  %v6216_v36 = vadd.f32 %v16033_v20, %v14096_v26  ;;  %v6134_v26 = vadd.f32 %v16648_v14, %v16658_v15  ;;  %vm18185_vm9 = vmmov %vm18123_vm0 }
 0x440   : > { %v8023_v8 = vadd.f32 %v8022_v44, %v7896_v7  ;;  %v7351_v21 = vadd.f32 %v7128_v1, %v6126_v24  ;;  %v7213_v39 = vpop.f32.mrf.mxu3  ;;  %v16707_v44 = vadd.f32 %v16656_v2, %v7516_v60 }
 0x441   : > { %v7385_v61 = vadd.f32 %v7213_v39, %v6211_v37  ;;  %v16709_v32 = vpop.f32.mrf.mxu1 }
 0x442   : > { %v7483_v22 = vadd.f32 %v16405_v38, %v7351_v21 }
 0x443   : > { %v7517_v33 = vadd.f32 %v16405_v38, %v7385_v61  ;;  %v9782_v61 = vld [vmem:[#allocation2 + $0x160] sm:$0xff] }
 0x444   : > { %v7636_v51 = vadd.f32 %v16678_v42, %v7483_v22  ;;  %9706 = vmatmul.msk.bf16.gmra.mxu2 %vm18168_vm8, %v9915_v27  ;;  %v6131_v22 = vadd.f32 %v16637_v30, %v16641_v57  ;;  %v9850_v30 = vld [vmem:[#allocation2 + $0x1a0] sm:$0xff]  ;;  %vm18184_vm8 = vmmov %vm18123_vm0 }
 0x445   : > { %v16712_v7 = vadd.f32 %v16656_v2, %v7517_v33  ;;  %9723 = vmatmul.msk.bf16.gmra.mxu3 %vm18170_vm11, %v9932_v18  ;;  %v9916_v33 = vld [vmem:[#allocation2 + $0x1d0] sm:$0xff]  ;;  %vm18186_vm11 = vmmov %vm18123_vm0 }
 0x446   : > { %v7763_v46 = vadd.f32 %v7762_v50, %v7636_v51  ;;  %v7897_v40 = vmul.f32 %v7636_v51, %v7636_v51  ;;  %v10361_v23 = vpack.c.bf16 %v7636_v51, %v7635_v31  ;;  %v16718_v37 = vpop.f32.mrf.mxu0  ;;  %v6214_v31 = vadd.f32 %v15979_v29, %v14047_v58 }
 0x447   : > { %v7131_v35 = vpop.f32.mrf.mxu2  ;;  %v10446_v54 = vpack.c.bf16 %v16712_v7, %v16707_v44 }
 0x448   : > { %v8024_v45 = vadd.f32 %v8023_v8, %v7897_v40  ;;  %10612 = vst [vmem:[%s13495_s14 + $0x100] sm:$0xff] %v10361_v23   ;;  %v7352_v24 = vadd.f32 %v7131_v35, %v6129_v17  ;;  %v7216_v1 = vpop.f32.mrf.mxu3  ;;  %v9933_v35 = vld [vmem:[#allocation2 + $0x258] sm:$0xff] }
 0x449   : > { %10629 = vst [vmem:[%s13495_s14 + $0x188] sm:$0xff] %v10446_v54   ;;  %v7386_v27 = vadd.f32 %v7216_v1, %v6214_v31  ;;  %v16725_v60 = vpop.f32.mrf.mxu1 }
 0x44a   : > { %v7484_v21 = vadd.f32 %v16405_v38, %v7352_v24 }
 0x44b   : > { %9365 = vmatmul.msk.bf16.gmra.mxu1 %vm18171_vm12, %v9782_v61  ;;  %v7518_v58 = vadd.f32 %v16405_v38, %v7386_v27  ;;  %vm18189_vm12 = vmmov %vm18123_vm0 }
 0x44c   : > { %v7637_v50 = vadd.f32 %v16678_v42, %v7484_v21 }
 0x44e   : > { %v7764_v8 = vadd.f32 %v7763_v46, %v7637_v50  ;;  %v7898_v39 = vmul.f32 %v7637_v50, %v7637_v50  ;;  %v16733_v40 = vpop.f32.mrf.mxu0 }
 0x44f   : > { %v7133_v18 = vpop.f32.mrf.mxu2  ;;  %9029 = vmatmul.msk.bf16.gmra.mxu0 %vm18173_vm13, %v9850_v30  ;;  %vm18193_vm13 = vmmov %vm18123_vm0 }
 0x450   : > { %v8025_v51 = vadd.f32 %v8024_v45, %v7898_v39  ;;  %v7353_v17 = vadd.f32 %v7133_v18, %v6131_v22  ;;  %v7218_v29 = vpop.f32.mrf.mxu3  ;;  %v16743_v45 = vadd.f32 %v16656_v2, %v7518_v58  ;;  %v6136_v58 = vadd.f32 %v16671_v47, %v16682_v28  ;;  %v9851_v47 = vld [vmem:[#allocation2 + $0x1a8] sm:$0xff] }
 0x451   : > { %v7387_v23 = vadd.f32 %v7218_v29, %v6216_v36  ;;  %v16745_v24 = vpop.f32.mrf.mxu1  ;;  %v9783_v29 = vld [vmem:[#allocation2 + $0x168] sm:$0xff] }
 0x452   : > { %v7485_v46 = vadd.f32 %v16405_v38, %v7353_v17 }
 0x453   : > { %v7519_v20 = vadd.f32 %v16405_v38, %v7387_v23  ;;  %v6221_v23 = vadd.f32 %v16141_v63, %v14221_v4  ;;  %v6139_v4 = vadd.f32 %v16689_v9, %v16697_v11 }
 0x454   : > { %v7638_v57 = vadd.f32 %v16678_v42, %v7485_v46  ;;  %9707 = vmatmul.msk.bf16.gmra.mxu2 %vm18172_vm10, %v9916_v33  ;;  %vm18190_vm10 = vmmov %vm18123_vm0 }
 0x455   : > { %v16748_v31 = vadd.f32 %v16656_v2, %v7519_v20  ;;  %9724 = vmatmul.msk.bf16.gmra.mxu3 %vm18174_vm14, %v9933_v35  ;;  %vm8093_vm14 = vcmask 1040384  }
 0x456   : > { %v7765_v54 = vadd.f32 %v7764_v8, %v7638_v57  ;;  %v7899_v1 = vmul.f32 %v7638_v57, %v7638_v57  ;;  %v10366_v21 = vpack.c.bf16 %v7638_v57, %v7637_v50  ;;  %v16754_v61 = vpop.f32.mrf.mxu0  ;;  %v6219_v50 = vadd.f32 %v16080_v19, %v14168_v16  ;;  %v9917_v57 = vld [vmem:[#allocation2 + $0x1d8] sm:$0xff] }
 0x457   : > { %v7136_v14 = vpop.f32.mrf.mxu2  ;;  %v10451_v39 = vpack.c.bf16 %v16748_v31, %v16743_v45 }
 0x458   : > { %v8026_v15 = vadd.f32 %v8025_v51, %v7899_v1  ;;  %10613 = vst [vmem:[%s13495_s14 + $0x108] sm:$0xff] %v10366_v21   ;;  %v7354_v27 = vadd.f32 %v7136_v14, %v6134_v26  ;;  %v7221_v22 = vpop.f32.mrf.mxu3  ;;  %v9934_v1 = vld [vmem:[#allocation2 + $0x260] sm:$0xff] }
 0x459   : > { %10630 = vst [vmem:[%s13495_s14 + $0x190] sm:$0xff] %v10451_v39   ;;  %v7388_v36 = vadd.f32 %v7221_v22, %v6219_v50  ;;  %v16761_v17 = vpop.f32.mrf.mxu1 }
 0x45a   : > { %v7486_v18 = vadd.f32 %v16405_v38, %v7354_v27 }
 0x45b   : > { %9366 = vmatmul.msk.bf16.gmra.mxu1 %vm18175_vm15, %v9783_v29  ;;  %v7520_v16 = vadd.f32 %v16405_v38, %v7388_v36 }
 0x45c   : > { %v7639_v8 = vadd.f32 %v16678_v42, %v7486_v18 }
 0x45d   : > { %v16779_v21 = vadd.f32 %v16656_v2, %v7520_v16 }
 0x45e   : > { %v7766_v51 = vadd.f32 %v7765_v54, %v7639_v8  ;;  %v7900_v33 = vmul.f32 %v7639_v8, %v7639_v8  ;;  %v16769_v26 = vpop.f32.mrf.mxu0 }
 0x45f   : > { %v7138_v46 = vpop.f32.mrf.mxu2  ;;  %9030 = vmatmul.msk.bf16.gmra.mxu0 %vm18177_vm3, %v9851_v47 }
 0x460   : > { %v8027_v35 = vadd.f32 %v8026_v15, %v7900_v33  ;;  %v7355_v30 = vadd.f32 %v7138_v46, %v6136_v58  ;;  %v7223_v19 = vpop.f32.mrf.mxu3 }
 0x461   : > { %v7389_v54 = vadd.f32 %v7223_v19, %v6221_v23  ;;  %v16781_v14 = vpop.f32.mrf.mxu1  ;;  %v6226_v19 = vadd.f32 %v16273_v62, %v14346_v3  ;;  %v6144_v3 = vadd.f32 %v16725_v60, %v16733_v40 }
 0x462   : > { %v7487_v20 = vadd.f32 %v16405_v38, %v7355_v30 }
 0x463   : > { %v7521_v63 = vadd.f32 %v16405_v38, %v7389_v54 }
 0x464   : > { %v7640_v28 = vadd.f32 %v16678_v42, %v7487_v20  ;;  %9708 = vmatmul.msk.bf16.gmra.mxu2 %vm18176_vm2, %v9917_v57  ;;  %v9784_v57 = vld [vmem:[#allocation2 + $0x170] sm:$0xff] }
 0x465   : > { %v16784_v22 = vadd.f32 %v16656_v2, %v7521_v63  ;;  %9725 = vmatmul.msk.bf16.gmra.mxu3 %vm18178_vm4, %v9934_v1  ;;  %v9918_v1 = vld [vmem:[#allocation2 + $0x1e0] sm:$0xff] }
 0x466   : > { %v7767_v15 = vadd.f32 %v7766_v51, %v7640_v28  ;;  %v7901_v27 = vmul.f32 %v7640_v28, %v7640_v28  ;;  %v10371_v39 = vpack.c.bf16 %v7640_v28, %v7639_v8  ;;  %v16790_v33 = vpop.f32.mrf.mxu0  ;;  %v6224_v8 = vadd.f32 %v16221_v55, %v14292_v52 }
 0x467   : > { %v7141_v9 = vpop.f32.mrf.mxu2  ;;  %v10456_v50 = vpack.c.bf16 %v16784_v22, %v16779_v21 }
 0x468   : > { %v8028_v11 = vadd.f32 %v8027_v35, %v7901_v27  ;;  %10614 = vst [vmem:[%s13495_s14 + $0x110] sm:$0xff] %v10371_v39   ;;  %v7356_v18 = vadd.f32 %v7141_v9, %v6139_v4  ;;  %v7226_v36 = vpop.f32.mrf.mxu3  ;;  %v6141_v35 = vadd.f32 %v16709_v32, %v16718_v37  ;;  %v9935_v37 = vld [vmem:[#allocation2 + $0x268] sm:$0xff]  ;;  %v9852_v4 = vld [vmem:[#allocation2 + $0x1b0] sm:$0xff] }
 0x469   : > { %10631 = vst [vmem:[%s13495_s14 + $0x198] sm:$0xff] %v10456_v50   ;;  %v7390_v29 = vadd.f32 %v7226_v36, %v6224_v8  ;;  %v16799_v30 = vpop.f32.mrf.mxu1 }
 0x46a   : > { %v7488_v58 = vadd.f32 %v16405_v38, %v7356_v18 }
 0x46b   : > { %9367 = vmatmul.msk.bf16.gmra.mxu1 %vm18123_vm0, %v9784_v57  ;;  %v7522_v52 = vadd.f32 %v16405_v38, %v7390_v29 }
 0x46c   : > { %v7641_v51 = vadd.f32 %v16678_v42, %v7488_v58 }
 0x46e   : > { %v7768_v46 = vadd.f32 %v7767_v15, %v7641_v51  ;;  %v7902_v23 = vmul.f32 %v7641_v51, %v7641_v51  ;;  %v16805_v47 = vpop.f32.mrf.mxu0  ;;  %v16815_v15 = vadd.f32 %v16656_v2, %v7522_v52 }
 0x46f   : > { %v7143_v16 = vpop.f32.mrf.mxu2  ;;  %9031 = vmatmul.msk.bf16.gmra.mxu0 %vm18180_vm1, %v9852_v4  ;;  %v9853_v4 = vld [vmem:[#allocation2 + $0x1b8] sm:$0xff] }
 0x470   : > { %v8029_v20 = vadd.f32 %v8028_v11, %v7902_v23  ;;  %v7357_v54 = vadd.f32 %v7143_v16, %v6141_v35  ;;  %v7228_v55 = vpop.f32.mrf.mxu3  ;;  %v6146_v16 = vadd.f32 %v16745_v24, %v16754_v61 }
 0x471   : > { %v7391_v32 = vadd.f32 %v7228_v55, %v6226_v19  ;;  %v16824_v36 = vpop.f32.mrf.mxu1  ;;  %v9785_v19 = vld [vmem:[#allocation2 + $0x178] sm:$0xff] }
 0x472   : > { %v7489_v28 = vadd.f32 %v16405_v38, %v7357_v54  ;;  %v18182_v54 = vld [vmem:[#allocation33_spill] sm:$0xff] }
 0x473   : > { %v7523_v62 = vadd.f32 %v16405_v38, %v7391_v32 }
 0x474   : > { %v7642_v63 = vadd.f32 %v16678_v42, %v7489_v28  ;;  %9709 = vmatmul.msk.bf16.gmra.mxu2 %vm18179_vm5, %v9918_v1  ;;  %v6231_v1 = vadd.f32 %v18182_v54, %v14486_v25  ;;  %v6151_v54 = vadd.f32 %v16781_v14, %v16790_v33  ;;  %v6154_v14 = vadd.f32 %v16799_v30, %v16805_v47 }
 0x475   : > { %v16818_v11 = vadd.f32 %v16656_v2, %v7523_v62  ;;  %9726 = vmatmul.msk.bf16.gmra.mxu3 %vm18181_vm6, %v9935_v37  ;;  %v9936_v37 = vld [vmem:[#allocation2 + $0x270] sm:$0xff] }
 0x476   : > { %v7769_v27 = vadd.f32 %v7768_v46, %v7642_v63  ;;  %v7903_v39 = vmul.f32 %v7642_v63, %v7642_v63  ;;  %v10376_v9 = vpack.c.bf16 %v7642_v63, %v7641_v51  ;;  %v16826_v8 = vpop.f32.mrf.mxu0  ;;  %v6229_v51 = vadd.f32 %v16296_v13, %v14418_v12  ;;  %v16841_v12 = vld [vmem:[%s17617_s4] ss:$0 sm:$0xff] }
 0x477   : > { %v7146_v18 = vpop.f32.mrf.mxu2  ;;  %v10461_v50 = vpack.c.bf16 %v16818_v11, %v16815_v15 }
 0x478   : > { %v8030_v60 = vadd.f32 %v8029_v20, %v7903_v39  ;;  %10615 = vst [vmem:[%s13495_s14 + $0x118] sm:$0xff] %v10376_v9   ;;  %v7358_v40 = vadd.f32 %v7146_v18, %v6144_v3  ;;  %v7231_v58 = vpop.f32.mrf.mxu3  ;;  %v6149_v3 = vadd.f32 %v16761_v17, %v16769_v26 }
 0x479   : > { %10632 = vst [vmem:[%s13495_s14 + $0x1a0] sm:$0xff] %v10461_v50   ;;  %v7392_v23 = vadd.f32 %v7231_v58, %v6229_v51  ;;  %v16847_v25 = vpop.f32.mrf.mxu1 }
 0x47a   : > { %v7490_v29 = vadd.f32 %v16405_v38, %v7358_v40  ;;  %v9919_v38 = vld [vmem:[#allocation2 + $0x1e8] sm:$0xff] }
 0x47b   : > { %9368 = vmatmul.msk.bf16.gmra.mxu1 %vm18183_vm7, %v9785_v19  ;;  %v7524_v13 = vadd.f32 %v16841_v12, %v7392_v23  ;;  %v18187_v23 = vld [vmem:[#allocation13_spill] sm:$0xff] }
 0x47c   : > { %v7643_v46 = vadd.f32 %v16678_v42, %v7490_v29 }
 0x47e   : > { %v7770_v35 = vadd.f32 %v7769_v27, %v7643_v46  ;;  %v7904_v57 = vmul.f32 %v7643_v46, %v7643_v46  ;;  %v16844_v32 = vpop.f32.mrf.mxu0  ;;  %v16856_v27 = vadd.f32 %v16656_v2, %v7524_v13 }
 0x47f   : > { %v7148_v20 = vpop.f32.mrf.mxu2  ;;  %9032 = vmatmul.msk.bf16.gmra.mxu0 %vm18185_vm9, %v9853_v4  ;;  %v9937_v4 = vld [vmem:[#allocation2 + $0x278] sm:$0xff] }
 0x480   : > { %v8031_v52 = vadd.f32 %v8030_v60, %v7904_v57  ;;  %v7359_v55 = vadd.f32 %v7148_v20, %v6146_v16  ;;  %v7233_v28 = vpop.f32.mrf.mxu3 }
 0x481   : > { %v7393_v61 = vadd.f32 %v7233_v28, %v6231_v1  ;;  %v16872_v57 = vpop.f32.mrf.mxu1  ;;  %v9920_v28 = vld [vmem:[#allocation2 + $0x1f0] sm:$0xff] }
 0x482   : > { %v7491_v24 = vadd.f32 %v16841_v12, %v7359_v55 }
 0x483   : > { %v7525_v62 = vadd.f32 %v16841_v12, %v7393_v61 }
 0x484   : > { %v7644_v63 = vadd.f32 %v16678_v42, %v7491_v24  ;;  %9710 = vmatmul.msk.bf16.gmra.mxu2 %vm18184_vm8, %v9919_v38 }
 0x485   : > { %v16859_v60 = vadd.f32 %v16656_v2, %v7525_v62  ;;  %9727 = vmatmul.msk.bf16.gmra.mxu3 %vm18186_vm11, %v9936_v37 }
 0x486   : > { %v7771_v39 = vadd.f32 %v7770_v35, %v7644_v63  ;;  %v7905_v9 = vmul.f32 %v7644_v63, %v7644_v63  ;;  %v10381_v18 = vpack.c.bf16 %v7644_v63, %v7643_v46  ;;  %v16867_v51 = vpop.f32.mrf.mxu0  ;;  %v6234_v46 = vadd.f32 %v16386_v49, %v18187_v23 }
 0x487   : > { %v7151_v40 = vpop.f32.mrf.mxu2  ;;  %v10466_v50 = vpack.c.bf16 %v16859_v60, %v16856_v27 }
 0x488   : > { %v8032_v17 = vadd.f32 %v8031_v52, %v7905_v9  ;;  %10616 = vst [vmem:[%s13495_s14 + $0x120] sm:$0xff] %v10381_v18   ;;  %v7360_v26 = vadd.f32 %v7151_v40, %v6149_v3  ;;  %v7236_v58 = vpop.f32.mrf.mxu3  ;;  %v18188_v52 = vld [vmem:[#allocation14_spill] sm:$0xff] }
 0x489   : > { %10633 = vst [vmem:[%s13495_s14 + $0x1a8] sm:$0xff] %v10466_v50   ;;  %v7394_v16 = vadd.f32 %v7236_v58, %v6234_v46  ;;  %v6236_v55 = vadd.f32 %v16397_v0, %v18188_v52  ;;  %v16894_v40 = vpop.f32.mrf.mxu1  ;;  %v18192_v52 = vld [vmem:[#allocation16_spill] sm:$0xff] }
 0x48a   : > { %v7492_v29 = vadd.f32 %v16841_v12, %v7360_v26 }
 0x48b   : > { %v7526_v24 = vadd.f32 %v16841_v12, %v7394_v16 }
 0x48c   : > { %v7645_v35 = vadd.f32 %v16678_v42, %v7492_v29  ;;  %v18191_v29 = vld [vmem:[#allocation15_spill] sm:$0xff] }
 0x48d   : > { %v16888_v3 = vadd.f32 %v16656_v2, %v7526_v24  ;;  %v6239_v23 = vadd.f32 %v16416_v59, %v18191_v29 }
 0x48e   : > { %v7772_v19 = vadd.f32 %v7771_v39, %v7645_v35  ;;  %v7906_v20 = vmul.f32 %v7645_v35, %v7645_v35  ;;  %v16885_v33 = vpop.f32.mrf.mxu0 }
 0x48f   : > { %v7153_v1 = vpop.f32.mrf.mxu2 }
 0x490   : > { %v8033_v38 = vadd.f32 %v8032_v17, %v7906_v20  ;;  %v7361_v13 = vadd.f32 %v7153_v1, %v6151_v54  ;;  %v7238_v49 = vpop.f32.mrf.mxu3  ;;  %v6156_v20 = vadd.f32 %v16824_v36, %v16826_v8  ;;  %v6159_v8 = vadd.f32 %v16847_v25, %v16844_v32 }
 0x491   : > { %v7395_v37 = vadd.f32 %v7238_v49, %v6236_v55  ;;  %v6241_v55 = vadd.f32 %v16427_v56, %v18192_v52  ;;  %v16910_v24 = vpop.f32.mrf.mxu1 }
 0x492   : > { %v7493_v61 = vadd.f32 %v16841_v12, %v7361_v13 }
 0x493   : > { %v7527_v0 = vadd.f32 %v16841_v12, %v7395_v37 }
 0x494   : > { %v7646_v63 = vadd.f32 %v16678_v42, %v7493_v61  ;;  %9711 = vmatmul.msk.bf16.gmra.mxu2 %vm18189_vm12, %v9920_v28  ;;  %v9921_v28 = vld [vmem:[#allocation2 + $0x1f8] sm:$0xff] }
 0x495   : > { %v16891_v18 = vadd.f32 %v16656_v2, %v7527_v0  ;;  %9728 = vmatmul.msk.bf16.gmra.mxu3 %vm18190_vm10, %v9937_v4 }
 0x496   : > { %v7773_v62 = vadd.f32 %v7772_v19, %v7646_v63  ;;  %v7907_v39 = vmul.f32 %v7646_v63, %v7646_v63  ;;  %v10386_v9 = vpack.c.bf16 %v7646_v63, %v7645_v35  ;;  %v16906_v54 = vpop.f32.mrf.mxu0 }
 0x497   : > { %v7156_v30 = vpop.f32.mrf.mxu2  ;;  %v10471_v26 = vpack.c.bf16 %v16891_v18, %v16888_v3 }
 0x498   : > { %v8034_v47 = vadd.f32 %v8033_v38, %v7907_v39  ;;  %10617 = vst [vmem:[%s13495_s14 + $0x128] sm:$0xff] %v10386_v9   ;;  %v7362_v17 = vadd.f32 %v7156_v30, %v6154_v14  ;;  %v7241_v50 = vpop.f32.mrf.mxu3 }
 0x499   : > { %10634 = vst [vmem:[%s13495_s14 + $0x1b0] sm:$0xff] %v10471_v26   ;;  %v7396_v35 = vadd.f32 %v7241_v50, %v6239_v23  ;;  %v6168_v26 = vpop.f32.mrf.mxu1  ;;  %v18194_v50 = vld [vmem:[#allocation17_spill] sm:$0xff] }
 0x49a   : > { %v7494_v58 = vadd.f32 %v16841_v12, %v7362_v17  ;;  %v11284_v23 = vld [vmem:[%s13370_s21] sm:$0xff]  ;;  %s8575_s21 = sshll.u32 %s11666_s10, 1 }
 0x49b   : > { %v7528_v59 = vadd.f32 %v16841_v12, %v7396_v35  ;;  %s17250_s13 = scalar_lea.vmem [#allocation6], %s8575_s21 }
 0x49c   : > { %v7647_v46 = vadd.f32 %v16678_v42, %v7494_v58  ;;  %v6244_v58 = vadd.f32 %v16439_v43, %v18194_v50 }
 0x49d   : > { %v16920_v4 = vadd.f32 %v16656_v2, %v7528_v59 }
 0x49e   : > { %v7774_v16 = vadd.f32 %v7773_v62, %v7647_v46  ;;  %v7908_v19 = vmul.f32 %v7647_v46, %v7647_v46  ;;  %v5303_v25 = vpop.f32.mrf.mxu0 }
 0x49f   : > { %v7158_v1 = vpop.f32.mrf.mxu2 }
 0x4a0   : > { %v8035_v38 = vadd.f32 %v8034_v47, %v7908_v19  ;;  %v7363_v13 = vadd.f32 %v7158_v1, %v6156_v20  ;;  %v7243_v49 = vpop.f32.mrf.mxu3  ;;  %v6161_v19 = vadd.f32 %v16872_v57, %v16867_v51  ;;  %v18195_v1 = vld [vmem:[#allocation18_spill] sm:$0xff]  ;;  %v6164_v51 = vadd.f32 %v16894_v40, %v16885_v33 }
 0x4a1   : > { %v7397_v37 = vadd.f32 %v7243_v49, %v6241_v55  ;;  %v6246_v52 = vadd.f32 %v16448_v34, %v18195_v1  ;;  %v7552_v57 = vrot.slane %v11284_v23, 5 }
 0x4a2   : > { %v7495_v61 = vadd.f32 %v16841_v12, %v7363_v13 }
 0x4a3   : > { %v7529_v56 = vadd.f32 %v16841_v12, %v7397_v37 }
 0x4a4   : > { %v7648_v36 = vadd.f32 %v16678_v42, %v7495_v61  ;;  %9712 = vmatmul.msk.bf16.gmra.mxu2 %vm18193_vm13, %v9921_v28 }
 0x4a5   : > { %v16923_v62 = vadd.f32 %v16656_v2, %v7529_v56 }
 0x4a6   : > { %v7775_v63 = vadd.f32 %v7774_v16, %v7648_v36  ;;  %v7909_v14 = vmul.f32 %v7648_v36, %v7648_v36  ;;  %v10391_v0 = vpack.c.bf16 %v7648_v36, %v7647_v46  ;;  %v7554_v46 = vrot.slane %v11284_v23, 7  ;;  %v5305_v61 = vpop.f32.mrf.mxu0  ;;  %v6170_v36 = vpop.f32.mrf.mxu1 }
 0x4a7   : > { %v7161_v39 = vpop.f32.mrf.mxu2  ;;  %v10476_v32 = vpack.c.bf16 %v16923_v62, %v16920_v4 }
 0x4a8   : > { %v8036_v9 = vadd.f32 %v8035_v38, %v7909_v14  ;;  %10618 = vst [vmem:[%s13495_s14 + $0x130] sm:$0xff] %v10391_v0   ;;  %v7364_v30 = vadd.f32 %v7161_v39, %v6159_v8  ;;  %v7246_v47 = vpop.f32.mrf.mxu3  ;;  %v16939_v28 = vperm.slane %v7554_v46, 0  ;;  %v6166_v46 = vadd.f32 %v16910_v24, %v16906_v54 }
 0x4a9   : > { %10635 = vst [vmem:[%s13495_s14 + $0x1b8] sm:$0xff] %v10476_v32   ;;  %v7398_v2 = vadd.f32 %v7246_v47, %v6244_v58  ;;  %v18196_v47 = vld [vmem:[#allocation19_spill] sm:$0xff] }
 0x4aa   : > { %v7496_v17 = vadd.f32 %v16841_v12, %v7364_v30  ;;  %v16953_v30 = vperm.slane %v7552_v57, 0 }
 0x4ab   : > { %v7530_v13 = vadd.f32 %v16841_v12, %v7398_v2 }
 0x4ac   : > { %v7649_v29 = vadd.f32 %v16678_v42, %v7496_v17  ;;  %v6249_v17 = vadd.f32 %v16466_v41, %v18196_v47 }
 0x4ad   : > { %v16947_v8 = vadd.f32 %v16939_v28, %v7530_v13 }
 0x4ae   : > { %v7776_v35 = vadd.f32 %v7775_v63, %v7649_v29  ;;  %v7910_v16 = vmul.f32 %v7649_v29, %v7649_v29  ;;  %v5308_v58 = vpop.f32.mrf.mxu0 }
 0x4af   : > { %v7163_v20 = vpop.f32.mrf.mxu2 }
 0x4b0   : > { %v8037_v55 = vadd.f32 %v8036_v9, %v7910_v16  ;;  %v7365_v38 = vadd.f32 %v7163_v20, %v6161_v19  ;;  %v7248_v43 = vpop.f32.mrf.mxu3  ;;  %v18197_v19 = vld [vmem:[#allocation20_spill] sm:$0xff] }
 0x4b1   : > { %v7399_v49 = vadd.f32 %v7248_v43, %v6246_v52  ;;  %v6251_v20 = vadd.f32 %v16477_v6, %v18197_v19 }
 0x4b2   : > { %v7497_v59 = vadd.f32 %v16841_v12, %v7365_v38 }
 0x4b3   : > { %v7531_v34 = vadd.f32 %v16841_v12, %v7399_v49 }
 0x4b4   : > { %v7650_v37 = vadd.f32 %v16678_v42, %v7497_v59  ;;  %v6169_v59 = vadd.f32 %v6168_v26, %v5303_v25 }
 0x4b5   : > { %v16950_v0 = vadd.f32 %v16939_v28, %v7531_v34 }
 0x4b6   : > { %v7777_v56 = vadd.f32 %v7776_v35, %v7650_v37  ;;  %v7911_v63 = vmul.f32 %v7650_v37, %v7650_v37  ;;  %v10396_v14 = vpack.c.bf16 %v7650_v37, %v7649_v29  ;;  %v6173_v35 = vpop.f32.mrf.mxu1  ;;  %v5310_v57 = vpop.f32.mrf.mxu0 }
 0x4b7   : > { %v7166_v39 = vpop.f32.mrf.mxu2  ;;  %v10481_v33 = vpack.c.bf16 %v16950_v0, %v16947_v8 }
 0x4b8   : > { %v8038_v9 = vadd.f32 %v8037_v55, %v7911_v63  ;;  %10619 = vst [vmem:[%s13495_s14 + $0x138] sm:$0xff] %v10396_v14   ;;  %v7366_v42 = vadd.f32 %v7166_v39, %v6164_v51  ;;  %v7251_v40 = vpop.f32.mrf.mxu3 }
 0x4b9   : > { %10636 = vst [vmem:[%s13495_s14 + $0x1c0] sm:$0xff] %v10481_v33   ;;  %v7400_v29 = vadd.f32 %v7251_v40, %v6249_v17  ;;  %v6171_v17 = vadd.f32 %v6170_v36, %v5305_v61 }
 0x4ba   : > { %v7498_v32 = vadd.f32 %v16841_v12, %v7366_v42 }
 0x4bb   : > { %v7532_v55 = vadd.f32 %v16841_v12, %v7400_v29  ;;  %v18199_v29 = vld [vmem:[#allocation22_spill] sm:$0xff] }
 0x4bc   : > { %v7651_v50 = vadd.f32 %v16953_v30, %v7498_v32 }
 0x4bd   : > { %v16971_v24 = vadd.f32 %v16939_v28, %v7532_v55 }
 0x4be   : > { %v7778_v2 = vadd.f32 %v7777_v56, %v7651_v50  ;;  %v7912_v23 = vmul.f32 %v7651_v50, %v7651_v50  ;;  %v6175_v26 = vpop.f32.mrf.mxu1 }
 0x4bf   : > { %v7168_v16 = vpop.f32.mrf.mxu2 }
 0x4c0   : > { %v8039_v1 = vadd.f32 %v8038_v9, %v7912_v23  ;;  %v7367_v52 = vadd.f32 %v7168_v16, %v6166_v46  ;;  %v7253_v41 = vpop.f32.mrf.mxu3  ;;  %v18198_v9 = vld [vmem:[#allocation21_spill] sm:$0xff]  ;;  %v5313_v16 = vpop.f32.mrf.mxu0 }
 0x4c1   : > { %v7401_v13 = vadd.f32 %v7253_v41, %v6251_v20  ;;  %v6254_v42 = vadd.f32 %v16491_v5, %v18198_v9 }
 0x4c2   : > { %v7499_v38 = vadd.f32 %v16841_v12, %v7367_v52 }
 0x4c3   : > { %v7533_v54 = vadd.f32 %v16841_v12, %v7401_v13 }
 0x4c4   : > { %v7652_v43 = vadd.f32 %v16953_v30, %v7499_v38 }
 0x4c5   : > { %v16974_v51 = vadd.f32 %v16939_v28, %v7533_v54  ;;  %v6174_v54 = vadd.f32 %v6173_v35, %v5308_v58 }
 0x4c6   : > { %v7779_v49 = vadd.f32 %v7778_v2, %v7652_v43  ;;  %v7913_v6 = vmul.f32 %v7652_v43, %v7652_v43  ;;  %v10401_v37 = vpack.c.bf16 %v7652_v43, %v7651_v50  ;;  %v6256_v2 = vadd.f32 %v16502_v10, %v18199_v29  ;;  %v6178_v5 = vpop.f32.mrf.mxu1 }
 0x4c7   : > { %v7171_v34 = vpop.f32.mrf.mxu2  ;;  %v10486_v25 = vpack.c.bf16 %v16974_v51, %v16971_v24 }
 0x4c8   : > { %v8040_v56 = vadd.f32 %v8039_v1, %v7913_v6  ;;  %10620 = vst [vmem:[%s13495_s14 + $0x140] sm:$0xff] %v10401_v37   ;;  %v7368_v63 = vadd.f32 %v7171_v34, %v6169_v59  ;;  %v7256_v14 = vpop.f32.mrf.mxu3  ;;  %v5315_v37 = vpop.f32.mrf.mxu0  ;;  %v18200_v34 = vld [vmem:[#allocation23_spill] sm:$0xff] }
 0x4c9   : > { %10637 = vst [vmem:[%s13495_s14 + $0x1c8] sm:$0xff] %v10486_v25   ;;  %v7402_v40 = vadd.f32 %v7256_v14, %v6254_v42 }
 0x4ca   : > { %v7500_v39 = vadd.f32 %v16841_v12, %v7368_v63 }
 0x4cb   : > { %v7534_v19 = vadd.f32 %v16841_v12, %v7402_v40  ;;  %v18203_v40 = vld [vmem:[#allocation35_spill] sm:$0xff] }
 0x4cc   : > { %v7653_v33 = vadd.f32 %v16953_v30, %v7500_v39  ;;  %v6176_v39 = vadd.f32 %v6175_v26, %v5310_v57 }
 0x4cd   : > { %v16991_v36 = vadd.f32 %v16939_v28, %v7534_v19 }
 0x4ce   : > { %v7780_v32 = vadd.f32 %v7779_v49, %v7653_v33  ;;  %v7914_v47 = vmul.f32 %v7653_v33, %v7653_v33  ;;  %v6180_v14 = vpop.f32.mrf.mxu1 }
 0x4cf   : > { %v7173_v50 = vpop.f32.mrf.mxu2 }
 0x4d0   : > { %v8041_v23 = vadd.f32 %v8040_v56, %v7914_v47  ;;  %v7369_v46 = vadd.f32 %v7173_v50, %v6171_v17  ;;  %v7258_v20 = vpop.f32.mrf.mxu3  ;;  %v18201_v56 = vld [vmem:[#allocation34_spill] sm:$0xff] }
 0x4d1   : > { %v7403_v52 = vadd.f32 %v7258_v20, %v6256_v2  ;;  %v6259_v63 = vadd.f32 %v18201_v56, %v18200_v34 }
 0x4d2   : > { %v7501_v1 = vadd.f32 %v16841_v12, %v7369_v46 }
 0x4d3   : > { %v7535_v61 = vadd.f32 %v16841_v12, %v7403_v52 }
 0x4d4   : > { %v7654_v55 = vadd.f32 %v16953_v30, %v7501_v1 }
 0x4d5   : > { %v16996_v13 = vadd.f32 %v16939_v28, %v7535_v61 }
 0x4d6   : > { %v16993_v10 = vadd.f32 %v7780_v32, %v7654_v55  ;;  %v7915_v41 = vmul.f32 %v7654_v55, %v7654_v55  ;;  %v10406_v38 = vpack.c.bf16 %v7654_v55, %v7653_v33  ;;  %v18202_v33 = vld [vmem:[#allocation24_spill] sm:$0xff]  ;;  %v6183_v20 = vpop.f32.mrf.mxu1  ;;  %v6179_v55 = vadd.f32 %v6178_v5, %v5313_v16 }
 0x4d7   : > { %v7176_v43 = vpop.f32.mrf.mxu2  ;;  %v10491_v49 = vpack.c.bf16 %v16996_v13, %v16991_v36  ;;  %v6261_v32 = vadd.f32 %v18203_v40, %v18202_v33 }
 0x4d8   : > { %v16998_v59 = vadd.f32 %v8041_v23, %v7915_v41  ;;  %10621 = vst [vmem:[%s13495_s14 + $0x148] sm:$0xff] %v10406_v38   ;;  %v7261_v6 = vpop.f32.mrf.mxu3  ;;  %v7370_v25 = vadd.f32 %v7176_v43, %v6174_v54  ;;  %v5318_v23 = vpop.f32.mrf.mxu0  ;;  %v18204_v38 = vld [vmem:[#allocation25_spill] sm:$0xff]  ;;  %v18205_v43 = vld [vmem:[#allocation36_spill] sm:$0xff] }
 0x4d9   : > { %10638 = vst [vmem:[%s13495_s14 + $0x1d0] sm:$0xff] %v10491_v49   ;;  %v7404_v9 = vadd.f32 %v7261_v6, %v6259_v63  ;;  %v6264_v54 = vadd.f32 %v18205_v43, %v18204_v38  ;;  %v6181_v6 = vadd.f32 %v6180_v14, %v5315_v37  ;;  %v18209_v38 = vld [vmem:[#allocation38_spill] sm:$0xff] }
 0x4da   : > { %v7502_v58 = vadd.f32 %v16841_v12, %v7370_v25  ;;  %v18206_v25 = vld [vmem:[#allocation26_spill] sm:$0xff] }
 0x4db   : > { %v7536_v50 = vadd.f32 %v16841_v12, %v7404_v9 }
 0x4dc   : > { %v17012_v2 = vadd.f32 %v16953_v30, %v7502_v58 }
 0x4dd   : > { %v17021_v19 = vadd.f32 %v16939_v28, %v7536_v50 }
 0x4de   : > { %v6185_v5 = vpop.f32.mrf.mxu1 }
 0x4df   : > { %v7178_v42 = vpop.f32.mrf.mxu2 }
 0x4e0   : > { %v7371_v35 = vadd.f32 %v7178_v42, %v6176_v39  ;;  %v7263_v47 = vpop.f32.mrf.mxu3  ;;  %v5320_v56 = vpop.f32.mrf.mxu0  ;;  %v18207_v39 = vld [vmem:[#allocation37_spill] sm:$0xff] }
 0x4e1   : > { %v7405_v29 = vadd.f32 %v7263_v47, %v6261_v32  ;;  %v6266_v9 = vadd.f32 %v18207_v39, %v18206_v25  ;;  %v18211_v25 = vld [vmem:[#allocation39_spill] sm:$0xff] }
 0x4e2   : > { %v7503_v17 = vadd.f32 %v16841_v12, %v7371_v35 }
 0x4e3   : > { %v7537_v26 = vadd.f32 %v16841_v12, %v7405_v29 }
 0x4e4   : > { %v17015_v57 = vadd.f32 %v16953_v30, %v7503_v17 }
 0x4e5   : > { %v17024_v1 = vadd.f32 %v16939_v28, %v7537_v26  ;;  %v6184_v26 = vadd.f32 %v6183_v20, %v5318_v23 }
 0x4e6   : > { %v10411_v46 = vpack.c.bf16 %v17015_v57, %v17012_v2 }
 0x4e7   : > { %v7181_v52 = vpop.f32.mrf.mxu2  ;;  %v10496_v61 = vpack.c.bf16 %v17024_v1, %v17021_v19 }
 0x4e8   : > { %10622 = vst [vmem:[%s13495_s14 + $0x150] sm:$0xff] %v10411_v46   ;;  %v7266_v41 = vpop.f32.mrf.mxu3  ;;  %v7372_v49 = vadd.f32 %v7181_v52, %v6179_v55  ;;  %v5323_v52 = vpop.f32.mrf.mxu0 }
 0x4e9   : > { %10639 = vst [vmem:[%s13495_s14 + $0x1d8] sm:$0xff] %v10496_v61   ;;  %v7406_v34 = vadd.f32 %v7266_v41, %v6264_v54  ;;  %v6188_v61 = vpop.f32.mrf.mxu1  ;;  %v18208_v41 = vld [vmem:[#allocation27_spill] sm:$0xff] }
 0x4ea   : > { %v7504_v42 = vadd.f32 %v16841_v12, %v7372_v49  ;;  %v6269_v43 = vadd.f32 %v18209_v38, %v18208_v41  ;;  %v6186_v49 = vadd.f32 %v6185_v5, %v5320_v56  ;;  %v18212_v38 = vld [vmem:[#allocation29_spill] sm:$0xff] }
 0x4eb   : > { %v7538_v32 = vadd.f32 %v16841_v12, %v7406_v34 }
 0x4ec   : > { %v17038_v37 = vadd.f32 %v16953_v30, %v7504_v42 }
 0x4ed   : > { %v17047_v17 = vadd.f32 %v16939_v28, %v7538_v32 }
 0x4ef   : > { %v7183_v63 = vpop.f32.mrf.mxu2 }
 0x4f0   : > { %v7373_v16 = vadd.f32 %v7183_v63, %v6181_v6  ;;  %v7268_v33 = vpop.f32.mrf.mxu3  ;;  %v18210_v63 = vld [vmem:[#allocation28_spill] sm:$0xff] }
 0x4f1   : > { %v7407_v58 = vadd.f32 %v7268_v33, %v6266_v9  ;;  %v6271_v39 = vadd.f32 %v18211_v25, %v18210_v63  ;;  %v5325_v33 = vpop.f32.mrf.mxu0  ;;  %v6190_v5 = vpop.f32.mrf.mxu1 }
 0x4f2   : > { %v7505_v40 = vadd.f32 %v16841_v12, %v7373_v16 }
 0x4f3   : > { %v7539_v35 = vadd.f32 %v16841_v12, %v7407_v58 }
 0x4f4   : > { %v17041_v14 = vadd.f32 %v16953_v30, %v7505_v40 }
 0x4f5   : > { %v17050_v50 = vadd.f32 %v16939_v28, %v7539_v35 }
 0x4f6   : > { %v10416_v47 = vpack.c.bf16 %v17041_v14, %v17038_v37 }
 0x4f7   : > { %v7186_v29 = vpop.f32.mrf.mxu2  ;;  %v10501_v46 = vpack.c.bf16 %v17050_v50, %v17047_v17 }
 0x4f8   : > { %10623 = vst [vmem:[%s13495_s14 + $0x158] sm:$0xff] %v10416_v47   ;;  %v7271_v55 = vpop.f32.mrf.mxu3  ;;  %v7374_v54 = vadd.f32 %v7186_v29, %v6184_v26 }
 0x4f9   : > { %10640 = vst [vmem:[%s13495_s14 + $0x1e0] sm:$0xff] %v10501_v46   ;;  %v7408_v6 = vadd.f32 %v7271_v55, %v6269_v43  ;;  %v6189_v46 = vadd.f32 %v6188_v61, %v5323_v52  ;;  %v18213_v43 = vld [vmem:[#allocation40_spill] sm:$0xff]  ;;  %v6193_v63 = vpop.f32.mrf.mxu1 }
 0x4fa   : > { %v7506_v23 = vadd.f32 %v16841_v12, %v7374_v54  ;;  %v6274_v54 = vadd.f32 %v18213_v43, %v18212_v38 }
 0x4fb   : > { %v7540_v16 = vadd.f32 %v16841_v12, %v7408_v6  ;;  %v5328_v6 = vpop.f32.mrf.mxu0 }
 0x4fc   : > { %v17064_v32 = vadd.f32 %v16953_v30, %v7506_v23  ;;  %v18214_v23 = vld [vmem:[#allocation30_spill] sm:$0xff]  ;;  %v6194_v43 = vadd.f32 %v6193_v63, %v5328_v6  ;;  %v7917_v6 = vmul.f32 %v17015_v57, %v17015_v57 }
 0x4fd   : > { %v17073_v47 = vadd.f32 %v16939_v28, %v7540_v16 }
 0x4ff   : > { %v7188_v34 = vpop.f32.mrf.mxu2 }
 0x500   : > { %v7375_v20 = vadd.f32 %v7188_v34, %v6186_v49  ;;  %v7273_v9 = vpop.f32.mrf.mxu3  ;;  %v6191_v34 = vadd.f32 %v6190_v5, %v5325_v33 }
 0x501   : > { %v7409_v40 = vadd.f32 %v7273_v9, %v6271_v39 }
 0x502   : > { %v7507_v42 = vadd.f32 %v16841_v12, %v7375_v20  ;;  %v18215_v20 = vld [vmem:[#allocation41_spill] sm:$0xff] }
 0x503   : > { %v7541_v58 = vadd.f32 %v16841_v12, %v7409_v40  ;;  %v6276_v9 = vadd.f32 %v18215_v20, %v18214_v23 }
 0x504   : > { %v17067_v56 = vadd.f32 %v16953_v30, %v7507_v42 }
 0x505   : > { %v17076_v29 = vadd.f32 %v16939_v28, %v7541_v58 }
 0x506   : > { %v10421_v35 = vpack.c.bf16 %v17067_v56, %v17064_v32 }
 0x507   : > { %v7191_v26 = vpop.f32.mrf.mxu2  ;;  %v10506_v55 = vpack.c.bf16 %v17076_v29, %v17073_v47 }
 0x508   : > { %10624 = vst [vmem:[%s13495_s14 + $0x160] sm:$0xff] %v10421_v35   ;;  %v7276_v41 = vpop.f32.mrf.mxu3  ;;  %v7376_v49 = vadd.f32 %v7191_v26, %v6189_v46 }
 0x509   : > { %10641 = vst [vmem:[%s13495_s14 + $0x1e8] sm:$0xff] %v10506_v55   ;;  %v7410_v25 = vadd.f32 %v7276_v41, %v6274_v54  ;;  %v5330_v55 = vpop.f32.mrf.mxu0  ;;  %v6195_v54 = vpop.f32.mrf.mxu1 }
 0x50a   : > { %v7508_v52 = vadd.f32 %v16841_v12, %v7376_v49 }
 0x50b   : > { %v7542_v40 = vadd.f32 %v16841_v12, %v7410_v25  ;;  %v18216_v25 = vld [vmem:[#allocation31_spill] sm:$0xff] }
 0x50c   : > { %v7661_v35 = vadd.f32 %v16953_v30, %v7508_v52  ;;  %v6196_v52 = vadd.f32 %v6195_v54, %v5330_v55  ;;  %v7918_v55 = vmul.f32 %v17038_v37, %v17038_v37 }
 0x50d   : > { %v17096_v46 = vadd.f32 %v16939_v28, %v7542_v40  ;;  %v18219_v40 = vld [vmem:[#allocation43_spill] sm:$0xff] }
 0x50f   : > { %v7193_v39 = vpop.f32.mrf.mxu2 }
 0x510   : > { %v7377_v61 = vadd.f32 %v7193_v39, %v6191_v34  ;;  %v7278_v42 = vpop.f32.mrf.mxu3  ;;  %v18217_v39 = vld [vmem:[#allocation42_spill] sm:$0xff] }
 0x511   : > { %v7411_v58 = vadd.f32 %v7278_v42, %v6276_v9  ;;  %v6279_v23 = vadd.f32 %v18217_v39, %v18216_v25  ;;  %v7916_v9 = vmul.f32 %v17012_v2, %v17012_v2  ;;  %v7782_v42 = vadd.f32 %v16993_v10, %v17012_v2  ;;  %v6198_v10 = vpop.f32.mrf.mxu1 }
 0x512   : > { %v7509_v16 = vadd.f32 %v16841_v12, %v7377_v61 }
 0x513   : > { %v7543_v5 = vadd.f32 %v16841_v12, %v7411_v58 }
 0x514   : > { %v17091_v33 = vadd.f32 %v16953_v30, %v7509_v16  ;;  %v18218_v16 = vld [vmem:[#allocation32_spill] sm:$0xff] }
 0x515   : > { %v17099_v41 = vadd.f32 %v16939_v28, %v7543_v5  ;;  %v6281_v58 = vadd.f32 %v18219_v40, %v18218_v16 }
 0x516   : > { %v10426_v26 = vpack.c.bf16 %v17091_v33, %v7661_v35 }
 0x517   : > { %v7196_v38 = vpop.f32.mrf.mxu2  ;;  %v10511_v49 = vpack.c.bf16 %v17099_v41, %v17096_v46 }
 0x518   : > { %10625 = vst [vmem:[%s13495_s14 + $0x168] sm:$0xff] %v10426_v26   ;;  %v7281_v34 = vpop.f32.mrf.mxu3  ;;  %v7378_v20 = vadd.f32 %v7196_v38, %v6194_v43  ;;  %v8043_v38 = vadd.f32 %v16998_v59, %v7916_v9  ;;  %v7783_v43 = vadd.f32 %v7782_v42, %v17015_v57 }
 0x519   : > { %10642 = vst [vmem:[%s13495_s14 + $0x1f0] sm:$0xff] %v10511_v49   ;;  %v7412_v61 = vadd.f32 %v7281_v34, %v6279_v23  ;;  %v5333_v49 = vpop.f32.mrf.mxu0 }
 0x51a   : > { %v7510_v5 = vadd.f32 %v16841_v12, %v7378_v20  ;;  %v8044_v39 = vadd.f32 %v8043_v38, %v7917_v6  ;;  %v7784_v23 = vadd.f32 %v7783_v43, %v17038_v37  ;;  %v7919_v20 = vmul.f32 %v17041_v14, %v17041_v14 }
 0x51b   : > { %v7544_v34 = vadd.f32 %v16841_v12, %v7412_v61  ;;  %v6199_v9 = vadd.f32 %v6198_v10, %v5333_v49  ;;  %v7920_v61 = vmul.f32 %v17064_v32, %v17064_v32 }
 0x51c   : > { %v7663_v59 = vadd.f32 %v16953_v30, %v7510_v5  ;;  %v8045_v42 = vadd.f32 %v8044_v39, %v7918_v55  ;;  %v7922_v55 = vmul.f32 %v7661_v35, %v7661_v35 }
 0x51d   : > { %v17132_v37 = vadd.f32 %v16939_v28, %v7544_v34  ;;  %v6200_v34 = vpop.f32.mrf.mxu1 }
 0x51e   : > { %v8046_v40 = vadd.f32 %v8045_v42, %v7919_v20  ;;  %v7924_v20 = vmul.f32 %v7663_v59, %v7663_v59 }
 0x51f   : > { %v7198_v63 = vpop.f32.mrf.mxu2 }
 0x520   : > { %v7379_v26 = vadd.f32 %v7198_v63, %v6196_v52  ;;  %v7283_v54 = vpop.f32.mrf.mxu3  ;;  %v7785_v63 = vadd.f32 %v7784_v23, %v17041_v14  ;;  %v8047_v38 = vadd.f32 %v8046_v40, %v7920_v61 }
 0x521   : > { %v7413_v25 = vadd.f32 %v7283_v54, %v6281_v58 }
 0x522   : > { %v7511_v2 = vadd.f32 %v16841_v12, %v7379_v26  ;;  %v7786_v5 = vadd.f32 %v7785_v63, %v17064_v32  ;;  %v7921_v26 = vmul.f32 %v17067_v56, %v17067_v56  ;;  %v7923_v32 = vmul.f32 %v17091_v33, %v17091_v33 }
 0x523   : > { %v7545_v52 = vadd.f32 %v16841_v12, %v7413_v25 }
 0x524   : > { %v7664_v57 = vadd.f32 %v16953_v30, %v7511_v2  ;;  %v7787_v43 = vadd.f32 %v7786_v5, %v17067_v56  ;;  %v8048_v10 = vadd.f32 %v8047_v38, %v7921_v26 }
 0x525   : > { %v17135_v16 = vadd.f32 %v16939_v28, %v7545_v52  ;;  %v5335_v28 = vpop.f32.mrf.mxu0 }
 0x526   : > { %v10431_v6 = vpack.c.bf16 %v7664_v57, %v7663_v59  ;;  %v7788_v2 = vadd.f32 %v7787_v43, %v7661_v35  ;;  %v6201_v25 = vadd.f32 %v6200_v34, %v5335_v28  ;;  %v8049_v39 = vadd.f32 %v8048_v10, %v7922_v55 }
 0x527   : > { %v7201_v58 = vpop.f32.mrf.mxu2  ;;  %v10516_v49 = vpack.c.bf16 %v17135_v16, %v17132_v37  ;;  %v7925_v63 = vmul.f32 %v7664_v57, %v7664_v57  ;;  %v7928_v55 = vmul.f32 %v16669_v53, %v16669_v53 }
 0x528   : > { %10626 = vst [vmem:[%s13495_s14 + $0x170] sm:$0xff] %v10431_v6   ;;  %v7380_v14 = vadd.f32 %v7201_v58, %v6199_v9  ;;  %v7789_v23 = vadd.f32 %v7788_v2, %v17091_v33  ;;  %v8050_v56 = vadd.f32 %v8049_v39, %v7923_v32  ;;  %v7931_v32 = vmul.f32 %v16712_v7, %v16712_v7 }
 0x529   : > { %10643 = vst [vmem:[%s13495_s14 + $0x1f8] sm:$0xff] %v10516_v49  }
 0x52a   : > { %v7512_v54 = vadd.f32 %v16841_v12, %v7380_v14  ;;  %v7790_v42 = vadd.f32 %v7789_v23, %v7663_v59  ;;  %v8051_v6 = vadd.f32 %v8050_v56, %v7924_v20 }
 0x52c   : > { %v7665_v9 = vadd.f32 %v16953_v30, %v7512_v54  ;;  %v7791_v40 = vadd.f32 %v7790_v42, %v7664_v57  ;;  %v8052_v5 = vadd.f32 %v8051_v6, %v7925_v63  ;;  %v7929_v57 = vmul.f32 %v16674_v48, %v16674_v48 }
 0x52e   : > { %v7926_v35 = vmul.f32 %v7665_v9, %v7665_v9  ;;  %v7792_v26 = vadd.f32 %v7791_v40, %v7665_v9 }
 0x52f   : > { %v7203_v52 = vpop.f32.mrf.mxu2 }
 0x530   : > { %v7381_v61 = vadd.f32 %v7203_v52, %v6201_v25  ;;  %v8053_v49 = vadd.f32 %v8052_v5, %v7926_v35  ;;  %v7932_v25 = vmul.f32 %v16743_v45, %v16743_v45 }
 0x532   : > { %v7513_v58 = vadd.f32 %v16841_v12, %v7381_v61 }
 0x534   : > { %v7666_v14 = vadd.f32 %v16953_v30, %v7513_v58  ;;  %v7930_v30 = vmul.f32 %v16707_v44, %v16707_v44 }
 0x536   : > { %v7793_v33 = vadd.f32 %v7792_v26, %v7666_v14  ;;  %v7927_v38 = vmul.f32 %v7666_v14, %v7666_v14  ;;  %v10436_v43 = vpack.c.bf16 %v7666_v14, %v7665_v9 }
 0x538   : > { %v7794_v59 = vadd.f32 %v7793_v33, %v16669_v53  ;;  %v8054_v54 = vadd.f32 %v8053_v49, %v7927_v38  ;;  %10627 = vst [vmem:[%s13495_s14 + $0x178] sm:$0xff] %v10436_v43  }
 0x53a   : > { %v7795_v12 = vadd.f32 %v7794_v59, %v16674_v48  ;;  %v8055_v28 = vadd.f32 %v8054_v54, %v7928_v55  ;;  %v7933_v48 = vmul.f32 %v16748_v31, %v16748_v31 }
 0x53c   : > { %v7796_v10 = vadd.f32 %v7795_v12, %v16707_v44  ;;  %v8056_v2 = vadd.f32 %v8055_v28, %v7929_v57  ;;  %v7934_v44 = vmul.f32 %v16779_v21, %v16779_v21 }
 0x53e   : > { %v7797_v34 = vadd.f32 %v7796_v10, %v16712_v7  ;;  %v8057_v53 = vadd.f32 %v8056_v2, %v7930_v30  ;;  %v7935_v7 = vmul.f32 %v16784_v22, %v16784_v22 }
 0x540   : > { %v7798_v39 = vadd.f32 %v7797_v34, %v16743_v45  ;;  %v8058_v23 = vadd.f32 %v8057_v53, %v7931_v32  ;;  %v7936_v45 = vmul.f32 %v16815_v15, %v16815_v15 }
 0x542   : > { %v7799_v20 = vadd.f32 %v7798_v39, %v16748_v31  ;;  %v8059_v9 = vadd.f32 %v8058_v23, %v7932_v25  ;;  %v7937_v31 = vmul.f32 %v16818_v11, %v16818_v11 }
 0x544   : > { %v7800_v52 = vadd.f32 %v7799_v20, %v16779_v21  ;;  %v8060_v56 = vadd.f32 %v8059_v9, %v7933_v48  ;;  %v7938_v21 = vmul.f32 %v16856_v27, %v16856_v27 }
 0x546   : > { %v7801_v42 = vadd.f32 %v7800_v52, %v16784_v22  ;;  %v8061_v63 = vadd.f32 %v8060_v56, %v7934_v44  ;;  %v7939_v22 = vmul.f32 %v16859_v60, %v16859_v60 }
 0x548   : > { %v7802_v61 = vadd.f32 %v7801_v42, %v16815_v15  ;;  %v8062_v6 = vadd.f32 %v8061_v63, %v7935_v7  ;;  %v7940_v15 = vmul.f32 %v16888_v3, %v16888_v3 }
 0x54a   : > { %v7803_v40 = vadd.f32 %v7802_v61, %v16818_v11  ;;  %v8063_v35 = vadd.f32 %v8062_v6, %v7936_v45  ;;  %v7941_v11 = vmul.f32 %v16891_v18, %v16891_v18 }
 0x54c   : > { %v7804_v58 = vadd.f32 %v7803_v40, %v16856_v27  ;;  %v8064_v5 = vadd.f32 %v8063_v35, %v7937_v31  ;;  %v7942_v27 = vmul.f32 %v16920_v4, %v16920_v4 }
 0x54e   : > { %v7805_v26 = vadd.f32 %v7804_v58, %v16859_v60  ;;  %v8065_v14 = vadd.f32 %v8064_v5, %v7938_v21  ;;  %v7943_v60 = vmul.f32 %v16923_v62, %v16923_v62 }
 0x550   : > { %v7806_v49 = vadd.f32 %v7805_v26, %v16888_v3  ;;  %v8066_v33 = vadd.f32 %v8065_v14, %v7939_v22  ;;  %v7944_v3 = vmul.f32 %v16947_v8, %v16947_v8  ;;  %v7959_v26 = vmul.f32 %v17135_v16, %v17135_v16 }
 0x552   : > { %v7807_v38 = vadd.f32 %v7806_v49, %v16891_v18  ;;  %v8067_v43 = vadd.f32 %v8066_v33, %v7940_v15  ;;  %v7945_v18 = vmul.f32 %v16950_v0, %v16950_v0 }
 0x554   : > { %v7808_v55 = vadd.f32 %v7807_v38, %v16920_v4  ;;  %v8068_v59 = vadd.f32 %v8067_v43, %v7941_v11  ;;  %v7946_v4 = vmul.f32 %v16971_v24, %v16971_v24 }
 0x556   : > { %v8069_v54 = vadd.f32 %v8068_v59, %v7942_v27  ;;  %v7809_v57 = vadd.f32 %v7808_v55, %v16923_v62  ;;  %v7947_v62 = vmul.f32 %v16974_v51, %v16974_v51 }
 0x558   : > { %v7810_v12 = vadd.f32 %v7809_v57, %v16947_v8  ;;  %v8070_v28 = vadd.f32 %v8069_v54, %v7943_v60  ;;  %v7948_v8 = vmul.f32 %v16991_v36, %v16991_v36 }
 0x55a   : > { %v7811_v30 = vadd.f32 %v7810_v12, %v16950_v0  ;;  %v8071_v10 = vadd.f32 %v8070_v28, %v7944_v3  ;;  %v7949_v0 = vmul.f32 %v16996_v13, %v16996_v13 }
 0x55c   : > { %v7812_v2 = vadd.f32 %v7811_v30, %v16971_v24  ;;  %v8072_v32 = vadd.f32 %v8071_v10, %v7945_v18  ;;  %v7950_v24 = vmul.f32 %v17021_v19, %v17021_v19 }
 0x55e   : > { %v7813_v34 = vadd.f32 %v7812_v2, %v16974_v51  ;;  %v8073_v53 = vadd.f32 %v8072_v32, %v7946_v4  ;;  %v7951_v51 = vmul.f32 %v17024_v1, %v17024_v1 }
 0x560   : > { %v7814_v25 = vadd.f32 %v7813_v34, %v16991_v36  ;;  %v8074_v39 = vadd.f32 %v8073_v53, %v7947_v62  ;;  %v7952_v36 = vmul.f32 %v17047_v17, %v17047_v17 }
 0x562   : > { %v7815_v23 = vadd.f32 %v7814_v25, %v16996_v13  ;;  %v8075_v48 = vadd.f32 %v8074_v39, %v7948_v8  ;;  %v7953_v13 = vmul.f32 %v17050_v50, %v17050_v50 }
 0x564   : > { %v7816_v20 = vadd.f32 %v7815_v23, %v17021_v19  ;;  %v8076_v9 = vadd.f32 %v8075_v48, %v7949_v0  ;;  %v7954_v19 = vmul.f32 %v17073_v47, %v17073_v47 }
 0x566   : > { %v7817_v44 = vadd.f32 %v7816_v20, %v17024_v1  ;;  %v8077_v52 = vadd.f32 %v8076_v9, %v7950_v24  ;;  %v7955_v1 = vmul.f32 %v17076_v29, %v17076_v29 }
 0x568   : > { %v7818_v56 = vadd.f32 %v7817_v44, %v17047_v17  ;;  %v8078_v7 = vadd.f32 %v8077_v52, %v7951_v51  ;;  %v7956_v17 = vmul.f32 %v17096_v46, %v17096_v46 }
 0x56a   : > { %v7819_v42 = vadd.f32 %v7818_v56, %v17050_v50  ;;  %v8079_v63 = vadd.f32 %v8078_v7, %v7952_v36  ;;  %v7957_v50 = vmul.f32 %v17099_v41, %v17099_v41 }
 0x56c   : > { %v7820_v45 = vadd.f32 %v7819_v42, %v17073_v47  ;;  %v8080_v61 = vadd.f32 %v8079_v63, %v7953_v13  ;;  %v7958_v47 = vmul.f32 %v17132_v37, %v17132_v37 }
 0x56e   : > { %v7821_v6 = vadd.f32 %v7820_v45, %v17076_v29  ;;  %v8081_v31 = vadd.f32 %v8080_v61, %v7954_v19 }
 0x570   : > { %v7822_v40 = vadd.f32 %v7821_v6, %v17096_v46  ;;  %v8082_v35 = vadd.f32 %v8081_v31, %v7955_v1 }
 0x572   : > { %v7823_v21 = vadd.f32 %v7822_v40, %v17099_v41  ;;  %v8083_v58 = vadd.f32 %v8082_v35, %v7956_v17 }
 0x574   : > { %v7824_v5 = vadd.f32 %v7823_v21, %v17132_v37  ;;  %v8084_v29 = vadd.f32 %v8083_v58, %v7957_v50 }
 0x576   : > { %v7825_v22 = vadd.f32 %v7824_v5, %v17135_v16  ;;  %v8085_v46 = vadd.f32 %v8084_v29, %v7958_v47 }
 0x578   : > { %v7826_v14 = vrot.slane %v7825_v22, 4  ;;  %v8086_v15 = vadd.f32 %v8085_v46, %v7959_v26 }
 0x57a   : > { %v7827_v49 = vadd.f32 %v7826_v14, %v7825_v22  ;;  %v8087_v33 = vrot.slane %v8086_v15, 4 }
 0x57c   : > { %v7828_v41 = vrot.slane %v7827_v49, 2  ;;  %v8088_v11 = vadd.f32 %v8087_v33, %v8086_v15 }
 0x57e   : > { %v7829_v38 = vadd.f32 %v7828_v41, %v7827_v49  ;;  %v8089_v43 = vrot.slane %v8088_v11, 2 }
 0x580   : > { %v7830_v27 = vrot.slane %v7829_v38, 1  ;;  %v8090_v55 = vadd.f32 %v8089_v43, %v8088_v11 }
 0x582   : > { %v8091_v37 = vrot.slane %v8090_v55, 1  ;;  %v7831_v59 = vadd.f32 %v7830_v27, %v7829_v38 }
 0x584   : > { %v8092_v60 = vadd.f32 %v8091_v37, %v8090_v55 }
 0x586   : > { %v8094_v54 = vsel %vm8093_vm14, %v7831_v59, %v8092_v60 }
 0x587   : > { %8095 = vst [vmem:[%s17250_s13] sm:$0x3] %v8094_v54 }
 0x588   : > { %s9731_s22 = sshll.u32 %s11367_s27, 4  ;;  %s9732_s12 = sshll.u32 %s11371_s28, 8 }
 0x589   : > { %s8369_s17 = sadd.s32 %s9732_s12, %s9731_s22  ;;  %s8382_s23 = sshll.u32 %s13495_s14, 4  ;;  %s8383_s23 = int_to_ptr.vmem [resolvable:$true] %s8382_s23 }
 0x58a   : > { %s9733_s9 = sshll.u32 %s8369_s17, 2  ;;  %s11386_s2 = smov 1024  }
 0x58b   : > { %s8371_s1 = scalar_lea.hbm %s17327_s6, %s9733_s9  ;;  %10656 = sst [smem:[#allocation9]] (%p11493_p8), %s11386_s2 }
 0x58c   : > { %s8384_s19 = sshll.u32 %s8371_s1, 4  ;;  %s11387_s3 = smov 2048   ;;  %s8385_s19 = int_to_ptr.hbm [resolvable:$true] %s8384_s19 }
 0x58d   : > { %10657 = sst [smem:[#allocation9 + $0x1]] (%p11493_p8), %s11387_s3  ;;  %s11388_s4 = smov 16  }
 0x58e   : > { %10658 = sst [smem:[#allocation9 + $0x2]] (%p11493_p8), %s11388_s4  ;;  %s11389_s14 = smov 64  }
 0x58f   : > { %10659 = sst [smem:[#allocation9 + $0x3]] (%p11493_p8), %s11389_s14  ;;  %s11390_s22 = smov 4  }
 0x590   : > { %10660 = sst [smem:[#allocation9 + $0x4]] (%p11493_p8), %s11389_s14  ;;  %s11391_s0 = smov [#allocation8]  }
 0x591   : > { %10661 = sst [smem:[#allocation9 + $0x5]] (%p11493_p8), %s11390_s22  ;;  %s11392_s1 = smov 0  }
 0x592   : > { %10662 = dma.general (%p11493_p8), %s8383_s23, 8192, %s8385_s19, %s8353_s18, %s11391_s0, [#allocation9], %s11392_s1, 0  }
 0x593   : > { %s9734_s2 = sshll.u32 %s11371_s28, 1  ;;  %s8414_s3 = sshll.u32 %s17250_s13, 4  ;;  %s8415_s3 = int_to_ptr.vmem [resolvable:$true] %s8414_s3 }
 0x594   : > { %s8410_s12 = sadd.s32 %s11367_s27, %s9734_s2  ;;  %s11305_s28 = scalar_lea.hbm %s17328_s7, 8 }
 0x595   : > { %s9735_s4 = sshll.u32 %s8410_s12, 1 }
 0x596   : > { %s8412_s21 = scalar_lea.hbm %s17328_s7, %s9735_s4 }
 0x597   : > { %s8416_s14 = sshll.u32 %s8412_s21, 4  ;;  %s8417_s14 = int_to_ptr.hbm [resolvable:$true] %s8416_s14 }
 0x598   : > { %s11299_s22 = sshra.s32 %s8417_s14, 4  ;;  %s11300_s22 = int_to_ptr.hbm [resolvable:$true] %s11299_s22 }
 0x599   : > { %s11301_s5 = scalar_lea.hbm %s11300_s22, 2  ;;  %p11306_p5 = scmp.lt.s32.totalorder %s11300_s22, %s17328_s7 }
 0x59a   : > { %p11302_p2 = scmp.ne.s32.totalorder %s11300_s22, %s11301_s5  ;;  %p11307_p6 = scmp.lt.s32.totalorder %s11305_s28, %s11301_s5 }
 0x59c   : > { %p11303_p3 = pnand %p11302_p2, %p11493_p8  ;;  %p11308_p7 = por %p11307_p6, %p11306_p5 }
 0x59e   : > { %p11304_p4 = pneg %p11303_p3 }
 0x5a0   : > { %p11309_p10 = pnand %p11308_p7, %p11304_p4 }
 0x5a2   : > { %11312 = shalt.err (!%p11309_p10)
}
 0x5a3   : > { %s18220_s23 = scalar_lea.sflag [#allocation7], %s11666_s10 }
 0x5a4   : > { %10663 = dma.vmem_to_hbm [thread:$0]  (%p11493_p8), %s8415_s3, 32, %s8417_s14, %s18220_s23  }
 0x5a5 PF: > { %p10673_p11 = scmp.ge.s32.totalorder %s11383_s8, 2  ;;  %s8428_s0 = sand.u32 1, %s11355_s24  }
 0x5a6   : > { %s8429_s1 = scalar_lea.sflag [#allocation5], %s8428_s0 }
 0x5a7   : > { %p10667_p12 = pnand %p10673_p11, %p11497_p9 }
 0x5a9   : > { %p10668_p13 = pneg %p10667_p12 }
 0x5ab   : > { %11346 = dma.done.wait (%p10668_p13), %s8429_s1, 8192  }
 0x5ac   : > { %11348 = vsyncadd (%p10668_p13), %s8429_s1, 4294959104  ;;  %s8439_s5 = scalar_lea.sflag [#allocation7], %s8428_s0 }
 0x5ad   : > { %11350 = dma.done.wait (%p10668_p13), %s8439_s5, 32  }
 0x5ae   : > { %11352 = vsyncadd (%p10668_p13), %s8439_s5, 4294967264  ;;  %s24_s8 = sadd.s32 1, %s11383_s8   ;;  %s18221_s15 = sld [smem:[#allocation12_spill]] }
 0x5af   : > { %p21_p0 = scmp.ge.s32.totalorder %s24_s8, 6   ;;  %s18222_s24 = smov %s11359_s25 }
 0x5b0   : > { %s18223_s25 = smov %s11363_s26  ;;  %s18224_s26 = smov %s11505_s20 }
 0x5b1   : > { %s18225_s27 = smov %s11375_s29  ;;  %s18226_s28 = smov %s11379_s30 }
 0x5b2   : > { %s18227_s29 = smov %s18230_s11  ;;  %23 = sbr.rel (!%p21_p0) target bundleno = 14 (0xe), region = 161 }
 0x5b4   : > { %s18228_s30 = smov %s18221_s15 }
 0x5b7   :  { %8445 = vsyncpa [#allocation5], 1 }
 0x5b8   :  { %8447 = vsyncpa [#allocation5 + $0x1], 1 }
 0x5b9   :  { %8448 = vsyncpa [#allocation7], 1 }
 0x5ba   :  { %8450 = vsyncpa [#allocation7 + $0x1], 1 }

</bundles_post_ra>
